<compile_context>
chip_gen: v5e
topology: v5e:2x2
jax: 0.10.0
libtpu: 0.0.40
codegen_flags: <defaults>
</compile_context>

<pallas_src>
import functools

import jax
import jax.numpy as jnp
from jax import lax
from jax.experimental import pallas as pl
from jax.experimental.pallas import tpu as pltpu


def _round_up(x, m):
    return (x + m - 1) // m * m


def _pad_slab(img, wpad):
    """(h, w, c) -> zero-padded (h + 3, wpad, c) slab.

    slab[r, c] = img[r - 1, c - 1] inside the image; row 0 / rows h+1, h+2 and
    column 0 / columns >= w+1 are zero.  The extra bottom row and right
    columns exist only so that every im2col tap below is a fixed-length
    contiguous slice of the flattened slab (no strided window gathers).
    """
    h, w, c = img.shape
    dt = img.dtype
    rows = jnp.concatenate(
        [jnp.zeros((h, 1, c), dt), img, jnp.zeros((h, wpad - w - 1, c), dt)],
        axis=1)
    return jnp.concatenate(
        [jnp.zeros((1, wpad, c), dt), rows, jnp.zeros((2, wpad, c), dt)],
        axis=0)


def _conv3x3(slab, wmat, wpad):
    """3x3 'SAME' conv of a padded slab as ONE fat MXU matmul.

    slab: (h + 3, wpad, cin) zero-padded input (see _pad_slab).
    wmat: (9 * cin, cout) weights, flattened in (kh, kw, cin) order.
    Returns f32 (h, wpad, cout); columns >= original w are don't-care.
    """
    hp, _, cin = slab.shape
    h = hp - 3
    xf = slab.reshape(hp * wpad, cin)
    n = h * wpad
    taps = [xf[dh * wpad + dw: dh * wpad + dw + n, :]
            for dh in range(3) for dw in range(3)]
    patch = jnp.concatenate(taps, axis=-1)                  # (n, 9*cin)
    acc = jnp.dot(patch, wmat, preferred_element_type=jnp.float32)
    return acc.reshape(h, wpad, wmat.shape[-1])


def _double_conv_kernel(x_ref, w1_ref, s1_ref, t1_ref, w2_ref, s2_ref, t2_ref,
                        o_ref, *, wpad, cdt):
    """Fused (conv3x3 + folded-BN + ReLU) x 2 for one NHWC image block."""
    h, w = o_ref.shape[1], o_ref.shape[2]

    x = x_ref[0].astype(cdt)                                    # (h, w, cin)
    acc1 = _conv3x3(_pad_slab(x, wpad), w1_ref[...], wpad)      # f32
    mid = jnp.maximum(acc1 * s1_ref[...] + t1_ref[...], 0.0)    # BN1 + ReLU
    mid = mid[:, :w, :].astype(cdt)                             # stays in VMEM

    acc2 = _conv3x3(_pad_slab(mid, wpad), w2_ref[...], wpad)    # f32
    y = jnp.maximum(acc2 * s2_ref[...] + t2_ref[...], 0.0)      # BN2 + ReLU
    o_ref[0] = y[:, :w, :].astype(o_ref.dtype)


def _fold_bn(bias, gamma, beta, mean, var, eps=1e-5):
    """Fold conv bias + BatchNorm (eval mode) into per-channel scale/shift."""
    scale = gamma / jnp.sqrt(var + eps)
    shift = (bias - mean) * scale + beta
    return scale, shift


def double_conv_nhwc(x, params, *, compute_dtype=jnp.bfloat16):
    """Fused DoubleConv forward, NHWC in / NHWC out."""
    n, h, w, cin = x.shape
    w1, w2 = params["w1"], params["w2"]
    cmid, cout = w1.shape[-1], w2.shape[-1]

    s1, t1 = _fold_bn(params["b1"], *params["bn1"])
    s2, t2 = _fold_bn(params["b2"], *params["bn2"])

    w1m = w1.reshape(9 * cin, cmid).astype(compute_dtype)
    w2m = w2.reshape(9 * cmid, cout).astype(compute_dtype)
    s1 = s1.reshape(1, cmid).astype(jnp.float32)
    t1 = t1.reshape(1, cmid).astype(jnp.float32)
    s2 = s2.reshape(1, cout).astype(jnp.float32)
    t2 = t2.reshape(1, cout).astype(jnp.float32)

    wpad = _round_up(w + 2, 8)   # sublane-friendly padded slab width
    kernel = functools.partial(_double_conv_kernel, wpad=wpad,
                               cdt=compute_dtype)

    return pl.pallas_call(
        kernel,
        out_shape=jax.ShapeDtypeStruct((n, h, w, cout), x.dtype),
        grid_spec=pltpu.PrefetchScalarGridSpec(
            num_scalar_prefetch=0,
            grid=(n,),
            in_specs=[
                pl.BlockSpec((1, h, w, cin), lambda b: (b, 0, 0, 0)),
                pl.BlockSpec((9 * cin, cmid), lambda b: (0, 0)),
                pl.BlockSpec((1, cmid), lambda b: (0, 0)),
                pl.BlockSpec((1, cmid), lambda b: (0, 0)),
                pl.BlockSpec((9 * cmid, cout), lambda b: (0, 0)),
                pl.BlockSpec((1, cout), lambda b: (0, 0)),
                pl.BlockSpec((1, cout), lambda b: (0, 0)),
            ],
            out_specs=pl.BlockSpec((1, h, w, cout), lambda b: (b, 0, 0, 0)),
        ),
        compiler_params=pltpu.CompilerParams(
            dimension_semantics=("parallel",),
            vmem_limit_bytes=64 * 1024 * 1024),
    )(x, w1m, s1, t1, w2m, s2, t2)


@functools.partial(jax.jit, static_argnames=("compute_dtype",))
def double_conv(x_nchw, params, *, compute_dtype=jnp.bfloat16):
    """DoubleConv forward (inference-mode BN).  NCHW in / NCHW out."""
    # TODO(synk): keep the surrounding model NHWC to drop these two HBM
    # transpose passes entirely.
    x = jnp.transpose(x_nchw, (0, 2, 3, 1))
    y = double_conv_nhwc(x, params, compute_dtype=compute_dtype)
    return jnp.transpose(y, (0, 3, 1, 2))


def init_double_conv_params(key, in_channels, out_channels, mid_channels=None):
    if not mid_channels:
        mid_channels = out_channels
    ks = jax.random.split(key, 4)

    def conv_params(kw, kb, cin, cout):
        fan_in = cin * 9
        bound = 1.0 / jnp.sqrt(fan_in)
        w = jax.random.uniform(kw, (3, 3, cin, cout), jnp.float32, -bound, bound)
        b = jax.random.uniform(kb, (cout,), jnp.float32, -bound, bound)
        return w, b

    def bn_params(k, c):
        k1, k2, k3, k4 = jax.random.split(k, 4)
        gamma = jax.random.uniform(k1, (c,), jnp.float32, 0.5, 1.5)
        beta = jax.random.uniform(k2, (c,), jnp.float32, -0.5, 0.5)
        mean = jax.random.uniform(k3, (c,), jnp.float32, -0.5, 0.5)
        var = jax.random.uniform(k4, (c,), jnp.float32, 0.5, 1.5)
        return gamma, beta, mean, var

    w1, b1 = conv_params(*jax.random.split(ks[0]), in_channels, mid_channels)
    bn1 = bn_params(ks[1], mid_channels)
    w2, b2 = conv_params(*jax.random.split(ks[2]), mid_channels, out_channels)
    bn2 = bn_params(ks[3], out_channels)
    return dict(w1=w1, b1=b1, bn1=bn1, w2=w2, b2=b2, bn2=bn2)


def _reference(x_nchw, params):
    """Pure-JAX (lax.conv) reference for correctness checking."""
    def conv_bn_relu(x, w_hwio, bias, bn):
        w_oihw = jnp.transpose(w_hwio, (3, 2, 0, 1))
        y = lax.conv_general_dilated(
            x, w_oihw, window_strides=(1, 1), padding=((1, 1), (1, 1)),
            dimension_numbers=("NCHW", "OIHW", "NCHW"))
        gamma, beta, mean, var = bn
        y = y + bias[None, :, None, None]
        y = (y - mean[None, :, None, None]) / jnp.sqrt(
            var[None, :, None, None] + 1e-5)
        y = y * gamma[None, :, None, None] + beta[None, :, None, None]
        return jnp.maximum(y, 0.0)

    y = conv_bn_relu(x_nchw, params["w1"], params["b1"], params["bn1"])
    return conv_bn_relu(y, params["w2"], params["b2"], params["bn2"])


if __name__ == "__main__":
    key = jax.random.PRNGKey(0)
    k_x, k_p = jax.random.split(key)

    N, C_IN, C_OUT, H, W = 2, 4, 8, 16, 16
    x = jax.random.normal(k_x, (N, C_IN, H, W), jnp.float32)
    params = init_double_conv_params(k_p, C_IN, C_OUT)

    ref = jax.block_until_ready(_reference(x, params))

    # Tight check with f32 matmuls.
    out_f32 = jax.block_until_ready(
        double_conv(x, params, compute_dtype=jnp.float32))
    assert out_f32.shape == (N, C_OUT, H, W), out_f32.shape
    assert jnp.allclose(out_f32, ref, atol=2e-4, rtol=2e-4), (
        float(jnp.max(jnp.abs(out_f32 - ref))))

    # Default bf16 MXU path (f32 accumulation / epilogue) — looser tolerance.
    out = jax.block_until_ready(double_conv(x, params))
    assert out.shape == (N, C_OUT, H, W), out.shape
    assert jnp.allclose(out, ref, atol=1e-1, rtol=1e-1), (
        float(jnp.max(jnp.abs(out - ref))))

    print("KERNEL_OK")
</pallas_src>

<mosaic_0001>
module attributes {stable_mosaic.version = 11 : i64} {
  func.func @_double_conv_kernel(%arg0: i32, %arg1: memref<1x16x16x4xf32, #tpu.memory_space<vmem>>, %arg2: memref<36x8xf32, #tpu.memory_space<vmem>>, %arg3: memref<1x8xf32, #tpu.memory_space<vmem>>, %arg4: memref<1x8xf32, #tpu.memory_space<vmem>>, %arg5: memref<72x8xf32, #tpu.memory_space<vmem>>, %arg6: memref<1x8xf32, #tpu.memory_space<vmem>>, %arg7: memref<1x8xf32, #tpu.memory_space<vmem>>, %arg8: memref<1x16x16x8xf32, #tpu.memory_space<vmem>>) attributes {dimension_semantics = [#tpu.dimension_semantics<parallel>], iteration_bounds = array<i64: 2>, scalar_prefetch = 0 : i64, scratch_operands = 0 : i64, tpu.core_type = #tpu.core_type<tc>, window_params = [{transform_indices = @transform_0, window_bounds = array<i64: 1, 16, 16, 4>}, {pipeline_mode = #tpu.pipeline_mode<synchronous>, transform_indices = @transform_1, window_bounds = array<i64: 36, 8>}, {pipeline_mode = #tpu.pipeline_mode<synchronous>, transform_indices = @transform_2, window_bounds = array<i64: 1, 8>}, {pipeline_mode = #tpu.pipeline_mode<synchronous>, transform_indices = @transform_3, window_bounds = array<i64: 1, 8>}, {pipeline_mode = #tpu.pipeline_mode<synchronous>, transform_indices = @transform_4, window_bounds = array<i64: 72, 8>}, {pipeline_mode = #tpu.pipeline_mode<synchronous>, transform_indices = @transform_5, window_bounds = array<i64: 1, 8>}, {pipeline_mode = #tpu.pipeline_mode<synchronous>, transform_indices = @transform_6, window_bounds = array<i64: 1, 8>}, {transform_indices = @transform_7, window_bounds = array<i64: 1, 16, 16, 8>}]} {
    %c0 = arith.constant 0 : index
    %c0_0 = arith.constant 0 : index
    %c0_1 = arith.constant 0 : index
    %c0_2 = arith.constant 0 : index
    %0 = vector.load %arg1[%c0, %c0_0, %c0_1, %c0_2] : memref<1x16x16x4xf32, #tpu.memory_space<vmem>>, vector<1x16x16x4xf32>
    %1 = vector.shape_cast %0 : vector<1x16x16x4xf32> to vector<16x16x4xf32>
    %cst = arith.constant 0.000000e+00 : f32
    %2 = vector.broadcast %cst : f32 to vector<16x1x4xf32>
    %cst_3 = arith.constant 0.000000e+00 : f32
    %3 = vector.broadcast %cst_3 : f32 to vector<16x7x4xf32>
    %4 = tpu.concatenate %2, %1, %3 in 1 : vector<16x1x4xf32>, vector<16x16x4xf32>, vector<16x7x4xf32> -> vector<16x24x4xf32>
    %cst_4 = arith.constant 0.000000e+00 : f32
    %5 = vector.broadcast %cst_4 : f32 to vector<1x24x4xf32>
    %cst_5 = arith.constant 0.000000e+00 : f32
    %6 = vector.broadcast %cst_5 : f32 to vector<2x24x4xf32>
    %7 = tpu.concatenate %5, %4, %6 in 0 : vector<1x24x4xf32>, vector<16x24x4xf32>, vector<2x24x4xf32> -> vector<19x24x4xf32>
    %c0_6 = arith.constant 0 : index
    %c0_7 = arith.constant 0 : index
    %8 = vector.load %arg2[%c0_6, %c0_7] : memref<36x8xf32, #tpu.memory_space<vmem>>, vector<36x8xf32>
    %9 = vector.shape_cast %7 : vector<19x24x4xf32> to vector<456x4xf32>
    %10 = vector.extract_strided_slice %9 {offsets = [0, 0], sizes = [384, 4], strides = [1, 1]} : vector<456x4xf32> to vector<384x4xf32>
    %11 = vector.extract_strided_slice %9 {offsets = [1, 0], sizes = [384, 4], strides = [1, 1]} : vector<456x4xf32> to vector<384x4xf32>
    %12 = vector.extract_strided_slice %9 {offsets = [2, 0], sizes = [384, 4], strides = [1, 1]} : vector<456x4xf32> to vector<384x4xf32>
    %13 = vector.extract_strided_slice %9 {offsets = [24, 0], sizes = [384, 4], strides = [1, 1]} : vector<456x4xf32> to vector<384x4xf32>
    %14 = vector.extract_strided_slice %9 {offsets = [25, 0], sizes = [384, 4], strides = [1, 1]} : vector<456x4xf32> to vector<384x4xf32>
    %15 = vector.extract_strided_slice %9 {offsets = [26, 0], sizes = [384, 4], strides = [1, 1]} : vector<456x4xf32> to vector<384x4xf32>
    %16 = vector.extract_strided_slice %9 {offsets = [48, 0], sizes = [384, 4], strides = [1, 1]} : vector<456x4xf32> to vector<384x4xf32>
    %17 = vector.extract_strided_slice %9 {offsets = [49, 0], sizes = [384, 4], strides = [1, 1]} : vector<456x4xf32> to vector<384x4xf32>
    %18 = vector.extract_strided_slice %9 {offsets = [50, 0], sizes = [384, 4], strides = [1, 1]} : vector<456x4xf32> to vector<384x4xf32>
    %19 = tpu.concatenate %10, %11, %12, %13, %14, %15, %16, %17, %18 in 1 : vector<384x4xf32>, vector<384x4xf32>, vector<384x4xf32>, vector<384x4xf32>, vector<384x4xf32>, vector<384x4xf32>, vector<384x4xf32>, vector<384x4xf32>, vector<384x4xf32> -> vector<384x36xf32>
    %cst_8 = arith.constant dense<0.000000e+00> : vector<384x8xf32>
    %20 = tpu.matmul %19, %8, %cst_8 {dimension_numbers = #tpu.dot_dimension_numbers<[1], [0], [0], [1], [0, 0, 1, 1], [], []>} : vector<384x36xf32>, vector<36x8xf32>, vector<384x8xf32> -> vector<384x8xf32>
    %21 = vector.shape_cast %20 : vector<384x8xf32> to vector<16x24x8xf32>
    %c0_9 = arith.constant 0 : index
    %c0_10 = arith.constant 0 : index
    %22 = vector.load %arg3[%c0_9, %c0_10] : memref<1x8xf32, #tpu.memory_space<vmem>>, vector<1x8xf32>
    %23 = vector.shape_cast %22 : vector<1x8xf32> to vector<1x1x8xf32>
    %24 = vector.broadcast %23 : vector<1x1x8xf32> to vector<16x24x8xf32>
    %25 = arith.mulf %21, %24 : vector<16x24x8xf32>
    %c0_11 = arith.constant 0 : index
    %c0_12 = arith.constant 0 : index
    %26 = vector.load %arg4[%c0_11, %c0_12] : memref<1x8xf32, #tpu.memory_space<vmem>>, vector<1x8xf32>
    %27 = vector.shape_cast %26 : vector<1x8xf32> to vector<1x1x8xf32>
    %28 = vector.broadcast %27 : vector<1x1x8xf32> to vector<16x24x8xf32>
    %29 = arith.addf %25, %28 : vector<16x24x8xf32>
    %cst_13 = arith.constant 0.000000e+00 : f32
    %30 = vector.broadcast %cst_13 : f32 to vector<16x24x8xf32>
    %31 = arith.maximumf %29, %30 : vector<16x24x8xf32>
    %32 = vector.extract_strided_slice %31 {offsets = [0, 0, 0], sizes = [16, 16, 8], strides = [1, 1, 1]} : vector<16x24x8xf32> to vector<16x16x8xf32>
    %cst_14 = arith.constant 0.000000e+00 : f32
    %33 = vector.broadcast %cst_14 : f32 to vector<16x1x8xf32>
    %cst_15 = arith.constant 0.000000e+00 : f32
    %34 = vector.broadcast %cst_15 : f32 to vector<16x7x8xf32>
    %35 = tpu.concatenate %33, %32, %34 in 1 : vector<16x1x8xf32>, vector<16x16x8xf32>, vector<16x7x8xf32> -> vector<16x24x8xf32>
    %cst_16 = arith.constant 0.000000e+00 : f32
    %36 = vector.broadcast %cst_16 : f32 to vector<1x24x8xf32>
    %cst_17 = arith.constant 0.000000e+00 : f32
    %37 = vector.broadcast %cst_17 : f32 to vector<2x24x8xf32>
    %38 = tpu.concatenate %36, %35, %37 in 0 : vector<1x24x8xf32>, vector<16x24x8xf32>, vector<2x24x8xf32> -> vector<19x24x8xf32>
    %c0_18 = arith.constant 0 : index
    %c0_19 = arith.constant 0 : index
    %39 = vector.load %arg5[%c0_18, %c0_19] : memref<72x8xf32, #tpu.memory_space<vmem>>, vector<72x8xf32>
    %40 = vector.shape_cast %38 : vector<19x24x8xf32> to vector<456x8xf32>
    %41 = vector.extract_strided_slice %40 {offsets = [0, 0], sizes = [384, 8], strides = [1, 1]} : vector<456x8xf32> to vector<384x8xf32>
    %42 = vector.extract_strided_slice %40 {offsets = [1, 0], sizes = [384, 8], strides = [1, 1]} : vector<456x8xf32> to vector<384x8xf32>
    %43 = vector.extract_strided_slice %40 {offsets = [2, 0], sizes = [384, 8], strides = [1, 1]} : vector<456x8xf32> to vector<384x8xf32>
    %44 = vector.extract_strided_slice %40 {offsets = [24, 0], sizes = [384, 8], strides = [1, 1]} : vector<456x8xf32> to vector<384x8xf32>
    %45 = vector.extract_strided_slice %40 {offsets = [25, 0], sizes = [384, 8], strides = [1, 1]} : vector<456x8xf32> to vector<384x8xf32>
    %46 = vector.extract_strided_slice %40 {offsets = [26, 0], sizes = [384, 8], strides = [1, 1]} : vector<456x8xf32> to vector<384x8xf32>
    %47 = vector.extract_strided_slice %40 {offsets = [48, 0], sizes = [384, 8], strides = [1, 1]} : vector<456x8xf32> to vector<384x8xf32>
    %48 = vector.extract_strided_slice %40 {offsets = [49, 0], sizes = [384, 8], strides = [1, 1]} : vector<456x8xf32> to vector<384x8xf32>
    %49 = vector.extract_strided_slice %40 {offsets = [50, 0], sizes = [384, 8], strides = [1, 1]} : vector<456x8xf32> to vector<384x8xf32>
    %50 = tpu.concatenate %41, %42, %43, %44, %45, %46, %47, %48, %49 in 1 : vector<384x8xf32>, vector<384x8xf32>, vector<384x8xf32>, vector<384x8xf32>, vector<384x8xf32>, vector<384x8xf32>, vector<384x8xf32>, vector<384x8xf32>, vector<384x8xf32> -> vector<384x72xf32>
    %cst_20 = arith.constant dense<0.000000e+00> : vector<384x8xf32>
    %51 = tpu.matmul %50, %39, %cst_20 {dimension_numbers = #tpu.dot_dimension_numbers<[1], [0], [0], [1], [0, 0, 1, 1], [], []>} : vector<384x72xf32>, vector<72x8xf32>, vector<384x8xf32> -> vector<384x8xf32>
    %52 = vector.shape_cast %51 : vector<384x8xf32> to vector<16x24x8xf32>
    %c0_21 = arith.constant 0 : index
    %c0_22 = arith.constant 0 : index
    %53 = vector.load %arg6[%c0_21, %c0_22] : memref<1x8xf32, #tpu.memory_space<vmem>>, vector<1x8xf32>
    %54 = vector.shape_cast %53 : vector<1x8xf32> to vector<1x1x8xf32>
    %55 = vector.broadcast %54 : vector<1x1x8xf32> to vector<16x24x8xf32>
    %56 = arith.mulf %52, %55 : vector<16x24x8xf32>
    %c0_23 = arith.constant 0 : index
    %c0_24 = arith.constant 0 : index
    %57 = vector.load %arg7[%c0_23, %c0_24] : memref<1x8xf32, #tpu.memory_space<vmem>>, vector<1x8xf32>
    %58 = vector.shape_cast %57 : vector<1x8xf32> to vector<1x1x8xf32>
    %59 = vector.broadcast %58 : vector<1x1x8xf32> to vector<16x24x8xf32>
    %60 = arith.addf %56, %59 : vector<16x24x8xf32>
    %cst_25 = arith.constant 0.000000e+00 : f32
    %61 = vector.broadcast %cst_25 : f32 to vector<16x24x8xf32>
    %62 = arith.maximumf %60, %61 : vector<16x24x8xf32>
    %63 = vector.extract_strided_slice %62 {offsets = [0, 0, 0], sizes = [16, 16, 8], strides = [1, 1, 1]} : vector<16x24x8xf32> to vector<16x16x8xf32>
    %c0_26 = arith.constant 0 : index
    %c0_27 = arith.constant 0 : index
    %c0_28 = arith.constant 0 : index
    %c0_29 = arith.constant 0 : index
    %64 = vector.load %arg8[%c0_26, %c0_27, %c0_28, %c0_29] : memref<1x16x16x8xf32, #tpu.memory_space<vmem>>, vector<1x16x16x8xf32>
    %65 = vector.shape_cast %64 : vector<1x16x16x8xf32> to vector<16x16x8xf32>
    %66 = vector.shape_cast %63 : vector<16x16x8xf32> to vector<1x16x16x8xf32>
    tpu.vector_store %arg8[%c0_26, %c0_27, %c0_28, %c0_29], %66 {strides = array<i32>} : memref<1x16x16x8xf32, #tpu.memory_space<vmem>>, vector<1x16x16x8xf32>,
    return
  }
  func.func @transform_0(%arg0: i32) -> (i32, i32, i32, i32) {
    %c0_i32 = arith.constant 0 : i32
    %c0_i32_0 = arith.constant 0 : i32
    %c0_i32_1 = arith.constant 0 : i32
    %c0_i32_2 = arith.constant 0 : i32
    return %arg0, %c0_i32, %c0_i32_0, %c0_i32_1 : i32, i32, i32, i32
  }
  func.func @transform_1(%arg0: i32) -> (i32, i32) {
    %c0_i32 = arith.constant 0 : i32
    %c0_i32_0 = arith.constant 0 : i32
    %c0_i32_1 = arith.constant 0 : i32
    return %c0_i32, %c0_i32_0 : i32, i32
  }
  func.func @transform_2(%arg0: i32) -> (i32, i32) {
    %c0_i32 = arith.constant 0 : i32
    %c0_i32_0 = arith.constant 0 : i32
    %c0_i32_1 = arith.constant 0 : i32
    return %c0_i32, %c0_i32_0 : i32, i32
  }
  func.func @transform_3(%arg0: i32) -> (i32, i32) {
    %c0_i32 = arith.constant 0 : i32
    %c0_i32_0 = arith.constant 0 : i32
    %c0_i32_1 = arith.constant 0 : i32
    return %c0_i32, %c0_i32_0 : i32, i32
  }
  func.func @transform_4(%arg0: i32) -> (i32, i32) {
    %c0_i32 = arith.constant 0 : i32
    %c0_i32_0 = arith.constant 0 : i32
    %c0_i32_1 = arith.constant 0 : i32
    return %c0_i32, %c0_i32_0 : i32, i32
  }
  func.func @transform_5(%arg0: i32) -> (i32, i32) {
    %c0_i32 = arith.constant 0 : i32
    %c0_i32_0 = arith.constant 0 : i32
    %c0_i32_1 = arith.constant 0 : i32
    return %c0_i32, %c0_i32_0 : i32, i32
  }
  func.func @transform_6(%arg0: i32) -> (i32, i32) {
    %c0_i32 = arith.constant 0 : i32
    %c0_i32_0 = arith.constant 0 : i32
    %c0_i32_1 = arith.constant 0 : i32
    return %c0_i32, %c0_i32_0 : i32, i32
  }
  func.func @transform_7(%arg0: i32) -> (i32, i32, i32, i32) {
    %c0_i32 = arith.constant 0 : i32
    %c0_i32_0 = arith.constant 0 : i32
    %c0_i32_1 = arith.constant 0 : i32
    %c0_i32_2 = arith.constant 0 : i32
    return %arg0, %c0_i32, %c0_i32_0, %c0_i32_1 : i32, i32, i32, i32
  }
}

</mosaic_0001>

<bundles_post_ra>
// kernel: double_conv.1
= control target key start
LH: loop header
LB: loop body
LE: loop exit
PB: predicated region body
PF: predicated region fallthrough
CT: control target
= control target key end

     0   :  { %s5231_s24 = smov 0   ;;  %s10977_s0 = inlined_call_operand.vmem [shape: f32[2,16,16,4], index: 0, kind: input, shape index: {}]   ;;  %s10978_s1 = inlined_call_operand.vmem [shape: f32[36,8], index: 1, kind: input, shape index: {}]   ;;  %s10979_s2 = inlined_call_operand.vmem [shape: f32[1,8], index: 2, kind: input, shape index: {}]   ;;  %s10980_s3 = inlined_call_operand.vmem [shape: f32[1,8], index: 3, kind: input, shape index: {}]   ;;  %s10981_s4 = inlined_call_operand.vmem [shape: f32[72,8], index: 4, kind: input, shape index: {}]   ;;  %s10982_s5 = inlined_call_operand.vmem [shape: f32[1,8], index: 5, kind: input, shape index: {}]   ;;  %s10983_s6 = inlined_call_operand.vmem [shape: f32[1,8], index: 6, kind: input, shape index: {}]   ;;  %s10984_s7 = inlined_call_operand.vmem [shape: f32[2,16,16,8], index: 7, kind: output, shape index: {}]  }
   0x1 LB: > { %s5014_s25 = sadd.s32 4294967295, %s5176_s24   ;;  %p5018_p0 = scmp.ge.s32.totalorder %s5176_s24, 1  ;;  %s5176_s24 = sphi %s5231_s24, %s17_s24  }
   0x2   : > { %p237_p1 = scmp.lt.s32.totalorder %s5176_s24, 3 }
   0x4   : > { %p238_p2 = pnand %p5018_p0, %p237_p1 }
   0x6   : > { %241 = sbr.rel (%p238_p2) target bundleno = 2515 (0x9d3), region = 48 }
   0xb   : > { %p269_p3 = scmp.lt.s32.totalorder %s5014_s25, 1  ;;  %v10985_v0 = vmov 0.0   ;;  %s5179_s26 = smov 4   ;;  %vm343_vm0 = vcmask 1040384   ;;  %vm508_vm1 = vcmask 1046528   ;;  %vm744_vm2 = vcmask 1045504  }
   0xc   : > { %v5240_v1 = vrot.slane %v10985_v0, 1  ;;  %s5180_s8 = smov 8   ;;  %s5181_s9 = smov 12   ;;  %vm2372_vm3 = vcmask 1043456   ;;  %vm1837_vm4 = vcmask 31744   ;;  %vm1885_vm5 = vcmask 64512  }
   0xd   : > { %s13104_s25 = smov (!%p269_p3, %s5014_s25), 1  ;;  %s5182_s10 = smov 16   ;;  %vm1933_vm6 = vcmask 97280   ;;  %vm1982_vm7 = vcmask 130048   ;;  %vm2031_vm8 = vcmask 162816   ;;  %vm2129_vm9 = vcmask 228352  }
   0xe   : > { %11424 = vst [vmem:[#allocation2_spill] sm:$0xff] %v5240_v1  ;;  %603 = vrot.lane.b32.xlu0 %v5240_v1, %s5179_s26  ;;  %s5122_s27 = sshll.u32 %s13104_s25, 8  ;;  %s5183_s11 = smov 20   ;;  %vm2080_vm10 = vcmask 195584   ;;  %vm2227_vm11 = vcmask 293888   ;;  %vm2178_vm12 = vcmask 261120  }
   0xf   : > { %s5252_s30 = scalar_lea.vmem %s10977_s0, %s5122_s27  ;;  %s5184_s12 = smov 24   ;;  %vm4337_vm13 = vcmask 326656   ;;  %vm4386_vm14 = vcmask 392192   ;;  %vm4484_vm15 = vcmask 523264  }
  0x10   : > { %v280_v2 = vld [vmem:[%s5252_s30 + $0x8] sm:$0xff]  ;;  %v281_v3 = vld [vmem:[%s5252_s30 + $0x10] sm:$0xff]  ;;  %v279_v4 = vld [vmem:[%s5252_s30] sm:$0xff]  ;;  %s5185_s13 = smov 28   ;;  %s5186_s14 = smov 32  }
  0x11   : > { %v345_v5 = vrot.slane %v280_v2, 7  ;;  %v347_v6 = vrot.slane %v281_v3, 7  ;;  %v344_v7 = vrot.slane %v279_v4, 7  ;;  %v282_v8 = vld [vmem:[%s5252_s30 + $0x18] sm:$0xff]  ;;  %v283_v23 = vld [vmem:[%s5252_s30 + $0x20] sm:$0xff]  ;;  %v284_v24 = vld [vmem:[%s5252_s30 + $0x28] sm:$0xff] }
  0x12   : > { %v348_v9 = vrot.slane %v282_v8, 7  ;;  %v350_v27 = vrot.slane %v283_v23, 7  ;;  %v351_v28 = vrot.slane %v284_v24, 7  ;;  %v285_v35 = vld [vmem:[%s5252_s30 + $0x30] sm:$0xff]  ;;  %v286_v36 = vld [vmem:[%s5252_s30 + $0x38] sm:$0xff]  ;;  %v287_v48 = vld [vmem:[%s5252_s30 + $0x40] sm:$0xff] }
  0x13   : > { %v5259_v10 = vsel %vm343_vm0, 0.0, %v347_v6  ;;  %v5262_v11 = vsel %vm343_vm0, %v345_v5, 0.0  ;;  %v5265_v12 = vsel %vm343_vm0, 0.0, %v344_v7  ;;  %v5268_v13 = vsel %vm343_vm0, %v344_v7, %v345_v5  ;;  %v288_v49 = vld [vmem:[%s5252_s30 + $0x48] sm:$0xff]  ;;  %v289_v61 = vld [vmem:[%s5252_s30 + $0x50] sm:$0xff]  ;;  %v290_v62 = vld [vmem:[%s5252_s30 + $0x58] sm:$0xff] }
  0x14   : > { %11425 = vst [vmem:[#allocation3_spill] sm:$0xff] %v5262_v11  ;;  %v515_v14 = vrot.slane %v5262_v11, 1  ;;  %v517_v15 = vrot.slane %v5259_v10, 1  ;;  %v511_v16 = vrot.slane %v5265_v12, 1  ;;  %v513_v17 = vrot.slane %v5268_v13, 1 }
  0x15   : > { %11426 = vst [vmem:[#allocation4_spill] sm:$0xff] %v5265_v12  ;;  %v5275_v18 = vsel %vm343_vm0, %v347_v6, %v348_v9  ;;  %v5278_v19 = vsel %vm343_vm0, %v348_v9, 0.0  ;;  %v5307_v32 = vsel %vm343_vm0, %v350_v27, %v351_v28  ;;  %v5310_v33 = vsel %vm343_vm0, 0.0, %v350_v27 }
  0x16   : > { %11427 = vst [vmem:[#allocation5_spill] sm:$0xff] %v5268_v13  ;;  %v5281_v20 = vsel %vm508_vm1, %v515_v14, %v517_v15  ;;  %v512_v21 = vsel %vm508_vm1, %v5240_v1, %v511_v16  ;;  %v5286_v22 = vsel %vm508_vm1, %v511_v16, %v513_v17  ;;  %v519_v25 = vrot.slane %v5275_v18, 1  ;;  %v291_v16 = vld [vmem:[%s5252_s30 + $0x60] sm:$0xff] }
  0x17   : > { %11428 = vst [vmem:[#allocation6_spill] sm:$0xff] %v5275_v18  ;;  %611 = vrot.lane.b32.xlu2 %v5281_v20, %s5179_s26  ;;  %605 = vrot.lane.b32.xlu0 %v512_v21, %s5179_s26  ;;  %v521_v26 = vrot.slane %v5278_v19, 1  ;;  %v5304_v31 = vsel %vm508_vm1, %v513_v17, %v515_v14  ;;  %v5313_v34 = vsel %vm343_vm0, %v351_v28, 0.0  ;;  %v523_v37 = vrot.slane %v5310_v33, 1  ;;  %v292_v17 = vld [vmem:[%s5252_s30 + $0x68] sm:$0xff] }
  0x18   : > { %11429 = vst [vmem:[#allocation7_spill] sm:$0xff] %v5278_v19  ;;  %607 = vrot.lane.b32.xlu1 %v5286_v22, %s5179_s26  ;;  %v5298_v29 = vsel %vm508_vm1, %v517_v15, %v519_v25  ;;  %v525_v38 = vrot.slane %v5307_v32, 1  ;;  %v527_v39 = vrot.slane %v5313_v34, 1  ;;  %v353_v40 = vrot.slane %v285_v35, 7 }
  0x19   : > { %11430 = vst [vmem:[#allocation8_spill] sm:$0xff] %v5298_v29  ;;  %v5301_v30 = vsel %vm508_vm1, %v519_v25, %v521_v26  ;;  %v354_v41 = vrot.slane %v286_v36, 7  ;;  %v5333_v44 = vsel %vm508_vm1, %v521_v26, %v523_v37  ;;  %v356_v53 = vrot.slane %v287_v48, 7 }
  0x1a   : > { %11431 = vst [vmem:[#allocation9_spill] sm:$0xff] %v5307_v32  ;;  %v5327_v42 = vsel %vm508_vm1, %v523_v37, %v525_v38  ;;  %v5330_v43 = vsel %vm508_vm1, %v525_v38, %v527_v39  ;;  %v5339_v46 = vsel %vm343_vm0, 0.0, %v353_v40  ;;  %v357_v54 = vrot.slane %v288_v49, 7 }
  0x1b   : > { %11432 = vst [vmem:[#allocation10_spill] sm:$0xff] %v5313_v34  ;;  %v5336_v45 = vsel %vm343_vm0, %v353_v40, %v354_v41  ;;  %v5342_v47 = vsel %vm343_vm0, %v354_v41, 0.0  ;;  %v529_v50 = vrot.slane %v5339_v46, 1  ;;  %v5368_v59 = vsel %vm343_vm0, 0.0, %v356_v53  ;;  %v294_v40 = vld [vmem:[%s5252_s30 + $0x78] sm:$0xff] }
  0x1c   : > { %11433 = vst [vmem:[#allocation11_spill] sm:$0xff] %v5327_v42  ;;  %v531_v51 = vrot.slane %v5336_v45, 1  ;;  %v533_v52 = vrot.slane %v5342_v47, 1  ;;  %v5365_v58 = vsel %vm343_vm0, %v356_v53, %v357_v54  ;;  %v5371_v60 = vsel %vm343_vm0, %v357_v54, 0.0 }
  0x1d   : > { %11434 = vst [vmem:[#allocation12_spill] sm:$0xff] %v5330_v43  ;;  %v5362_v57 = vsel %vm508_vm1, %v527_v39, %v529_v50  ;;  %v535_v63 = vrot.slane %v5368_v59, 1  ;;  %v537_v2 = vrot.slane %v5365_v58, 1  ;;  %v539_v3 = vrot.slane %v5371_v60, 1  ;;  %v293_v39 = vld [vmem:[%s5252_s30 + $0x70] sm:$0xff] }
  0x1e   : > { %11435 = vst [vmem:[#allocation13_spill] sm:$0xff] %v5333_v44  ;;  %v5356_v55 = vsel %vm508_vm1, %v529_v50, %v531_v51  ;;  %v5359_v56 = vsel %vm508_vm1, %v531_v51, %v533_v52  ;;  %v359_v4 = vrot.slane %v289_v61, 7  ;;  %v360_v5 = vrot.slane %v290_v62, 7 }
  0x1f   : > { %613 = vrot.lane.b32.xlu2 %v5298_v29, %s5179_s26  ;;  %615 = vrot.lane.b32.xlu0 %v5301_v30, %s5179_s26  ;;  %11436 = vst [vmem:[#allocation14_spill] sm:$0xff] %v5336_v45  ;;  %v5385_v6 = vsel %vm508_vm1, %v535_v63, %v537_v2  ;;  %v5388_v7 = vsel %vm508_vm1, %v537_v2, %v539_v3  ;;  %v362_v25 = vrot.slane %v291_v16, 7  ;;  %v363_v26 = vrot.slane %v292_v17, 7  ;;  %v295_v2 = vld [vmem:[%s5252_s30 + $0x80] sm:$0xff] }
  0x20   : > { %609 = vrot.lane.b32.xlu1 %v5304_v31, %s5179_s26  ;;  %11437 = vst [vmem:[#allocation15_spill] sm:$0xff] %v5342_v47  ;;  %v5391_v8 = vsel %vm508_vm1, %v533_v52, %v535_v63  ;;  %v5394_v9 = vsel %vm343_vm0, %v359_v4, %v360_v5  ;;  %v5397_v14 = vsel %vm343_vm0, 0.0, %v359_v4  ;;  %v5400_v15 = vsel %vm343_vm0, %v360_v5, 0.0 }
  0x21   : > { %11438 = vst [vmem:[#allocation16_spill] sm:$0xff] %v5356_v55  ;;  %v541_v21 = vrot.slane %v5397_v14, 1  ;;  %v543_v23 = vrot.slane %v5394_v9, 1  ;;  %v545_v24 = vrot.slane %v5400_v15, 1  ;;  %v5423_v36 = vsel %vm343_vm0, %v362_v25, %v363_v26 }
  0x22   : > { %11439 = vst [vmem:[#allocation17_spill] sm:$0xff] %v5359_v56  ;;  %v5426_v37 = vsel %vm343_vm0, 0.0, %v362_v25  ;;  %v5429_v38 = vsel %vm343_vm0, %v363_v26, 0.0  ;;  %v549_v48 = vrot.slane %v5423_v36, 1  ;;  %v365_v50 = vrot.slane %v293_v39, 7 }
  0x23   : > { %11440 = vst [vmem:[#allocation18_spill] sm:$0xff] %v5362_v57  ;;  %v5414_v27 = vsel %vm508_vm1, %v541_v21, %v543_v23  ;;  %v5417_v28 = vsel %vm508_vm1, %v543_v23, %v545_v24  ;;  %v5420_v35 = vsel %vm508_vm1, %v539_v3, %v541_v21  ;;  %v547_v41 = vrot.slane %v5426_v37, 1  ;;  %v296_v3 = vld [vmem:[%s5252_s30 + $0x88] sm:$0xff] }
  0x24   : > { %11441 = vst [vmem:[#allocation19_spill] sm:$0xff] %v5365_v58  ;;  %v551_v49 = vrot.slane %v5429_v38, 1  ;;  %v366_v51 = vrot.slane %v294_v40, 7  ;;  %v5455_v62 = vsel %vm343_vm0, 0.0, %v365_v50  ;;  %v368_v17 = vrot.slane %v295_v2, 7 }
  0x25   : > { %11442 = vst [vmem:[#allocation20_spill] sm:$0xff] %v5368_v59  ;;  %v5443_v52 = vsel %vm508_vm1, %v547_v41, %v549_v48  ;;  %v5449_v54 = vsel %vm508_vm1, %v545_v24, %v547_v41  ;;  %v553_v4 = vrot.slane %v5455_v62, 1  ;;  %v369_v21 = vrot.slane %v296_v3, 7  ;;  %v297_v41 = vld [vmem:[%s5252_s30 + $0x90] sm:$0xff] }
  0x26   : > { %11443 = vst [vmem:[#allocation21_spill] sm:$0xff] %v5371_v60  ;;  %v5446_v53 = vsel %vm508_vm1, %v549_v48, %v551_v49  ;;  %v5452_v61 = vsel %vm343_vm0, %v365_v50, %v366_v51  ;;  %v5458_v63 = vsel %vm343_vm0, %v366_v51, 0.0  ;;  %v5484_v39 = vsel %vm343_vm0, 0.0, %v368_v17  ;;  %v298_v48 = vld [vmem:[%s5252_s30 + $0x98] sm:$0xff] }
  0x27   : > { %619 = vrot.lane.b32.xlu2 %v5327_v42, %s5179_s26  ;;  %621 = vrot.lane.b32.xlu0 %v5330_v43, %s5179_s26  ;;  %11444 = vst [vmem:[#allocation22_spill] sm:$0xff] %v5385_v6  ;;  %v555_v5 = vrot.slane %v5452_v61, 1  ;;  %v557_v16 = vrot.slane %v5458_v63, 1  ;;  %v5478_v25 = vsel %vm508_vm1, %v551_v49, %v553_v4  ;;  %v5481_v26 = vsel %vm343_vm0, %v368_v17, %v369_v21 }
  0x28   : > { %617 = vrot.lane.b32.xlu1 %v5333_v44, %s5179_s26  ;;  %11445 = vst [vmem:[#allocation23_spill] sm:$0xff] %v5388_v7  ;;  %v5487_v40 = vsel %vm343_vm0, %v369_v21, 0.0  ;;  %v559_v49 = vrot.slane %v5484_v39, 1  ;;  %v561_v50 = vrot.slane %v5481_v26, 1  ;;  %v371_v2 = vrot.slane %v297_v41, 7  ;;  %v299_v41 = vld [vmem:[%s5252_s30 + $0xa0] sm:$0xff] }
  0x29   : > { %11446 = vst [vmem:[#allocation24_spill] sm:$0xff] %v5391_v8  ;;  %v5472_v23 = vsel %vm508_vm1, %v553_v4, %v555_v5  ;;  %v5475_v24 = vsel %vm508_vm1, %v555_v5, %v557_v16  ;;  %v563_v51 = vrot.slane %v5487_v40, 1  ;;  %v372_v3 = vrot.slane %v298_v48, 7  ;;  %v300_v48 = vld [vmem:[%s5252_s30 + $0xa8] sm:$0xff] }
  0x2a   : > { %11447 = vst [vmem:[#allocation25_spill] sm:$0xff] %v5394_v9  ;;  %v5501_v4 = vsel %vm508_vm1, %v559_v49, %v561_v50  ;;  %v5507_v17 = vsel %vm508_vm1, %v557_v16, %v559_v49  ;;  %v5513_v0 = vsel %vm343_vm0, 0.0, %v371_v2 }
  0x2b   : > { %11448 = vst [vmem:[#allocation26_spill] sm:$0xff] %v5397_v14  ;;  %v5504_v5 = vsel %vm508_vm1, %v561_v50, %v563_v51  ;;  %v5510_v21 = vsel %vm343_vm0, %v371_v2, %v372_v3  ;;  %v565_v16 = vrot.slane %v5513_v0, 1  ;;  %v374_v2 = vrot.slane %v299_v41, 7  ;;  %v301_v41 = vld [vmem:[%s5252_s30 + $0xb0] sm:$0xff] }
  0x2c   : > { %11449 = vst [vmem:[#allocation27_spill] sm:$0xff] %v5400_v15  ;;  %v567_v49 = vrot.slane %v5510_v21, 1 }
  0x2d   : > { %11450 = vst [vmem:[#allocation28_spill] sm:$0xff] %v5414_v27 }
  0x2e   : > { %11451 = vst [vmem:[#allocation29_spill] sm:$0xff] %v5417_v28 }
  0x2f   : > { %625 = vrot.lane.b32.xlu2 %v5356_v55, %s5179_s26  ;;  %627 = vrot.lane.b32.xlu0 %v5359_v56, %s5179_s26  ;;  %11452 = vst [vmem:[#allocation30_spill] sm:$0xff] %v5420_v35 }
  0x30   : > { %623 = vrot.lane.b32.xlu1 %v5362_v57, %s5179_s26  ;;  %11453 = vst [vmem:[#allocation31_spill] sm:$0xff] %v5423_v36 }
  0x31   : > { %11454 = vst [vmem:[#allocation32_spill] sm:$0xff] %v5426_v37 }
  0x32   : > { %11455 = vst [vmem:[#allocation33_spill] sm:$0xff] %v5429_v38 }
  0x33   : > { %11456 = vst [vmem:[#allocation34_spill] sm:$0xff] %v5443_v52 }
  0x34   : > { %11457 = vst [vmem:[#allocation35_spill] sm:$0xff] %v5446_v53 }
  0x35   : > { %11458 = vst [vmem:[#allocation36_spill] sm:$0xff] %v5449_v54 }
  0x36   : > { %11459 = vst [vmem:[#allocation37_spill] sm:$0xff] %v5455_v62 }
  0x37   : > { %631 = vrot.lane.b32.xlu2 %v5385_v6, %s5179_s26  ;;  %633 = vrot.lane.b32.xlu0 %v5388_v7, %s5179_s26  ;;  %11460 = vst [vmem:[#allocation38_spill] sm:$0xff] %v5472_v23 }
  0x38   : > { %629 = vrot.lane.b32.xlu1 %v5391_v8, %s5179_s26  ;;  %11461 = vst [vmem:[#allocation39_spill] sm:$0xff] %v5475_v24 }
  0x39   : > { %11462 = vst [vmem:[#allocation40_spill] sm:$0xff] %v5478_v25 }
  0x3a   : > { %11463 = vst [vmem:[#allocation41_spill] sm:$0xff] %v5487_v40 }
  0x3b   : > { %11464 = vst [vmem:[#allocation42_spill] sm:$0xff] %v5501_v4 }
  0x3c   : > { %11465 = vst [vmem:[#allocation43_spill] sm:$0xff] %v5504_v5 }
  0x3d   : > { %11466 = vst [vmem:[#allocation44_spill] sm:$0xff] %v5507_v17 }
  0x3e   : > { %11467 = vst [vmem:[#allocation45_spill] sm:$0xff] %v5510_v21 }
  0x3f   : > { %637 = vrot.lane.b32.xlu2 %v5414_v27, %s5179_s26  ;;  %639 = vrot.lane.b32.xlu0 %v5417_v28, %s5179_s26  ;;  %11468 = vst [vmem:[#allocation46_spill] sm:$0xff] %v5513_v0 }
  0x40   : > { %635 = vrot.lane.b32.xlu1 %v5420_v35, %s5179_s26 }
  0x47   : > { %643 = vrot.lane.b32.xlu2 %v5443_v52, %s5179_s26  ;;  %645 = vrot.lane.b32.xlu0 %v5446_v53, %s5179_s26 }
  0x48   : > { %641 = vrot.lane.b32.xlu1 %v5449_v54, %s5179_s26 }
  0x4f   : > { %649 = vrot.lane.b32.xlu2 %v5472_v23, %s5179_s26  ;;  %651 = vrot.lane.b32.xlu0 %v5475_v24, %s5179_s26  ;;  %v5516_v23 = vsel %vm343_vm0, %v372_v3, 0.0  ;;  %v375_v3 = vrot.slane %v300_v48, 7  ;;  %v5530_v24 = vsel %vm508_vm1, %v565_v16, %v567_v49  ;;  %v302_v48 = vld [vmem:[%s5252_s30 + $0xb8] sm:$0xff] }
  0x50   : > { %647 = vrot.lane.b32.xlu1 %v5478_v25, %s5179_s26  ;;  %11469 = vst [vmem:[#allocation47_spill] sm:$0xff] %v5516_v23  ;;  %v569_v50 = vrot.slane %v5516_v23, 1 }
  0x51   : > { %11470 = vst [vmem:[#allocation48_spill] sm:$0xff] %v5530_v24  ;;  %v5545_v53 = vsel %vm343_vm0, %v375_v3, 0.0 }
  0x52   : > { %v5533_v52 = vsel %vm508_vm1, %v567_v49, %v569_v50  ;;  %11475 = vst [vmem:[#allocation53_spill] sm:$0xff] %v5545_v53  ;;  %v575_v49 = vrot.slane %v5545_v53, 1 }
  0x53   : > { %11471 = vst [vmem:[#allocation49_spill] sm:$0xff] %v5533_v52 }
  0x57   : > { %655 = vrot.lane.b32.xlu2 %v5501_v4, %s5179_s26  ;;  %657 = vrot.lane.b32.xlu0 %v5504_v5, %s5179_s26  ;;  %v5536_v4 = vsel %vm508_vm1, %v563_v51, %v565_v16  ;;  %v5539_v5 = vsel %vm343_vm0, %v374_v2, %v375_v3  ;;  %v378_v3 = vrot.slane %v302_v48, 7  ;;  %v304_v48 = vld [vmem:[%s5252_s30 + $0xc8] sm:$0xff] }
  0x58   : > { %653 = vrot.lane.b32.xlu1 %v5507_v17, %s5179_s26  ;;  %11472 = vst [vmem:[#allocation50_spill] sm:$0xff] %v5536_v4  ;;  %v5542_v17 = vsel %vm343_vm0, 0.0, %v374_v2  ;;  %v573_v16 = vrot.slane %v5539_v5, 1  ;;  %v377_v2 = vrot.slane %v301_v41, 7  ;;  %v303_v41 = vld [vmem:[%s5252_s30 + $0xc0] sm:$0xff] }
  0x59   : > { %11473 = vst [vmem:[#allocation51_spill] sm:$0xff] %v5539_v5  ;;  %v571_v51 = vrot.slane %v5542_v17, 1  ;;  %v5574_v28 = vsel %vm343_vm0, %v378_v3, 0.0 }
  0x5a   : > { %11474 = vst [vmem:[#allocation52_spill] sm:$0xff] %v5542_v17  ;;  %v5562_v27 = vsel %vm508_vm1, %v573_v16, %v575_v49 }
  0x5b   : > { %v5559_v25 = vsel %vm508_vm1, %v571_v51, %v573_v16  ;;  %11477 = vst [vmem:[#allocation55_spill] sm:$0xff] %v5562_v27  ;;  %v581_v16 = vrot.slane %v5574_v28, 1 }
  0x5c   : > { %11476 = vst [vmem:[#allocation54_spill] sm:$0xff] %v5559_v25 }
  0x5d   : > { %11481 = vst [vmem:[#allocation59_spill] sm:$0xff] %v5574_v28 }
  0x5f   : > { %661 = vrot.lane.b32.xlu2 %v5530_v24, %s5179_s26  ;;  %663 = vrot.lane.b32.xlu0 %v5533_v52, %s5179_s26  ;;  %v5565_v24 = vsel %vm508_vm1, %v569_v50, %v571_v51  ;;  %v5568_v52 = vsel %vm343_vm0, %v377_v2, %v378_v3  ;;  %v381_v3 = vrot.slane %v304_v48, 7  ;;  %v306_v48 = vld [vmem:[%s5252_s30 + $0xd8] sm:$0xff] }
  0x60   : > { %659 = vrot.lane.b32.xlu1 %v5536_v4, %s5179_s26  ;;  %11478 = vst [vmem:[#allocation56_spill] sm:$0xff] %v5565_v24  ;;  %v5571_v4 = vsel %vm343_vm0, 0.0, %v377_v2  ;;  %v579_v51 = vrot.slane %v5568_v52, 1  ;;  %v380_v2 = vrot.slane %v303_v41, 7  ;;  %v305_v41 = vld [vmem:[%s5252_s30 + $0xd0] sm:$0xff]  ;;  %v384_v35 = vrot.slane %v306_v48, 7 }
  0x61   : > { %11479 = vst [vmem:[#allocation57_spill] sm:$0xff] %v5568_v52  ;;  %v577_v50 = vrot.slane %v5571_v4, 1  ;;  %v5603_v7 = vsel %vm343_vm0, %v381_v3, 0.0  ;;  %v308_v48 = vld [vmem:[%s5252_s30 + $0xe8] sm:$0xff] }
  0x62   : > { %11480 = vst [vmem:[#allocation58_spill] sm:$0xff] %v5571_v4  ;;  %v5591_v6 = vsel %vm508_vm1, %v579_v51, %v581_v16  ;;  %v5634_v8 = vsel %vm343_vm0, %v384_v35, 0.0 }
  0x63   : > { %v5588_v54 = vsel %vm508_vm1, %v577_v50, %v579_v51  ;;  %11483 = vst [vmem:[#allocation61_spill] sm:$0xff] %v5591_v6  ;;  %v587_v51 = vrot.slane %v5603_v7, 1 }
  0x64   : > { %11482 = vst [vmem:[#allocation60_spill] sm:$0xff] %v5588_v54 }
  0x65   : > { %11487 = vst [vmem:[#allocation65_spill] sm:$0xff] %v5603_v7 }
  0x66   : > { %11494 = vst [vmem:[#allocation72_spill] sm:$0xff] %v5634_v8 }
  0x67   : > { %667 = vrot.lane.b32.xlu2 %v5559_v25, %s5179_s26  ;;  %669 = vrot.lane.b32.xlu0 %v5562_v27, %s5179_s26  ;;  %v5594_v25 = vsel %vm508_vm1, %v575_v49, %v577_v50  ;;  %v5597_v27 = vsel %vm343_vm0, %v380_v2, %v381_v3  ;;  %v383_v3 = vrot.slane %v305_v41, 7  ;;  %v307_v41 = vld [vmem:[%s5252_s30 + $0xe0] sm:$0xff] }
  0x68   : > { %665 = vrot.lane.b32.xlu1 %v5565_v24, %s5179_s26  ;;  %11484 = vst [vmem:[#allocation62_spill] sm:$0xff] %v5594_v25  ;;  %v5600_v24 = vsel %vm343_vm0, 0.0, %v380_v2  ;;  %v585_v50 = vrot.slane %v5597_v27, 1 }
  0x69   : > { %11485 = vst [vmem:[#allocation63_spill] sm:$0xff] %v5597_v27  ;;  %v583_v49 = vrot.slane %v5600_v24, 1  ;;  %v5631_v56 = vsel %vm343_vm0, 0.0, %v383_v3 }
  0x6a   : > { %11486 = vst [vmem:[#allocation64_spill] sm:$0xff] %v5600_v24 }
  0x6b   : > { %v5619_v55 = vsel %vm508_vm1, %v583_v49, %v585_v50  ;;  %11493 = vst [vmem:[#allocation71_spill] sm:$0xff] %v5631_v56 }
  0x6c   : > { %11489 = vst [vmem:[#allocation67_spill] sm:$0xff] %v5619_v55 }
  0x6f   : > { %673 = vrot.lane.b32.xlu2 %v5588_v54, %s5179_s26  ;;  %675 = vrot.lane.b32.xlu0 %v5591_v6, %s5179_s26  ;;  %v5622_v54 = vsel %vm508_vm1, %v585_v50, %v587_v51  ;;  %v5625_v6 = vsel %vm508_vm1, %v581_v16, %v583_v49  ;;  %v589_v16 = vrot.slane %v5631_v56, 1  ;;  %v593_v50 = vrot.slane %v5634_v8, 1 }
  0x70   : > { %671 = vrot.lane.b32.xlu1 %v5594_v25, %s5179_s26  ;;  %11490 = vst [vmem:[#allocation68_spill] sm:$0xff] %v5622_v54  ;;  %v5628_v25 = vsel %vm343_vm0, %v383_v3, %v384_v35  ;;  %v386_v3 = vrot.slane %v307_v41, 7 }
  0x71   : > { %v5616_v2 = vpop.permute.xlu2 %611  ;;  %11491 = vst [vmem:[#allocation69_spill] sm:$0xff] %v5625_v6  ;;  %v591_v49 = vrot.slane %v5628_v25, 1 }
  0x72   : > { %11488 = vst [vmem:[#allocation66_spill] sm:$0xff] %v5616_v2  ;;  %v387_v2 = vrot.slane %v308_v48, 7  ;;  %v5662_v43 = vsel %vm343_vm0, 0.0, %v386_v3  ;;  %v5674_v48 = vld [vmem:[%s5252_s30 + $0xf0] sm:$0xff] }
  0x73   : > { %11492 = vst [vmem:[#allocation70_spill] sm:$0xff] %v5628_v25  ;;  %v5650_v42 = vsel %vm508_vm1, %v589_v16, %v591_v49 }
  0x74   : > { %11496 = vst [vmem:[#allocation74_spill] sm:$0xff] %v5650_v42  ;;  %v5665_v57 = vsel %vm343_vm0, %v387_v2, 0.0 }
  0x75   : > { %11500 = vst [vmem:[#allocation78_spill] sm:$0xff] %v5662_v43 }
  0x76   : > { %11501 = vst [vmem:[#allocation79_spill] sm:$0xff] %v5665_v57 }
  0x77   : > { %679 = vrot.lane.b32.xlu2 %v5619_v55, %s5179_s26  ;;  %681 = vrot.lane.b32.xlu0 %v5622_v54, %s5179_s26  ;;  %v5653_v55 = vsel %vm508_vm1, %v591_v49, %v593_v50  ;;  %v5656_v54 = vsel %vm508_vm1, %v587_v51, %v589_v16  ;;  %v595_v51 = vrot.slane %v5662_v43, 1 }
  0x78   : > { %677 = vrot.lane.b32.xlu1 %v5625_v6, %s5179_s26  ;;  %11497 = vst [vmem:[#allocation75_spill] sm:$0xff] %v5653_v55  ;;  %v5659_v6 = vsel %vm343_vm0, %v386_v3, %v387_v2  ;;  %v599_v2 = vrot.slane %v5665_v57, 1  ;;  %v11057_v3 = vrot.slane %v5674_v48, 7 }
  0x79   : > { %v5647_v35 = vpop.permute.xlu2 %613  ;;  %11498 = vst [vmem:[#allocation76_spill] sm:$0xff] %v5656_v54  ;;  %v597_v16 = vrot.slane %v5659_v6, 1 }
  0x7a   : > { %11495 = vst [vmem:[#allocation73_spill] sm:$0xff] %v5647_v35 }
  0x7b   : > { %11499 = vst [vmem:[#allocation77_spill] sm:$0xff] %v5659_v6  ;;  %v5685_v35 = vsel %vm508_vm1, %v595_v51, %v597_v16 }
  0x7c   : > { %11504 = vst [vmem:[#allocation82_spill] sm:$0xff] %v5685_v35 }
  0x7f   : > { %685 = vrot.lane.b32.xlu2 %v5650_v42, %s5179_s26  ;;  %687 = vrot.lane.b32.xlu0 %v5653_v55, %s5179_s26  ;;  %v5691_v42 = vsel %vm508_vm1, %v593_v50, %v595_v51  ;;  %v5696_v55 = vsel %vm343_vm0, 0.0, %v11057_v3  ;;  %v747_v50 = vrot.slane %v5265_v12, 2 }
  0x80   : > { %v5671_v41 = vpop.permute.xlu0 %603  ;;  %683 = vrot.lane.b32.xlu1 %v5656_v54, %s5179_s26  ;;  %11506 = vst [vmem:[#allocation84_spill] sm:$0xff] %v5691_v42  ;;  %v11068_v3 = vrot.slane %v5696_v55, 1 }
  0x81   : > { %11502 = vst [vmem:[#allocation80_spill] sm:$0xff] %v5671_v41  ;;  %v5681_v49 = vpop.permute.xlu2 %619  ;;  %v5688_v41 = vsel %vm508_vm1, %v597_v16, %v599_v2 }
  0x82   : > { %11503 = vst [vmem:[#allocation81_spill] sm:$0xff] %v5681_v49  ;;  %v11507_v49 = vmov 0.0  }
  0x83   : > { %11505 = vst [vmem:[#allocation83_spill] sm:$0xff] %v5688_v41  ;;  %v5703_v54 = vrot.slane %v11507_v49, 2 }
  0x85   : > { %11508 = vst [vmem:[#allocation85_spill] sm:$0xff] %v5703_v54  ;;  %v748_v49 = vsel %vm744_vm2, %v5703_v54, %v747_v50 }
  0x87   : > { %691 = vrot.lane.b32.xlu2 %v5685_v35, %s5179_s26  ;;  %693 = vrot.lane.b32.xlu0 %v5688_v41, %s5179_s26  ;;  %v5159_v35 = vpack.i.bf16 %v5240_v1, %v5703_v54  ;;  %v5722_v41 = vsel %vm508_vm1, %v599_v2, %v11068_v3 }
  0x88   : > { %689 = vrot.lane.b32.xlu1 %v5691_v42, %s5179_s26  ;;  %11512 = vst [vmem:[#allocation89_spill] sm:$0xff] %v5722_v41 }
  0x89   : > { %v5708_v51 = vpop.permute.xlu2 %625  ;;  %v5710_v16 = vpop.permute.xlu0 %605 }
  0x8a   : > { %11509 = vst [vmem:[#allocation86_spill] sm:$0xff] %v5708_v51  ;;  %v5713_v29 = vpop.permute.xlu1 %607  ;;  %v751_v51 = vrot.slane %v5262_v11, 2 }
  0x8b   : > { %11510 = vst [vmem:[#allocation87_spill] sm:$0xff] %v5710_v16  ;;  %v749_v16 = vrot.slane %v5268_v13, 2 }
  0x8c   : > { %11511 = vst [vmem:[#allocation88_spill] sm:$0xff] %v5713_v29  ;;  %v753_v29 = vrot.slane %v5259_v10, 2 }
  0x8e   : > { %v5738_v3 = vsel %vm744_vm2, %v751_v51, %v753_v29 }
  0x8f   : > { %5160 = vrot.lane.b32.xlu2 %v5159_v35, %s5180_s8  ;;  %841 = vrot.lane.b32.xlu0 %v748_v49, %s5180_s8  ;;  %11516 = vst [vmem:[#allocation93_spill] sm:$0xff] %v5738_v3  ;;  %v5741_v35 = vsel %vm744_vm2, %v749_v16, %v751_v51  ;;  %v5744_v49 = vsel %vm744_vm2, %v747_v50, %v749_v16 }
  0x90   : > { %695 = vrot.lane.b32.xlu1 %v5722_v41, %s5179_s26  ;;  %11517 = vst [vmem:[#allocation94_spill] sm:$0xff] %v5741_v35  ;;  %s10387_s26 = scalar_lea.vmem %s10984_s7, %s5122_s27 }
  0x91   : > { %v5731_v54 = vpop.permute.xlu2 %631  ;;  %v5733_v1 = vpop.permute.xlu0 %615  ;;  %11518 = vst [vmem:[#allocation95_spill] sm:$0xff] %v5744_v49 }
  0x92   : > { %11513 = vst [vmem:[#allocation90_spill] sm:$0xff] %v5731_v54  ;;  %v5735_v2 = vpop.permute.xlu1 %609  ;;  %v757_v54 = vrot.slane %v5278_v19, 2 }
  0x93   : > { %11514 = vst [vmem:[#allocation91_spill] sm:$0xff] %v5733_v1  ;;  %v759_v1 = vrot.slane %v5310_v33, 2 }
  0x94   : > { %11515 = vst [vmem:[#allocation92_spill] sm:$0xff] %v5735_v2  ;;  %v755_v2 = vrot.slane %v5275_v18, 2 }
  0x95   : > { %v5762_v16 = vsel %vm744_vm2, %v757_v54, %v759_v1 }
  0x96   : > { %11522 = vst [vmem:[#allocation99_spill] sm:$0xff] %v5762_v16 }
  0x97   : > { %847 = vrot.lane.b32.xlu0 %v5738_v3, %s5180_s8  ;;  %845 = vrot.lane.b32.xlu2 %v5741_v35, %s5180_s8  ;;  %v5765_v35 = vsel %vm744_vm2, %v755_v2, %v757_v54 }
  0x98   : > { %843 = vrot.lane.b32.xlu1 %v5744_v49, %s5180_s8  ;;  %11523 = vst [vmem:[#allocation100_spill] sm:$0xff] %v5765_v35  ;;  %v5768_v49 = vsel %vm744_vm2, %v753_v29, %v755_v2 }
  0x99   : > { %v5755_v51 = vpop.permute.xlu2 %637  ;;  %v5757_v41 = vpop.permute.xlu0 %621  ;;  %11524 = vst [vmem:[#allocation101_spill] sm:$0xff] %v5768_v49 }
  0x9a   : > { %11519 = vst [vmem:[#allocation96_spill] sm:$0xff] %v5755_v51  ;;  %v5759_v50 = vpop.permute.xlu1 %617  ;;  %v763_v51 = vrot.slane %v5313_v34, 2 }
  0x9b   : > { %11520 = vst [vmem:[#allocation97_spill] sm:$0xff] %v5757_v41  ;;  %v765_v41 = vrot.slane %v5339_v46, 2 }
  0x9c   : > { %11521 = vst [vmem:[#allocation98_spill] sm:$0xff] %v5759_v50  ;;  %v761_v50 = vrot.slane %v5307_v32, 2 }
  0x9d   : > { %v5786_v2 = vsel %vm744_vm2, %v763_v51, %v765_v41 }
  0x9e   : > { %11528 = vst [vmem:[#allocation105_spill] sm:$0xff] %v5786_v2 }
  0x9f   : > { %853 = vrot.lane.b32.xlu0 %v5762_v16, %s5180_s8  ;;  %851 = vrot.lane.b32.xlu2 %v5765_v35, %s5180_s8  ;;  %v5789_v35 = vsel %vm744_vm2, %v761_v50, %v763_v51 }
  0xa0   : > { %849 = vrot.lane.b32.xlu1 %v5768_v49, %s5180_s8  ;;  %11529 = vst [vmem:[#allocation106_spill] sm:$0xff] %v5789_v35  ;;  %v5792_v49 = vsel %vm744_vm2, %v759_v1, %v761_v50 }
  0xa1   : > { %v5779_v54 = vpop.permute.xlu2 %643  ;;  %v5781_v3 = vpop.permute.xlu0 %627  ;;  %11530 = vst [vmem:[#allocation107_spill] sm:$0xff] %v5792_v49 }
  0xa2   : > { %11525 = vst [vmem:[#allocation102_spill] sm:$0xff] %v5779_v54  ;;  %v5783_v29 = vpop.permute.xlu1 %623  ;;  %v769_v54 = vrot.slane %v5342_v47, 2 }
  0xa3   : > { %11526 = vst [vmem:[#allocation103_spill] sm:$0xff] %v5781_v3  ;;  %v771_v3 = vrot.slane %v5368_v59, 2 }
  0xa4   : > { %11527 = vst [vmem:[#allocation104_spill] sm:$0xff] %v5783_v29  ;;  %v767_v29 = vrot.slane %v5336_v45, 2 }
  0xa5   : > { %v5810_v50 = vsel %vm744_vm2, %v769_v54, %v771_v3 }
  0xa6   : > { %11534 = vst [vmem:[#allocation111_spill] sm:$0xff] %v5810_v50 }
  0xa7   : > { %859 = vrot.lane.b32.xlu0 %v5786_v2, %s5180_s8  ;;  %857 = vrot.lane.b32.xlu2 %v5789_v35, %s5180_s8  ;;  %v5813_v35 = vsel %vm744_vm2, %v767_v29, %v769_v54 }
  0xa8   : > { %855 = vrot.lane.b32.xlu1 %v5792_v49, %s5180_s8  ;;  %11535 = vst [vmem:[#allocation112_spill] sm:$0xff] %v5813_v35  ;;  %v5816_v49 = vsel %vm744_vm2, %v765_v41, %v767_v29 }
  0xa9   : > { %v5803_v51 = vpop.permute.xlu2 %649  ;;  %v5805_v16 = vpop.permute.xlu0 %633  ;;  %11536 = vst [vmem:[#allocation113_spill] sm:$0xff] %v5816_v49 }
  0xaa   : > { %11531 = vst [vmem:[#allocation108_spill] sm:$0xff] %v5803_v51  ;;  %v5807_v1 = vpop.permute.xlu1 %629  ;;  %v775_v51 = vrot.slane %v5371_v60, 2 }
  0xab   : > { %11532 = vst [vmem:[#allocation109_spill] sm:$0xff] %v5805_v16  ;;  %v777_v16 = vrot.slane %v5397_v14, 2 }
  0xac   : > { %11533 = vst [vmem:[#allocation110_spill] sm:$0xff] %v5807_v1  ;;  %v773_v1 = vrot.slane %v5365_v58, 2 }
  0xad   : > { %v5834_v29 = vsel %vm744_vm2, %v775_v51, %v777_v16 }
  0xae   : > { %11540 = vst [vmem:[#allocation117_spill] sm:$0xff] %v5834_v29 }
  0xaf   : > { %865 = vrot.lane.b32.xlu0 %v5810_v50, %s5180_s8  ;;  %863 = vrot.lane.b32.xlu2 %v5813_v35, %s5180_s8  ;;  %v5837_v35 = vsel %vm744_vm2, %v773_v1, %v775_v51 }
  0xb0   : > { %861 = vrot.lane.b32.xlu1 %v5816_v49, %s5180_s8  ;;  %11541 = vst [vmem:[#allocation118_spill] sm:$0xff] %v5837_v35  ;;  %v5840_v49 = vsel %vm744_vm2, %v771_v3, %v773_v1 }
  0xb1   : > { %v5827_v54 = vpop.permute.xlu2 %655  ;;  %v5829_v2 = vpop.permute.xlu0 %639  ;;  %11542 = vst [vmem:[#allocation119_spill] sm:$0xff] %v5840_v49 }
  0xb2   : > { %11537 = vst [vmem:[#allocation114_spill] sm:$0xff] %v5827_v54  ;;  %v5831_v41 = vpop.permute.xlu1 %635  ;;  %v779_v54 = vrot.slane %v5394_v9, 2 }
  0xb3   : > { %11538 = vst [vmem:[#allocation115_spill] sm:$0xff] %v5829_v2  ;;  %v781_v2 = vrot.slane %v5400_v15, 2 }
  0xb4   : > { %11539 = vst [vmem:[#allocation116_spill] sm:$0xff] %v5831_v41  ;;  %v783_v41 = vrot.slane %v5426_v37, 2 }
  0xb6   : > { %v5858_v1 = vsel %vm744_vm2, %v781_v2, %v783_v41 }
  0xb7   : > { %871 = vrot.lane.b32.xlu0 %v5834_v29, %s5180_s8  ;;  %869 = vrot.lane.b32.xlu2 %v5837_v35, %s5180_s8  ;;  %11546 = vst [vmem:[#allocation123_spill] sm:$0xff] %v5858_v1  ;;  %v5861_v35 = vsel %vm744_vm2, %v779_v54, %v781_v2 }
  0xb8   : > { %867 = vrot.lane.b32.xlu1 %v5840_v49, %s5180_s8  ;;  %11547 = vst [vmem:[#allocation124_spill] sm:$0xff] %v5861_v35  ;;  %v5864_v49 = vsel %vm744_vm2, %v777_v16, %v779_v54 }
  0xb9   : > { %v5851_v51 = vpop.permute.xlu2 %661  ;;  %v5853_v50 = vpop.permute.xlu0 %645  ;;  %11548 = vst [vmem:[#allocation125_spill] sm:$0xff] %v5864_v49 }
  0xba   : > { %11543 = vst [vmem:[#allocation120_spill] sm:$0xff] %v5851_v51  ;;  %v5855_v3 = vpop.permute.xlu1 %641  ;;  %v785_v51 = vrot.slane %v5423_v36, 2 }
  0xbb   : > { %11544 = vst [vmem:[#allocation121_spill] sm:$0xff] %v5853_v50  ;;  %v787_v50 = vrot.slane %v5429_v38, 2 }
  0xbc   : > { %11545 = vst [vmem:[#allocation122_spill] sm:$0xff] %v5855_v3  ;;  %v789_v3 = vrot.slane %v5455_v62, 2 }
  0xbe   : > { %v5882_v54 = vsel %vm744_vm2, %v787_v50, %v789_v3 }
  0xbf   : > { %877 = vrot.lane.b32.xlu0 %v5858_v1, %s5180_s8  ;;  %875 = vrot.lane.b32.xlu2 %v5861_v35, %s5180_s8  ;;  %11552 = vst [vmem:[#allocation129_spill] sm:$0xff] %v5882_v54  ;;  %v5885_v35 = vsel %vm744_vm2, %v785_v51, %v787_v50 }
  0xc0   : > { %873 = vrot.lane.b32.xlu1 %v5864_v49, %s5180_s8  ;;  %11553 = vst [vmem:[#allocation130_spill] sm:$0xff] %v5885_v35  ;;  %v5888_v49 = vsel %vm744_vm2, %v783_v41, %v785_v51 }
  0xc1   : > { %v5875_v2 = vpop.permute.xlu2 %667  ;;  %v5877_v29 = vpop.permute.xlu0 %651  ;;  %11554 = vst [vmem:[#allocation131_spill] sm:$0xff] %v5888_v49 }
  0xc2   : > { %11549 = vst [vmem:[#allocation126_spill] sm:$0xff] %v5875_v2  ;;  %v5879_v16 = vpop.permute.xlu1 %647  ;;  %v795_v2 = vrot.slane %v5484_v39, 2 }
  0xc3   : > { %11550 = vst [vmem:[#allocation127_spill] sm:$0xff] %v5877_v29  ;;  %v791_v29 = vrot.slane %v5452_v61, 2 }
  0xc4   : > { %11551 = vst [vmem:[#allocation128_spill] sm:$0xff] %v5879_v16  ;;  %v793_v16 = vrot.slane %v5458_v63, 2 }
  0xc6   : > { %v5906_v51 = vsel %vm744_vm2, %v793_v16, %v795_v2 }
  0xc7   : > { %883 = vrot.lane.b32.xlu0 %v5882_v54, %s5180_s8  ;;  %881 = vrot.lane.b32.xlu2 %v5885_v35, %s5180_s8  ;;  %11558 = vst [vmem:[#allocation135_spill] sm:$0xff] %v5906_v51  ;;  %v5909_v35 = vsel %vm744_vm2, %v791_v29, %v793_v16 }
  0xc8   : > { %879 = vrot.lane.b32.xlu1 %v5888_v49, %s5180_s8  ;;  %11559 = vst [vmem:[#allocation136_spill] sm:$0xff] %v5909_v35  ;;  %v5912_v49 = vsel %vm744_vm2, %v789_v3, %v791_v29 }
  0xc9   : > { %v5899_v50 = vpop.permute.xlu2 %673  ;;  %v5901_v1 = vpop.permute.xlu0 %657  ;;  %11560 = vst [vmem:[#allocation137_spill] sm:$0xff] %v5912_v49 }
  0xca   : > { %11555 = vst [vmem:[#allocation132_spill] sm:$0xff] %v5899_v50  ;;  %v5903_v41 = vpop.permute.xlu1 %653  ;;  %v799_v50 = vrot.slane %v5487_v40, 2 }
  0xcb   : > { %11556 = vst [vmem:[#allocation133_spill] sm:$0xff] %v5901_v1  ;;  %v801_v1 = vrot.slane %v5513_v0, 2 }
  0xcc   : > { %11557 = vst [vmem:[#allocation134_spill] sm:$0xff] %v5903_v41  ;;  %v797_v41 = vrot.slane %v5481_v26, 2 }
  0xcd   : > { %v5930_v3 = vsel %vm744_vm2, %v799_v50, %v801_v1 }
  0xce   : > { %11564 = vst [vmem:[#allocation141_spill] sm:$0xff] %v5930_v3 }
  0xcf   : > { %889 = vrot.lane.b32.xlu0 %v5906_v51, %s5180_s8  ;;  %887 = vrot.lane.b32.xlu2 %v5909_v35, %s5180_s8  ;;  %v5933_v35 = vsel %vm744_vm2, %v797_v41, %v799_v50 }
  0xd0   : > { %885 = vrot.lane.b32.xlu1 %v5912_v49, %s5180_s8  ;;  %11565 = vst [vmem:[#allocation142_spill] sm:$0xff] %v5933_v35  ;;  %v5936_v49 = vsel %vm744_vm2, %v795_v2, %v797_v41 }
  0xd1   : > { %v5923_v16 = vpop.permute.xlu2 %679  ;;  %v5925_v54 = vpop.permute.xlu0 %663  ;;  %11566 = vst [vmem:[#allocation143_spill] sm:$0xff] %v5936_v49 }
  0xd2   : > { %11561 = vst [vmem:[#allocation138_spill] sm:$0xff] %v5923_v16  ;;  %v5927_v29 = vpop.permute.xlu1 %659  ;;  %v805_v16 = vrot.slane %v5516_v23, 2 }
  0xd3   : > { %11562 = vst [vmem:[#allocation139_spill] sm:$0xff] %v5925_v54  ;;  %v807_v54 = vrot.slane %v5542_v17, 2 }
  0xd4   : > { %11563 = vst [vmem:[#allocation140_spill] sm:$0xff] %v5927_v29  ;;  %v803_v29 = vrot.slane %v5510_v21, 2 }
  0xd5   : > { %v5954_v41 = vsel %vm744_vm2, %v805_v16, %v807_v54 }
  0xd6   : > { %11570 = vst [vmem:[#allocation147_spill] sm:$0xff] %v5954_v41 }
  0xd7   : > { %895 = vrot.lane.b32.xlu0 %v5930_v3, %s5180_s8  ;;  %893 = vrot.lane.b32.xlu2 %v5933_v35, %s5180_s8  ;;  %v5957_v35 = vsel %vm744_vm2, %v803_v29, %v805_v16 }
  0xd8   : > { %891 = vrot.lane.b32.xlu1 %v5936_v49, %s5180_s8  ;;  %11571 = vst [vmem:[#allocation148_spill] sm:$0xff] %v5957_v35  ;;  %v5960_v49 = vsel %vm744_vm2, %v801_v1, %v803_v29 }
  0xd9   : > { %v5947_v50 = vpop.permute.xlu2 %685  ;;  %v5949_v51 = vpop.permute.xlu0 %669  ;;  %11572 = vst [vmem:[#allocation149_spill] sm:$0xff] %v5960_v49 }
  0xda   : > { %11567 = vst [vmem:[#allocation144_spill] sm:$0xff] %v5947_v50  ;;  %v5951_v2 = vpop.permute.xlu1 %665  ;;  %v811_v50 = vrot.slane %v5545_v53, 2 }
  0xdb   : > { %11568 = vst [vmem:[#allocation145_spill] sm:$0xff] %v5949_v51  ;;  %v813_v51 = vrot.slane %v5571_v4, 2 }
  0xdc   : > { %11569 = vst [vmem:[#allocation146_spill] sm:$0xff] %v5951_v2  ;;  %v809_v2 = vrot.slane %v5539_v5, 2 }
  0xdd   : > { %v5978_v29 = vsel %vm744_vm2, %v811_v50, %v813_v51 }
  0xde   : > { %11576 = vst [vmem:[#allocation153_spill] sm:$0xff] %v5978_v29 }
  0xdf   : > { %901 = vrot.lane.b32.xlu0 %v5954_v41, %s5180_s8  ;;  %899 = vrot.lane.b32.xlu2 %v5957_v35, %s5180_s8  ;;  %v5981_v35 = vsel %vm744_vm2, %v809_v2, %v811_v50 }
  0xe0   : > { %897 = vrot.lane.b32.xlu1 %v5960_v49, %s5180_s8  ;;  %11577 = vst [vmem:[#allocation154_spill] sm:$0xff] %v5981_v35  ;;  %v5984_v49 = vsel %vm744_vm2, %v807_v54, %v809_v2 }
  0xe1   : > { %v5971_v16 = vpop.permute.xlu2 %691  ;;  %v5973_v3 = vpop.permute.xlu0 %675  ;;  %11578 = vst [vmem:[#allocation155_spill] sm:$0xff] %v5984_v49 }
  0xe2   : > { %11573 = vst [vmem:[#allocation150_spill] sm:$0xff] %v5971_v16  ;;  %v5975_v1 = vpop.permute.xlu1 %671  ;;  %v817_v16 = vrot.slane %v5574_v28, 2 }
  0xe3   : > { %11574 = vst [vmem:[#allocation151_spill] sm:$0xff] %v5973_v3  ;;  %v819_v3 = vrot.slane %v5600_v24, 2 }
  0xe4   : > { %11575 = vst [vmem:[#allocation152_spill] sm:$0xff] %v5975_v1  ;;  %v815_v1 = vrot.slane %v5568_v52, 2 }
  0xe5   : > { %v6002_v2 = vsel %vm744_vm2, %v817_v16, %v819_v3 }
  0xe6   : > { %11582 = vst [vmem:[#allocation159_spill] sm:$0xff] %v6002_v2 }
  0xe7   : > { %907 = vrot.lane.b32.xlu0 %v5978_v29, %s5180_s8  ;;  %905 = vrot.lane.b32.xlu2 %v5981_v35, %s5180_s8  ;;  %v6005_v35 = vsel %vm744_vm2, %v815_v1, %v817_v16 }
  0xe8   : > { %903 = vrot.lane.b32.xlu1 %v5984_v49, %s5180_s8  ;;  %11583 = vst [vmem:[#allocation160_spill] sm:$0xff] %v6005_v35  ;;  %v6008_v49 = vsel %vm744_vm2, %v813_v51, %v815_v1 }
  0xe9   : > { %v5995_v50 = vpop.permute.xlu2 %5160  ;;  %v5997_v41 = vpop.permute.xlu0 %681  ;;  %11584 = vst [vmem:[#allocation161_spill] sm:$0xff] %v6008_v49 }
  0xea   : > { %11579 = vst [vmem:[#allocation156_spill] sm:$0xff] %v5995_v50  ;;  %v5999_v54 = vpop.permute.xlu1 %677  ;;  %v821_v50 = vrot.slane %v5597_v27, 2 }
  0xeb   : > { %11580 = vst [vmem:[#allocation157_spill] sm:$0xff] %v5997_v41  ;;  %v823_v41 = vrot.slane %v5603_v7, 2 }
  0xec   : > { %11581 = vst [vmem:[#allocation158_spill] sm:$0xff] %v5999_v54  ;;  %v825_v54 = vrot.slane %v5631_v56, 2 }
  0xee   : > { %v6026_v1 = vsel %vm744_vm2, %v823_v41, %v825_v54 }
  0xef   : > { %913 = vrot.lane.b32.xlu0 %v6002_v2, %s5180_s8  ;;  %911 = vrot.lane.b32.xlu2 %v6005_v35, %s5180_s8  ;;  %11588 = vst [vmem:[#allocation165_spill] sm:$0xff] %v6026_v1  ;;  %v6029_v35 = vsel %vm744_vm2, %v821_v50, %v823_v41 }
  0xf0   : > { %909 = vrot.lane.b32.xlu1 %v6008_v49, %s5180_s8  ;;  %11589 = vst [vmem:[#allocation166_spill] sm:$0xff] %v6029_v35  ;;  %v6032_v49 = vsel %vm744_vm2, %v819_v3, %v821_v50 }
  0xf1   : > { %v6019_v16 = vpop.permute.xlu0 %687  ;;  %v6021_v29 = vpop.permute.xlu2 %845  ;;  %11590 = vst [vmem:[#allocation167_spill] sm:$0xff] %v6032_v49 }
  0xf2   : > { %11585 = vst [vmem:[#allocation162_spill] sm:$0xff] %v6019_v16  ;;  %v6023_v51 = vpop.permute.xlu1 %683  ;;  %v829_v16 = vrot.slane %v5634_v8, 2 }
  0xf3   : > { %11586 = vst [vmem:[#allocation163_spill] sm:$0xff] %v6021_v29  ;;  %v827_v29 = vrot.slane %v5628_v25, 2 }
  0xf4   : > { %11587 = vst [vmem:[#allocation164_spill] sm:$0xff] %v6023_v51  ;;  %v831_v51 = vrot.slane %v5662_v43, 2 }
  0xf6   : > { %v6050_v50 = vsel %vm744_vm2, %v829_v16, %v831_v51 }
  0xf7   : > { %919 = vrot.lane.b32.xlu0 %v6026_v1, %s5180_s8  ;;  %917 = vrot.lane.b32.xlu2 %v6029_v35, %s5180_s8  ;;  %11594 = vst [vmem:[#allocation171_spill] sm:$0xff] %v6050_v50  ;;  %v6053_v35 = vsel %vm744_vm2, %v827_v29, %v829_v16 }
  0xf8   : > { %915 = vrot.lane.b32.xlu1 %v6032_v49, %s5180_s8  ;;  %11595 = vst [vmem:[#allocation172_spill] sm:$0xff] %v6053_v35  ;;  %v6056_v49 = vsel %vm744_vm2, %v825_v54, %v827_v29 }
  0xf9   : > { %v6043_v41 = vpop.permute.xlu0 %693  ;;  %v6045_v2 = vpop.permute.xlu2 %851  ;;  %11596 = vst [vmem:[#allocation173_spill] sm:$0xff] %v6056_v49 }
  0xfa   : > { %11591 = vst [vmem:[#allocation168_spill] sm:$0xff] %v6043_v41  ;;  %v6047_v3 = vpop.permute.xlu1 %689  ;;  %v835_v41 = vrot.slane %v5665_v57, 2 }
  0xfb   : > { %11592 = vst [vmem:[#allocation169_spill] sm:$0xff] %v6045_v2  ;;  %v833_v2 = vrot.slane %v5659_v6, 2 }
  0xfc   : > { %11593 = vst [vmem:[#allocation170_spill] sm:$0xff] %v6047_v3  ;;  %v11151_v3 = vrot.slane %v5696_v55, 2 }
  0xfe   : > { %v6076_v54 = vsel %vm744_vm2, %v835_v41, %v11151_v3 }
  0xff   : > { %925 = vrot.lane.b32.xlu0 %v6050_v50, %s5180_s8  ;;  %923 = vrot.lane.b32.xlu2 %v6053_v35, %s5180_s8  ;;  %11600 = vst [vmem:[#allocation177_spill] sm:$0xff] %v6076_v54  ;;  %v6079_v35 = vsel %vm744_vm2, %v833_v2, %v835_v41 }
 0x100   : > { %921 = vrot.lane.b32.xlu1 %v6056_v49, %s5180_s8  ;;  %11601 = vst [vmem:[#allocation178_spill] sm:$0xff] %v6079_v35  ;;  %v6082_v49 = vsel %vm744_vm2, %v831_v51, %v833_v2 }
 0x101   : > { %v6067_v16 = vpop.permute.xlu0 %841  ;;  %v6069_v1 = vpop.permute.xlu2 %857 }
 0x102   : > { %11597 = vst [vmem:[#allocation174_spill] sm:$0xff] %v6067_v16  ;;  %v6071_v29 = vpop.permute.xlu1 %695 }
 0x103   : > { %11598 = vst [vmem:[#allocation175_spill] sm:$0xff] %v6069_v1 }
 0x104   : > { %11599 = vst [vmem:[#allocation176_spill] sm:$0xff] %v6071_v29 }
 0x107   : > { %931 = vrot.lane.b32.xlu0 %v6076_v54, %s5180_s8  ;;  %929 = vrot.lane.b32.xlu2 %v6079_v35, %s5180_s8 }
 0x108   : > { %927 = vrot.lane.b32.xlu1 %v6082_v49, %s5180_s8 }
 0x109   : > { %v6090_v29 = vpop.permute.xlu0 %847  ;;  %v6092_v1 = vpop.permute.xlu2 %863 }
 0x10a   : > { %11602 = vst [vmem:[#allocation179_spill] sm:$0xff] %v6090_v29  ;;  %v6094_v3 = vpop.permute.xlu1 %843 }
 0x10b   : > { %11603 = vst [vmem:[#allocation180_spill] sm:$0xff] %v6092_v1 }
 0x10c   : > { %11604 = vst [vmem:[#allocation181_spill] sm:$0xff] %v6094_v3 }
 0x10f   : > { %985 = vrot.lane.b32.xlu0 %v5262_v11, %s5181_s9  ;;  %983 = vrot.lane.b32.xlu2 %v5268_v13, %s5181_s9 }
 0x110   : > { %981 = vrot.lane.b32.xlu1 %v5265_v12, %s5181_s9 }
 0x111   : > { %v6102_v2 = vpop.permute.xlu0 %853  ;;  %v6104_v51 = vpop.permute.xlu2 %869 }
 0x112   : > { %11605 = vst [vmem:[#allocation182_spill] sm:$0xff] %v6102_v2  ;;  %v6106_v41 = vpop.permute.xlu1 %849 }
 0x113   : > { %11606 = vst [vmem:[#allocation183_spill] sm:$0xff] %v6104_v51 }
 0x114   : > { %11607 = vst [vmem:[#allocation184_spill] sm:$0xff] %v6106_v41 }
 0x117   : > { %991 = vrot.lane.b32.xlu0 %v5278_v19, %s5181_s9  ;;  %989 = vrot.lane.b32.xlu2 %v5275_v18, %s5181_s9 }
 0x118   : > { %987 = vrot.lane.b32.xlu1 %v5259_v10, %s5181_s9 }
 0x119   : > { %v6114_v1 = vpop.permute.xlu0 %859  ;;  %v6116_v29 = vpop.permute.xlu2 %875 }
 0x11a   : > { %11608 = vst [vmem:[#allocation185_spill] sm:$0xff] %v6114_v1  ;;  %v6118_v11 = vpop.permute.xlu1 %855 }
 0x11b   : > { %11609 = vst [vmem:[#allocation186_spill] sm:$0xff] %v6116_v29 }
 0x11c   : > { %11610 = vst [vmem:[#allocation187_spill] sm:$0xff] %v6118_v11 }
 0x11f   : > { %997 = vrot.lane.b32.xlu0 %v5313_v34, %s5181_s9  ;;  %995 = vrot.lane.b32.xlu2 %v5307_v32, %s5181_s9 }
 0x120   : > { %993 = vrot.lane.b32.xlu1 %v5310_v33, %s5181_s9 }
 0x121   : > { %v6126_v51 = vpop.permute.xlu0 %865  ;;  %v6128_v2 = vpop.permute.xlu2 %881 }
 0x122   : > { %11611 = vst [vmem:[#allocation188_spill] sm:$0xff] %v6126_v51  ;;  %v6130_v41 = vpop.permute.xlu1 %861 }
 0x123   : > { %11612 = vst [vmem:[#allocation189_spill] sm:$0xff] %v6128_v2 }
 0x124   : > { %11613 = vst [vmem:[#allocation190_spill] sm:$0xff] %v6130_v41 }
 0x127   : > { %1003 = vrot.lane.b32.xlu0 %v5342_v47, %s5181_s9  ;;  %1001 = vrot.lane.b32.xlu2 %v5336_v45, %s5181_s9 }
 0x128   : > { %999 = vrot.lane.b32.xlu1 %v5339_v46, %s5181_s9 }
 0x129   : > { %v6138_v29 = vpop.permute.xlu0 %871  ;;  %v6140_v1 = vpop.permute.xlu2 %887 }
 0x12a   : > { %11614 = vst [vmem:[#allocation191_spill] sm:$0xff] %v6138_v29  ;;  %v6142_v11 = vpop.permute.xlu1 %867 }
 0x12b   : > { %11615 = vst [vmem:[#allocation192_spill] sm:$0xff] %v6140_v1 }
 0x12c   : > { %11616 = vst [vmem:[#allocation193_spill] sm:$0xff] %v6142_v11 }
 0x12f   : > { %1009 = vrot.lane.b32.xlu0 %v5371_v60, %s5181_s9  ;;  %1007 = vrot.lane.b32.xlu2 %v5365_v58, %s5181_s9 }
 0x130   : > { %1005 = vrot.lane.b32.xlu1 %v5368_v59, %s5181_s9 }
 0x131   : > { %v6150_v2 = vpop.permute.xlu0 %877  ;;  %v6152_v51 = vpop.permute.xlu2 %893 }
 0x132   : > { %11617 = vst [vmem:[#allocation194_spill] sm:$0xff] %v6150_v2  ;;  %v6154_v41 = vpop.permute.xlu1 %873 }
 0x133   : > { %11618 = vst [vmem:[#allocation195_spill] sm:$0xff] %v6152_v51 }
 0x134   : > { %11619 = vst [vmem:[#allocation196_spill] sm:$0xff] %v6154_v41 }
 0x137   : > { %1015 = vrot.lane.b32.xlu0 %v5400_v15, %s5181_s9  ;;  %1013 = vrot.lane.b32.xlu2 %v5394_v9, %s5181_s9 }
 0x138   : > { %1011 = vrot.lane.b32.xlu1 %v5397_v14, %s5181_s9 }
 0x139   : > { %v6162_v29 = vpop.permute.xlu0 %883  ;;  %v6164_v11 = vpop.permute.xlu2 %899 }
 0x13a   : > { %11620 = vst [vmem:[#allocation197_spill] sm:$0xff] %v6162_v29  ;;  %v6166_v1 = vpop.permute.xlu1 %879 }
 0x13b   : > { %11621 = vst [vmem:[#allocation198_spill] sm:$0xff] %v6164_v11 }
 0x13c   : > { %11622 = vst [vmem:[#allocation199_spill] sm:$0xff] %v6166_v1 }
 0x13f   : > { %1021 = vrot.lane.b32.xlu0 %v5429_v38, %s5181_s9  ;;  %1019 = vrot.lane.b32.xlu2 %v5423_v36, %s5181_s9 }
 0x140   : > { %1017 = vrot.lane.b32.xlu1 %v5426_v37, %s5181_s9 }
 0x141   : > { %v6174_v2 = vpop.permute.xlu0 %889  ;;  %v6176_v41 = vpop.permute.xlu2 %905 }
 0x142   : > { %11623 = vst [vmem:[#allocation200_spill] sm:$0xff] %v6174_v2  ;;  %v6178_v51 = vpop.permute.xlu1 %885 }
 0x143   : > { %11624 = vst [vmem:[#allocation201_spill] sm:$0xff] %v6176_v41 }
 0x144   : > { %11625 = vst [vmem:[#allocation202_spill] sm:$0xff] %v6178_v51 }
 0x147   : > { %1027 = vrot.lane.b32.xlu0 %v5458_v63, %s5181_s9  ;;  %1025 = vrot.lane.b32.xlu2 %v5452_v61, %s5181_s9 }
 0x148   : > { %1023 = vrot.lane.b32.xlu1 %v5455_v62, %s5181_s9 }
 0x149   : > { %v6186_v29 = vpop.permute.xlu0 %895  ;;  %v6188_v1 = vpop.permute.xlu2 %911 }
 0x14a   : > { %11626 = vst [vmem:[#allocation203_spill] sm:$0xff] %v6186_v29  ;;  %v6190_v11 = vpop.permute.xlu1 %891 }
 0x14b   : > { %11627 = vst [vmem:[#allocation204_spill] sm:$0xff] %v6188_v1 }
 0x14c   : > { %11628 = vst [vmem:[#allocation205_spill] sm:$0xff] %v6190_v11 }
 0x14f   : > { %1033 = vrot.lane.b32.xlu0 %v5487_v40, %s5181_s9  ;;  %1031 = vrot.lane.b32.xlu2 %v5481_v26, %s5181_s9 }
 0x150   : > { %1029 = vrot.lane.b32.xlu1 %v5484_v39, %s5181_s9 }
 0x151   : > { %v6198_v51 = vpop.permute.xlu0 %901  ;;  %v6200_v41 = vpop.permute.xlu2 %917 }
 0x152   : > { %11629 = vst [vmem:[#allocation206_spill] sm:$0xff] %v6198_v51  ;;  %v6202_v2 = vpop.permute.xlu1 %897 }
 0x153   : > { %11630 = vst [vmem:[#allocation207_spill] sm:$0xff] %v6200_v41 }
 0x154   : > { %11631 = vst [vmem:[#allocation208_spill] sm:$0xff] %v6202_v2 }
 0x157   : > { %1039 = vrot.lane.b32.xlu0 %v5516_v23, %s5181_s9  ;;  %1037 = vrot.lane.b32.xlu2 %v5510_v21, %s5181_s9 }
 0x158   : > { %1035 = vrot.lane.b32.xlu1 %v5513_v0, %s5181_s9 }
 0x159   : > { %v6210_v1 = vpop.permute.xlu0 %907  ;;  %v6212_v29 = vpop.permute.xlu2 %923 }
 0x15a   : > { %11632 = vst [vmem:[#allocation209_spill] sm:$0xff] %v6210_v1  ;;  %v6214_v11 = vpop.permute.xlu1 %903 }
 0x15b   : > { %11633 = vst [vmem:[#allocation210_spill] sm:$0xff] %v6212_v29 }
 0x15c   : > { %11634 = vst [vmem:[#allocation211_spill] sm:$0xff] %v6214_v11 }
 0x15f   : > { %1045 = vrot.lane.b32.xlu0 %v5545_v53, %s5181_s9  ;;  %1043 = vrot.lane.b32.xlu2 %v5539_v5, %s5181_s9 }
 0x160   : > { %1041 = vrot.lane.b32.xlu1 %v5542_v17, %s5181_s9 }
 0x161   : > { %v6222_v41 = vpop.permute.xlu0 %913  ;;  %v6224_v51 = vpop.permute.xlu2 %929 }
 0x162   : > { %11635 = vst [vmem:[#allocation212_spill] sm:$0xff] %v6222_v41  ;;  %v6226_v2 = vpop.permute.xlu1 %909 }
 0x163   : > { %11636 = vst [vmem:[#allocation213_spill] sm:$0xff] %v6224_v51 }
 0x164   : > { %11637 = vst [vmem:[#allocation214_spill] sm:$0xff] %v6226_v2 }
 0x167   : > { %1051 = vrot.lane.b32.xlu0 %v5574_v28, %s5181_s9  ;;  %1049 = vrot.lane.b32.xlu2 %v5568_v52, %s5181_s9 }
 0x168   : > { %1047 = vrot.lane.b32.xlu1 %v5571_v4, %s5181_s9 }
 0x169   : > { %v6234_v29 = vpop.permute.xlu0 %919  ;;  %v6236_v1 = vpop.permute.xlu2 %983 }
 0x16a   : > { %11638 = vst [vmem:[#allocation215_spill] sm:$0xff] %v6234_v29  ;;  %v6238_v11 = vpop.permute.xlu1 %915 }
 0x16b   : > { %11639 = vst [vmem:[#allocation216_spill] sm:$0xff] %v6236_v1 }
 0x16c   : > { %11640 = vst [vmem:[#allocation217_spill] sm:$0xff] %v6238_v11 }
 0x16f   : > { %1057 = vrot.lane.b32.xlu0 %v5603_v7, %s5181_s9  ;;  %1055 = vrot.lane.b32.xlu2 %v5597_v27, %s5181_s9 }
 0x170   : > { %1053 = vrot.lane.b32.xlu1 %v5600_v24, %s5181_s9 }
 0x171   : > { %v6246_v51 = vpop.permute.xlu0 %925  ;;  %v6248_v41 = vpop.permute.xlu2 %989 }
 0x172   : > { %11641 = vst [vmem:[#allocation218_spill] sm:$0xff] %v6246_v51  ;;  %v6250_v2 = vpop.permute.xlu1 %921  ;;  %v310_v51 = vld [vmem:[%s5252_s30 + $0xf8] sm:$0xff] }
 0x173   : > { %11642 = vst [vmem:[#allocation219_spill] sm:$0xff] %v6248_v41 }
 0x174   : > { %11643 = vst [vmem:[#allocation220_spill] sm:$0xff] %v6250_v2  ;;  %v390_v2 = vrot.slane %v310_v51, 7 }
 0x177   : > { %1063 = vrot.lane.b32.xlu0 %v5634_v8, %s5181_s9  ;;  %1061 = vrot.lane.b32.xlu2 %v5628_v25, %s5181_s9 }
 0x178   : > { %1059 = vrot.lane.b32.xlu1 %v5631_v56, %s5181_s9 }
 0x179   : > { %v6258_v29 = vpop.permute.xlu0 %931  ;;  %v6260_v11 = vpop.permute.xlu2 %995 }
 0x17a   : > { %11644 = vst [vmem:[#allocation221_spill] sm:$0xff] %v6258_v29  ;;  %v6262_v13 = vpop.permute.xlu1 %927 }
 0x17b   : > { %11645 = vst [vmem:[#allocation222_spill] sm:$0xff] %v6260_v11  ;;  %v6278_v11 = vsel %vm343_vm0, %v390_v2, 0.0 }
 0x17c   : > { %11646 = vst [vmem:[#allocation223_spill] sm:$0xff] %v6262_v13  ;;  %v11650_v13 = vrot.slane %v5674_v48, 7 }
 0x17e   : > { %v6283_v12 = vsel %vm343_vm0, %v11650_v13, %v390_v2 }
 0x17f   : > { %1069 = vrot.lane.b32.xlu0 %v5665_v57, %s5181_s9  ;;  %1067 = vrot.lane.b32.xlu2 %v5659_v6, %s5181_s9 }
 0x180   : > { %1065 = vrot.lane.b32.xlu1 %v5662_v43, %s5181_s9 }
 0x181   : > { %v6271_v41 = vpop.permute.xlu0 %985  ;;  %v6273_v3 = vpop.permute.xlu2 %1001 }
 0x182   : > { %11647 = vst [vmem:[#allocation224_spill] sm:$0xff] %v6271_v41  ;;  %v6275_v29 = vpop.permute.xlu1 %981 }
 0x183   : > { %11648 = vst [vmem:[#allocation225_spill] sm:$0xff] %v6273_v3 }
 0x184   : > { %11649 = vst [vmem:[#allocation226_spill] sm:$0xff] %v6275_v29 }
 0x187   : > { %1075 = vrot.lane.b32.xlu0 %v6278_v11, %s5181_s9  ;;  %1073 = vrot.lane.b32.xlu2 %v6283_v12, %s5181_s9 }
 0x188   : > { %1071 = vrot.lane.b32.xlu1 %v5696_v55, %s5181_s9 }
 0x189   : > { %v6291_v51 = vpop.permute.xlu0 %991  ;;  %v6293_v3 = vpop.permute.xlu2 %1007 }
 0x18a   : > { %11651 = vst [vmem:[#allocation227_spill] sm:$0xff] %v6291_v51  ;;  %v6295_v41 = vpop.permute.xlu1 %987 }
 0x18b   : > { %11652 = vst [vmem:[#allocation228_spill] sm:$0xff] %v6293_v3 }
 0x18c   : > { %11653 = vst [vmem:[#allocation229_spill] sm:$0xff] %v6295_v41 }
 0x18f   : > { %1134 = vrot.lane.b32.xlu0 %v5281_v20, %s5182_s10  ;;  %1132 = vrot.lane.b32.xlu2 %v5304_v31, %s5182_s10  ;;  %v11657_v20 = vld [vmem:[#allocation8_spill] sm:$0xff] }
 0x190   : > { %1130 = vrot.lane.b32.xlu1 %v5286_v22, %s5182_s10 }
 0x191   : > { %v6303_v13 = vpop.permute.xlu0 %997  ;;  %v6305_v48 = vpop.permute.xlu2 %1013 }
 0x192   : > { %11654 = vst [vmem:[#allocation230_spill] sm:$0xff] %v6303_v13  ;;  %v6307_v2 = vpop.permute.xlu1 %993  ;;  %v11661_v13 = vld [vmem:[#allocation18_spill] sm:$0xff] }
 0x193   : > { %11655 = vst [vmem:[#allocation231_spill] sm:$0xff] %v6305_v48  ;;  %v11662_v48 = vld [vmem:[#allocation12_spill] sm:$0xff] }
 0x194   : > { %11656 = vst [vmem:[#allocation232_spill] sm:$0xff] %v6307_v2  ;;  %v11663_v2 = vld [vmem:[#allocation11_spill] sm:$0xff] }
 0x197   : > { %1140 = vrot.lane.b32.xlu0 %v5333_v44, %s5182_s10  ;;  %1138 = vrot.lane.b32.xlu2 %v5301_v30, %s5182_s10 }
 0x198   : > { %1136 = vrot.lane.b32.xlu1 %v11657_v20, %s5182_s10 }
 0x199   : > { %v6315_v3 = vpop.permute.xlu0 %1003  ;;  %v6317_v31 = vpop.permute.xlu2 %1019 }
 0x19a   : > { %11658 = vst [vmem:[#allocation8_spill] sm:$0xff] %v6315_v3  ;;  %v6319_v22 = vpop.permute.xlu1 %999  ;;  %v11667_v3 = vld [vmem:[#allocation24_spill] sm:$0xff] }
 0x19b   : > { %11659 = vst [vmem:[#allocation233_spill] sm:$0xff] %v6317_v31  ;;  %v11668_v31 = vld [vmem:[#allocation17_spill] sm:$0xff] }
 0x19c   : > { %11660 = vst [vmem:[#allocation234_spill] sm:$0xff] %v6319_v22  ;;  %v11669_v22 = vld [vmem:[#allocation16_spill] sm:$0xff] }
 0x19f   : > { %1146 = vrot.lane.b32.xlu0 %v11661_v13, %s5182_s10  ;;  %1144 = vrot.lane.b32.xlu2 %v11662_v48, %s5182_s10 }
 0x1a0   : > { %1142 = vrot.lane.b32.xlu1 %v11663_v2, %s5182_s10 }
 0x1a1   : > { %v6327_v51 = vpop.permute.xlu0 %1009  ;;  %v6329_v41 = vpop.permute.xlu2 %1025 }
 0x1a2   : > { %11664 = vst [vmem:[#allocation12_spill] sm:$0xff] %v6327_v51  ;;  %v6331_v16 = vpop.permute.xlu1 %1005  ;;  %v11673_v51 = vld [vmem:[#allocation30_spill] sm:$0xff] }
 0x1a3   : > { %11665 = vst [vmem:[#allocation11_spill] sm:$0xff] %v6329_v41  ;;  %v11674_v41 = vld [vmem:[#allocation23_spill] sm:$0xff] }
 0x1a4   : > { %11666 = vst [vmem:[#allocation235_spill] sm:$0xff] %v6331_v16  ;;  %v11675_v16 = vld [vmem:[#allocation22_spill] sm:$0xff] }
 0x1a7   : > { %1152 = vrot.lane.b32.xlu0 %v11667_v3, %s5182_s10  ;;  %1150 = vrot.lane.b32.xlu2 %v11668_v31, %s5182_s10 }
 0x1a8   : > { %1148 = vrot.lane.b32.xlu1 %v11669_v22, %s5182_s10 }
 0x1a9   : > { %v6339_v1 = vpop.permute.xlu0 %1015  ;;  %v6341_v29 = vpop.permute.xlu2 %1031 }
 0x1aa   : > { %11670 = vst [vmem:[#allocation236_spill] sm:$0xff] %v6339_v1  ;;  %v6343_v13 = vpop.permute.xlu1 %1011  ;;  %v11679_v1 = vld [vmem:[#allocation36_spill] sm:$0xff] }
 0x1ab   : > { %11671 = vst [vmem:[#allocation237_spill] sm:$0xff] %v6341_v29  ;;  %v11681_v29 = vld [vmem:[#allocation28_spill] sm:$0xff] }
 0x1ac   : > { %11672 = vst [vmem:[#allocation238_spill] sm:$0xff] %v6343_v13  ;;  %v11680_v13 = vld [vmem:[#allocation29_spill] sm:$0xff] }
 0x1af   : > { %1158 = vrot.lane.b32.xlu0 %v11673_v51, %s5182_s10  ;;  %1156 = vrot.lane.b32.xlu2 %v11674_v41, %s5182_s10 }
 0x1b0   : > { %1154 = vrot.lane.b32.xlu1 %v11675_v16, %s5182_s10 }
 0x1b1   : > { %v6351_v3 = vpop.permute.xlu0 %1021  ;;  %v6353_v31 = vpop.permute.xlu2 %1037 }
 0x1b2   : > { %11676 = vst [vmem:[#allocation239_spill] sm:$0xff] %v6351_v3  ;;  %v6355_v22 = vpop.permute.xlu1 %1017  ;;  %v11685_v3 = vld [vmem:[#allocation40_spill] sm:$0xff] }
 0x1b3   : > { %11677 = vst [vmem:[#allocation240_spill] sm:$0xff] %v6353_v31  ;;  %v11687_v31 = vld [vmem:[#allocation34_spill] sm:$0xff] }
 0x1b4   : > { %11678 = vst [vmem:[#allocation241_spill] sm:$0xff] %v6355_v22  ;;  %v11686_v22 = vld [vmem:[#allocation35_spill] sm:$0xff] }
 0x1b7   : > { %1164 = vrot.lane.b32.xlu0 %v11679_v1, %s5182_s10  ;;  %1162 = vrot.lane.b32.xlu2 %v11680_v13, %s5182_s10 }
 0x1b8   : > { %1160 = vrot.lane.b32.xlu1 %v11681_v29, %s5182_s10 }
 0x1b9   : > { %v6363_v51 = vpop.permute.xlu0 %1027  ;;  %v6365_v41 = vpop.permute.xlu2 %1043 }
 0x1ba   : > { %11682 = vst [vmem:[#allocation242_spill] sm:$0xff] %v6363_v51  ;;  %v6367_v16 = vpop.permute.xlu1 %1023  ;;  %v11691_v51 = vld [vmem:[#allocation44_spill] sm:$0xff] }
 0x1bb   : > { %11683 = vst [vmem:[#allocation243_spill] sm:$0xff] %v6365_v41  ;;  %v11693_v41 = vld [vmem:[#allocation38_spill] sm:$0xff] }
 0x1bc   : > { %11684 = vst [vmem:[#allocation244_spill] sm:$0xff] %v6367_v16  ;;  %v11692_v16 = vld [vmem:[#allocation39_spill] sm:$0xff] }
 0x1bf   : > { %1170 = vrot.lane.b32.xlu0 %v11685_v3, %s5182_s10  ;;  %1168 = vrot.lane.b32.xlu2 %v11686_v22, %s5182_s10 }
 0x1c0   : > { %1166 = vrot.lane.b32.xlu1 %v11687_v31, %s5182_s10 }
 0x1c1   : > { %v6375_v1 = vpop.permute.xlu0 %1033  ;;  %v6377_v13 = vpop.permute.xlu2 %1049 }
 0x1c2   : > { %11688 = vst [vmem:[#allocation245_spill] sm:$0xff] %v6375_v1  ;;  %v6379_v29 = vpop.permute.xlu1 %1029  ;;  %v11697_v1 = vld [vmem:[#allocation50_spill] sm:$0xff] }
 0x1c3   : > { %11689 = vst [vmem:[#allocation246_spill] sm:$0xff] %v6377_v13  ;;  %v11699_v13 = vld [vmem:[#allocation42_spill] sm:$0xff] }
 0x1c4   : > { %11690 = vst [vmem:[#allocation247_spill] sm:$0xff] %v6379_v29  ;;  %v11698_v29 = vld [vmem:[#allocation43_spill] sm:$0xff] }
 0x1c7   : > { %1176 = vrot.lane.b32.xlu0 %v11691_v51, %s5182_s10  ;;  %1174 = vrot.lane.b32.xlu2 %v11692_v16, %s5182_s10 }
 0x1c8   : > { %1172 = vrot.lane.b32.xlu1 %v11693_v41, %s5182_s10 }
 0x1c9   : > { %v6387_v3 = vpop.permute.xlu0 %1039  ;;  %v6389_v22 = vpop.permute.xlu2 %1055 }
 0x1ca   : > { %11694 = vst [vmem:[#allocation248_spill] sm:$0xff] %v6387_v3  ;;  %v6391_v31 = vpop.permute.xlu1 %1035  ;;  %v11703_v3 = vld [vmem:[#allocation56_spill] sm:$0xff] }
 0x1cb   : > { %11695 = vst [vmem:[#allocation249_spill] sm:$0xff] %v6389_v22  ;;  %v11704_v22 = vld [vmem:[#allocation49_spill] sm:$0xff] }
 0x1cc   : > { %11696 = vst [vmem:[#allocation250_spill] sm:$0xff] %v6391_v31  ;;  %v11705_v31 = vld [vmem:[#allocation48_spill] sm:$0xff] }
 0x1cf   : > { %1182 = vrot.lane.b32.xlu0 %v11697_v1, %s5182_s10  ;;  %1180 = vrot.lane.b32.xlu2 %v11698_v29, %s5182_s10 }
 0x1d0   : > { %1178 = vrot.lane.b32.xlu1 %v11699_v13, %s5182_s10 }
 0x1d1   : > { %v6399_v51 = vpop.permute.xlu0 %1045  ;;  %v6401_v16 = vpop.permute.xlu2 %1061 }
 0x1d2   : > { %11700 = vst [vmem:[#allocation251_spill] sm:$0xff] %v6399_v51  ;;  %v6403_v41 = vpop.permute.xlu1 %1041  ;;  %v11709_v51 = vld [vmem:[#allocation62_spill] sm:$0xff] }
 0x1d3   : > { %11701 = vst [vmem:[#allocation252_spill] sm:$0xff] %v6401_v16  ;;  %v11710_v16 = vld [vmem:[#allocation55_spill] sm:$0xff] }
 0x1d4   : > { %11702 = vst [vmem:[#allocation253_spill] sm:$0xff] %v6403_v41  ;;  %v11711_v41 = vld [vmem:[#allocation54_spill] sm:$0xff] }
 0x1d7   : > { %1188 = vrot.lane.b32.xlu0 %v11703_v3, %s5182_s10  ;;  %1186 = vrot.lane.b32.xlu2 %v11704_v22, %s5182_s10 }
 0x1d8   : > { %1184 = vrot.lane.b32.xlu1 %v11705_v31, %s5182_s10 }
 0x1d9   : > { %v6411_v1 = vpop.permute.xlu0 %1051  ;;  %v6413_v29 = vpop.permute.xlu2 %1067 }
 0x1da   : > { %11706 = vst [vmem:[#allocation254_spill] sm:$0xff] %v6411_v1  ;;  %v6415_v13 = vpop.permute.xlu1 %1047  ;;  %v11715_v1 = vld [vmem:[#allocation69_spill] sm:$0xff] }
 0x1db   : > { %11707 = vst [vmem:[#allocation255_spill] sm:$0xff] %v6413_v29  ;;  %v11716_v29 = vld [vmem:[#allocation61_spill] sm:$0xff] }
 0x1dc   : > { %11708 = vst [vmem:[#allocation256_spill] sm:$0xff] %v6415_v13  ;;  %v11717_v13 = vld [vmem:[#allocation60_spill] sm:$0xff] }
 0x1df   : > { %1194 = vrot.lane.b32.xlu0 %v11709_v51, %s5182_s10  ;;  %1192 = vrot.lane.b32.xlu2 %v11710_v16, %s5182_s10 }
 0x1e0   : > { %1190 = vrot.lane.b32.xlu1 %v11711_v41, %s5182_s10 }
 0x1e1   : > { %v6423_v3 = vpop.permute.xlu0 %1057  ;;  %v6425_v22 = vpop.permute.xlu2 %1073 }
 0x1e2   : > { %11712 = vst [vmem:[#allocation257_spill] sm:$0xff] %v6423_v3  ;;  %v6427_v31 = vpop.permute.xlu1 %1053  ;;  %v11721_v3 = vld [vmem:[#allocation76_spill] sm:$0xff] }
 0x1e3   : > { %11713 = vst [vmem:[#allocation258_spill] sm:$0xff] %v6425_v22  ;;  %v11722_v22 = vld [vmem:[#allocation68_spill] sm:$0xff] }
 0x1e4   : > { %11714 = vst [vmem:[#allocation259_spill] sm:$0xff] %v6427_v31  ;;  %v11723_v31 = vld [vmem:[#allocation67_spill] sm:$0xff] }
 0x1e7   : > { %1200 = vrot.lane.b32.xlu0 %v11715_v1, %s5182_s10  ;;  %1198 = vrot.lane.b32.xlu2 %v11716_v29, %s5182_s10 }
 0x1e8   : > { %1196 = vrot.lane.b32.xlu1 %v11717_v13, %s5182_s10 }
 0x1e9   : > { %v6435_v51 = vpop.permute.xlu0 %1063  ;;  %v6437_v16 = vpop.permute.xlu2 %1132 }
 0x1ea   : > { %11718 = vst [vmem:[#allocation260_spill] sm:$0xff] %v6435_v51  ;;  %v6439_v41 = vpop.permute.xlu1 %1059  ;;  %v11727_v51 = vld [vmem:[#allocation75_spill] sm:$0xff] }
 0x1eb   : > { %11719 = vst [vmem:[#allocation261_spill] sm:$0xff] %v6437_v16 }
 0x1ec   : > { %11720 = vst [vmem:[#allocation262_spill] sm:$0xff] %v6439_v41  ;;  %v11728_v41 = vld [vmem:[#allocation74_spill] sm:$0xff] }
 0x1ef   : > { %1206 = vrot.lane.b32.xlu0 %v11721_v3, %s5182_s10  ;;  %1204 = vrot.lane.b32.xlu2 %v11722_v22, %s5182_s10 }
 0x1f0   : > { %1202 = vrot.lane.b32.xlu1 %v11723_v31, %s5182_s10 }
 0x1f1   : > { %v6447_v1 = vpop.permute.xlu0 %1069  ;;  %v6449_v29 = vpop.permute.xlu2 %1138 }
 0x1f2   : > { %11724 = vst [vmem:[#allocation263_spill] sm:$0xff] %v6447_v1  ;;  %v6451_v13 = vpop.permute.xlu1 %1065  ;;  %v11732_v1 = vld [vmem:[#allocation89_spill] sm:$0xff] }
 0x1f3   : > { %11725 = vst [vmem:[#allocation264_spill] sm:$0xff] %v6449_v29  ;;  %v1127_v29 = vrot.slane %v6278_v11, 1 }
 0x1f4   : > { %11726 = vst [vmem:[#allocation265_spill] sm:$0xff] %v6451_v13  ;;  %v11733_v13 = vld [vmem:[#allocation83_spill] sm:$0xff] }
 0x1f7   : > { %1212 = vrot.lane.b32.xlu0 %v5691_v42, %s5182_s10  ;;  %1210 = vrot.lane.b32.xlu2 %v11727_v51, %s5182_s10  ;;  %v1125_v42 = vrot.slane %v6283_v12, 1  ;;  %v11734_v51 = vld [vmem:[#allocation82_spill] sm:$0xff] }
 0x1f8   : > { %1208 = vrot.lane.b32.xlu1 %v11728_v41, %s5182_s10 }
 0x1f9   : > { %v6459_v16 = vpop.permute.xlu0 %1075  ;;  %v6461_v3 = vpop.permute.xlu2 %1144 }
 0x1fa   : > { %11729 = vst [vmem:[#allocation266_spill] sm:$0xff] %v6459_v16  ;;  %v6463_v31 = vpop.permute.xlu1 %1071 }
 0x1fb   : > { %11730 = vst [vmem:[#allocation267_spill] sm:$0xff] %v6461_v3 }
 0x1fc   : > { %11731 = vst [vmem:[#allocation268_spill] sm:$0xff] %v6463_v31  ;;  %v11738_v31 = vld [vmem:[#allocation2_spill] sm:$0xff] }
 0x1fd   : > { %v6481_v22 = vsel %vm508_vm1, %v1127_v29, %v11738_v31 }
 0x1fe   : > { %11739 = vst [vmem:[#allocation271_spill] sm:$0xff] %v6481_v22 }
 0x1ff   : > { %1218 = vrot.lane.b32.xlu0 %v11732_v1, %s5182_s10  ;;  %1216 = vrot.lane.b32.xlu2 %v11733_v13, %s5182_s10  ;;  %v6484_v1 = vsel %vm508_vm1, %v1125_v42, %v1127_v29  ;;  %v11740_v13 = vrot.slane %v5696_v55, 1 }
 0x200   : > { %1214 = vrot.lane.b32.xlu1 %v11734_v51, %s5182_s10 }
 0x201   : > { %v6473_v41 = vpop.permute.xlu0 %1134  ;;  %v6475_v16 = vpop.permute.xlu2 %1150  ;;  %v6489_v44 = vsel %vm508_vm1, %v11740_v13, %v1125_v42  ;;  %v11746_v42 = vld [vmem:[#allocation94_spill] sm:$0xff]  ;;  %v11747_v13 = vld [vmem:[#allocation95_spill] sm:$0xff] }
 0x202   : > { %11735 = vst [vmem:[#allocation82_spill] sm:$0xff] %v6473_v41  ;;  %v6477_v3 = vpop.permute.xlu1 %1130 }
 0x203   : > { %11736 = vst [vmem:[#allocation269_spill] sm:$0xff] %v6475_v16 }
 0x204   : > { %11737 = vst [vmem:[#allocation270_spill] sm:$0xff] %v6477_v3  ;;  %v11745_v3 = vld [vmem:[#allocation93_spill] sm:$0xff] }
 0x205   : > { %11741 = vst [vmem:[#allocation272_spill] sm:$0xff] %v6489_v44 }
 0x207   : > { %1224 = vrot.lane.b32.xlu0 %v6481_v22, %s5182_s10  ;;  %1222 = vrot.lane.b32.xlu2 %v6484_v1, %s5182_s10 }
 0x208   : > { %1220 = vrot.lane.b32.xlu1 %v6489_v44, %s5182_s10 }
 0x209   : > { %v6497_v16 = vpop.permute.xlu0 %1140  ;;  %v6499_v41 = vpop.permute.xlu2 %1156 }
 0x20a   : > { %11742 = vst [vmem:[#allocation273_spill] sm:$0xff] %v6497_v16  ;;  %v6501_v29 = vpop.permute.xlu1 %1136  ;;  %v11752_v16 = vld [vmem:[#allocation100_spill] sm:$0xff] }
 0x20b   : > { %11743 = vst [vmem:[#allocation274_spill] sm:$0xff] %v6499_v41  ;;  %v11751_v41 = vld [vmem:[#allocation99_spill] sm:$0xff] }
 0x20c   : > { %11744 = vst [vmem:[#allocation275_spill] sm:$0xff] %v6501_v29 }
 0x20f   : > { %1283 = vrot.lane.b32.xlu0 %v11745_v3, %s5183_s11  ;;  %1281 = vrot.lane.b32.xlu2 %v11746_v42, %s5183_s11  ;;  %v11753_v3 = vld [vmem:[#allocation101_spill] sm:$0xff] }
 0x210   : > { %1279 = vrot.lane.b32.xlu1 %v11747_v13, %s5183_s11 }
 0x211   : > { %v6509_v22 = vpop.permute.xlu0 %1146  ;;  %v6511_v31 = vpop.permute.xlu2 %1162 }
 0x212   : > { %11748 = vst [vmem:[#allocation93_spill] sm:$0xff] %v6509_v22  ;;  %v6513_v44 = vpop.permute.xlu1 %1142  ;;  %v11757_v22 = vld [vmem:[#allocation105_spill] sm:$0xff] }
 0x213   : > { %11749 = vst [vmem:[#allocation94_spill] sm:$0xff] %v6511_v31  ;;  %v11758_v31 = vld [vmem:[#allocation106_spill] sm:$0xff] }
 0x214   : > { %11750 = vst [vmem:[#allocation95_spill] sm:$0xff] %v6513_v44  ;;  %v11759_v44 = vld [vmem:[#allocation107_spill] sm:$0xff] }
 0x217   : > { %1289 = vrot.lane.b32.xlu0 %v11751_v41, %s5183_s11  ;;  %1287 = vrot.lane.b32.xlu2 %v11752_v16, %s5183_s11 }
 0x218   : > { %1285 = vrot.lane.b32.xlu1 %v11753_v3, %s5183_s11 }
 0x219   : > { %v6521_v29 = vpop.permute.xlu0 %1152  ;;  %v6523_v42 = vpop.permute.xlu2 %1168 }
 0x21a   : > { %11754 = vst [vmem:[#allocation276_spill] sm:$0xff] %v6521_v29  ;;  %v6525_v13 = vpop.permute.xlu1 %1148  ;;  %v11763_v29 = vld [vmem:[#allocation111_spill] sm:$0xff] }
 0x21b   : > { %11755 = vst [vmem:[#allocation277_spill] sm:$0xff] %v6523_v42  ;;  %v11764_v42 = vld [vmem:[#allocation112_spill] sm:$0xff] }
 0x21c   : > { %11756 = vst [vmem:[#allocation278_spill] sm:$0xff] %v6525_v13  ;;  %v11765_v13 = vld [vmem:[#allocation113_spill] sm:$0xff] }
 0x21f   : > { %1295 = vrot.lane.b32.xlu0 %v11757_v22, %s5183_s11  ;;  %1293 = vrot.lane.b32.xlu2 %v11758_v31, %s5183_s11 }
 0x220   : > { %1291 = vrot.lane.b32.xlu1 %v11759_v44, %s5183_s11 }
 0x221   : > { %v6533_v41 = vpop.permute.xlu0 %1158  ;;  %v6535_v16 = vpop.permute.xlu2 %1174 }
 0x222   : > { %11760 = vst [vmem:[#allocation279_spill] sm:$0xff] %v6533_v41  ;;  %v6537_v3 = vpop.permute.xlu1 %1154  ;;  %v11769_v41 = vld [vmem:[#allocation117_spill] sm:$0xff] }
 0x223   : > { %11761 = vst [vmem:[#allocation280_spill] sm:$0xff] %v6535_v16  ;;  %v11770_v16 = vld [vmem:[#allocation118_spill] sm:$0xff] }
 0x224   : > { %11762 = vst [vmem:[#allocation281_spill] sm:$0xff] %v6537_v3  ;;  %v11771_v3 = vld [vmem:[#allocation119_spill] sm:$0xff] }
 0x227   : > { %1301 = vrot.lane.b32.xlu0 %v11763_v29, %s5183_s11  ;;  %1299 = vrot.lane.b32.xlu2 %v11764_v42, %s5183_s11 }
 0x228   : > { %1297 = vrot.lane.b32.xlu1 %v11765_v13, %s5183_s11 }
 0x229   : > { %v6545_v22 = vpop.permute.xlu0 %1164  ;;  %v6547_v31 = vpop.permute.xlu2 %1180 }
 0x22a   : > { %11766 = vst [vmem:[#allocation282_spill] sm:$0xff] %v6545_v22  ;;  %v6549_v44 = vpop.permute.xlu1 %1160  ;;  %v11775_v22 = vld [vmem:[#allocation123_spill] sm:$0xff] }
 0x22b   : > { %11767 = vst [vmem:[#allocation283_spill] sm:$0xff] %v6547_v31  ;;  %v11777_v31 = vld [vmem:[#allocation125_spill] sm:$0xff] }
 0x22c   : > { %11768 = vst [vmem:[#allocation284_spill] sm:$0xff] %v6549_v44  ;;  %v11776_v44 = vld [vmem:[#allocation124_spill] sm:$0xff] }
 0x22f   : > { %1307 = vrot.lane.b32.xlu0 %v11769_v41, %s5183_s11  ;;  %1305 = vrot.lane.b32.xlu2 %v11770_v16, %s5183_s11 }
 0x230   : > { %1303 = vrot.lane.b32.xlu1 %v11771_v3, %s5183_s11 }
 0x231   : > { %v6557_v29 = vpop.permute.xlu0 %1170  ;;  %v6559_v42 = vpop.permute.xlu2 %1186 }
 0x232   : > { %11772 = vst [vmem:[#allocation285_spill] sm:$0xff] %v6557_v29  ;;  %v6561_v13 = vpop.permute.xlu1 %1166  ;;  %v11781_v29 = vld [vmem:[#allocation129_spill] sm:$0xff] }
 0x233   : > { %11773 = vst [vmem:[#allocation286_spill] sm:$0xff] %v6559_v42  ;;  %v11783_v42 = vld [vmem:[#allocation131_spill] sm:$0xff] }
 0x234   : > { %11774 = vst [vmem:[#allocation287_spill] sm:$0xff] %v6561_v13  ;;  %v11782_v13 = vld [vmem:[#allocation130_spill] sm:$0xff] }
 0x237   : > { %1313 = vrot.lane.b32.xlu0 %v11775_v22, %s5183_s11  ;;  %1311 = vrot.lane.b32.xlu2 %v11776_v44, %s5183_s11 }
 0x238   : > { %1309 = vrot.lane.b32.xlu1 %v11777_v31, %s5183_s11 }
 0x239   : > { %v6569_v41 = vpop.permute.xlu0 %1176  ;;  %v6571_v16 = vpop.permute.xlu2 %1192 }
 0x23a   : > { %11778 = vst [vmem:[#allocation288_spill] sm:$0xff] %v6569_v41  ;;  %v6573_v3 = vpop.permute.xlu1 %1172  ;;  %v11787_v41 = vld [vmem:[#allocation135_spill] sm:$0xff] }
 0x23b   : > { %11779 = vst [vmem:[#allocation289_spill] sm:$0xff] %v6571_v16  ;;  %v11789_v16 = vld [vmem:[#allocation137_spill] sm:$0xff] }
 0x23c   : > { %11780 = vst [vmem:[#allocation290_spill] sm:$0xff] %v6573_v3  ;;  %v11788_v3 = vld [vmem:[#allocation136_spill] sm:$0xff] }
 0x23f   : > { %1319 = vrot.lane.b32.xlu0 %v11781_v29, %s5183_s11  ;;  %1317 = vrot.lane.b32.xlu2 %v11782_v13, %s5183_s11 }
 0x240   : > { %1315 = vrot.lane.b32.xlu1 %v11783_v42, %s5183_s11 }
 0x241   : > { %v6581_v22 = vpop.permute.xlu0 %1182  ;;  %v6583_v44 = vpop.permute.xlu2 %1198 }
 0x242   : > { %11784 = vst [vmem:[#allocation291_spill] sm:$0xff] %v6581_v22  ;;  %v6585_v31 = vpop.permute.xlu1 %1178  ;;  %v11793_v22 = vld [vmem:[#allocation141_spill] sm:$0xff] }
 0x243   : > { %11785 = vst [vmem:[#allocation292_spill] sm:$0xff] %v6583_v44  ;;  %v11795_v44 = vld [vmem:[#allocation143_spill] sm:$0xff] }
 0x244   : > { %11786 = vst [vmem:[#allocation293_spill] sm:$0xff] %v6585_v31  ;;  %v11794_v31 = vld [vmem:[#allocation142_spill] sm:$0xff] }
 0x247   : > { %1325 = vrot.lane.b32.xlu0 %v11787_v41, %s5183_s11  ;;  %1323 = vrot.lane.b32.xlu2 %v11788_v3, %s5183_s11 }
 0x248   : > { %1321 = vrot.lane.b32.xlu1 %v11789_v16, %s5183_s11 }
 0x249   : > { %v6593_v29 = vpop.permute.xlu0 %1188  ;;  %v6595_v13 = vpop.permute.xlu2 %1204 }
 0x24a   : > { %11790 = vst [vmem:[#allocation294_spill] sm:$0xff] %v6593_v29  ;;  %v6597_v42 = vpop.permute.xlu1 %1184  ;;  %v11799_v29 = vld [vmem:[#allocation147_spill] sm:$0xff] }
 0x24b   : > { %11791 = vst [vmem:[#allocation295_spill] sm:$0xff] %v6595_v13  ;;  %v11800_v13 = vld [vmem:[#allocation148_spill] sm:$0xff] }
 0x24c   : > { %11792 = vst [vmem:[#allocation296_spill] sm:$0xff] %v6597_v42  ;;  %v11801_v42 = vld [vmem:[#allocation149_spill] sm:$0xff] }
 0x24f   : > { %1331 = vrot.lane.b32.xlu0 %v11793_v22, %s5183_s11  ;;  %1329 = vrot.lane.b32.xlu2 %v11794_v31, %s5183_s11 }
 0x250   : > { %1327 = vrot.lane.b32.xlu1 %v11795_v44, %s5183_s11 }
 0x251   : > { %v6605_v41 = vpop.permute.xlu0 %1194  ;;  %v6607_v3 = vpop.permute.xlu2 %1210 }
 0x252   : > { %11796 = vst [vmem:[#allocation297_spill] sm:$0xff] %v6605_v41  ;;  %v6609_v16 = vpop.permute.xlu1 %1190  ;;  %v11805_v41 = vld [vmem:[#allocation153_spill] sm:$0xff] }
 0x253   : > { %11797 = vst [vmem:[#allocation298_spill] sm:$0xff] %v6607_v3  ;;  %v11806_v3 = vld [vmem:[#allocation154_spill] sm:$0xff] }
 0x254   : > { %11798 = vst [vmem:[#allocation299_spill] sm:$0xff] %v6609_v16  ;;  %v11807_v16 = vld [vmem:[#allocation155_spill] sm:$0xff] }
 0x257   : > { %1337 = vrot.lane.b32.xlu0 %v11799_v29, %s5183_s11  ;;  %1335 = vrot.lane.b32.xlu2 %v11800_v13, %s5183_s11 }
 0x258   : > { %1333 = vrot.lane.b32.xlu1 %v11801_v42, %s5183_s11 }
 0x259   : > { %v6617_v22 = vpop.permute.xlu0 %1200  ;;  %v6619_v31 = vpop.permute.xlu2 %1216 }
 0x25a   : > { %11802 = vst [vmem:[#allocation300_spill] sm:$0xff] %v6617_v22  ;;  %v6621_v44 = vpop.permute.xlu1 %1196  ;;  %v11811_v22 = vld [vmem:[#allocation159_spill] sm:$0xff] }
 0x25b   : > { %11803 = vst [vmem:[#allocation301_spill] sm:$0xff] %v6619_v31  ;;  %v11812_v31 = vld [vmem:[#allocation160_spill] sm:$0xff] }
 0x25c   : > { %11804 = vst [vmem:[#allocation302_spill] sm:$0xff] %v6621_v44  ;;  %v11813_v44 = vld [vmem:[#allocation161_spill] sm:$0xff] }
 0x25f   : > { %1343 = vrot.lane.b32.xlu0 %v11805_v41, %s5183_s11  ;;  %1341 = vrot.lane.b32.xlu2 %v11806_v3, %s5183_s11 }
 0x260   : > { %1339 = vrot.lane.b32.xlu1 %v11807_v16, %s5183_s11 }
 0x261   : > { %v6629_v29 = vpop.permute.xlu0 %1206  ;;  %v6631_v13 = vpop.permute.xlu2 %1222 }
 0x262   : > { %11808 = vst [vmem:[#allocation303_spill] sm:$0xff] %v6629_v29  ;;  %v6633_v42 = vpop.permute.xlu1 %1202  ;;  %v11817_v29 = vld [vmem:[#allocation165_spill] sm:$0xff] }
 0x263   : > { %11809 = vst [vmem:[#allocation304_spill] sm:$0xff] %v6631_v13  ;;  %v11818_v13 = vld [vmem:[#allocation166_spill] sm:$0xff] }
 0x264   : > { %11810 = vst [vmem:[#allocation305_spill] sm:$0xff] %v6633_v42  ;;  %v11819_v42 = vld [vmem:[#allocation167_spill] sm:$0xff] }
 0x267   : > { %1349 = vrot.lane.b32.xlu0 %v11811_v22, %s5183_s11  ;;  %1347 = vrot.lane.b32.xlu2 %v11812_v31, %s5183_s11 }
 0x268   : > { %1345 = vrot.lane.b32.xlu1 %v11813_v44, %s5183_s11 }
 0x269   : > { %v6641_v41 = vpop.permute.xlu0 %1212  ;;  %v6643_v3 = vpop.permute.xlu2 %1281 }
 0x26a   : > { %11814 = vst [vmem:[#allocation306_spill] sm:$0xff] %v6641_v41  ;;  %v6645_v16 = vpop.permute.xlu1 %1208  ;;  %v11823_v41 = vld [vmem:[#allocation172_spill] sm:$0xff] }
 0x26b   : > { %11815 = vst [vmem:[#allocation307_spill] sm:$0xff] %v6643_v3 }
 0x26c   : > { %11816 = vst [vmem:[#allocation308_spill] sm:$0xff] %v6645_v16  ;;  %v11824_v16 = vld [vmem:[#allocation173_spill] sm:$0xff] }
 0x26f   : > { %1355 = vrot.lane.b32.xlu0 %v11817_v29, %s5183_s11  ;;  %1353 = vrot.lane.b32.xlu2 %v11818_v13, %s5183_s11 }
 0x270   : > { %1351 = vrot.lane.b32.xlu1 %v11819_v42, %s5183_s11 }
 0x271   : > { %v6653_v22 = vpop.permute.xlu0 %1218  ;;  %v6655_v31 = vpop.permute.xlu2 %1287 }
 0x272   : > { %11820 = vst [vmem:[#allocation167_spill] sm:$0xff] %v6653_v22  ;;  %v6657_v44 = vpop.permute.xlu1 %1214  ;;  %v1276_v22 = vrot.slane %v6278_v11, 2 }
 0x273   : > { %11821 = vst [vmem:[#allocation309_spill] sm:$0xff] %v6655_v31 }
 0x274   : > { %11822 = vst [vmem:[#allocation310_spill] sm:$0xff] %v6657_v44  ;;  %v1274_v44 = vrot.slane %v6283_v12, 2 }
 0x277   : > { %1361 = vrot.lane.b32.xlu0 %v6050_v50, %s5183_s11  ;;  %1359 = vrot.lane.b32.xlu2 %v11823_v41, %s5183_s11 }
 0x278   : > { %1357 = vrot.lane.b32.xlu1 %v11824_v16, %s5183_s11 }
 0x279   : > { %v6665_v3 = vpop.permute.xlu0 %1224  ;;  %v6667_v13 = vpop.permute.xlu2 %1293 }
 0x27a   : > { %11825 = vst [vmem:[#allocation173_spill] sm:$0xff] %v6665_v3  ;;  %v6669_v29 = vpop.permute.xlu1 %1220 }
 0x27b   : > { %11826 = vst [vmem:[#allocation311_spill] sm:$0xff] %v6667_v13 }
 0x27c   : > { %11827 = vst [vmem:[#allocation312_spill] sm:$0xff] %v6669_v29  ;;  %v11830_v29 = vld [vmem:[#allocation85_spill] sm:$0xff] }
 0x27d   : > { %v6687_v41 = vsel %vm744_vm2, %v1276_v22, %v11830_v29 }
 0x27f   : > { %1367 = vrot.lane.b32.xlu0 %v6076_v54, %s5183_s11  ;;  %1365 = vrot.lane.b32.xlu2 %v6079_v35, %s5183_s11  ;;  %v6690_v54 = vsel %vm744_vm2, %v1274_v44, %v1276_v22  ;;  %v11832_v35 = vrot.slane %v5696_v55, 2 }
 0x280   : > { %1363 = vrot.lane.b32.xlu1 %v6082_v49, %s5183_s11  ;;  %11831 = vst [vmem:[#allocation315_spill] sm:$0xff] %v6690_v54 }
 0x281   : > { %v6679_v31 = vpop.permute.xlu0 %1283  ;;  %v6681_v3 = vpop.permute.xlu2 %1299  ;;  %v6695_v50 = vsel %vm744_vm2, %v11832_v35, %v1274_v44 }
 0x282   : > { %11828 = vst [vmem:[#allocation313_spill] sm:$0xff] %v6679_v31  ;;  %v6683_v13 = vpop.permute.xlu1 %1279 }
 0x283   : > { %11829 = vst [vmem:[#allocation314_spill] sm:$0xff] %v6681_v3 }
 0x287   : > { %1373 = vrot.lane.b32.xlu0 %v6687_v41, %s5183_s11  ;;  %1371 = vrot.lane.b32.xlu2 %v6690_v54, %s5183_s11 }
 0x288   : > { %1369 = vrot.lane.b32.xlu1 %v6695_v50, %s5183_s11 }
 0x289   : > { %v6703_v3 = vpop.permute.xlu0 %1289  ;;  %v6705_v31 = vpop.permute.xlu2 %1305 }
 0x28a   : > { %11833 = vst [vmem:[#allocation316_spill] sm:$0xff] %v6705_v31  ;;  %v6707_v22 = vpop.permute.xlu1 %1285 }
 0x28f   : > { %1427 = vrot.lane.b32.xlu0 %v5278_v19, %s5184_s12  ;;  %1425 = vrot.lane.b32.xlu2 %v5275_v18, %s5184_s12 }
 0x290   : > { %1423 = vrot.lane.b32.xlu1 %v5259_v10, %s5184_s12 }
 0x291   : > { %v6715_v44 = vpop.permute.xlu0 %1295  ;;  %v6717_v35 = vpop.permute.xlu2 %1311 }
 0x292   : > { %11834 = vst [vmem:[#allocation317_spill] sm:$0xff] %v6717_v35  ;;  %v6719_v54 = vpop.permute.xlu1 %1291 }
 0x297   : > { %1433 = vrot.lane.b32.xlu0 %v5313_v34, %s5184_s12  ;;  %1431 = vrot.lane.b32.xlu2 %v5307_v32, %s5184_s12 }
 0x298   : > { %1429 = vrot.lane.b32.xlu1 %v5310_v33, %s5184_s12 }
 0x299   : > { %v6727_v31 = vpop.permute.xlu0 %1301  ;;  %v6729_v19 = vpop.permute.xlu2 %1317 }
 0x29a   : > { %11835 = vst [vmem:[#allocation318_spill] sm:$0xff] %v6729_v19  ;;  %v6731_v18 = vpop.permute.xlu1 %1297 }
 0x29f   : > { %1439 = vrot.lane.b32.xlu0 %v5342_v47, %s5184_s12  ;;  %1437 = vrot.lane.b32.xlu2 %v5336_v45, %s5184_s12 }
 0x2a0   : > { %1435 = vrot.lane.b32.xlu1 %v5339_v46, %s5184_s12 }
 0x2a1   : > { %v6739_v35 = vpop.permute.xlu0 %1307  ;;  %v6741_v34 = vpop.permute.xlu2 %1323 }
 0x2a2   : > { %11836 = vst [vmem:[#allocation319_spill] sm:$0xff] %v6739_v35  ;;  %v6743_v32 = vpop.permute.xlu1 %1303 }
 0x2a3   : > { %11837 = vst [vmem:[#allocation320_spill] sm:$0xff] %v6741_v34 }
 0x2a7   : > { %1445 = vrot.lane.b32.xlu0 %v5371_v60, %s5184_s12  ;;  %1443 = vrot.lane.b32.xlu2 %v5365_v58, %s5184_s12 }
 0x2a8   : > { %1441 = vrot.lane.b32.xlu1 %v5368_v59, %s5184_s12  ;;  %v11937_v59 = vld [vmem:[#allocation107_spill] sm:$0xff] }
 0x2a9   : > { %v6751_v19 = vpop.permute.xlu0 %1313  ;;  %v6753_v47 = vpop.permute.xlu2 %1329 }
 0x2aa   : > { %11838 = vst [vmem:[#allocation321_spill] sm:$0xff] %v6751_v19  ;;  %v6755_v45 = vpop.permute.xlu1 %1309 }
 0x2ab   : > { %11839 = vst [vmem:[#allocation322_spill] sm:$0xff] %v6755_v45 }
 0x2af   : > { %1451 = vrot.lane.b32.xlu0 %v5400_v15, %s5184_s12  ;;  %1449 = vrot.lane.b32.xlu2 %v5394_v9, %s5184_s12 }
 0x2b0   : > { %1447 = vrot.lane.b32.xlu1 %v5397_v14, %s5184_s12 }
 0x2b1   : > { %v6763_v34 = vpop.permute.xlu0 %1319  ;;  %v6765_v60 = vpop.permute.xlu2 %1335 }
 0x2b2   : > { %11840 = vst [vmem:[#allocation323_spill] sm:$0xff] %v6763_v34  ;;  %v6767_v58 = vpop.permute.xlu1 %1315 }
 0x2b3   : > { %11841 = vst [vmem:[#allocation324_spill] sm:$0xff] %v6767_v58 }
 0x2b7   : > { %1457 = vrot.lane.b32.xlu0 %v5429_v38, %s5184_s12  ;;  %1455 = vrot.lane.b32.xlu2 %v5423_v36, %s5184_s12 }
 0x2b8   : > { %1453 = vrot.lane.b32.xlu1 %v5426_v37, %s5184_s12 }
 0x2b9   : > { %v6775_v15 = vpop.permute.xlu0 %1325  ;;  %v6777_v9 = vpop.permute.xlu2 %1341 }
 0x2ba   : > { %11842 = vst [vmem:[#allocation325_spill] sm:$0xff] %v6775_v15  ;;  %v6779_v14 = vpop.permute.xlu1 %1321 }
 0x2bb   : > { %11843 = vst [vmem:[#allocation326_spill] sm:$0xff] %v6777_v9 }
 0x2bc   : > { %11844 = vst [vmem:[#allocation327_spill] sm:$0xff] %v6779_v14 }
 0x2bf   : > { %1463 = vrot.lane.b32.xlu0 %v5458_v63, %s5184_s12  ;;  %1461 = vrot.lane.b32.xlu2 %v5452_v61, %s5184_s12 }
 0x2c0   : > { %1459 = vrot.lane.b32.xlu1 %v5455_v62, %s5184_s12 }
 0x2c1   : > { %v6787_v38 = vpop.permute.xlu0 %1331  ;;  %v6789_v36 = vpop.permute.xlu2 %1347 }
 0x2c2   : > { %11845 = vst [vmem:[#allocation328_spill] sm:$0xff] %v6789_v36  ;;  %v6791_v37 = vpop.permute.xlu1 %1327 }
 0x2c3   : > { %11846 = vst [vmem:[#allocation329_spill] sm:$0xff] %v6791_v37 }
 0x2c7   : > { %1469 = vrot.lane.b32.xlu0 %v5487_v40, %s5184_s12  ;;  %1467 = vrot.lane.b32.xlu2 %v5481_v26, %s5184_s12 }
 0x2c8   : > { %1465 = vrot.lane.b32.xlu1 %v5484_v39, %s5184_s12 }
 0x2c9   : > { %v6799_v15 = vpop.permute.xlu0 %1337  ;;  %v6801_v14 = vpop.permute.xlu2 %1353 }
 0x2ca   : > { %11847 = vst [vmem:[#allocation330_spill] sm:$0xff] %v6799_v15  ;;  %v6803_v62 = vpop.permute.xlu1 %1333 }
 0x2cb   : > { %11848 = vst [vmem:[#allocation331_spill] sm:$0xff] %v6801_v14 }
 0x2cf   : > { %1475 = vrot.lane.b32.xlu0 %v5516_v23, %s5184_s12  ;;  %1473 = vrot.lane.b32.xlu2 %v5510_v21, %s5184_s12 }
 0x2d0   : > { %1471 = vrot.lane.b32.xlu1 %v5513_v0, %s5184_s12  ;;  %v11945_v0 = vld [vmem:[#allocation119_spill] sm:$0xff] }
 0x2d1   : > { %v6811_v37 = vpop.permute.xlu0 %1343  ;;  %v6813_v34 = vpop.permute.xlu2 %1359 }
 0x2d2   : > { %11849 = vst [vmem:[#allocation332_spill] sm:$0xff] %v6811_v37  ;;  %v6815_v36 = vpop.permute.xlu1 %1339 }
 0x2d3   : > { %11850 = vst [vmem:[#allocation333_spill] sm:$0xff] %v6813_v34 }
 0x2d4   : > { %11851 = vst [vmem:[#allocation334_spill] sm:$0xff] %v6815_v36  ;;  %v11942_v36 = vld [vmem:[#allocation105_spill] sm:$0xff] }
 0x2d7   : > { %1481 = vrot.lane.b32.xlu0 %v5545_v53, %s5184_s12  ;;  %1479 = vrot.lane.b32.xlu2 %v5539_v5, %s5184_s12 }
 0x2d8   : > { %1477 = vrot.lane.b32.xlu1 %v5542_v17, %s5184_s12  ;;  %v11889_v17 = vld [vmem:[#allocation38_spill] sm:$0xff] }
 0x2d9   : > { %v6823_v14 = vpop.permute.xlu0 %1349  ;;  %v6825_v58 = vpop.permute.xlu2 %1365 }
 0x2da   : > { %11852 = vst [vmem:[#allocation335_spill] sm:$0xff] %v6823_v14  ;;  %v6827_v19 = vpop.permute.xlu1 %1345  ;;  %v11882_v14 = vld [vmem:[#allocation35_spill] sm:$0xff] }
 0x2db   : > { %11853 = vst [vmem:[#allocation336_spill] sm:$0xff] %v6825_v58 }
 0x2dc   : > { %11854 = vst [vmem:[#allocation337_spill] sm:$0xff] %v6827_v19 }
 0x2df   : > { %1487 = vrot.lane.b32.xlu0 %v5574_v28, %s5184_s12  ;;  %1485 = vrot.lane.b32.xlu2 %v5568_v52, %s5184_s12 }
 0x2e0   : > { %1483 = vrot.lane.b32.xlu1 %v5571_v4, %s5184_s12  ;;  %v11878_v4 = vld [vmem:[#allocation28_spill] sm:$0xff] }
 0x2e1   : > { %v6835_v34 = vpop.permute.xlu0 %1355  ;;  %v6837_v53 = vpop.permute.xlu2 %1371 }
 0x2e2   : > { %11855 = vst [vmem:[#allocation338_spill] sm:$0xff] %v6835_v34  ;;  %v6839_v5 = vpop.permute.xlu1 %1351 }
 0x2e3   : > { %11856 = vst [vmem:[#allocation339_spill] sm:$0xff] %v6837_v53 }
 0x2e4   : > { %11857 = vst [vmem:[#allocation340_spill] sm:$0xff] %v6839_v5  ;;  %v11877_v5 = vld [vmem:[#allocation29_spill] sm:$0xff] }
 0x2e7   : > { %1493 = vrot.lane.b32.xlu0 %v5603_v7, %s5184_s12  ;;  %1491 = vrot.lane.b32.xlu2 %v5597_v27, %s5184_s12 }
 0x2e8   : > { %1489 = vrot.lane.b32.xlu1 %v5600_v24, %s5184_s12  ;;  %v11873_v24 = vld [vmem:[#allocation22_spill] sm:$0xff] }
 0x2e9   : > { %v6847_v58 = vpop.permute.xlu0 %1361  ;;  %v6849_v28 = vpop.permute.xlu2 %1425 }
 0x2ea   : > { %11858 = vst [vmem:[#allocation341_spill] sm:$0xff] %v6847_v58  ;;  %v6851_v52 = vpop.permute.xlu1 %1357 }
 0x2eb   : > { %11859 = vst [vmem:[#allocation342_spill] sm:$0xff] %v6851_v52  ;;  %v11872_v52 = vld [vmem:[#allocation23_spill] sm:$0xff] }
 0x2ef   : > { %1499 = vrot.lane.b32.xlu0 %v5634_v8, %s5184_s12  ;;  %1497 = vrot.lane.b32.xlu2 %v5628_v25, %s5184_s12 }
 0x2f0   : > { %1495 = vrot.lane.b32.xlu1 %v5631_v56, %s5184_s12 }
 0x2f1   : > { %v6859_v53 = vpop.permute.xlu0 %1367  ;;  %v6861_v7 = vpop.permute.xlu2 %1431 }
 0x2f2   : > { %11860 = vst [vmem:[#allocation343_spill] sm:$0xff] %v6859_v53  ;;  %v6863_v27 = vpop.permute.xlu1 %1363  ;;  %v11868_v53 = vld [vmem:[#allocation17_spill] sm:$0xff] }
 0x2f3   : > { %11861 = vst [vmem:[#allocation344_spill] sm:$0xff] %v6863_v27  ;;  %v11869_v27 = vld [vmem:[#allocation16_spill] sm:$0xff] }
 0x2f7   : > { %1505 = vrot.lane.b32.xlu0 %v5665_v57, %s5184_s12  ;;  %1503 = vrot.lane.b32.xlu2 %v5659_v6, %s5184_s12 }
 0x2f8   : > { %1501 = vrot.lane.b32.xlu1 %v5662_v43, %s5184_s12 }
 0x2f9   : > { %v6871_v8 = vpop.permute.xlu0 %1373  ;;  %v6873_v25 = vpop.permute.xlu2 %1437 }
 0x2fa   : > { %11862 = vst [vmem:[#allocation345_spill] sm:$0xff] %v6871_v8  ;;  %v6875_v56 = vpop.permute.xlu1 %1369 }
 0x2fb   : > { %11863 = vst [vmem:[#allocation346_spill] sm:$0xff] %v6875_v56 }
 0x2ff   : > { %1511 = vrot.lane.b32.xlu0 %v6278_v11, %s5184_s12  ;;  %1509 = vrot.lane.b32.xlu2 %v6283_v12, %s5184_s12  ;;  %v11864_v11 = vmov 0.0  }
 0x300   : > { %1507 = vrot.lane.b32.xlu1 %v5696_v55, %s5184_s12 }
 0x301   : > { %v6883_v57 = vpop.permute.xlu0 %1427  ;;  %v6885_v6 = vpop.permute.xlu2 %1443 }
 0x302   : > { %v6887_v43 = vpop.permute.xlu1 %1423 }
 0x307   : > { %1563 = vrot.lane.b32.xlu0 %v5301_v30, %s5185_s13  ;;  %1561 = vrot.lane.b32.xlu2 %v11657_v20, %s5185_s13  ;;  %v11866_v30 = vld [vmem:[#allocation13_spill] sm:$0xff] }
 0x308   : > { %1513 = vrot.lane.b32.xlu1 %v11864_v11, %s5184_s12 }
 0x309   : > { %v6895_v12 = vpop.permute.xlu0 %1433  ;;  %v6897_v8 = vpop.permute.xlu2 %1449 }
 0x30a   : > { %11865 = vst [vmem:[#allocation347_spill] sm:$0xff] %v6897_v8  ;;  %v6899_v55 = vpop.permute.xlu1 %1429  ;;  %v11950_v8 = vld [vmem:[#allocation125_spill] sm:$0xff] }
 0x30f   : > { %1569 = vrot.lane.b32.xlu0 %v11662_v48, %s5185_s13  ;;  %1567 = vrot.lane.b32.xlu2 %v11663_v2, %s5185_s13  ;;  %v11870_v48 = vld [vmem:[#allocation18_spill] sm:$0xff] }
 0x310   : > { %1565 = vrot.lane.b32.xlu1 %v11866_v30, %s5185_s13 }
 0x311   : > { %v6907_v56 = vpop.permute.xlu0 %1439  ;;  %v6909_v20 = vpop.permute.xlu2 %1455 }
 0x312   : > { %11867 = vst [vmem:[#allocation13_spill] sm:$0xff] %v6909_v20  ;;  %v6911_v11 = vpop.permute.xlu1 %1435 }
 0x317   : > { %1575 = vrot.lane.b32.xlu0 %v11868_v53, %s5185_s13  ;;  %1573 = vrot.lane.b32.xlu2 %v11869_v27, %s5185_s13  ;;  %v11874_v53 = vld [vmem:[#allocation24_spill] sm:$0xff] }
 0x318   : > { %1571 = vrot.lane.b32.xlu1 %v11870_v48, %s5185_s13 }
 0x319   : > { %v6919_v58 = vpop.permute.xlu0 %1445  ;;  %v6921_v2 = vpop.permute.xlu2 %1461 }
 0x31a   : > { %11871 = vst [vmem:[#allocation17_spill] sm:$0xff] %v6921_v2  ;;  %v6923_v30 = vpop.permute.xlu1 %1441 }
 0x31f   : > { %1581 = vrot.lane.b32.xlu0 %v11872_v52, %s5185_s13  ;;  %1579 = vrot.lane.b32.xlu2 %v11873_v24, %s5185_s13  ;;  %v11879_v52 = vld [vmem:[#allocation30_spill] sm:$0xff] }
 0x320   : > { %1577 = vrot.lane.b32.xlu1 %v11874_v53, %s5185_s13 }
 0x321   : > { %v6931_v34 = vpop.permute.xlu0 %1451  ;;  %v6933_v27 = vpop.permute.xlu2 %1467 }
 0x322   : > { %11875 = vst [vmem:[#allocation16_spill] sm:$0xff] %v6931_v34  ;;  %v6935_v48 = vpop.permute.xlu1 %1447  ;;  %v11941_v34 = vld [vmem:[#allocation113_spill] sm:$0xff] }
 0x323   : > { %11876 = vst [vmem:[#allocation18_spill] sm:$0xff] %v6933_v27  ;;  %v11883_v27 = vld [vmem:[#allocation34_spill] sm:$0xff] }
 0x327   : > { %1587 = vrot.lane.b32.xlu0 %v11877_v5, %s5185_s13  ;;  %1585 = vrot.lane.b32.xlu2 %v11878_v4, %s5185_s13  ;;  %v11884_v5 = vld [vmem:[#allocation36_spill] sm:$0xff] }
 0x328   : > { %1583 = vrot.lane.b32.xlu1 %v11879_v52, %s5185_s13 }
 0x329   : > { %v6943_v2 = vpop.permute.xlu0 %1457  ;;  %v6945_v24 = vpop.permute.xlu2 %1473 }
 0x32a   : > { %11880 = vst [vmem:[#allocation23_spill] sm:$0xff] %v6943_v2  ;;  %v6947_v53 = vpop.permute.xlu1 %1453  ;;  %v11888_v2 = vld [vmem:[#allocation39_spill] sm:$0xff] }
 0x32b   : > { %11881 = vst [vmem:[#allocation22_spill] sm:$0xff] %v6947_v53  ;;  %v11910_v53 = vld [vmem:[#allocation61_spill] sm:$0xff] }
 0x32f   : > { %1593 = vrot.lane.b32.xlu0 %v11882_v14, %s5185_s13  ;;  %1591 = vrot.lane.b32.xlu2 %v11883_v27, %s5185_s13  ;;  %v11890_v14 = vld [vmem:[#allocation40_spill] sm:$0xff] }
 0x330   : > { %1589 = vrot.lane.b32.xlu1 %v11884_v5, %s5185_s13 }
 0x331   : > { %v6955_v19 = vpop.permute.xlu0 %1463  ;;  %v6957_v4 = vpop.permute.xlu2 %1479 }
 0x332   : > { %11885 = vst [vmem:[#allocation24_spill] sm:$0xff] %v6955_v19  ;;  %v6959_v52 = vpop.permute.xlu1 %1459  ;;  %v11894_v19 = vld [vmem:[#allocation43_spill] sm:$0xff] }
 0x333   : > { %11886 = vst [vmem:[#allocation29_spill] sm:$0xff] %v6957_v4 }
 0x334   : > { %11887 = vst [vmem:[#allocation28_spill] sm:$0xff] %v6959_v52  ;;  %v11895_v52 = vld [vmem:[#allocation42_spill] sm:$0xff] }
 0x337   : > { %1599 = vrot.lane.b32.xlu0 %v11888_v2, %s5185_s13  ;;  %1597 = vrot.lane.b32.xlu2 %v11889_v17, %s5185_s13  ;;  %v11896_v2 = vld [vmem:[#allocation44_spill] sm:$0xff] }
 0x338   : > { %1595 = vrot.lane.b32.xlu1 %v11890_v14, %s5185_s13 }
 0x339   : > { %v6967_v20 = vpop.permute.xlu0 %1469  ;;  %v6969_v27 = vpop.permute.xlu2 %1485 }
 0x33a   : > { %11891 = vst [vmem:[#allocation30_spill] sm:$0xff] %v6967_v20  ;;  %v6971_v5 = vpop.permute.xlu1 %1465  ;;  %v11899_v20 = vld [vmem:[#allocation49_spill] sm:$0xff] }
 0x33b   : > { %11892 = vst [vmem:[#allocation35_spill] sm:$0xff] %v6969_v27  ;;  %v11904_v27 = vld [vmem:[#allocation55_spill] sm:$0xff] }
 0x33c   : > { %11893 = vst [vmem:[#allocation34_spill] sm:$0xff] %v6971_v5  ;;  %v11900_v5 = vld [vmem:[#allocation48_spill] sm:$0xff] }
 0x33f   : > { %1605 = vrot.lane.b32.xlu0 %v11894_v19, %s5185_s13  ;;  %1603 = vrot.lane.b32.xlu2 %v11895_v52, %s5185_s13  ;;  %v11901_v19 = vld [vmem:[#allocation50_spill] sm:$0xff] }
 0x340   : > { %1601 = vrot.lane.b32.xlu1 %v11896_v2, %s5185_s13 }
 0x341   : > { %v6979_v37 = vpop.permute.xlu0 %1475  ;;  %v6981_v17 = vpop.permute.xlu2 %1491 }
 0x342   : > { %11897 = vst [vmem:[#allocation36_spill] sm:$0xff] %v6981_v17  ;;  %v6983_v14 = vpop.permute.xlu1 %1471 }
 0x343   : > { %11898 = vst [vmem:[#allocation39_spill] sm:$0xff] %v6983_v14  ;;  %v11905_v14 = vld [vmem:[#allocation54_spill] sm:$0xff] }
 0x347   : > { %1611 = vrot.lane.b32.xlu0 %v11899_v20, %s5185_s13  ;;  %1609 = vrot.lane.b32.xlu2 %v11900_v5, %s5185_s13  ;;  %v11906_v20 = vld [vmem:[#allocation56_spill] sm:$0xff] }
 0x348   : > { %1607 = vrot.lane.b32.xlu1 %v11901_v19, %s5185_s13 }
 0x349   : > { %v6991_v23 = vpop.permute.xlu0 %1481  ;;  %v6993_v52 = vpop.permute.xlu2 %1497 }
 0x34a   : > { %11902 = vst [vmem:[#allocation38_spill] sm:$0xff] %v6991_v23  ;;  %v6995_v2 = vpop.permute.xlu1 %1477 }
 0x34b   : > { %11903 = vst [vmem:[#allocation40_spill] sm:$0xff] %v6993_v52  ;;  %v11911_v52 = vld [vmem:[#allocation60_spill] sm:$0xff] }
 0x34f   : > { %1617 = vrot.lane.b32.xlu0 %v11904_v27, %s5185_s13  ;;  %1615 = vrot.lane.b32.xlu2 %v11905_v14, %s5185_s13  ;;  %v11912_v27 = vld [vmem:[#allocation62_spill] sm:$0xff] }
 0x350   : > { %1613 = vrot.lane.b32.xlu1 %v11906_v20, %s5185_s13 }
 0x351   : > { %v7003_v17 = vpop.permute.xlu0 %1487  ;;  %v7005_v5 = vpop.permute.xlu2 %1503 }
 0x352   : > { %11907 = vst [vmem:[#allocation43_spill] sm:$0xff] %v7003_v17  ;;  %v7007_v19 = vpop.permute.xlu1 %1483  ;;  %v11916_v17 = vld [vmem:[#allocation68_spill] sm:$0xff] }
 0x353   : > { %11908 = vst [vmem:[#allocation42_spill] sm:$0xff] %v7005_v5  ;;  %v11917_v5 = vld [vmem:[#allocation67_spill] sm:$0xff] }
 0x354   : > { %11909 = vst [vmem:[#allocation44_spill] sm:$0xff] %v7007_v19 }
 0x357   : > { %1623 = vrot.lane.b32.xlu0 %v11910_v53, %s5185_s13  ;;  %1621 = vrot.lane.b32.xlu2 %v11911_v52, %s5185_s13  ;;  %v11918_v53 = vld [vmem:[#allocation69_spill] sm:$0xff] }
 0x358   : > { %1619 = vrot.lane.b32.xlu1 %v11912_v27, %s5185_s13 }
 0x359   : > { %v7015_v9 = vpop.permute.xlu0 %1493  ;;  %v7017_v14 = vpop.permute.xlu2 %1509 }
 0x35a   : > { %11913 = vst [vmem:[#allocation49_spill] sm:$0xff] %v7015_v9  ;;  %v7019_v20 = vpop.permute.xlu1 %1489  ;;  %v11921_v9 = vld [vmem:[#allocation75_spill] sm:$0xff] }
 0x35b   : > { %11914 = vst [vmem:[#allocation48_spill] sm:$0xff] %v7017_v14  ;;  %v11922_v14 = vld [vmem:[#allocation74_spill] sm:$0xff] }
 0x35c   : > { %11915 = vst [vmem:[#allocation50_spill] sm:$0xff] %v7019_v20 }
 0x35f   : > { %1629 = vrot.lane.b32.xlu0 %v11916_v17, %s5185_s13  ;;  %1627 = vrot.lane.b32.xlu2 %v11917_v5, %s5185_s13  ;;  %v11923_v17 = vld [vmem:[#allocation76_spill] sm:$0xff] }
 0x360   : > { %1625 = vrot.lane.b32.xlu1 %v11918_v53, %s5185_s13 }
 0x361   : > { %v7027_v45 = vpop.permute.xlu0 %1499  ;;  %v7029_v52 = vpop.permute.xlu2 %1561 }
 0x362   : > { %11919 = vst [vmem:[#allocation55_spill] sm:$0xff] %v7027_v45  ;;  %v7031_v27 = vpop.permute.xlu1 %1495  ;;  %v11926_v45 = vld [vmem:[#allocation83_spill] sm:$0xff] }
 0x363   : > { %11920 = vst [vmem:[#allocation54_spill] sm:$0xff] %v7031_v27 }
 0x367   : > { %1635 = vrot.lane.b32.xlu0 %v11921_v9, %s5185_s13  ;;  %1633 = vrot.lane.b32.xlu2 %v11922_v14, %s5185_s13  ;;  %v11927_v9 = vld [vmem:[#allocation84_spill] sm:$0xff] }
 0x368   : > { %1631 = vrot.lane.b32.xlu1 %v11923_v17, %s5185_s13 }
 0x369   : > { %v7039_v20 = vpop.permute.xlu0 %1505  ;;  %v7041_v5 = vpop.permute.xlu2 %1567 }
 0x36a   : > { %11924 = vst [vmem:[#allocation56_spill] sm:$0xff] %v7039_v20  ;;  %v7043_v53 = vpop.permute.xlu1 %1501  ;;  %v11930_v20 = vld [vmem:[#allocation272_spill] sm:$0xff] }
 0x36b   : > { %11925 = vst [vmem:[#allocation61_spill] sm:$0xff] %v7043_v53 }
 0x36f   : > { %1641 = vrot.lane.b32.xlu0 %v11926_v45, %s5185_s13  ;;  %1639 = vrot.lane.b32.xlu2 %v11734_v51, %s5185_s13  ;;  %v11931_v45 = vld [vmem:[#allocation89_spill] sm:$0xff] }
 0x370   : > { %1637 = vrot.lane.b32.xlu1 %v11927_v9, %s5185_s13 }
 0x371   : > { %v7051_v27 = vpop.permute.xlu0 %1511  ;;  %v7053_v14 = vpop.permute.xlu2 %1573 }
 0x372   : > { %11928 = vst [vmem:[#allocation60_spill] sm:$0xff] %v7051_v27  ;;  %v7055_v17 = vpop.permute.xlu1 %1507  ;;  %v11933_v27 = vld [vmem:[#allocation101_spill] sm:$0xff] }
 0x373   : > { %11929 = vst [vmem:[#allocation62_spill] sm:$0xff] %v7055_v17  ;;  %v11934_v17 = vld [vmem:[#allocation2_spill] sm:$0xff] }
 0x377   : > { %1647 = vrot.lane.b32.xlu0 %v6484_v1, %s5185_s13  ;;  %1645 = vrot.lane.b32.xlu2 %v11930_v20, %s5185_s13  ;;  %v11935_v1 = vld [vmem:[#allocation271_spill] sm:$0xff] }
 0x378   : > { %1643 = vrot.lane.b32.xlu1 %v11931_v45, %s5185_s13 }
 0x379   : > { %v7063_v53 = vpop.permute.xlu0 %1563  ;;  %v7065_v51 = vpop.permute.xlu2 %1579 }
 0x37a   : > { %v7067_v9 = vpop.permute.xlu1 %1513 }
 0x37b   : > { %11932 = vst [vmem:[#allocation68_spill] sm:$0xff] %v7067_v9  ;;  %v11938_v9 = vld [vmem:[#allocation99_spill] sm:$0xff] }
 0x37f   : > { %1699 = vrot.lane.b32.xlu0 %v11933_v27, %s5186_s14  ;;  %1651 = vrot.lane.b32.xlu2 %v11934_v17, %s5185_s13  ;;  %v11939_v27 = vld [vmem:[#allocation100_spill] sm:$0xff] }
 0x380   : > { %1649 = vrot.lane.b32.xlu1 %v11935_v1, %s5185_s13 }
 0x381   : > { %v7075_v20 = vpop.permute.xlu0 %1569  ;;  %v7077_v21 = vpop.permute.xlu2 %1585 }
 0x382   : > { %11936 = vst [vmem:[#allocation67_spill] sm:$0xff] %v7077_v21  ;;  %v7079_v45 = vpop.permute.xlu1 %1565 }
 0x387   : > { %1705 = vrot.lane.b32.xlu0 %v11937_v59, %s5186_s14  ;;  %1703 = vrot.lane.b32.xlu2 %v11938_v9, %s5186_s14  ;;  %v11943_v59 = vld [vmem:[#allocation106_spill] sm:$0xff] }
 0x388   : > { %1701 = vrot.lane.b32.xlu1 %v11939_v27, %s5186_s14 }
 0x389   : > { %v7087_v19 = vpop.permute.xlu0 %1575  ;;  %v7089_v17 = vpop.permute.xlu2 %1591 }
 0x38a   : > { %11940 = vst [vmem:[#allocation69_spill] sm:$0xff] %v7089_v17  ;;  %v7091_v1 = vpop.permute.xlu1 %1571  ;;  %v11946_v17 = vld [vmem:[#allocation111_spill] sm:$0xff] }
 0x38f   : > { %1711 = vrot.lane.b32.xlu0 %v11941_v34, %s5186_s14  ;;  %1709 = vrot.lane.b32.xlu2 %v11942_v36, %s5186_s14  ;;  %v11947_v34 = vld [vmem:[#allocation112_spill] sm:$0xff] }
 0x390   : > { %1707 = vrot.lane.b32.xlu1 %v11943_v59, %s5186_s14 }
 0x391   : > { %v7099_v35 = vpop.permute.xlu0 %1581  ;;  %v7101_v9 = vpop.permute.xlu2 %1597 }
 0x392   : > { %11944 = vst [vmem:[#allocation75_spill] sm:$0xff] %v7101_v9  ;;  %v7103_v27 = vpop.permute.xlu1 %1577  ;;  %v11951_v9 = vld [vmem:[#allocation117_spill] sm:$0xff] }
 0x397   : > { %1717 = vrot.lane.b32.xlu0 %v11945_v0, %s5186_s14  ;;  %1715 = vrot.lane.b32.xlu2 %v11946_v17, %s5186_s14  ;;  %v11952_v0 = vld [vmem:[#allocation118_spill] sm:$0xff] }
 0x398   : > { %1713 = vrot.lane.b32.xlu1 %v11947_v34, %s5186_s14 }
 0x399   : > { %v7111_v23 = vpop.permute.xlu0 %1587  ;;  %v7113_v36 = vpop.permute.xlu2 %1603 }
 0x39a   : > { %11948 = vst [vmem:[#allocation74_spill] sm:$0xff] %v7111_v23  ;;  %v7115_v59 = vpop.permute.xlu1 %1583  ;;  %v11956_v23 = vld [vmem:[#allocation131_spill] sm:$0xff] }
 0x39b   : > { %11949 = vst [vmem:[#allocation76_spill] sm:$0xff] %v7113_v36  ;;  %v11957_v36 = vld [vmem:[#allocation123_spill] sm:$0xff] }
 0x39f   : > { %1723 = vrot.lane.b32.xlu0 %v11950_v8, %s5186_s14  ;;  %1721 = vrot.lane.b32.xlu2 %v11951_v9, %s5186_s14  ;;  %v11958_v8 = vld [vmem:[#allocation124_spill] sm:$0xff] }
 0x3a0   : > { %1719 = vrot.lane.b32.xlu1 %v11952_v0, %s5186_s14 }
 0x3a1   : > { %v7123_v15 = vpop.permute.xlu0 %1593  ;;  %v7125_v17 = vpop.permute.xlu2 %1609 }
 0x3a2   : > { %11953 = vst [vmem:[#allocation83_spill] sm:$0xff] %v7123_v15  ;;  %v7127_v34 = vpop.permute.xlu1 %1589  ;;  %v11961_v15 = vld [vmem:[#allocation137_spill] sm:$0xff] }
 0x3a3   : > { %11954 = vst [vmem:[#allocation84_spill] sm:$0xff] %v7125_v17  ;;  %v11962_v17 = vld [vmem:[#allocation129_spill] sm:$0xff] }
 0x3a4   : > { %11955 = vst [vmem:[#allocation272_spill] sm:$0xff] %v7127_v34 }
 0x3a7   : > { %1729 = vrot.lane.b32.xlu0 %v11956_v23, %s5186_s14  ;;  %1727 = vrot.lane.b32.xlu2 %v11957_v36, %s5186_s14  ;;  %v11963_v23 = vld [vmem:[#allocation130_spill] sm:$0xff] }
 0x3a8   : > { %1725 = vrot.lane.b32.xlu1 %v11958_v8, %s5186_s14 }
 0x3a9   : > { %v7135_v40 = vpop.permute.xlu0 %1599  ;;  %v7137_v9 = vpop.permute.xlu2 %1615 }
 0x3aa   : > { %11959 = vst [vmem:[#allocation89_spill] sm:$0xff] %v7135_v40  ;;  %v7139_v0 = vpop.permute.xlu1 %1595  ;;  %v11967_v40 = vld [vmem:[#allocation143_spill] sm:$0xff] }
 0x3ab   : > { %11960 = vst [vmem:[#allocation101_spill] sm:$0xff] %v7139_v0  ;;  %v11968_v0 = vld [vmem:[#allocation135_spill] sm:$0xff] }
 0x3af   : > { %1735 = vrot.lane.b32.xlu0 %v11961_v15, %s5186_s14  ;;  %1733 = vrot.lane.b32.xlu2 %v11962_v17, %s5186_s14  ;;  %v11969_v15 = vld [vmem:[#allocation136_spill] sm:$0xff] }
 0x3b0   : > { %1731 = vrot.lane.b32.xlu1 %v11963_v23, %s5186_s14 }
 0x3b1   : > { %v7147_v34 = vpop.permute.xlu0 %1605  ;;  %v7151_v8 = vpop.permute.xlu2 %1621 }
 0x3b2   : > { %11964 = vst [vmem:[#allocation271_spill] sm:$0xff] %v7147_v34  ;;  %v7149_v36 = vpop.permute.xlu1 %1601  ;;  %v11972_v34 = vld [vmem:[#allocation149_spill] sm:$0xff] }
 0x3b3   : > { %11965 = vst [vmem:[#allocation107_spill] sm:$0xff] %v7149_v36  ;;  %v11973_v36 = vld [vmem:[#allocation141_spill] sm:$0xff] }
 0x3b4   : > { %11966 = vst [vmem:[#allocation99_spill] sm:$0xff] %v7151_v8 }
 0x3b7   : > { %1741 = vrot.lane.b32.xlu0 %v11967_v40, %s5186_s14  ;;  %1739 = vrot.lane.b32.xlu2 %v11968_v0, %s5186_s14  ;;  %v11974_v40 = vld [vmem:[#allocation142_spill] sm:$0xff] }
 0x3b8   : > { %1737 = vrot.lane.b32.xlu1 %v11969_v15, %s5186_s14  ;;  %v11976_v15 = vld [vmem:[#allocation155_spill] sm:$0xff] }
 0x3b9   : > { %v7159_v21 = vpop.permute.xlu0 %1611  ;;  %v7163_v23 = vpop.permute.xlu2 %1627 }
 0x3ba   : > { %v7161_v17 = vpop.permute.xlu1 %1607  ;;  %11971 = vst [vmem:[#allocation113_spill] sm:$0xff] %v7163_v23 }
 0x3bb   : > { %11970 = vst [vmem:[#allocation100_spill] sm:$0xff] %v7161_v17  ;;  %v11977_v17 = vld [vmem:[#allocation147_spill] sm:$0xff] }
 0x3bf   : > { %1747 = vrot.lane.b32.xlu0 %v11972_v34, %s5186_s14  ;;  %1745 = vrot.lane.b32.xlu2 %v11973_v36, %s5186_s14  ;;  %v11979_v34 = vld [vmem:[#allocation148_spill] sm:$0xff] }
 0x3c0   : > { %1743 = vrot.lane.b32.xlu1 %v11974_v40, %s5186_s14  ;;  %v475_v40 = vld [vmem:[%s10978_s1 + $0x20] sm:$0xf] }
 0x3c1   : > { %v7171_v8 = vpop.permute.xlu0 %1617  ;;  %v7179_v23 = vpop.permute.xlu2 %1633  ;;  %5023 = vmatpush.msk.msra.mxu0 %vm2372_vm3, %v475_v40  ;;  %5124 = vmatpush.msk.msra.mxu3 %vm2372_vm3, %v475_v40  ;;  %v472_v40 = vld [vmem:[%s10978_s1 + $0x8] sm:$0xff] }
 0x3c2   : > { %11975 = vst [vmem:[#allocation105_spill] sm:$0xff] %v7171_v8  ;;  %v7173_v0 = vpop.permute.xlu1 %1613 }
 0x3c3   : > { %11978 = vst [vmem:[#allocation106_spill] sm:$0xff] %v7179_v23  ;;  %v11983_v23 = vld [vmem:[#allocation153_spill] sm:$0xff] }
 0x3c7   : > { %1753 = vrot.lane.b32.xlu0 %v11976_v15, %s5186_s14  ;;  %1751 = vrot.lane.b32.xlu2 %v11977_v17, %s5186_s14  ;;  %v474_v15 = vld [vmem:[%s10978_s1 + $0x18] sm:$0xff]  ;;  %v473_v17 = vld [vmem:[%s10978_s1 + $0x10] sm:$0xff] }
 0x3c8   : > { %1749 = vrot.lane.b32.xlu1 %v11979_v34, %s5186_s14  ;;  %2388 = vmatpush.msra.mxu0 %v474_v15  ;;  %v11982_v34 = vld [vmem:[#allocation161_spill] sm:$0xff] }
 0x3c9   : > { %v7183_v4 = vpop.permute.xlu0 %1623  ;;  %5125 = vmatpush.msra.mxu3 %v474_v15  ;;  %v7207_v8 = vpop.permute.xlu2 %1639 }
 0x3ca   : > { %11980 = vst [vmem:[#allocation119_spill] sm:$0xff] %v7183_v4  ;;  %v7185_v36 = vpop.permute.xlu1 %1619  ;;  %v11984_v4 = vld [vmem:[#allocation154_spill] sm:$0xff]  ;;  %2389 = vmatpush.msra.mxu0 %v473_v17 }
 0x3cb   : > { %11981 = vst [vmem:[#allocation111_spill] sm:$0xff] %v7185_v36  ;;  %5126 = vmatpush.msra.mxu3 %v473_v17  ;;  %v11989_v17 = vld [vmem:[#allocation160_spill] sm:$0xff] }
 0x3cc   : > { %11986 = vst [vmem:[#allocation125_spill] sm:$0xff] %v7207_v8  ;;  %2390 = vmatpush.msra.mxu0 %v472_v40 }
 0x3cd   : > { %5127 = vmatpush.msra.mxu3 %v472_v40  ;;  %v11993_v40 = vld [vmem:[#allocation165_spill] sm:$0xff] }
 0x3cf   : > { %1759 = vrot.lane.b32.xlu0 %v11982_v34, %s5186_s14  ;;  %1757 = vrot.lane.b32.xlu2 %v11983_v23, %s5186_s14  ;;  %v471_v23 = vld [vmem:[%s10978_s1] sm:$0xff] }
 0x3d0   : > { %1755 = vrot.lane.b32.xlu1 %v11984_v4, %s5186_s14  ;;  %2391 = vmatpush.msra.mxu0 %v471_v23  ;;  %v11988_v4 = vld [vmem:[#allocation159_spill] sm:$0xff] }
 0x3d1   : > { %v7205_v36 = vpop.permute.xlu0 %1629  ;;  %5128 = vmatpush.msra.mxu3 %v471_v23 }
 0x3d2   : > { %11985 = vst [vmem:[#allocation112_spill] sm:$0xff] %v7205_v36  ;;  %v7209_v15 = vpop.permute.xlu1 %1625  ;;  %v7224_v36 = vpop.permute.xlu2 %1645 }
 0x3d3   : > { %11987 = vst [vmem:[#allocation117_spill] sm:$0xff] %v7209_v15  ;;  %v12003_v15 = vld [vmem:[#allocation270_spill] sm:$0xff] }
 0x3d4   : > { %11992 = vst [vmem:[#allocation123_spill] sm:$0xff] %v7224_v36  ;;  %v11998_v36 = vld [vmem:[#allocation171_spill] sm:$0xff] }
 0x3d7   : > { %1765 = vrot.lane.b32.xlu0 %v11819_v42, %s5186_s14  ;;  %1763 = vrot.lane.b32.xlu2 %v11988_v4, %s5186_s14  ;;  %v11994_v42 = vld [vmem:[#allocation166_spill] sm:$0xff] }
 0x3d8   : > { %1761 = vrot.lane.b32.xlu1 %v11989_v17, %s5186_s14 }
 0x3d9   : > { %v7220_v34 = vpop.permute.xlu0 %1635 }
 0x3da   : > { %11990 = vst [vmem:[#allocation118_spill] sm:$0xff] %v7220_v34  ;;  %v7222_v8 = vpop.permute.xlu1 %1631  ;;  %v7236_v17 = vpop.permute.xlu2 %1651 }
 0x3db   : > { %11991 = vst [vmem:[#allocation131_spill] sm:$0xff] %v7222_v8 }
 0x3dc   : > { %11997 = vst [vmem:[#allocation129_spill] sm:$0xff] %v7236_v17 }
 0x3df   : > { %1771 = vrot.lane.b32.xlu0 %v11824_v16, %s5186_s14  ;;  %1769 = vrot.lane.b32.xlu2 %v11993_v40, %s5186_s14  ;;  %v11999_v16 = vld [vmem:[#allocation156_spill] sm:$0xff] }
 0x3e0   : > { %1767 = vrot.lane.b32.xlu1 %v11994_v42, %s5186_s14  ;;  %v5162_v34 = vunpack.i.l.bf16 %v11999_v16  ;;  %v12000_v40 = vld [vmem:[#allocation172_spill] sm:$0xff] }
 0x3e1   : > { %v7232_v23 = vpop.permute.xlu0 %1641 }
 0x3e2   : > { %11995 = vst [vmem:[#allocation124_spill] sm:$0xff] %v7232_v23  ;;  %v7234_v4 = vpop.permute.xlu1 %1637 }
 0x3e3   : > { %11996 = vst [vmem:[#allocation137_spill] sm:$0xff] %v7234_v4  ;;  %v12001_v4 = vld [vmem:[#allocation80_spill] sm:$0xff] }
 0x3e4   : > { %v1838_v17 = vsel %vm1837_vm4, 0.0, %v12001_v4  ;;  %v12004_v4 = vld [vmem:[#allocation177_spill] sm:$0xff] }
 0x3e5   : > { %v1886_v8 = vsel %vm1885_vm5, %v1838_v17, %v5162_v34  ;;  %v1704_v17 = vpop.permute.xlu2 %1703 }
 0x3e7   : > { %1777 = vrot.lane.b32.xlu0 %v6082_v49, %s5186_s14  ;;  %1775 = vrot.lane.b32.xlu2 %v11998_v36, %s5186_s14  ;;  %v12002_v49 = vld [vmem:[#allocation226_spill] sm:$0xff] }
 0x3e8   : > { %1773 = vrot.lane.b32.xlu1 %v12000_v40, %s5186_s14  ;;  %v1934_v36 = vsel %vm1933_vm6, %v1886_v8, %v12002_v49  ;;  %v12005_v49 = vld [vmem:[#allocation178_spill] sm:$0xff] }
 0x3e9   : > { %v7245_v42 = vpop.permute.xlu0 %1647  ;;  %v1983_v16 = vsel %vm1982_vm7, %v1934_v36, %v12003_v15 }
 0x3ea   : > { %v7247_v23 = vpop.permute.xlu1 %1643  ;;  %v2032_v40 = vsel %vm2031_vm8, %v1983_v16, %v6683_v13  ;;  %v12007_v16 = vld [vmem:[#allocation216_spill] sm:$0xff] }
 0x3eb   : > { %v2081_v34 = vsel %vm2080_vm10, %v2032_v40, %v6887_v43  ;;  %v12008_v43 = vld [vmem:[#allocation261_spill] sm:$0xff] }
 0x3ec   : > { %v2130_v15 = vsel %vm2129_vm9, %v2081_v34, %v7029_v52  ;;  %v12009_v52 = vld [vmem:[#allocation307_spill] sm:$0xff] }
 0x3ef   : > { %1783 = vrot.lane.b32.xlu0 %v6695_v50, %s5186_s14  ;;  %1781 = vrot.lane.b32.xlu2 %v12004_v4, %s5186_s14  ;;  %v1935_v4 = vsel %vm1933_vm6, %v1886_v8, %v12007_v16 }
 0x3f0   : > { %1779 = vrot.lane.b32.xlu1 %v12005_v49, %s5186_s14  ;;  %v1984_v40 = vsel %vm1982_vm7, %v1935_v4, %v12008_v43  ;;  %v12010_v49 = vld [vmem:[#allocation315_spill] sm:$0xff] }
 0x3f1   : > { %v1700_v36 = vpop.permute.xlu0 %1699  ;;  %v2033_v34 = vsel %vm2031_vm8, %v1984_v40, %v12009_v52  ;;  %v12011_v43 = vld [vmem:[#allocation87_spill] sm:$0xff]  ;;  %v12012_v40 = vld [vmem:[#allocation174_spill] sm:$0xff] }
 0x3f2   : > { %v7268_v13 = vpop.permute.xlu1 %1649  ;;  %v2179_v50 = vsel %vm2178_vm12, %v2130_v15, %v1700_v36  ;;  %v2082_v15 = vsel %vm2080_vm10, %v2033_v34, %v6849_v28  ;;  %v12014_v28 = vld [vmem:[#allocation82_spill] sm:$0xff] }
 0x3f3   : > { %12006 = vst [vmem:[#allocation130_spill] sm:$0xff] %v7268_v13  ;;  %5024 = vmatmul.msk.f32.vlgmr.msra.gmra.mxu0 %vm2227_vm11, %v2179_v50  ;;  %v2131_v8 = vsel %vm2129_vm9, %v2082_v15, %v7063_v53  ;;  %v1710_v50 = vpop.permute.xlu2 %1709  ;;  %v12015_v13 = vld [vmem:[#allocation313_spill] sm:$0xff] }
 0x3f7   : > { %1789 = vrot.lane.b32.xlu0 %v11830_v29, %s5186_s14  ;;  %1787 = vrot.lane.b32.xlu2 %v6687_v41, %s5186_s14  ;;  %v1839_v41 = vsel %vm1837_vm4, 0.0, %v12011_v43 }
 0x3f8   : > { %1785 = vrot.lane.b32.xlu1 %v12010_v49, %s5186_s14  ;;  %v1887_v52 = vsel %vm1885_vm5, %v1839_v41, %v12012_v40  ;;  %v12013_v49 = vld [vmem:[#allocation224_spill] sm:$0xff] }
 0x3f9   : > { %v1706_v36 = vpop.permute.xlu0 %1705  ;;  %v1936_v29 = vsel %vm1933_vm6, %v1887_v52, %v12013_v49  ;;  %v12016_v41 = vld [vmem:[#allocation88_spill] sm:$0xff] }
 0x3fa   : > { %v1702_v16 = vpop.permute.xlu1 %1701  ;;  %v1985_v34 = vsel %vm1982_vm7, %v1936_v29, %v12014_v28  ;;  %v12017_v40 = vld [vmem:[#allocation4_spill] sm:$0xff]  ;;  %v12018_v29 = vld [vmem:[#allocation181_spill] sm:$0xff] }
 0x3fb   : > { %v2180_v4 = vsel %vm2178_vm12, %v2131_v8, %v1702_v16  ;;  %v2034_v53 = vsel %vm2031_vm8, %v1985_v34, %v12015_v13  ;;  %v1840_v52 = vsel %vm1837_vm4, %v12017_v40, %v12016_v41  ;;  %v7308_v49 = vpop.permute.xlu2 %1715  ;;  %v12019_v28 = vld [vmem:[#allocation229_spill] sm:$0xff]  ;;  %v12020_v34 = vld [vmem:[#allocation275_spill] sm:$0xff]  ;;  %v12021_v41 = vld [vmem:[#allocation92_spill] sm:$0xff] }
 0x3fc   : > { %5025 = vmatmul.msk.f32.gmra.mxu0 %vm2227_vm11, %v2180_v4  ;;  %v2083_v15 = vsel %vm2080_vm10, %v2034_v53, %v6883_v57  ;;  %v1888_v13 = vsel %vm1885_vm5, %v1840_v52, %v12018_v29  ;;  %v12022_v40 = vld [vmem:[#allocation5_spill] sm:$0xff] }
 0x3fd   : > { %v2132_v8 = vsel %vm2129_vm9, %v2083_v15, %v7079_v45  ;;  %v1937_v57 = vsel %vm1933_vm6, %v1888_v13, %v12019_v28  ;;  %v1841_v52 = vsel %vm1837_vm4, %v12022_v40, %v12021_v41  ;;  %v12023_v13 = vld [vmem:[#allocation163_spill] sm:$0xff]  ;;  %v12027_v41 = vld [vmem:[#allocation66_spill] sm:$0xff] }
 0x3fe   : > { %v2181_v43 = vsel %vm2178_vm12, %v2132_v8, %v1704_v17  ;;  %v1986_v45 = vsel %vm1982_vm7, %v1937_v57, %v12020_v34  ;;  %v12024_v28 = vld [vmem:[#allocation219_spill] sm:$0xff] }
 0x3ff   : > { %v2035_v17 = vsel %vm2031_vm8, %v1986_v45, %v6707_v22  ;;  %v1889_v22 = vsel %vm1885_vm5, %v1841_v52, %v12023_v13  ;;  %v12028_v40 = vld [vmem:[#allocation3_spill] sm:$0xff] }
 0x400   : > { %v2084_v53 = vsel %vm2080_vm10, %v2035_v17, %v6899_v55  ;;  %v1938_v55 = vsel %vm1933_vm6, %v1889_v22, %v12024_v28  ;;  %v1842_v52 = vsel %vm1837_vm4, %v12028_v40, %v12027_v41  ;;  %v12029_v13 = vld [vmem:[#allocation179_spill] sm:$0xff]  ;;  %v12033_v40 = vld [vmem:[#allocation184_spill] sm:$0xff] }
 0x401   : > { %v1712_v16 = vpop.permute.xlu0 %1711  ;;  %v2133_v15 = vsel %vm2129_vm9, %v2084_v53, %v7041_v5  ;;  %v12025_v5 = vld [vmem:[#allocation264_spill] sm:$0xff]  ;;  %v1890_v22 = vsel %vm1885_vm5, %v1842_v52, %v12029_v13  ;;  %v12030_v28 = vld [vmem:[#allocation227_spill] sm:$0xff] }
 0x402   : > { %v1708_v4 = vpop.permute.xlu1 %1707  ;;  %v1987_v34 = vsel %vm1982_vm7, %v1938_v55, %v12025_v5  ;;  %v1939_v55 = vsel %vm1933_vm6, %v1890_v22, %v12030_v28  ;;  %v12031_v5 = vld [vmem:[#allocation273_spill] sm:$0xff]  ;;  %v12034_v52 = vld [vmem:[#allocation232_spill] sm:$0xff] }
 0x403   : > { %v7334_v57 = vpop.permute.xlu2 %1721 }
 0x404   : > { %5026 = vmatmul.msk.f32.gmra.mxu0 %vm2227_vm11, %v2181_v43  ;;  %v2182_v43 = vsel %vm2178_vm12, %v2133_v15, %v1706_v36  ;;  %v12026_v36 = vld [vmem:[#allocation309_spill] sm:$0xff] }
 0x405   : > { %v2036_v45 = vsel %vm2031_vm8, %v1987_v34, %v12026_v36 }
 0x406   : > { %v2085_v17 = vsel %vm2080_vm10, %v2036_v45, %v6861_v7 }
 0x407   : > { %v2134_v53 = vsel %vm2129_vm9, %v2085_v17, %v7075_v20  ;;  %v1988_v20 = vsel %vm1982_vm7, %v1939_v55, %v12031_v5 }
 0x409   : > { %v7327_v29 = vpop.permute.xlu0 %1717 }
 0x40a   : > { %v1714_v8 = vpop.permute.xlu1 %1713 }
 0x40b   : > { %v7361_v34 = vpop.permute.xlu2 %1727 }
 0x40c   : > { %5027 = vmatmul.msk.f32.gmra.mxu0 %vm2227_vm11, %v2182_v43  ;;  %v2183_v43 = vsel %vm2178_vm12, %v2134_v53, %v1708_v4  ;;  %v2037_v4 = vsel %vm2031_vm8, %v1988_v20, %v6703_v3 }
 0x40d   : > { %v2086_v36 = vsel %vm2080_vm10, %v2037_v4, %v6895_v12  ;;  %v12035_v12 = vld [vmem:[#allocation95_spill] sm:$0xff] }
 0x40e   : > { %v2135_v45 = vsel %vm2129_vm9, %v2086_v36, %v7091_v1  ;;  %v12036_v4 = vld [vmem:[#allocation91_spill] sm:$0xff]  ;;  %v12037_v36 = vld [vmem:[#allocation6_spill] sm:$0xff] }
 0x40f   : > { %v2184_v53 = vsel %vm2178_vm12, %v2135_v45, %v1710_v50  ;;  %v1844_v45 = vsel %vm1837_vm4, %v12037_v36, %v12036_v4  ;;  %v12044_v4 = vld [vmem:[#allocation182_spill] sm:$0xff] }
 0x410   : > { %v12045_v36 = vld [vmem:[#allocation230_spill] sm:$0xff] }
 0x411   : > { %v7355_v7 = vpop.permute.xlu0 %1723 }
 0x412   : > { %v7344_v15 = vpop.permute.xlu1 %1719 }
 0x413   : > { %v7388_v55 = vpop.permute.xlu2 %1733 }
 0x414   : > { %5028 = vmatmul.msk.f32.gmra.mxu0 %vm2227_vm11, %v2183_v43  ;;  %v12032_v43 = vld [vmem:[#allocation73_spill] sm:$0xff] }
 0x415   : > { %v1843_v41 = vsel %vm1837_vm4, %v5259_v10, %v12032_v43  ;;  %v12039_v43 = vld [vmem:[#allocation222_spill] sm:$0xff] }
 0x416   : > { %v1891_v3 = vsel %vm1885_vm5, %v1843_v41, %v12033_v40  ;;  %v12040_v41 = vld [vmem:[#allocation267_spill] sm:$0xff] }
 0x417   : > { %v1940_v13 = vsel %vm1933_vm6, %v1891_v3, %v12034_v52  ;;  %v12041_v40 = vld [vmem:[#allocation311_spill] sm:$0xff] }
 0x418   : > { %v1989_v22 = vsel %vm1982_vm7, %v1940_v13, %v12035_v12 }
 0x419   : > { %v2038_v1 = vsel %vm2031_vm8, %v1989_v22, %v6719_v54  ;;  %v7382_v28 = vpop.permute.xlu0 %1729  ;;  %v12038_v54 = vld [vmem:[#allocation169_spill] sm:$0xff] }
 0x41a   : > { %v7367_v17 = vpop.permute.xlu1 %1725  ;;  %v2087_v50 = vsel %vm2080_vm10, %v2038_v1, %v6911_v11  ;;  %v12042_v1 = vld [vmem:[#allocation98_spill] sm:$0xff] }
 0x41b   : > { %v2136_v10 = vsel %vm2129_vm9, %v2087_v50, %v7053_v14  ;;  %v12043_v50 = vld [vmem:[#allocation7_spill] sm:$0xff] }
 0x41c   : > { %5029 = vmatmul.msk.f32.gmra.mxu0 %vm2227_vm11, %v2184_v53  ;;  %v2185_v20 = vsel %vm2178_vm12, %v2136_v10, %v1712_v16  ;;  %v1892_v53 = vsel %vm1885_vm5, %v1844_v45, %v12038_v54  ;;  %v1845_v10 = vsel %vm1837_vm4, %v12043_v50, %v12042_v1  ;;  %v12046_v45 = vld [vmem:[#allocation93_spill] sm:$0xff]  ;;  %v12051_v1 = vld [vmem:[#allocation234_spill] sm:$0xff] }
 0x41d   : > { %v1941_v11 = vsel %vm1933_vm6, %v1892_v53, %v12039_v43  ;;  %v12052_v50 = vld [vmem:[#allocation237_spill] sm:$0xff] }
 0x41e   : > { %v1990_v14 = vsel %vm1982_vm7, %v1941_v11, %v12040_v41 }
 0x41f   : > { %v2039_v3 = vsel %vm2031_vm8, %v1990_v14, %v12041_v40  ;;  %v12047_v14 = vld [vmem:[#allocation81_spill] sm:$0xff] }
 0x420   : > { %v2088_v16 = vsel %vm2080_vm10, %v2039_v3, %v6873_v25  ;;  %v1893_v25 = vsel %vm1885_vm5, %v1845_v10, %v12044_v4  ;;  %v1846_v40 = vsel %vm1837_vm4, %v5310_v33, %v12047_v14  ;;  %v12048_v3 = vld [vmem:[#allocation127_spill] sm:$0xff]  ;;  %v12053_v4 = vld [vmem:[#allocation278_spill] sm:$0xff] }
 0x421   : > { %v2137_v52 = vsel %vm2129_vm9, %v2088_v16, %v7087_v19  ;;  %v7409_v13 = vpop.permute.xlu0 %1735  ;;  %v1942_v19 = vsel %vm1933_vm6, %v1893_v25, %v12045_v36  ;;  %v1862_v16 = vsel %vm1837_vm4, %v5452_v61, %v12048_v3  ;;  %v12054_v25 = vld [vmem:[#allocation283_spill] sm:$0xff] }
 0x422   : > { %v7390_v5 = vpop.permute.xlu1 %1731  ;;  %v2186_v22 = vsel %vm2178_vm12, %v2137_v52, %v1714_v8  ;;  %v1991_v54 = vsel %vm1982_vm7, %v1942_v19, %v12046_v45  ;;  %v12050_v52 = vld [vmem:[#allocation192_spill] sm:$0xff] }
 0x423   : > { %v2040_v8 = vsel %vm2031_vm8, %v1991_v54, %v6715_v44 }
 0x424   : > { %5030 = vmatmul.msk.f32.gmra.mxu0 %vm2227_vm11, %v2185_v20  ;;  %v7417_v20 = vpop.permute.xlu2 %1739  ;;  %v2089_v53 = vsel %vm2080_vm10, %v2040_v8, %v6907_v56  ;;  %v12049_v56 = vld [vmem:[#allocation187_spill] sm:$0xff] }
 0x425   : > { %v2138_v43 = vsel %vm2129_vm9, %v2089_v53, %v7103_v27  ;;  %v1894_v27 = vsel %vm1885_vm5, %v1846_v40, %v12049_v56  ;;  %v12055_v40 = vld [vmem:[#allocation97_spill] sm:$0xff] }
 0x426   : > { %v2187_v41 = vsel %vm2178_vm12, %v2138_v43, %v7308_v49  ;;  %v1943_v49 = vsel %vm1933_vm6, %v1894_v27, %v12051_v1  ;;  %v12060_v56 = vld [vmem:[#allocation225_spill] sm:$0xff] }
 0x427   : > { %v1992_v61 = vsel %vm1982_vm7, %v1943_v49, %v12053_v4  ;;  %v12062_v49 = vld [vmem:[#allocation269_spill] sm:$0xff]  ;;  %v12064_v4 = vld [vmem:[#allocation314_spill] sm:$0xff] }
 0x428   : > { %v2041_v19 = vsel %vm2031_vm8, %v1992_v61, %v6731_v18 }
 0x429   : > { %v7442_v44 = vpop.permute.xlu0 %1741  ;;  %v2090_v54 = vsel %vm2080_vm10, %v2041_v19, %v6923_v30  ;;  %v12057_v30 = vld [vmem:[#allocation134_spill] sm:$0xff] }
 0x42a   : > { %v7411_v12 = vpop.permute.xlu1 %1737  ;;  %v2139_v53 = vsel %vm2129_vm9, %v2090_v54, %v7065_v51  ;;  %v12058_v51 = vld [vmem:[#allocation175_spill] sm:$0xff] }
 0x42b   : > { %v2188_v14 = vsel %vm2178_vm12, %v2139_v53, %v7327_v29 }
 0x42c   : > { %5031 = vmatmul.msk.f32.gmra.mxu0 %vm2227_vm11, %v2186_v22  ;;  %v1910_v22 = vsel %vm1885_vm5, %v1862_v16, %v12050_v52  ;;  %v7453_v10 = vpop.permute.xlu2 %1745  ;;  %v12059_v16 = vld [vmem:[#allocation200_spill] sm:$0xff]  ;;  %v12061_v52 = vld [vmem:[#allocation245_spill] sm:$0xff] }
 0x42d   : > { %v1959_v33 = vsel %vm1933_vm6, %v1910_v22, %v12052_v50  ;;  %v12063_v50 = vld [vmem:[#allocation291_spill] sm:$0xff] }
 0x42e   : > { %v2008_v36 = vsel %vm1982_vm7, %v1959_v33, %v12054_v25 }
 0x42f   : > { %v2057_v45 = vsel %vm2031_vm8, %v2008_v36, %v6753_v47  ;;  %v12056_v47 = vld [vmem:[#allocation9_spill] sm:$0xff] }
 0x430   : > { %v2106_v8 = vsel %vm2080_vm10, %v2057_v45, %v6945_v24  ;;  %v1847_v3 = vsel %vm1837_vm4, %v12056_v47, %v12055_v40  ;;  %v1863_v24 = vsel %vm1837_vm4, %v5458_v63, %v12057_v30  ;;  %v12070_v40 = vld [vmem:[#allocation8_spill] sm:$0xff] }
 0x431   : > { %v2155_v43 = vsel %vm2129_vm9, %v2106_v8, %v7159_v21  ;;  %v1895_v21 = vsel %vm1885_vm5, %v1847_v3, %v12058_v51  ;;  %v1911_v29 = vsel %vm1885_vm5, %v1863_v24, %v12059_v16  ;;  %v7490_v1 = vpop.permute.xlu0 %1747  ;;  %v12071_v3 = vld [vmem:[#allocation250_spill] sm:$0xff]  ;;  %v12072_v24 = vld [vmem:[#allocation276_spill] sm:$0xff] }
 0x432   : > { %v7432_v11 = vpop.permute.xlu1 %1743  ;;  %v1944_v27 = vsel %vm1933_vm6, %v1895_v21, %v12060_v56  ;;  %v1960_v22 = vsel %vm1933_vm6, %v1911_v29, %v12061_v52 }
 0x433   : > { %v1993_v63 = vsel %vm1982_vm7, %v1944_v27, %v12062_v49  ;;  %v2009_v33 = vsel %vm1982_vm7, %v1960_v22, %v12063_v50  ;;  %v12074_v50 = vld [vmem:[#allocation86_spill] sm:$0xff] }
 0x434   : > { %5032 = vmatmul.msk.f32.gmra.mxu0 %vm2227_vm11, %v2187_v41  ;;  %v2042_v61 = vsel %vm2031_vm8, %v1993_v63, %v12064_v4  ;;  %v2058_v25 = vsel %vm2031_vm8, %v2009_v33, %v6787_v38  ;;  %v1752_v36 = vpop.permute.xlu2 %1751  ;;  %v12066_v38 = vld [vmem:[#allocation10_spill] sm:$0xff]  ;;  %v12075_v33 = vld [vmem:[#allocation133_spill] sm:$0xff]  ;;  %v12078_v4 = vld [vmem:[#allocation235_spill] sm:$0xff] }
 0x435   : > { %v2091_v19 = vsel %vm2080_vm10, %v2042_v61, %v6885_v6  ;;  %v2107_v45 = vsel %vm2080_vm10, %v2058_v25, %v6979_v37  ;;  %v12068_v37 = vld [vmem:[#allocation185_spill] sm:$0xff]  ;;  %v12079_v25 = vld [vmem:[#allocation240_spill] sm:$0xff] }
 0x436   : > { %v2140_v54 = vsel %vm2129_vm9, %v2091_v19, %v7099_v35  ;;  %v2156_v8 = vsel %vm2129_vm9, %v2107_v45, %v7173_v0  ;;  %v12069_v0 = vld [vmem:[#allocation205_spill] sm:$0xff] }
 0x437   : > { %v2189_v53 = vsel %vm2178_vm12, %v2140_v54, %v7344_v15 }
 0x439   : > { %v1754_v56 = vpop.permute.xlu0 %1753 }
 0x43a   : > { %v1750_v41 = vpop.permute.xlu1 %1749 }
 0x43b   : > { %v2204_v18 = vsel %vm2178_vm12, %v2155_v43, %v1750_v41  ;;  %v2205_v43 = vsel %vm2178_vm12, %v2156_v8, %v1752_v36  ;;  %v12065_v41 = vld [vmem:[#allocation104_spill] sm:$0xff]  ;;  %v12080_v36 = vld [vmem:[#allocation281_spill] sm:$0xff] }
 0x43c   : > { %5033 = vmatmul.msk.f32.gmra.mxu0 %vm2227_vm11, %v2188_v14  ;;  %5049 = vmatmul.msk.f32.vlgmr.msra.gmra.mxu3 %vm2227_vm11, %v2204_v18  ;;  %v1848_v14 = vsel %vm1837_vm4, %v12066_v38, %v12065_v41  ;;  %v12067_v18 = vld [vmem:[#allocation114_spill] sm:$0xff]  ;;  %v12082_v41 = vld [vmem:[#allocation29_spill] sm:$0xff] }
 0x43d   : > { %v1864_v6 = vsel %vm1837_vm4, %v5484_v39, %v12067_v18  ;;  %v1896_v35 = vsel %vm1885_vm5, %v1848_v14, %v12068_v37  ;;  %v12073_v39 = vld [vmem:[#allocation296_spill] sm:$0xff]  ;;  %v12083_v14 = vld [vmem:[#allocation67_spill] sm:$0xff] }
 0x43e   : > { %v1912_v15 = vsel %vm1885_vm5, %v1864_v6, %v12069_v0  ;;  %v1945_v47 = vsel %vm1933_vm6, %v1896_v35, %v12070_v40  ;;  %v12084_v6 = vld [vmem:[#allocation105_spill] sm:$0xff]  ;;  %v12085_v0 = vld [vmem:[#allocation103_spill] sm:$0xff]  ;;  %v12087_v40 = vld [vmem:[#allocation140_spill] sm:$0xff] }
 0x43f   : > { %v1961_v30 = vsel %vm1933_vm6, %v1912_v15, %v12071_v3  ;;  %v1994_v51 = vsel %vm1982_vm7, %v1945_v47, %v12072_v24  ;;  %v12089_v3 = vld [vmem:[#allocation180_spill] sm:$0xff]  ;;  %v12090_v24 = vld [vmem:[#allocation203_spill] sm:$0xff] }
 0x440   : > { %v2010_v21 = vsel %vm1982_vm7, %v1961_v30, %v12073_v39  ;;  %v2043_v16 = vsel %vm2031_vm8, %v1994_v51, %v6727_v31  ;;  %v12091_v51 = vld [vmem:[#allocation228_spill] sm:$0xff] }
 0x441   : > { %v2059_v29 = vsel %vm2031_vm8, %v2010_v21, %v6803_v62  ;;  %v2092_v27 = vsel %vm2080_vm10, %v2043_v16, %v6919_v58  ;;  %v1849_v62 = vsel %vm1837_vm4, %v5339_v46, %v12074_v50  ;;  %v1865_v58 = vsel %vm1837_vm4, %v5481_v26, %v12075_v33  ;;  %v12081_v26 = vld [vmem:[#allocation286_spill] sm:$0xff]  ;;  %v12092_v21 = vld [vmem:[#allocation248_spill] sm:$0xff]  ;;  %v1758_v50 = vpop.permute.xlu2 %1757 }
 0x442   : > { %v2108_v52 = vsel %vm2080_vm10, %v2059_v29, %v6995_v2  ;;  %v2141_v22 = vsel %vm2129_vm9, %v2092_v27, %v7115_v59  ;;  %v12076_v2 = vld [vmem:[#allocation190_spill] sm:$0xff] }
 0x443   : > { %v2157_v49 = vsel %vm2129_vm9, %v2108_v52, %v7137_v9  ;;  %v2190_v63 = vsel %vm2178_vm12, %v2141_v22, %v7334_v57  ;;  %v1897_v59 = vsel %vm1885_vm5, %v1849_v62, %v12076_v2  ;;  %v12077_v9 = vld [vmem:[#allocation195_spill] sm:$0xff]  ;;  %v12093_v29 = vld [vmem:[#allocation274_spill] sm:$0xff]  ;;  %v12095_v22 = vld [vmem:[#allocation316_spill] sm:$0xff] }
 0x444   : > { %5034 = vmatmul.msk.f32.gmra.mxu0 %vm2227_vm11, %v2189_v53  ;;  %5050 = vmatmul.msk.f32.gmra.mxu3 %vm2227_vm11, %v2205_v43  ;;  %v2206_v31 = vsel %vm2178_vm12, %v2157_v49, %v1754_v56  ;;  %v1913_v57 = vsel %vm1885_vm5, %v1865_v58, %v12077_v9  ;;  %v1946_v61 = vsel %vm1933_vm6, %v1897_v59, %v12078_v4  ;;  %v1756_v53 = vpop.permute.xlu1 %1755  ;;  %v12094_v27 = vld [vmem:[#allocation294_spill] sm:$0xff]  ;;  %v12097_v62 = vld [vmem:[#allocation347_spill] sm:$0xff] }
 0x445   : > { %v1962_v46 = vsel %vm1933_vm6, %v1913_v57, %v12079_v25  ;;  %v1995_v19 = vsel %vm1982_vm7, %v1946_v61, %v12080_v36  ;;  %v12098_v58 = vld [vmem:[#allocation38_spill] sm:$0xff]  ;;  %v12100_v57 = vld [vmem:[#allocation111_spill] sm:$0xff] }
 0x446   : > { %v2011_v45 = vsel %vm1982_vm7, %v1962_v46, %v12081_v26  ;;  %v2044_v54 = vsel %vm2031_vm8, %v1995_v19, %v6743_v32  ;;  %v12099_v59 = vld [vmem:[#allocation74_spill] sm:$0xff]  ;;  %v12102_v36 = vld [vmem:[#allocation15_spill] sm:$0xff]  ;;  %v12103_v26 = vld [vmem:[#allocation120_spill] sm:$0xff] }
 0x447   : > { %v2060_v8 = vsel %vm2031_vm8, %v2011_v45, %v6765_v60  ;;  %v2093_v43 = vsel %vm2080_vm10, %v2044_v54, %v6935_v48  ;;  %v12086_v60 = vld [vmem:[#allocation14_spill] sm:$0xff]  ;;  %v12088_v48 = vld [vmem:[#allocation41_spill] sm:$0xff] }
 0x448   : > { %v2109_v38 = vsel %vm2080_vm10, %v2060_v8, %v12082_v41  ;;  %v2142_v18 = vsel %vm2129_vm9, %v2093_v43, %v12083_v14  ;;  %v1850_v15 = vsel %vm1837_vm4, %v12086_v60, %v12085_v0  ;;  %v1866_v47 = vsel %vm1837_vm4, %v12088_v48, %v12087_v40  ;;  %v12101_v46 = vld [vmem:[#allocation110_spill] sm:$0xff]  ;;  %v12105_v8 = vld [vmem:[#allocation188_spill] sm:$0xff]  ;;  %v12108_v14 = vld [vmem:[#allocation253_spill] sm:$0xff]  ;;  %v1760_v48 = vpop.permute.xlu0 %1759 }
 0x449   : > { %v2158_v37 = vsel %vm2129_vm9, %v2109_v38, %v12084_v6  ;;  %v2191_v35 = vsel %vm2178_vm12, %v2142_v18, %v7355_v7  ;;  %v1898_v30 = vsel %vm1885_vm5, %v1850_v15, %v12089_v3  ;;  %v1914_v7 = vsel %vm1885_vm5, %v1866_v47, %v12090_v24  ;;  %v12104_v45 = vld [vmem:[#allocation46_spill] sm:$0xff]  ;;  %v12106_v43 = vld [vmem:[#allocation208_spill] sm:$0xff]  ;;  %v12109_v6 = vld [vmem:[#allocation279_spill] sm:$0xff] }
 0x44a   : > { %v2207_v32 = vsel %vm2178_vm12, %v2158_v37, %v1756_v53  ;;  %v1947_v39 = vsel %vm1933_vm6, %v1898_v30, %v12091_v51  ;;  %v1963_v16 = vsel %vm1933_vm6, %v1914_v7, %v12092_v21  ;;  %v1851_v19 = vsel %vm1837_vm4, %v12102_v36, %v12101_v46  ;;  %v12107_v41 = vld [vmem:[#allocation12_spill] sm:$0xff]  ;;  %v12111_v0 = vld [vmem:[#allocation319_spill] sm:$0xff]  ;;  %v12112_v15 = vld [vmem:[#allocation334_spill] sm:$0xff] }
 0x44b   : > { %v1996_v56 = vsel %vm1982_vm7, %v1947_v39, %v12093_v29  ;;  %v2012_v52 = vsel %vm1982_vm7, %v1963_v16, %v12094_v27  ;;  %v1867_v54 = vsel %vm1837_vm4, %v12104_v45, %v12103_v26  ;;  %v1899_v53 = vsel %vm1885_vm5, %v1851_v19, %v12105_v8  ;;  %v12113_v47 = vld [vmem:[#allocation16_spill] sm:$0xff]  ;;  %v12116_v39 = vld [vmem:[#allocation99_spill] sm:$0xff]  ;;  %v12128_v36 = vld [vmem:[#allocation326_spill] sm:$0xff] }
 0x44c   : > { %5035 = vmatmul.msk.f32.gmra.mxu0 %vm2227_vm11, %v2190_v63  ;;  %5051 = vmatmul.msk.f32.gmra.mxu3 %vm2227_vm11, %v2206_v31  ;;  %v2045_v49 = vsel %vm2031_vm8, %v1996_v56, %v12095_v22  ;;  %v12096_v63 = vld [vmem:[#allocation330_spill] sm:$0xff]  ;;  %v1948_v38 = vsel %vm1933_vm6, %v1899_v53, %v12107_v41  ;;  %v12114_v30 = vld [vmem:[#allocation44_spill] sm:$0xff]  ;;  %v12119_v22 = vld [vmem:[#allocation139_spill] sm:$0xff]  ;;  %v1762_v26 = vpop.permute.xlu1 %1761 }
 0x44d   : > { %v2061_v31 = vsel %vm2031_vm8, %v2012_v52, %v12096_v63  ;;  %v2094_v33 = vsel %vm2080_vm10, %v2045_v49, %v12097_v62  ;;  %v1997_v37 = vsel %vm1982_vm7, %v1948_v38, %v12109_v6  ;;  %v12115_v7 = vld [vmem:[#allocation272_spill] sm:$0xff]  ;;  %v12117_v56 = vld [vmem:[#allocation90_spill] sm:$0xff]  ;;  %v12120_v49 = vld [vmem:[#allocation45_spill] sm:$0xff] }
 0x44e   : > { %v2110_v2 = vsel %vm2080_vm10, %v2061_v31, %v12098_v58  ;;  %v2143_v9 = vsel %vm2129_vm9, %v2094_v33, %v12099_v59  ;;  %v2046_v60 = vsel %vm2031_vm8, %v1997_v37, %v12111_v0  ;;  %v12118_v27 = vld [vmem:[#allocation20_spill] sm:$0xff]  ;;  %v1868_v63 = vsel %vm1837_vm4, %v12120_v49, %v12119_v22  ;;  %v12121_v31 = vld [vmem:[#allocation193_spill] sm:$0xff]  ;;  %v12122_v62 = vld [vmem:[#allocation198_spill] sm:$0xff]  ;;  %v1764_v49 = vpop.permute.xlu2 %1763 }
 0x44f   : > { %v2159_v4 = vsel %vm2129_vm9, %v2110_v2, %v12100_v57  ;;  %v2192_v61 = vsel %vm2178_vm12, %v2143_v9, %v7367_v17  ;;  %v1915_v17 = vsel %vm1885_vm5, %v1867_v54, %v12106_v43  ;;  %v2095_v3 = vsel %vm2080_vm10, %v2046_v60, %v12113_v47  ;;  %v12123_v33 = vld [vmem:[#allocation238_spill] sm:$0xff]  ;;  %v12124_v2 = vld [vmem:[#allocation243_spill] sm:$0xff]  ;;  %v12125_v9 = vld [vmem:[#allocation284_spill] sm:$0xff] }
 0x450   : > { %v2208_v25 = vsel %vm2178_vm12, %v2159_v4, %v1758_v50  ;;  %v1964_v18 = vsel %vm1933_vm6, %v1915_v17, %v12108_v14  ;;  %v2144_v51 = vsel %vm2129_vm9, %v2095_v3, %v12115_v7  ;;  %v1852_v52 = vsel %vm1837_vm4, %v12118_v27, %v12117_v56  ;;  %v12126_v4 = vld [vmem:[#allocation289_spill] sm:$0xff]  ;;  %v12129_v45 = vld [vmem:[#allocation22_spill] sm:$0xff]  ;;  %v12130_v8 = vld [vmem:[#allocation35_spill] sm:$0xff] }
 0x451   : > { %v2193_v16 = vsel %vm2178_vm12, %v2144_v51, %v7361_v34  ;;  %v1900_v50 = vsel %vm1885_vm5, %v1852_v52, %v12121_v31  ;;  %v1916_v34 = vsel %vm1885_vm5, %v1868_v63, %v12122_v62  ;;  %v12131_v43 = vld [vmem:[#allocation69_spill] sm:$0xff]  ;;  %v12132_v41 = vld [vmem:[#allocation119_spill] sm:$0xff]  ;;  %v7701_v47 = vld [vmem:[%s10979_s2] ss:$0 sm:$0xff] }
 0x452   : > { %v1949_v58 = vsel %vm1933_vm6, %v1900_v50, %v12123_v33  ;;  %v1965_v59 = vsel %vm1933_vm6, %v1916_v34, %v12124_v2  ;;  %v12133_v6 = vld [vmem:[#allocation109_spill] sm:$0xff]  ;;  %v12134_v37 = vld [vmem:[#allocation19_spill] sm:$0xff]  ;;  %v12141_v51 = vld [vmem:[#allocation94_spill] sm:$0xff] }
 0x453   : > { %v1998_v57 = vsel %vm1982_vm7, %v1949_v58, %v12125_v9  ;;  %v12136_v0 = vld [vmem:[#allocation47_spill] sm:$0xff]  ;;  %v12143_v56 = vld [vmem:[#allocation317_spill] sm:$0xff]  ;;  %v12144_v52 = vld [vmem:[#allocation332_spill] sm:$0xff] }
 0x454   : > { %5036 = vmatmul.msk.f32.gmra.mxu0 %vm2227_vm11, %v2191_v35  ;;  %5052 = vmatmul.msk.f32.gmra.mxu3 %vm2227_vm11, %v2207_v32  ;;  %v12110_v35 = vld [vmem:[#allocation299_spill] sm:$0xff]  ;;  %v12145_v31 = vld [vmem:[#allocation13_spill] sm:$0xff] }
 0x455   : > { %v2013_v32 = vsel %vm1982_vm7, %v1964_v18, %v12110_v35  ;;  %v1853_v35 = vsel %vm1837_vm4, %v12134_v37, %v12133_v6  ;;  %v12139_v3 = vld [vmem:[#allocation231_spill] sm:$0xff]  ;;  %v12158_v37 = vld [vmem:[#allocation302_spill] sm:$0xff] }
 0x456   : > { %v2062_v40 = vsel %vm2031_vm8, %v2013_v32, %v12112_v15  ;;  %v12135_v32 = vld [vmem:[#allocation146_spill] sm:$0xff]  ;;  %v12137_v15 = vld [vmem:[#allocation183_spill] sm:$0xff] }
 0x457   : > { %v2111_v24 = vsel %vm2080_vm10, %v2062_v40, %v12114_v30  ;;  %v1869_v60 = vsel %vm1837_vm4, %v12136_v0, %v12135_v32  ;;  %v1901_v40 = vsel %vm1885_vm5, %v1853_v35, %v12137_v15  ;;  %v12146_v62 = vld [vmem:[#allocation43_spill] sm:$0xff]  ;;  %v12159_v0 = vld [vmem:[#allocation321_spill] sm:$0xff] }
 0x458   : > { %v2160_v21 = vsel %vm2129_vm9, %v2111_v24, %v12116_v39  ;;  %v1950_v30 = vsel %vm1933_vm6, %v1901_v40, %v12139_v3  ;;  %v12140_v24 = vld [vmem:[#allocation251_spill] sm:$0xff]  ;;  %v12160_v15 = vld [vmem:[#allocation337_spill] sm:$0xff] }
 0x459   : > { %v2209_v29 = vsel %vm2178_vm12, %v2160_v21, %v1760_v48  ;;  %v12138_v48 = vld [vmem:[#allocation206_spill] sm:$0xff]  ;;  %v1999_v39 = vsel %vm1982_vm7, %v1950_v30, %v12141_v51  ;;  %v12142_v21 = vld [vmem:[#allocation297_spill] sm:$0xff]  ;;  %v12147_v58 = vld [vmem:[#allocation83_spill] sm:$0xff] }
 0x45a   : > { %v2048_v27 = vsel %vm2031_vm8, %v1999_v39, %v12143_v56  ;;  %v12162_v30 = vld [vmem:[#allocation50_spill] sm:$0xff]  ;;  %v12164_v39 = vld [vmem:[#allocation101_spill] sm:$0xff] }
 0x45b   : > { %v2097_v50 = vsel %vm2080_vm10, %v2048_v27, %v12145_v31 }
 0x45c   : > { %5037 = vmatmul.msk.f32.gmra.mxu0 %vm2227_vm11, %v2192_v61  ;;  %5053 = vmatmul.msk.f32.gmra.mxu3 %vm2227_vm11, %v2208_v25  ;;  %v2014_v61 = vsel %vm1982_vm7, %v1965_v59, %v12126_v4  ;;  %v12127_v25 = vld [vmem:[#allocation322_spill] sm:$0xff]  ;;  %v2146_v2 = vsel %vm2129_vm9, %v2097_v50, %v12147_v58  ;;  %v12148_v59 = vld [vmem:[#allocation117_spill] sm:$0xff] }
 0x45d   : > { %v2047_v46 = vsel %vm2031_vm8, %v1998_v57, %v12127_v25  ;;  %v2063_v19 = vsel %vm2031_vm8, %v2014_v61, %v12128_v36  ;;  %v2195_v4 = vsel %vm2178_vm12, %v2146_v2, %v7390_v5  ;;  %v12149_v25 = vld [vmem:[#allocation116_spill] sm:$0xff]  ;;  %v12170_v2 = vld [vmem:[#allocation2_spill] sm:$0xff] }
 0x45e   : > { %v2096_v54 = vsel %vm2080_vm10, %v2047_v46, %v12129_v45  ;;  %v2112_v53 = vsel %vm2080_vm10, %v2063_v19, %v12130_v8  ;;  %v12150_v46 = vld [vmem:[#allocation21_spill] sm:$0xff]  ;;  %v12151_v19 = vld [vmem:[#allocation126_spill] sm:$0xff] }
 0x45f   : > { %v2145_v17 = vsel %vm2129_vm9, %v2096_v54, %v12131_v43  ;;  %v2161_v38 = vsel %vm2129_vm9, %v2112_v53, %v12132_v41  ;;  %v1854_v36 = vsel %vm1837_vm4, %v12150_v46, %v12149_v25  ;;  %v12153_v54 = vld [vmem:[#allocation191_spill] sm:$0xff]  ;;  %v12174_v46 = vld [vmem:[#allocation246_spill] sm:$0xff] }
 0x460   : > { %v2194_v14 = vsel %vm2178_vm12, %v2145_v17, %v7382_v28  ;;  %v2210_v18 = vsel %vm2178_vm12, %v2161_v38, %v1762_v26  ;;  %v1917_v28 = vsel %vm1885_vm5, %v1869_v60, %v12138_v48  ;;  %v12152_v26 = vld [vmem:[#allocation52_spill] sm:$0xff]  ;;  %v1902_v8 = vsel %vm1885_vm5, %v1854_v36, %v12153_v54  ;;  %v12154_v53 = vld [vmem:[#allocation211_spill] sm:$0xff]  ;;  %v1766_v48 = vpop.permute.xlu0 %1765 }
 0x461   : > { %v1966_v7 = vsel %vm1933_vm6, %v1917_v28, %v12140_v24  ;;  %v1870_v45 = vsel %vm1837_vm4, %v12152_v26, %v12151_v19  ;;  %v12155_v17 = vld [vmem:[#allocation236_spill] sm:$0xff]  ;;  %v12161_v28 = vld [vmem:[#allocation23_spill] sm:$0xff] }
 0x462   : > { %v1918_v5 = vsel %vm1885_vm5, %v1870_v45, %v12154_v53  ;;  %v1951_v41 = vsel %vm1933_vm6, %v1902_v8, %v12155_v17  ;;  %v12156_v38 = vld [vmem:[#allocation256_spill] sm:$0xff]  ;;  %v12175_v26 = vld [vmem:[#allocation287_spill] sm:$0xff] }
 0x463   : > { %v12176_v54 = vld [vmem:[#allocation292_spill] sm:$0xff] }
 0x464   : > { %5038 = vmatmul.msk.f32.gmra.mxu0 %vm2227_vm11, %v2193_v16  ;;  %5054 = vmatmul.msk.f32.gmra.mxu3 %vm2227_vm11, %v2209_v29  ;;  %v2015_v16 = vsel %vm1982_vm7, %v1966_v7, %v12142_v21  ;;  %v7714_v29 = vld [vmem:[%s10980_s3] ss:$0 sm:$0xff]  ;;  %v12177_v53 = vld [vmem:[#allocation324_spill] sm:$0xff] }
 0x465   : > { %v2064_v22 = vsel %vm2031_vm8, %v2015_v16, %v12144_v52  ;;  %v12165_v16 = vld [vmem:[#allocation113_spill] sm:$0xff] }
 0x466   : > { %v2113_v34 = vsel %vm2080_vm10, %v2064_v22, %v12146_v62  ;;  %v12166_v22 = vld [vmem:[#allocation96_spill] sm:$0xff]  ;;  %v12168_v62 = vld [vmem:[#allocation145_spill] sm:$0xff] }
 0x467   : > { %v2162_v9 = vsel %vm2129_vm9, %v2113_v34, %v12148_v59  ;;  %v12169_v34 = vld [vmem:[#allocation51_spill] sm:$0xff] }
 0x468   : > { %v2211_v61 = vsel %vm2178_vm12, %v2162_v9, %v1764_v49  ;;  %v12167_v49 = vld [vmem:[#allocation26_spill] sm:$0xff]  ;;  %v12171_v9 = vld [vmem:[#allocation196_spill] sm:$0xff] }
 0x46c   : > { %5039 = vmatmul.msk.f32.gmra.mxu0 %vm2227_vm11, %v2194_v14  ;;  %5055 = vmatmul.msk.f32.gmra.mxu3 %vm2227_vm11, %v2210_v18  ;;  %v1967_v14 = vsel %vm1933_vm6, %v1918_v5, %v12156_v38  ;;  %v12157_v18 = vld [vmem:[#allocation282_spill] sm:$0xff] }
 0x46d   : > { %v2000_v6 = vsel %vm1982_vm7, %v1951_v41, %v12157_v18  ;;  %v2016_v35 = vsel %vm1982_vm7, %v1967_v14, %v12158_v37  ;;  %v1768_v41 = vpop.permute.xlu1 %1767  ;;  %v12179_v14 = vld [vmem:[#allocation28_spill] sm:$0xff] }
 0x46e   : > { %v2049_v60 = vsel %vm2031_vm8, %v2000_v6, %v12159_v0  ;;  %v2065_v40 = vsel %vm2031_vm8, %v2016_v35, %v12160_v15  ;;  %v12180_v6 = vld [vmem:[#allocation36_spill] sm:$0xff]  ;;  %v12181_v0 = vld [vmem:[#allocation75_spill] sm:$0xff] }
 0x46f   : > { %v2098_v3 = vsel %vm2080_vm10, %v2049_v60, %v12161_v28  ;;  %v2114_v24 = vsel %vm2080_vm10, %v2065_v40, %v12162_v30  ;;  %v12182_v15 = vld [vmem:[#allocation112_spill] sm:$0xff] }
 0x470   : > { %v2393_v63 = vpop.f32.mrf.mxu0  ;;  %v2147_v21 = vsel %vm2129_vm9, %v2098_v3, %v12164_v39  ;;  %v2163_v56 = vsel %vm2129_vm9, %v2114_v24, %v12165_v16  ;;  %v12185_v39 = vld [vmem:[#allocation115_spill] sm:$0xff] }
 0x471   : > { %v2525_v33 = vmul.f32 %v7701_v47, %v2393_v63  ;;  %v1855_v63 = vsel %vm1837_vm4, %v12167_v49, %v12166_v22  ;;  %v2196_v31 = vsel %vm2178_vm12, %v2147_v21, %v7388_v55  ;;  %v2212_v50 = vsel %vm2178_vm12, %v2163_v56, %v1766_v48  ;;  %v12186_v21 = vld [vmem:[#allocation25_spill] sm:$0xff]  ;;  %v12187_v56 = vld [vmem:[#allocation152_spill] sm:$0xff]  ;;  %v12189_v22 = vld [vmem:[#allocation186_spill] sm:$0xff] }
 0x472   : > { %v1856_v16 = vsel %vm1837_vm4, %v12186_v21, %v12185_v39  ;;  %v12190_v49 = vld [vmem:[#allocation209_spill] sm:$0xff]  ;;  %v12208_v39 = vld [vmem:[#allocation259_spill] sm:$0xff] }
 0x473   : > { %v2561_v57 = vadd.f32 %v7714_v29, %v2525_v33  ;;  %v1871_v33 = vsel %vm1837_vm4, %v12169_v34, %v12168_v62  ;;  %v12191_v62 = vld [vmem:[#allocation233_spill] sm:$0xff] }
 0x474   : > { %5040 = vmatmul.msk.f32.gmra.mxu0 %vm2227_vm11, %v2195_v4  ;;  %5056 = vmatmul.msk.f32.gmra.mxu3 %vm2227_vm11, %v2211_v61  ;;  %v12172_v4 = vld [vmem:[#allocation201_spill] sm:$0xff] }
 0x475   : > { %v2593_v43 = vmax.f32 %v2561_v57, 0.0  ;;  %v1903_v57 = vsel %vm1885_vm5, %v1855_v63, %v12171_v9  ;;  %v1919_v55 = vsel %vm1885_vm5, %v1871_v33, %v12172_v4  ;;  %v12173_v61 = vld [vmem:[#allocation241_spill] sm:$0xff]  ;;  %v12192_v33 = vld [vmem:[#allocation254_spill] sm:$0xff] }
 0x476   : > { %v1952_v25 = vsel %vm1933_vm6, %v1903_v57, %v12173_v61  ;;  %v1968_v36 = vsel %vm1933_vm6, %v1919_v55, %v12174_v46  ;;  %v12194_v57 = vld [vmem:[#allocation300_spill] sm:$0xff]  ;;  %v12196_v61 = vld [vmem:[#allocation335_spill] sm:$0xff]  ;;  %v1770_v46 = vpop.permute.xlu2 %1769 }
 0x477   : > { %v2657_v32 = vrot.slane %v2593_v43, 7  ;;  %v2001_v45 = vsel %vm1982_vm7, %v1952_v25, %v12175_v26  ;;  %v2017_v8 = vsel %vm1982_vm7, %v1968_v36, %v12176_v54  ;;  %v12178_v43 = vld [vmem:[#allocation328_spill] sm:$0xff]  ;;  %v12197_v36 = vld [vmem:[#allocation17_spill] sm:$0xff] }
 0x478   : > { %v2050_v5 = vsel %vm2031_vm8, %v2001_v45, %v12177_v53  ;;  %v2066_v17 = vsel %vm2031_vm8, %v2017_v8, %v12178_v43  ;;  %v12198_v26 = vld [vmem:[#allocation49_spill] sm:$0xff] }
 0x479   : > { %v7762_v7 = vsel %vm343_vm0, 0.0, %v2657_v32  ;;  %v2396_v51 = vpop.f32.mrf.mxu0  ;;  %v2099_v18 = vsel %vm2080_vm10, %v2050_v5, %v12179_v14  ;;  %v2115_v37 = vsel %vm2080_vm10, %v2066_v17, %v12180_v6  ;;  %v12199_v8 = vld [vmem:[#allocation89_spill] sm:$0xff]  ;;  %v12200_v5 = vld [vmem:[#allocation131_spill] sm:$0xff]  ;;  %v12201_v14 = vld [vmem:[#allocation122_spill] sm:$0xff] }
 0x47a   : > { %12163 = vst [vmem:[#allocation143_spill] sm:$0xff] %v7762_v7  ;;  %v2526_v27 = vmul.f32 %v7701_v47, %v2396_v51  ;;  %v2824_v52 = vrot.slane %v7762_v7, 1  ;;  %v2148_v60 = vsel %vm2129_vm9, %v2099_v18, %v12181_v0  ;;  %v2164_v40 = vsel %vm2129_vm9, %v2115_v37, %v12182_v15  ;;  %v12202_v18 = vld [vmem:[#allocation27_spill] sm:$0xff]  ;;  %v12203_v37 = vld [vmem:[#allocation132_spill] sm:$0xff]  ;;  %v12205_v15 = vld [vmem:[#allocation194_spill] sm:$0xff] }
 0x47b   : > { %v2197_v3 = vsel %vm2178_vm12, %v2148_v60, %v7409_v13  ;;  %v2213_v30 = vsel %vm2178_vm12, %v2164_v40, %v1768_v41  ;;  %v1904_v13 = vsel %vm1885_vm5, %v1856_v16, %v12189_v22  ;;  %v1857_v6 = vsel %vm1837_vm4, %v12202_v18, %v12201_v14  ;;  %v12222_v14 = vld [vmem:[#allocation204_spill] sm:$0xff] }
 0x47c   : > { %v2562_v58 = vadd.f32 %v7714_v29, %v2526_v27  ;;  %5041 = vmatmul.msk.f32.gmra.mxu0 %vm2227_vm11, %v2196_v31  ;;  %5057 = vmatmul.msk.f32.gmra.mxu3 %vm2227_vm11, %v2212_v50  ;;  %v2825_v59 = vsel %vm508_vm1, %v12170_v2, %v2824_v52  ;;  %v12188_v27 = vld [vmem:[#allocation53_spill] sm:$0xff]  ;;  %v1953_v34 = vsel %vm1933_vm6, %v1904_v13, %v12191_v62  ;;  %v12211_v13 = vld [vmem:[#allocation323_spill] sm:$0xff] }
 0x47d   : > { %2918 = vrot.lane.b32.xlu1 %v2825_v59, %s5180_s8  ;;  %v12193_v59 = vld [vmem:[#allocation277_spill] sm:$0xff]  ;;  %v1905_v40 = vsel %vm1885_vm5, %v1857_v6, %v12205_v15 }
 0x47e   : > { %v2594_v19 = vmax.f32 %v2562_v58, 0.0  ;;  %v2002_v9 = vsel %vm1982_vm7, %v1953_v34, %v12193_v59  ;;  %v1772_v34 = vpop.permute.xlu0 %1771 }
 0x480   : > { %v2658_v38 = vrot.slane %v2594_v19, 7 }
 0x481   : > { %v2399_v35 = vpop.f32.mrf.mxu0 }
 0x482   : > { %v7810_v48 = vsel %vm343_vm0, %v2657_v32, %v2658_v38  ;;  %v7813_v28 = vsel %vm343_vm0, %v2658_v38, 0.0  ;;  %v1872_v32 = vsel %vm1837_vm4, %v12188_v27, %v12187_v56  ;;  %v12204_v35 = vld [vmem:[#allocation58_spill] sm:$0xff]  ;;  %v12209_v56 = vld [vmem:[#allocation285_spill] sm:$0xff] }
 0x483   : > { %12183 = vst [vmem:[#allocation135_spill] sm:$0xff] %v7810_v48  ;;  %v2826_v24 = vrot.slane %v7810_v48, 1  ;;  %v2828_v51 = vrot.slane %v7813_v28, 1  ;;  %v1920_v63 = vsel %vm1885_vm5, %v1872_v32, %v12190_v49  ;;  %v1873_v0 = vsel %vm1837_vm4, %v12204_v35, %v12203_v37  ;;  %v12210_v32 = vld [vmem:[#allocation305_spill] sm:$0xff]  ;;  %v12223_v37 = vld [vmem:[#allocation244_spill] sm:$0xff] }
 0x484   : > { %12184 = vst [vmem:[#allocation136_spill] sm:$0xff] %v7813_v28  ;;  %5042 = vmatmul.msk.f32.gmra.mxu0 %vm2227_vm11, %v2197_v3  ;;  %5058 = vmatmul.msk.f32.gmra.mxu3 %vm2227_vm11, %v2213_v30  ;;  %v1969_v58 = vsel %vm1933_vm6, %v1920_v63, %v12192_v33  ;;  %v12207_v30 = vld [vmem:[#allocation239_spill] sm:$0xff]  ;;  %v12212_v63 = vld [vmem:[#allocation340_spill] sm:$0xff] }
 0x485   : > { %v7833_v31 = vsel %vm508_vm1, %v2826_v24, %v2828_v51  ;;  %v7836_v50 = vsel %vm508_vm1, %v2824_v52, %v2826_v24  ;;  %v2018_v4 = vsel %vm1982_vm7, %v1969_v58, %v12194_v57  ;;  %v12195_v52 = vld [vmem:[#allocation318_spill] sm:$0xff]  ;;  %v1954_v24 = vsel %vm1933_vm6, %v1905_v40, %v12207_v30  ;;  %v12213_v58 = vld [vmem:[#allocation24_spill] sm:$0xff] }
 0x486   : > { %2922 = vrot.lane.b32.xlu0 %v7833_v31, %s5180_s8  ;;  %2920 = vrot.lane.b32.xlu2 %v7836_v50, %s5180_s8  ;;  %v2051_v55 = vsel %vm2031_vm8, %v2002_v9, %v12195_v52  ;;  %v2067_v25 = vsel %vm2031_vm8, %v2018_v4, %v12196_v61  ;;  %v2003_v27 = vsel %vm1982_vm7, %v1954_v24, %v12209_v56  ;;  %v12214_v9 = vld [vmem:[#allocation54_spill] sm:$0xff]  ;;  %v12215_v52 = vld [vmem:[#allocation107_spill] sm:$0xff] }
 0x487   : > { %v2100_v19 = vsel %vm2080_vm10, %v2051_v55, %v12197_v36  ;;  %v2116_v45 = vsel %vm2080_vm10, %v2067_v25, %v12198_v26  ;;  %v2052_v49 = vsel %vm2031_vm8, %v2003_v27, %v12211_v13  ;;  %v12216_v61 = vld [vmem:[#allocation106_spill] sm:$0xff]  ;;  %v12227_v24 = vld [vmem:[#allocation327_spill] sm:$0xff] }
 0x488   : > { %v2149_v53 = vsel %vm2129_vm9, %v2100_v19, %v12199_v8  ;;  %v2165_v43 = vsel %vm2129_vm9, %v2116_v45, %v12200_v5  ;;  %v2101_v59 = vsel %vm2080_vm10, %v2052_v49, %v12213_v58  ;;  %v12218_v8 = vld [vmem:[#allocation32_spill] sm:$0xff]  ;;  %v12219_v5 = vld [vmem:[#allocation151_spill] sm:$0xff]  ;;  %v12225_v40 = vld [vmem:[#allocation290_spill] sm:$0xff] }
 0x489   : > { %v2401_v54 = vpop.f32.mrf.mxu0  ;;  %v2198_v41 = vsel %vm2178_vm12, %v2149_v53, %v7411_v12  ;;  %v2214_v38 = vsel %vm2178_vm12, %v2165_v43, %v1770_v46  ;;  %v12206_v12 = vld [vmem:[#allocation214_spill] sm:$0xff]  ;;  %v2150_v55 = vsel %vm2129_vm9, %v2101_v59, %v12215_v52  ;;  %v12220_v43 = vld [vmem:[#allocation57_spill] sm:$0xff] }
 0x48a   : > { %v2527_v17 = vmul.f32 %v7701_v47, %v2401_v54  ;;  %v1921_v3 = vsel %vm1885_vm5, %v1873_v0, %v12206_v12  ;;  %v2199_v19 = vsel %vm2178_vm12, %v2150_v55, %v7417_v20  ;;  %v12217_v54 = vld [vmem:[#allocation102_spill] sm:$0xff]  ;;  %v12224_v0 = vld [vmem:[#allocation249_spill] sm:$0xff] }
 0x48b   : > { %v1970_v21 = vsel %vm1933_vm6, %v1921_v3, %v12208_v39  ;;  %v1858_v53 = vsel %vm1837_vm4, %v12218_v8, %v12217_v54  ;;  %v12226_v3 = vld [vmem:[#allocation295_spill] sm:$0xff]  ;;  %v12229_v27 = vld [vmem:[#allocation34_spill] sm:$0xff]  ;;  %v12237_v54 = vld [vmem:[#allocation189_spill] sm:$0xff] }
 0x48c   : > { %v2563_v60 = vadd.f32 %v7714_v29, %v2527_v17  ;;  %5043 = vmatmul.msk.f32.gmra.mxu0 %vm2227_vm11, %v2198_v41  ;;  %5059 = vmatmul.msk.f32.gmra.mxu3 %vm2227_vm11, %v2214_v38  ;;  %v2019_v22 = vsel %vm1982_vm7, %v1970_v21, %v12210_v32  ;;  %v1874_v17 = vsel %vm1837_vm4, %v12220_v43, %v12219_v5  ;;  %v12221_v38 = vld [vmem:[#allocation199_spill] sm:$0xff]  ;;  %v12238_v8 = vld [vmem:[#allocation212_spill] sm:$0xff] }
 0x48d   : > { %v2068_v62 = vsel %vm2031_vm8, %v2019_v22, %v12212_v63  ;;  %v1906_v20 = vsel %vm1885_vm5, %v1858_v53, %v12221_v38  ;;  %v1922_v18 = vsel %vm1885_vm5, %v1874_v17, %v12222_v14  ;;  %v12228_v39 = vld [vmem:[#allocation331_spill] sm:$0xff]  ;;  %v12230_v22 = vld [vmem:[#allocation40_spill] sm:$0xff]  ;;  %v12242_v38 = vld [vmem:[#allocation257_spill] sm:$0xff] }
 0x48e   : > { %v2595_v16 = vmax.f32 %v2563_v60, 0.0  ;;  %v2117_v57 = vsel %vm2080_vm10, %v2068_v62, %v12214_v9  ;;  %v1955_v35 = vsel %vm1933_vm6, %v1906_v20, %v12223_v37  ;;  %v1971_v60 = vsel %vm1933_vm6, %v1922_v18, %v12224_v0  ;;  %v12231_v63 = vld [vmem:[#allocation76_spill] sm:$0xff]  ;;  %v12241_v17 = vld [vmem:[#allocation11_spill] sm:$0xff] }
 0x48f   : > { %v2166_v25 = vsel %vm2129_vm9, %v2117_v57, %v12216_v61  ;;  %v2004_v12 = vsel %vm1982_vm7, %v1955_v35, %v12225_v40  ;;  %v2020_v30 = vsel %vm1982_vm7, %v1971_v60, %v12226_v3  ;;  %v12233_v61 = vld [vmem:[#allocation121_spill] sm:$0xff]  ;;  %v12243_v14 = vld [vmem:[#allocation280_spill] sm:$0xff]  ;;  %v12244_v37 = vld [vmem:[#allocation303_spill] sm:$0xff]  ;;  %v1776_v40 = vpop.permute.xlu2 %1775 }
 0x490   : > { %v2660_v33 = vrot.slane %v2595_v16, 7  ;;  %v2215_v26 = vsel %vm2178_vm12, %v2166_v25, %v1772_v34  ;;  %v2069_v21 = vsel %vm2031_vm8, %v2020_v30, %v12228_v39  ;;  %v1774_v16 = vpop.permute.xlu1 %1773  ;;  %v12232_v34 = vld [vmem:[#allocation118_spill] sm:$0xff]  ;;  %v12234_v25 = vld [vmem:[#allocation31_spill] sm:$0xff] }
 0x491   : > { %v2404_v4 = vpop.f32.mrf.mxu0  ;;  %v2118_v13 = vsel %vm2080_vm10, %v2069_v21, %v12230_v22  ;;  %v12246_v60 = vld [vmem:[#allocation338_spill] sm:$0xff]  ;;  %v12248_v30 = vld [vmem:[#allocation55_spill] sm:$0xff] }
 0x492   : > { %v7900_v46 = vsel %vm343_vm0, 0.0, %v2660_v33  ;;  %v2528_v36 = vmul.f32 %v7701_v47, %v2404_v4  ;;  %v2167_v58 = vsel %vm2129_vm9, %v2118_v13, %v12232_v34  ;;  %v12249_v39 = vld [vmem:[#allocation271_spill] sm:$0xff]  ;;  %v12251_v13 = vld [vmem:[#allocation128_spill] sm:$0xff] }
 0x493   : > { %v2830_v45 = vrot.slane %v7900_v46, 1  ;;  %v2216_v4 = vsel %vm2178_vm12, %v2167_v58, %v1774_v16  ;;  %v12250_v16 = vld [vmem:[#allocation137_spill] sm:$0xff]  ;;  %v12254_v34 = vld [vmem:[#allocation64_spill] sm:$0xff] }
 0x494   : > { %v2564_v41 = vadd.f32 %v7714_v29, %v2528_v36  ;;  %5044 = vmatmul.msk.f32.gmra.mxu0 %vm2227_vm11, %v2199_v19  ;;  %5060 = vmatmul.msk.f32.gmra.mxu3 %vm2227_vm11, %v2215_v26  ;;  %v1859_v36 = vsel %vm1837_vm4, %v12234_v25, %v12233_v61  ;;  %v12235_v19 = vld [vmem:[#allocation158_spill] sm:$0xff]  ;;  %v12236_v26 = vld [vmem:[#allocation59_spill] sm:$0xff] }
 0x495   : > { %v7921_v6 = vsel %vm508_vm1, %v2828_v51, %v2830_v45  ;;  %v2053_v51 = vsel %vm2031_vm8, %v2004_v12, %v12227_v24  ;;  %v12247_v12 = vld [vmem:[#allocation18_spill] sm:$0xff] }
 0x496   : > { %v2596_v15 = vmax.f32 %v2564_v41, 0.0  ;;  %2924 = vrot.lane.b32.xlu1 %v7921_v6, %s5180_s8  ;;  %v2102_v32 = vsel %vm2080_vm10, %v2053_v51, %v12229_v27  ;;  %v12257_v25 = vld [vmem:[#allocation242_spill] sm:$0xff] }
 0x497   : > { %v2151_v62 = vsel %vm2129_vm9, %v2102_v32, %v12231_v63 }
 0x498   : > { %v2661_v56 = vrot.slane %v2596_v15, 7  ;;  %v2200_v57 = vsel %vm2178_vm12, %v2151_v62, %v7442_v44  ;;  %v1907_v44 = vsel %vm1885_vm5, %v1859_v36, %v12237_v54  ;;  %v12253_v62 = vld [vmem:[#allocation138_spill] sm:$0xff]  ;;  %v12259_v54 = vld [vmem:[#allocation288_spill] sm:$0xff] }
 0x499   : > { %v2407_v49 = vpop.f32.mrf.mxu0  ;;  %v1956_v41 = vsel %vm1933_vm6, %v1907_v44, %v12241_v17  ;;  %v1876_v58 = vsel %vm1837_vm4, %v12254_v34, %v12253_v62  ;;  %v12261_v17 = vld [vmem:[#allocation325_spill] sm:$0xff]  ;;  %v12272_v62 = vld [vmem:[#allocation207_spill] sm:$0xff] }
 0x49a   : > { %v7946_v59 = vsel %vm343_vm0, %v2660_v33, %v2661_v56  ;;  %v7949_v9 = vsel %vm343_vm0, %v2661_v56, 0.0  ;;  %v1875_v33 = vsel %vm1837_vm4, %v12236_v26, %v12235_v19  ;;  %v2005_v18 = vsel %vm1982_vm7, %v1956_v41, %v12243_v14  ;;  %v12252_v49 = vld [vmem:[#allocation33_spill] sm:$0xff]  ;;  %v12258_v19 = vld [vmem:[#allocation262_spill] sm:$0xff]  ;;  %v1778_v14 = vpop.permute.xlu0 %1777 }
 0x49b   : > { %v2832_v52 = vrot.slane %v7946_v59, 1  ;;  %v2834_v55 = vrot.slane %v7949_v9, 1  ;;  %v1923_v53 = vsel %vm1885_vm5, %v1875_v33, %v12238_v8  ;;  %v1860_v63 = vsel %vm1837_vm4, %v12252_v49, %v12251_v13  ;;  %v12260_v8 = vld [vmem:[#allocation308_spill] sm:$0xff] }
 0x49c   : > { %5045 = vmatmul.msk.f32.gmra.mxu0 %vm2227_vm11, %v2200_v57  ;;  %5061 = vmatmul.msk.f32.gmra.mxu3 %vm2227_vm11, %v2216_v4  ;;  %v1972_v20 = vsel %vm1933_vm6, %v1923_v53, %v12242_v38  ;;  %v12255_v4 = vld [vmem:[#allocation197_spill] sm:$0xff]  ;;  %v12262_v38 = vld [vmem:[#allocation342_spill] sm:$0xff] }
 0x49d   : > { %v7969_v5 = vsel %vm508_vm1, %v2832_v52, %v2834_v55  ;;  %v7972_v43 = vsel %vm508_vm1, %v2830_v45, %v2832_v52  ;;  %v2021_v35 = vsel %vm1982_vm7, %v1972_v20, %v12244_v37  ;;  %v12245_v45 = vld [vmem:[#allocation320_spill] sm:$0xff]  ;;  %v1908_v52 = vsel %vm1885_vm5, %v1860_v63, %v12255_v4  ;;  %v12263_v37 = vld [vmem:[#allocation30_spill] sm:$0xff] }
 0x49e   : > { %12239 = vst [vmem:[#allocation149_spill] sm:$0xff] %v7969_v5  ;;  %2928 = vrot.lane.b32.xlu0 %v7969_v5, %s5180_s8  ;;  %2926 = vrot.lane.b32.xlu2 %v7972_v43, %s5180_s8  ;;  %v2054_v0 = vsel %vm2031_vm8, %v2005_v18, %v12245_v45  ;;  %v2070_v15 = vsel %vm2031_vm8, %v2021_v35, %v12246_v60  ;;  %v12264_v45 = vld [vmem:[#allocation61_spill] sm:$0xff]  ;;  %v12271_v63 = vld [vmem:[#allocation202_spill] sm:$0xff] }
 0x49f   : > { %12240 = vst [vmem:[#allocation141_spill] sm:$0xff] %v7972_v43  ;;  %v2103_v3 = vsel %vm2080_vm10, %v2054_v0, %v12247_v12  ;;  %v2119_v24 = vsel %vm2080_vm10, %v2070_v15, %v12248_v30  ;;  %v1957_v36 = vsel %vm1933_vm6, %v1908_v52, %v12257_v25  ;;  %v12265_v15 = vld [vmem:[#allocation100_spill] sm:$0xff]  ;;  %v12266_v12 = vld [vmem:[#allocation125_spill] sm:$0xff] }
 0x4a0   : > { %v2152_v21 = vsel %vm2129_vm9, %v2103_v3, %v12249_v39  ;;  %v2168_v56 = vsel %vm2129_vm9, %v2119_v24, %v12250_v16  ;;  %v2006_v44 = vsel %vm1982_vm7, %v1957_v36, %v12259_v54  ;;  %v12267_v16 = vld [vmem:[#allocation108_spill] sm:$0xff]  ;;  %v12276_v25 = vld [vmem:[#allocation293_spill] sm:$0xff] }
 0x4a1   : > { %v2409_v51 = vpop.f32.mrf.mxu0  ;;  %v2201_v32 = vsel %vm2178_vm12, %v2152_v21, %v7432_v11  ;;  %v2217_v22 = vsel %vm2178_vm12, %v2168_v56, %v1776_v40  ;;  %v12256_v11 = vld [vmem:[#allocation217_spill] sm:$0xff]  ;;  %v2055_v41 = vsel %vm2031_vm8, %v2006_v44, %v12261_v17  ;;  %v12275_v52 = vld [vmem:[#allocation252_spill] sm:$0xff]  ;;  %v12280_v17 = vld [vmem:[#allocation39_spill] sm:$0xff] }
 0x4a2   : > { %v2529_v27 = vmul.f32 %v7701_v47, %v2409_v51  ;;  %v1924_v61 = vsel %vm1885_vm5, %v1876_v58, %v12256_v11  ;;  %v2104_v35 = vsel %vm2080_vm10, %v2055_v41, %v12263_v37  ;;  %v12268_v56 = vld [vmem:[#allocation37_spill] sm:$0xff]  ;;  %v12282_v37 = vld [vmem:[#allocation84_spill] sm:$0xff] }
 0x4a3   : > { %v1973_v26 = vsel %vm1933_vm6, %v1924_v61, %v12258_v19  ;;  %v2153_v40 = vsel %vm2129_vm9, %v2104_v35, %v12265_v15  ;;  %v12277_v19 = vld [vmem:[#allocation298_spill] sm:$0xff]  ;;  %v12279_v54 = vld [vmem:[#allocation333_spill] sm:$0xff] }
 0x4a4   : > { %v2565_v57 = vadd.f32 %v7714_v29, %v2529_v27  ;;  %5046 = vmatmul.msk.f32.gmra.mxu0 %vm2227_vm11, %v2201_v32  ;;  %5062 = vmatmul.msk.f32.gmra.mxu3 %vm2227_vm11, %v2217_v22  ;;  %v2022_v53 = vsel %vm1982_vm7, %v1973_v26, %v12260_v8  ;;  %v2202_v51 = vsel %vm2178_vm12, %v2153_v40, %v7453_v10  ;;  %v12269_v32 = vld [vmem:[#allocation157_spill] sm:$0xff]  ;;  %v12270_v22 = vld [vmem:[#allocation63_spill] sm:$0xff]  ;;  %v1780_v8 = vpop.permute.xlu1 %1779 }
 0x4a5   : > { %v2071_v20 = vsel %vm2031_vm8, %v2022_v53, %v12262_v38  ;;  %v1861_v27 = vsel %vm1837_vm4, %v12268_v56, %v12267_v16  ;;  %v1877_v13 = vsel %vm1837_vm4, %v12270_v22, %v12269_v32  ;;  %v12281_v38 = vld [vmem:[#allocation42_spill] sm:$0xff]  ;;  %v12291_v32 = vld [vmem:[#allocation260_spill] sm:$0xff] }
 0x4a6   : > { %v2597_v33 = vmax.f32 %v2565_v57, 0.0  ;;  %v2120_v0 = vsel %vm2080_vm10, %v2071_v20, %v12264_v45  ;;  %v1909_v10 = vsel %vm1885_vm5, %v1861_v27, %v12271_v63  ;;  %v1925_v34 = vsel %vm1885_vm5, %v1877_v13, %v12272_v62  ;;  %v12274_v57 = vld [vmem:[#allocation247_spill] sm:$0xff]  ;;  %v12283_v45 = vld [vmem:[#allocation124_spill] sm:$0xff]  ;;  %v12292_v13 = vld [vmem:[#allocation306_spill] sm:$0xff]  ;;  %v1782_v62 = vpop.permute.xlu2 %1781 }
 0x4a7   : > { %v2169_v3 = vsel %vm2129_vm9, %v2120_v0, %v12266_v12  ;;  %v1958_v4 = vsel %vm1933_vm6, %v1909_v10, %v12274_v57  ;;  %v1974_v11 = vsel %vm1933_vm6, %v1925_v34, %v12275_v52  ;;  %v12293_v63 = vld [vmem:[#allocation341_spill] sm:$0xff]  ;;  %v12294_v34 = vld [vmem:[#allocation56_spill] sm:$0xff] }
 0x4a8   : > { %v2663_v18 = vrot.slane %v2597_v33, 7  ;;  %v2218_v39 = vsel %vm2178_vm12, %v2169_v3, %v1778_v14  ;;  %v2007_v36 = vsel %vm1982_vm7, %v1958_v4, %v12276_v25  ;;  %v2023_v26 = vsel %vm1982_vm7, %v1974_v11, %v12277_v19  ;;  %v12278_v33 = vld [vmem:[#allocation329_spill] sm:$0xff]  ;;  %v12296_v25 = vld [vmem:[#allocation71_spill] sm:$0xff] }
 0x4a9   : > { %v2412_v60 = vpop.f32.mrf.mxu0  ;;  %v2072_v44 = vsel %vm2031_vm8, %v2023_v26, %v12279_v54  ;;  %v12297_v26 = vld [vmem:[#allocation220_spill] sm:$0xff] }
 0x4aa   : > { %v8036_v30 = vsel %vm343_vm0, 0.0, %v2663_v18  ;;  %v2530_v24 = vmul.f32 %v7701_v47, %v2412_v60  ;;  %v2121_v20 = vsel %vm2080_vm10, %v2072_v44, %v12281_v38  ;;  %v1784_v38 = vpop.permute.xlu0 %1783 }
 0x4ab   : > { %v2836_v21 = vrot.slane %v8036_v30, 1  ;;  %v2170_v0 = vsel %vm2129_vm9, %v2121_v20, %v12283_v45  ;;  %v12302_v45 = vld [vmem:[#allocation123_spill] sm:$0xff] }
 0x4ac   : > { %v2566_v49 = vadd.f32 %v7714_v29, %v2530_v24  ;;  %5047 = vmatmul.msk.f32.gmra.mxu0 %vm2227_vm11, %v2202_v51  ;;  %5063 = vmatmul.msk.f32.gmra.mxu3 %vm2227_vm11, %v2218_v39  ;;  %v2219_v12 = vsel %vm2178_vm12, %v2170_v0, %v1780_v8  ;;  %v12286_v51 = vld [vmem:[#allocation164_spill] sm:$0xff]  ;;  %v12287_v39 = vld [vmem:[#allocation65_spill] sm:$0xff] }
 0x4ad   : > { %v8057_v58 = vsel %vm508_vm1, %v2834_v55, %v2836_v21  ;;  %v2056_v55 = vsel %vm2031_vm8, %v2007_v36, %v12278_v33  ;;  %v1878_v16 = vsel %vm1837_vm4, %v12287_v39, %v12286_v51  ;;  %v12304_v39 = vld [vmem:[#allocation162_spill] sm:$0xff] }
 0x4ae   : > { %12273 = vst [vmem:[#allocation142_spill] sm:$0xff] %v8057_v58  ;;  %v2598_v61 = vmax.f32 %v2566_v49, 0.0  ;;  %2930 = vrot.lane.b32.xlu1 %v8057_v58, %s5180_s8  ;;  %v2105_v41 = vsel %vm2080_vm10, %v2056_v55, %v12280_v17  ;;  %v12298_v55 = vld [vmem:[#allocation265_spill] sm:$0xff]  ;;  %v12300_v17 = vld [vmem:[#allocation344_spill] sm:$0xff] }
 0x4af   : > { %v2154_v35 = vsel %vm2129_vm9, %v2105_v41, %v12282_v37 }
 0x4b0   : > { %v2664_v53 = vrot.slane %v2598_v61, 7  ;;  %v2203_v40 = vsel %vm2178_vm12, %v2154_v35, %v7490_v1  ;;  %v12295_v61 = vld [vmem:[#allocation144_spill] sm:$0xff] }
 0x4b1   : > { %v2415_v14 = vpop.f32.mrf.mxu0  ;;  %v1879_v36 = vsel %vm1837_vm4, %v12296_v25, %v12295_v61  ;;  %v12311_v61 = vld [vmem:[#allocation48_spill] sm:$0xff] }
 0x4b2   : > { %v8082_v60 = vsel %vm343_vm0, %v2663_v18, %v2664_v53  ;;  %v8085_v15 = vsel %vm343_vm0, %v2664_v53, 0.0  ;;  %v12288_v18 = vld [vmem:[#allocation215_spill] sm:$0xff]  ;;  %v1927_v33 = vsel %vm1885_vm5, %v1879_v36, %v12297_v26  ;;  %v12301_v14 = vld [vmem:[#allocation62_spill] sm:$0xff] }
 0x4b3   : > { %12284 = vst [vmem:[#allocation155_spill] sm:$0xff] %v8082_v60  ;;  %v2838_v3 = vrot.slane %v8082_v60, 1  ;;  %v2840_v24 = vrot.slane %v8085_v15, 1  ;;  %v1926_v56 = vsel %vm1885_vm5, %v1878_v16, %v12288_v18  ;;  %v1976_v54 = vsel %vm1933_vm6, %v1927_v33, %v12298_v55  ;;  %v12305_v16 = vld [vmem:[#allocation70_spill] sm:$0xff] }
 0x4b4   : > { %12285 = vst [vmem:[#allocation147_spill] sm:$0xff] %v8085_v15  ;;  %5048 = vmatmul.msk.f32.gmra.mxu0 %vm2227_vm11, %v2203_v40  ;;  %5064 = vmatmul.msk.f32.gmra.mxu3 %vm2227_vm11, %v2219_v12  ;;  %v1975_v22 = vsel %vm1933_vm6, %v1926_v56, %v12291_v32  ;;  %v1880_v18 = vsel %vm1837_vm4, %v12305_v16, %v12304_v39  ;;  %v12306_v32 = vld [vmem:[#allocation210_spill] sm:$0xff]  ;;  %v12322_v39 = vld [vmem:[#allocation60_spill] sm:$0xff] }
 0x4b5   : > { %v8100_v27 = vsel %vm508_vm1, %v2838_v3, %v2840_v24  ;;  %v8103_v1 = vsel %vm508_vm1, %v2836_v21, %v2838_v3  ;;  %v2024_v49 = vsel %vm1982_vm7, %v1975_v22, %v12292_v13  ;;  %v1928_v22 = vsel %vm1885_vm5, %v1880_v18, %v12306_v32  ;;  %v12323_v18 = vld [vmem:[#allocation130_spill] sm:$0xff] }
 0x4b6   : > { %12289 = vst [vmem:[#allocation148_spill] sm:$0xff] %v8100_v27  ;;  %2934 = vrot.lane.b32.xlu0 %v8100_v27, %s5180_s8  ;;  %2932 = vrot.lane.b32.xlu2 %v8103_v1, %s5180_s8  ;;  %v2073_v10 = vsel %vm2031_vm8, %v2024_v49, %v12293_v63  ;;  %v12308_v49 = vld [vmem:[#allocation255_spill] sm:$0xff] }
 0x4b7   : > { %12290 = vst [vmem:[#allocation161_spill] sm:$0xff] %v8103_v1  ;;  %v2122_v21 = vsel %vm2080_vm10, %v2073_v10, %v12294_v34  ;;  %v1977_v63 = vsel %vm1933_vm6, %v1928_v22, %v12308_v49  ;;  %v12324_v49 = vld [vmem:[#allocation150_spill] sm:$0xff] }
 0x4b8   : > { %v2171_v4 = vsel %vm2129_vm9, %v2122_v21, %v7247_v23  ;;  %v12299_v23 = vld [vmem:[#allocation310_spill] sm:$0xff] }
 0x4b9   : > { %v2417_v57 = vpop.f32.mrf.mxu0  ;;  %v2220_v11 = vsel %vm2178_vm12, %v2171_v4, %v1782_v62  ;;  %v2025_v8 = vsel %vm1982_vm7, %v1976_v54, %v12299_v23  ;;  %v12309_v62 = vld [vmem:[#allocation301_spill] sm:$0xff]  ;;  %v12315_v23 = vld [vmem:[#allocation72_spill] sm:$0xff] }
 0x4ba   : > { %v2531_v52 = vmul.f32 %v7701_v47, %v2417_v57  ;;  %v2074_v41 = vsel %vm2031_vm8, %v2025_v8, %v12300_v17  ;;  %v2026_v34 = vsel %vm1982_vm7, %v1977_v63, %v12309_v62  ;;  %v12310_v57 = vld [vmem:[#allocation336_spill] sm:$0xff]  ;;  %v12316_v17 = vld [vmem:[#allocation218_spill] sm:$0xff] }
 0x4bb   : > { %v2123_v37 = vsel %vm2080_vm10, %v2074_v41, %v12301_v14  ;;  %v2075_v4 = vsel %vm2031_vm8, %v2026_v34, %v12310_v57  ;;  %v12325_v63 = vld [vmem:[#allocation78_spill] sm:$0xff]  ;;  %v12326_v34 = vld [vmem:[#allocation223_spill] sm:$0xff] }
 0x4bc   : > { %v2567_v19 = vadd.f32 %v7714_v29, %v2531_v52  ;;  %5065 = vmatmul.msk.f32.gmra.mxu3 %vm2227_vm11, %v2220_v11  ;;  %v2172_v0 = vsel %vm2129_vm9, %v2123_v37, %v12302_v45  ;;  %v1786_v52 = vpop.permute.xlu1 %1785  ;;  %v12320_v37 = vld [vmem:[#allocation167_spill] sm:$0xff] }
 0x4bd   : > { %v2221_v3 = vsel %vm2178_vm12, %v2172_v0, %v1784_v38  ;;  %v12321_v0 = vld [vmem:[#allocation343_spill] sm:$0xff] }
 0x4be   : > { %v2599_v44 = vmax.f32 %v2567_v19, 0.0 }
 0x4bf   : > { %v8132_v53 = vpop.f32.mrf.mxu3 }
 0x4c0   : > { %v2666_v20 = vrot.slane %v2599_v44, 7  ;;  %v12314_v44 = vld [vmem:[#allocation170_spill] sm:$0xff] }
 0x4c1   : > { %v2420_v35 = vpop.f32.mrf.mxu0  ;;  %v1881_v8 = vsel %vm1837_vm4, %v12315_v23, %v12314_v44  ;;  %v12330_v44 = vld [vmem:[#allocation68_spill] sm:$0xff] }
 0x4c2   : > { %v8141_v40 = vsel %vm343_vm0, 0.0, %v2666_v20  ;;  %v2532_v12 = vmul.f32 %v7701_v47, %v2420_v35 }
 0x4c3   : > { %12303 = vst [vmem:[#allocation153_spill] sm:$0xff] %v8141_v40  ;;  %v2842_v51 = vrot.slane %v8141_v40, 1 }
 0x4c4   : > { %v2568_v56 = vadd.f32 %v7714_v29, %v2532_v12  ;;  %5066 = vmatmul.msk.f32.gmra.mxu3 %vm2227_vm11, %v2221_v3  ;;  %v1788_v3 = vpop.permute.xlu2 %1787 }
 0x4c5   : > { %v8154_v13 = vsel %vm508_vm1, %v2840_v24, %v2842_v51  ;;  %v2124_v24 = vsel %vm2080_vm10, %v2075_v4, %v12311_v61  ;;  %v12327_v4 = vld [vmem:[#allocation268_spill] sm:$0xff] }
 0x4c6   : > { %12307 = vst [vmem:[#allocation154_spill] sm:$0xff] %v8154_v13  ;;  %v2600_v10 = vmax.f32 %v2568_v56, 0.0  ;;  %2936 = vrot.lane.b32.xlu1 %v8154_v13, %s5180_s8  ;;  %v2173_v36 = vsel %vm2129_vm9, %v2124_v24, %v7245_v42  ;;  %v1929_v42 = vsel %vm1885_vm5, %v1881_v8, %v12316_v17  ;;  %v1790_v8 = vpop.permute.xlu0 %1789 }
 0x4c7   : > { %v2463_v21 = vpop.f32.mrf.mxu3  ;;  %v2222_v33 = vsel %vm2178_vm12, %v2173_v36, %v1786_v52  ;;  %v12329_v36 = vld [vmem:[#allocation346_spill] sm:$0xff] }
 0x4c8   : > { %v2667_v11 = vrot.slane %v2600_v10, 7  ;;  %v1882_v10 = vsel %vm1837_vm4, %v12325_v63, %v12324_v49 }
 0x4c9   : > { %v2423_v25 = vpop.f32.mrf.mxu0  ;;  %v1930_v21 = vsel %vm1885_vm5, %v1882_v10, %v12326_v34  ;;  %v12337_v10 = vld [vmem:[#allocation258_spill] sm:$0xff] }
 0x4ca   : > { %v8169_v19 = vsel %vm343_vm0, %v2666_v20, %v2667_v11  ;;  %v8172_v26 = vsel %vm343_vm0, %v2667_v11, 0.0  ;;  %v12319_v20 = vld [vmem:[#allocation263_spill] sm:$0xff]  ;;  %v1979_v52 = vsel %vm1933_vm6, %v1930_v21, %v12327_v4  ;;  %v12328_v11 = vld [vmem:[#allocation312_spill] sm:$0xff] }
 0x4cb   : > { %12312 = vst [vmem:[#allocation159_spill] sm:$0xff] %v8169_v19  ;;  %v2844_v55 = vrot.slane %v8169_v19, 1  ;;  %v2846_v54 = vrot.slane %v8172_v26, 1  ;;  %v1978_v14 = vsel %vm1933_vm6, %v1929_v42, %v12319_v20  ;;  %v2028_v61 = vsel %vm1982_vm7, %v1979_v52, %v12328_v11  ;;  %v12338_v4 = vld [vmem:[#allocation304_spill] sm:$0xff] }
 0x4cc   : > { %12313 = vst [vmem:[#allocation160_spill] sm:$0xff] %v8172_v26  ;;  %5067 = vmatmul.msk.f32.gmra.mxu3 %vm2227_vm11, %v2222_v33  ;;  %v2027_v35 = vsel %vm1982_vm7, %v1978_v14, %v12320_v37  ;;  %v2077_v33 = vsel %vm2031_vm8, %v2028_v61, %v12329_v36  ;;  %v12331_v14 = vld [vmem:[#allocation129_spill] sm:$0xff]  ;;  %v12339_v61 = vld [vmem:[#allocation339_spill] sm:$0xff] }
 0x4cd   : > { %v8184_v41 = vsel %vm508_vm1, %v2844_v55, %v2846_v54  ;;  %v8187_v38 = vsel %vm508_vm1, %v2842_v51, %v2844_v55  ;;  %v2076_v12 = vsel %vm2031_vm8, %v2027_v35, %v12321_v0  ;;  %v2126_v23 = vsel %vm2080_vm10, %v2077_v33, %v12330_v44 }
 0x4ce   : > { %12317 = vst [vmem:[#allocation165_spill] sm:$0xff] %v8184_v41  ;;  %2940 = vrot.lane.b32.xlu0 %v8184_v41, %s5180_s8  ;;  %2938 = vrot.lane.b32.xlu2 %v8187_v38, %s5180_s8  ;;  %v2125_v51 = vsel %vm2080_vm10, %v2076_v12, %v12322_v39  ;;  %v2175_v37 = vsel %vm2129_vm9, %v2126_v23, %v12331_v14 }
 0x4cf   : > { %12318 = vst [vmem:[#allocation166_spill] sm:$0xff] %v8187_v38  ;;  %v2465_v45 = vpop.f32.mrf.mxu3  ;;  %v2174_v56 = vsel %vm2129_vm9, %v2125_v51, %v12323_v18  ;;  %v12333_v51 = vld [vmem:[#allocation168_spill] sm:$0xff] }
 0x4d0   : > { %v2543_v32 = vmul.f32 %v7701_v47, %v2465_v45  ;;  %v2223_v62 = vsel %vm2178_vm12, %v2174_v56, %v1788_v3  ;;  %v2224_v3 = vsel %vm2178_vm12, %v2175_v37, %v1790_v8 }
 0x4d1   : > { %v2425_v16 = vpop.f32.mrf.mxu0 }
 0x4d2   : > { %v2533_v22 = vmul.f32 %v7701_v47, %v2425_v16  ;;  %v2579_v24 = vadd.f32 %v7714_v29, %v2543_v32  ;;  %v12334_v16 = vld [vmem:[#allocation77_spill] sm:$0xff] }
 0x4d3   : > { %v1883_v18 = vsel %vm1837_vm4, %v12334_v16, %v12333_v51 }
 0x4d4   : > { %v2569_v57 = vadd.f32 %v7714_v29, %v2533_v22  ;;  %5068 = vmatmul.msk.f32.gmra.mxu3 %vm2227_vm11, %v2223_v62  ;;  %v2611_v35 = vmax.f32 %v2579_v24, 0.0  ;;  %v12335_v22 = vld [vmem:[#allocation213_spill] sm:$0xff] }
 0x4d5   : > { %v1931_v49 = vsel %vm1885_vm5, %v1883_v18, %v12335_v22  ;;  %v12348_v22 = vld [vmem:[#allocation173_spill] sm:$0xff] }
 0x4d6   : > { %v2601_v25 = vmax.f32 %v2569_v57, 0.0  ;;  %v1980_v62 = vsel %vm1933_vm6, %v1931_v49, %v12337_v10  ;;  %v8244_v34 = vrot.slane %v2611_v35, 7 }
 0x4d7   : > { %v2468_v55 = vpop.f32.mrf.mxu3  ;;  %v2029_v52 = vsel %vm1982_vm7, %v1980_v62, %v12338_v4  ;;  %v12349_v62 = vld [vmem:[#allocation345_spill] sm:$0xff] }
 0x4d8   : > { %v2669_v17 = vrot.slane %v2601_v25, 7  ;;  %v2544_v42 = vmul.f32 %v7701_v47, %v2468_v55  ;;  %v2078_v24 = vsel %vm2031_vm8, %v2029_v52, %v12339_v61 }
 0x4d9   : > { %v2428_v20 = vpop.f32.mrf.mxu0  ;;  %v2127_v36 = vsel %vm2080_vm10, %v2078_v24, %v12330_v44 }
 0x4da   : > { %v8226_v45 = vsel %vm343_vm0, 0.0, %v2669_v17  ;;  %v2580_v0 = vadd.f32 %v7714_v29, %v2544_v42  ;;  %v2534_v12 = vmul.f32 %v7701_v47, %v2428_v20  ;;  %v2176_v42 = vsel %vm2129_vm9, %v2127_v36, %v12331_v14 }
 0x4db   : > { %12332 = vst [vmem:[#allocation171_spill] sm:$0xff] %v8226_v45  ;;  %v2848_v39 = vrot.slane %v8226_v45, 1  ;;  %v2225_v20 = vsel %vm2178_vm12, %v2176_v42, %v1790_v8 }
 0x4dc   : > { %v2612_v56 = vmax.f32 %v2580_v0, 0.0  ;;  %v2570_v32 = vadd.f32 %v7714_v29, %v2534_v12  ;;  %5069 = vmatmul.msk.f32.gmra.mxu3 %vm2227_vm11, %v2224_v3  ;;  %v12342_v0 = vld [vmem:[#allocation176_spill] sm:$0xff]  ;;  %v12343_v12 = vld [vmem:[#allocation79_spill] sm:$0xff] }
 0x4dd   : > { %v8240_v63 = vsel %vm508_vm1, %v2846_v54, %v2848_v39  ;;  %v1884_v3 = vsel %vm1837_vm4, %v12343_v12, %v12342_v0 }
 0x4de   : > { %12336 = vst [vmem:[#allocation172_spill] sm:$0xff] %v8240_v63  ;;  %v8246_v21 = vrot.slane %v2612_v56, 7  ;;  %v2602_v57 = vmax.f32 %v2570_v32, 0.0  ;;  %2942 = vrot.lane.b32.xlu1 %v8240_v63, %s5180_s8  ;;  %v12347_v56 = vld [vmem:[#allocation266_spill] sm:$0xff] }
 0x4df   : > { %v2471_v11 = vpop.f32.mrf.mxu3 }
 0x4e0   : > { %v8257_v54 = vsel %vm343_vm0, %v8244_v34, %v8246_v21  ;;  %v2670_v25 = vrot.slane %v2602_v57, 7 }
 0x4e1   : > { %v2431_v33 = vpop.f32.mrf.mxu0 }
 0x4e2   : > { %v8262_v55 = vsel %vm343_vm0, %v2669_v17, %v2670_v25  ;;  %v8265_v23 = vsel %vm343_vm0, %v2670_v25, 0.0  ;;  %v12344_v17 = vld [vmem:[#allocation221_spill] sm:$0xff] }
 0x4e3   : > { %12340 = vst [vmem:[#allocation80_spill] sm:$0xff] %v8262_v55  ;;  %v2850_v37 = vrot.slane %v8262_v55, 1  ;;  %v2852_v35 = vrot.slane %v8265_v23, 1  ;;  %v1932_v51 = vsel %vm1885_vm5, %v1884_v3, %v12344_v17 }
 0x4e4   : > { %12341 = vst [vmem:[#allocation226_spill] sm:$0xff] %v8265_v23  ;;  %5070 = vmatmul.msk.f32.gmra.mxu3 %vm2227_vm11, %v2225_v20  ;;  %v1981_v32 = vsel %vm1933_vm6, %v1932_v51, %v12347_v56 }
 0x4e5   : > { %v8279_v16 = vsel %vm508_vm1, %v2850_v37, %v2852_v35  ;;  %v8282_v18 = vsel %vm508_vm1, %v2848_v39, %v2850_v37  ;;  %v2030_v49 = vsel %vm1982_vm7, %v1981_v32, %v12348_v22 }
 0x4e6   : > { %12345 = vst [vmem:[#allocation270_spill] sm:$0xff] %v8279_v16  ;;  %2946 = vrot.lane.b32.xlu0 %v8279_v16, %s5180_s8  ;;  %2944 = vrot.lane.b32.xlu2 %v8282_v18, %s5180_s8  ;;  %v2079_v57 = vsel %vm2031_vm8, %v2030_v49, %v12349_v62 }
 0x4e7   : > { %12346 = vst [vmem:[#allocation177_spill] sm:$0xff] %v8282_v18  ;;  %v2473_v10 = vpop.f32.mrf.mxu3  ;;  %v2128_v39 = vsel %vm2080_vm10, %v2079_v57, %v12330_v44 }
 0x4e8   : > { %v2545_v52 = vmul.f32 %v7701_v47, %v2473_v10  ;;  %v2177_v61 = vsel %vm2129_vm9, %v2128_v39, %v12331_v14 }
 0x4e9   : > { %v2433_v4 = vpop.f32.mrf.mxu0  ;;  %v2226_v24 = vsel %vm2178_vm12, %v2177_v61, %v1790_v8 }
 0x4ea   : > { %v2535_v11 = vmul.f32 %v7701_v47, %v2433_v4  ;;  %v2581_v36 = vadd.f32 %v7714_v29, %v2545_v52 }
 0x4ec   : > { %v2571_v25 = vadd.f32 %v7714_v29, %v2535_v11  ;;  %5071 = vmatmul.msk.f32.gmra.mxu3 %vm2227_vm11, %v2226_v24  ;;  %v2613_v0 = vmax.f32 %v2581_v36, 0.0 }
 0x4ee   : > { %v2603_v33 = vmax.f32 %v2571_v25, 0.0  ;;  %v8315_v32 = vrot.slane %v2613_v0, 7 }
 0x4ef   : > { %v2476_v42 = vpop.f32.mrf.mxu3 }
 0x4f0   : > { %v2672_v20 = vrot.slane %v2603_v33, 7  ;;  %v2546_v44 = vmul.f32 %v7701_v47, %v2476_v42 }
 0x4f1   : > { %v2436_v37 = vpop.f32.mrf.mxu0 }
 0x4f2   : > { %v8306_v12 = vsel %vm343_vm0, 0.0, %v2672_v20  ;;  %v2582_v14 = vadd.f32 %v7714_v29, %v2546_v44  ;;  %v2536_v8 = vmul.f32 %v7701_v47, %v2436_v37 }
 0x4f3   : > { %12350 = vst [vmem:[#allocation178_spill] sm:$0xff] %v8306_v12  ;;  %v2854_v3 = vrot.slane %v8306_v12, 1 }
 0x4f4   : > { %v2614_v17 = vmax.f32 %v2582_v14, 0.0  ;;  %v2572_v51 = vadd.f32 %v7714_v29, %v2536_v8 }
 0x4f5   : > { %v8313_v56 = vsel %vm508_vm1, %v2852_v35, %v2854_v3 }
 0x4f6   : > { %12351 = vst [vmem:[#allocation216_spill] sm:$0xff] %v8313_v56  ;;  %v8317_v22 = vrot.slane %v2614_v17, 7  ;;  %v2604_v49 = vmax.f32 %v2572_v51, 0.0  ;;  %2948 = vrot.lane.b32.xlu1 %v8313_v56, %s5180_s8 }
 0x4f7   : > { %v2479_v10 = vpop.f32.mrf.mxu3 }
 0x4f8   : > { %v8324_v62 = vsel %vm343_vm0, %v8315_v32, %v8317_v22  ;;  %v2673_v57 = vrot.slane %v2604_v49, 7 }
 0x4f9   : > { %v2439_v39 = vpop.f32.mrf.mxu0 }
 0x4fa   : > { %v8327_v4 = vsel %vm343_vm0, %v2672_v20, %v2673_v57  ;;  %v8330_v35 = vsel %vm343_vm0, %v2673_v57, 0.0 }
 0x4fb   : > { %12352 = vst [vmem:[#allocation261_spill] sm:$0xff] %v8327_v4  ;;  %v2856_v52 = vrot.slane %v8327_v4, 1  ;;  %v2858_v11 = vrot.slane %v8330_v35, 1 }
 0x4fc   : > { %12353 = vst [vmem:[#allocation307_spill] sm:$0xff] %v8330_v35 }
 0x4fd   : > { %v8335_v61 = vsel %vm508_vm1, %v2856_v52, %v2858_v11  ;;  %v8338_v24 = vsel %vm508_vm1, %v2854_v3, %v2856_v52 }
 0x4fe   : > { %12354 = vst [vmem:[#allocation315_spill] sm:$0xff] %v8335_v61  ;;  %2952 = vrot.lane.b32.xlu0 %v8335_v61, %s5180_s8  ;;  %2950 = vrot.lane.b32.xlu2 %v8338_v24, %s5180_s8 }
 0x4ff   : > { %12355 = vst [vmem:[#allocation87_spill] sm:$0xff] %v8338_v24  ;;  %v2481_v25 = vpop.f32.mrf.mxu3 }
 0x500   : > { %v2547_v33 = vmul.f32 %v7701_v47, %v2481_v25 }
 0x501   : > { %v2441_v36 = vpop.f32.mrf.mxu0 }
 0x502   : > { %v2537_v42 = vmul.f32 %v7701_v47, %v2441_v36  ;;  %v2583_v44 = vadd.f32 %v7714_v29, %v2547_v33 }
 0x504   : > { %v2573_v20 = vadd.f32 %v7714_v29, %v2537_v42  ;;  %v2615_v17 = vmax.f32 %v2583_v44, 0.0 }
 0x506   : > { %v2605_v37 = vmax.f32 %v2573_v20, 0.0  ;;  %v8359_v36 = vrot.slane %v2615_v17, 7 }
 0x507   : > { %v2484_v0 = vpop.f32.mrf.mxu3 }
 0x508   : > { %v2675_v14 = vrot.slane %v2605_v37, 7  ;;  %v2548_v8 = vmul.f32 %v7701_v47, %v2484_v0 }
 0x509   : > { %v2444_v3 = vpop.f32.mrf.mxu0 }
 0x50a   : > { %v8350_v51 = vsel %vm343_vm0, 0.0, %v2675_v14  ;;  %v2584_v49 = vadd.f32 %v7714_v29, %v2548_v8  ;;  %v2538_v10 = vmul.f32 %v7701_v47, %v2444_v3 }
 0x50b   : > { %12356 = vst [vmem:[#allocation174_spill] sm:$0xff] %v8350_v51  ;;  %v2860_v57 = vrot.slane %v8350_v51, 1 }
 0x50c   : > { %v2616_v39 = vmax.f32 %v2584_v49, 0.0  ;;  %v2574_v52 = vadd.f32 %v7714_v29, %v2538_v10 }
 0x50d   : > { %v8357_v25 = vsel %vm508_vm1, %v2858_v11, %v2860_v57 }
 0x50e   : > { %12357 = vst [vmem:[#allocation224_spill] sm:$0xff] %v8357_v25  ;;  %v8361_v33 = vrot.slane %v2616_v39, 7  ;;  %v2606_v42 = vmax.f32 %v2574_v52, 0.0  ;;  %2954 = vrot.lane.b32.xlu1 %v8357_v25, %s5180_s8 }
 0x50f   : > { %v2487_v20 = vpop.f32.mrf.mxu3 }
 0x510   : > { %v8368_v44 = vsel %vm343_vm0, %v8359_v36, %v8361_v33  ;;  %v2676_v37 = vrot.slane %v2606_v42, 7 }
 0x511   : > { %12358 = vst [vmem:[#allocation82_spill] sm:$0xff] %v8368_v44  ;;  %v2447_v0 = vpop.f32.mrf.mxu0 }
 0x512   : > { %v8371_v8 = vsel %vm343_vm0, %v2675_v14, %v2676_v37  ;;  %v8374_v11 = vsel %vm343_vm0, %v2676_v37, 0.0 }
 0x513   : > { %12359 = vst [vmem:[#allocation313_spill] sm:$0xff] %v8371_v8  ;;  %v2862_v3 = vrot.slane %v8371_v8, 1  ;;  %v2864_v17 = vrot.slane %v8374_v11, 1 }
 0x514   : > { %12360 = vst [vmem:[#allocation88_spill] sm:$0xff] %v8374_v11 }
 0x515   : > { %v8379_v49 = vsel %vm508_vm1, %v2862_v3, %v2864_v17  ;;  %v8382_v10 = vsel %vm508_vm1, %v2860_v57, %v2862_v3 }
 0x516   : > { %12361 = vst [vmem:[#allocation4_spill] sm:$0xff] %v8379_v49  ;;  %2958 = vrot.lane.b32.xlu0 %v8379_v49, %s5180_s8  ;;  %2956 = vrot.lane.b32.xlu2 %v8382_v10, %s5180_s8 }
 0x517   : > { %12362 = vst [vmem:[#allocation181_spill] sm:$0xff] %v8382_v10  ;;  %v2489_v14 = vpop.f32.mrf.mxu3 }
 0x519   : > { %v2449_v39 = vpop.f32.mrf.mxu0 }
 0x51a   : > { %v2539_v52 = vmul.f32 %v7701_v47, %v2449_v39 }
 0x51c   : > { %v2575_v42 = vadd.f32 %v7714_v29, %v2539_v52  ;;  %v2542_v52 = vmul.f32 %v7701_v47, %v8132_v53 }
 0x51e   : > { %v2607_v20 = vmax.f32 %v2575_v42, 0.0 }
 0x51f   : > { %v2492_v37 = vpop.f32.mrf.mxu3 }
 0x520   : > { %v2678_v0 = vrot.slane %v2607_v20, 7 }
 0x521   : > { %v2452_v2 = vpop.f32.mrf.mxu0 }
 0x522   : > { %v8391_v61 = vsel %vm343_vm0, 0.0, %v2678_v0  ;;  %v2540_v57 = vmul.f32 %v7701_v47, %v2452_v2 }
 0x523   : > { %v2866_v3 = vrot.slane %v8391_v61, 1 }
 0x524   : > { %v2576_v49 = vadd.f32 %v7714_v29, %v2540_v57 }
 0x525   : > { %v8397_v10 = vsel %vm508_vm1, %v2864_v17, %v2866_v3 }
 0x526   : > { %12363 = vst [vmem:[#allocation229_spill] sm:$0xff] %v8397_v10  ;;  %v2608_v24 = vmax.f32 %v2576_v49, 0.0  ;;  %2960 = vrot.lane.b32.xlu1 %v8397_v10, %s5180_s8  ;;  %v2578_v49 = vadd.f32 %v7714_v29, %v2542_v52 }
 0x527   : > { %v2495_v39 = vpop.f32.mrf.mxu3 }
 0x528   : > { %v2679_v42 = vrot.slane %v2608_v24, 7  ;;  %v2610_v24 = vmax.f32 %v2578_v49, 0.0 }
 0x529   : > { %v2455_v20 = vpop.f32.mrf.mxu0 }
 0x52a   : > { %v8404_v25 = vsel %vm343_vm0, %v2678_v0, %v2679_v42  ;;  %v8407_v2 = vsel %vm343_vm0, %v2679_v42, 0.0  ;;  %v2682_v20 = vrot.slane %v2610_v24, 7 }
 0x52b   : > { %12364 = vst [vmem:[#allocation275_spill] sm:$0xff] %v8404_v25  ;;  %v2868_v57 = vrot.slane %v8404_v25, 1  ;;  %v2870_v17 = vrot.slane %v8407_v2, 1 }
 0x52c   : > { %12365 = vst [vmem:[#allocation92_spill] sm:$0xff] %v8407_v2  ;;  %v8425_v56 = vsel %vm343_vm0, %v2682_v20, 0.0 }
 0x52d   : > { %v8413_v10 = vsel %vm508_vm1, %v2868_v57, %v2870_v17  ;;  %v8416_v39 = vsel %vm508_vm1, %v2866_v3, %v2868_v57  ;;  %12368 = vst [vmem:[#allocation219_spill] sm:$0xff] %v8425_v56  ;;  %v2876_v24 = vrot.slane %v8425_v56, 1 }
 0x52e   : > { %12366 = vst [vmem:[#allocation5_spill] sm:$0xff] %v8413_v10  ;;  %2964 = vrot.lane.b32.xlu0 %v8413_v10, %s5180_s8  ;;  %2962 = vrot.lane.b32.xlu2 %v8416_v39, %s5180_s8 }
 0x52f   : > { %12367 = vst [vmem:[#allocation163_spill] sm:$0xff] %v8416_v39  ;;  %v2497_v53 = vpop.f32.mrf.mxu3 }
 0x531   : > { %v2457_v0 = vpop.f32.mrf.mxu0 }
 0x532   : > { %v2541_v42 = vmul.f32 %v7701_v47, %v2457_v0  ;;  %v8438_v0 = vsel %vm343_vm0, 0.0, %v8244_v34 }
 0x534   : > { %v2577_v52 = vadd.f32 %v7714_v29, %v2541_v42  ;;  %v8442_v42 = vsel %vm343_vm0, %v8246_v21, 0.0  ;;  %v2878_v21 = vrot.slane %v8438_v0, 1 }
 0x536   : > { %v2609_v16 = vmax.f32 %v2577_v52, 0.0  ;;  %v8463_v41 = vsel %vm508_vm1, %v2876_v24, %v2878_v21 }
 0x537   : > { %v2500_v18 = vpop.f32.mrf.mxu3  ;;  %12374 = vst [vmem:[#allocation227_spill] sm:$0xff] %v8463_v41 }
 0x538   : > { %v2681_v3 = vrot.slane %v2609_v16, 7 }
 0x53a   : > { %v8428_v57 = vsel %vm343_vm0, %v2681_v3, %v2682_v20  ;;  %v8431_v10 = vsel %vm343_vm0, 0.0, %v2681_v3  ;;  %v2882_v3 = vrot.slane %v8442_v42, 1 }
 0x53b   : > { %12369 = vst [vmem:[#allocation264_spill] sm:$0xff] %v8428_v57  ;;  %v2872_v49 = vrot.slane %v8431_v10, 1  ;;  %v2874_v39 = vrot.slane %v8428_v57, 1 }
 0x53c   : > { %12370 = vst [vmem:[#allocation309_spill] sm:$0xff] %v8431_v10 }
 0x53d   : > { %v8445_v16 = vsel %vm508_vm1, %v2870_v17, %v2872_v49  ;;  %v8448_v20 = vsel %vm508_vm1, %v2874_v39, %v2876_v24  ;;  %v8451_v52 = vsel %vm508_vm1, %v2872_v49, %v2874_v39  ;;  %v2880_v17 = vrot.slane %v8257_v54, 1 }
 0x53e   : > { %12371 = vst [vmem:[#allocation66_spill] sm:$0xff] %v8445_v16  ;;  %2966 = vrot.lane.b32.xlu1 %v8445_v16, %s5180_s8  ;;  %2970 = vrot.lane.b32.xlu0 %v8448_v20, %s5180_s8  ;;  %v8470_v49 = vsel %vm343_vm0, 0.0, %v8315_v32  ;;  %v2886_v16 = vrot.slane %v8324_v62, 1 }
 0x53f   : > { %12372 = vst [vmem:[#allocation3_spill] sm:$0xff] %v8448_v20  ;;  %2968 = vrot.lane.b32.xlu2 %v8451_v52, %s5180_s8  ;;  %v2503_v34 = vpop.f32.mrf.mxu3  ;;  %v8466_v39 = vsel %vm508_vm1, %v2880_v17, %v2882_v3  ;;  %v8474_v20 = vsel %vm343_vm0, %v8317_v22, 0.0  ;;  %v8483_v24 = vsel %vm508_vm1, %v2878_v21, %v2880_v17  ;;  %v2884_v22 = vrot.slane %v8470_v49, 1 }
 0x540   : > { %12373 = vst [vmem:[#allocation179_spill] sm:$0xff] %v8451_v52  ;;  %v2549_v34 = vmul.f32 %v7701_v47, %v2489_v14  ;;  %v2550_v52 = vmul.f32 %v7701_v47, %v2492_v37  ;;  %v2888_v14 = vrot.slane %v8474_v20, 1 }
 0x541   : > { %12375 = vst [vmem:[#allocation273_spill] sm:$0xff] %v8466_v39  ;;  %v8497_v21 = vsel %vm508_vm1, %v2882_v3, %v2884_v22 }
 0x542   : > { %12376 = vst [vmem:[#allocation73_spill] sm:$0xff] %v8474_v20  ;;  %v2585_v47 = vadd.f32 %v7714_v29, %v2549_v34  ;;  %v2586_v37 = vadd.f32 %v7714_v29, %v2550_v52  ;;  %v8500_v17 = vsel %vm508_vm1, %v2886_v16, %v2888_v14  ;;  %v8509_v29 = vld [vmem:[%s10979_s2] ss:$0 sm:$0xff] }
 0x543   : > { %12377 = vst [vmem:[#allocation184_spill] sm:$0xff] %v8483_v24  ;;  %v2552_v52 = vmul.f32 %v8509_v29, %v2500_v18 }
 0x544   : > { %12379 = vst [vmem:[#allocation95_spill] sm:$0xff] %v8497_v21  ;;  %v2618_v38 = vmax.f32 %v2586_v37, 0.0 }
 0x545   : > { %12380 = vst [vmem:[#allocation91_spill] sm:$0xff] %v8500_v17 }
 0x546   : > { %2972 = vrot.lane.b32.xlu1 %v8463_v41, %s5180_s8  ;;  %2976 = vrot.lane.b32.xlu0 %v8466_v39, %s5180_s8  ;;  %v8494_v39 = vsel %vm343_vm0, 0.0, %v8359_v36  ;;  %v2617_v41 = vmax.f32 %v2585_v47, 0.0  ;;  %v2551_v36 = vmul.f32 %v8509_v29, %v2497_v53  ;;  %v2892_v47 = vrot.slane %v8368_v44, 1 }
 0x547   : > { %2974 = vrot.lane.b32.xlu2 %v8483_v24, %s5180_s8  ;;  %v2505_v32 = vpop.f32.mrf.mxu3  ;;  %12378 = vst [vmem:[#allocation232_spill] sm:$0xff] %v8494_v39  ;;  %v8504_v24 = vsel %vm343_vm0, %v8361_v33, 0.0  ;;  %v8518_v33 = vsel %vm508_vm1, %v2884_v22, %v2886_v16  ;;  %v2890_v34 = vrot.slane %v8494_v39, 1  ;;  %v2694_v37 = vrot.slane %v2618_v38, 7 }
 0x548   : > { %12381 = vst [vmem:[#allocation6_spill] sm:$0xff] %v8504_v24  ;;  %v2894_v53 = vrot.slane %v8504_v24, 1  ;;  %v2693_v18 = vrot.slane %v2617_v41, 7 }
 0x549   : > { %12382 = vst [vmem:[#allocation169_spill] sm:$0xff] %v8518_v33  ;;  %v8529_v16 = vsel %vm508_vm1, %v2888_v14, %v2890_v34  ;;  %v8541_v38 = vsel %vm508_vm1, %v2890_v34, %v2892_v47  ;;  %v8544_v1 = vsel %vm343_vm0, %v2694_v37, 0.0  ;;  %v2553_v14 = vmul.f32 %v8509_v29, %v2505_v32  ;;  %v8554_v34 = vpop.permute.xlu2 %2920 }
 0x54a   : > { %12383 = vst [vmem:[#allocation222_spill] sm:$0xff] %v8529_v16  ;;  %v8532_v22 = vsel %vm508_vm1, %v2892_v47, %v2894_v53  ;;  %v8538_v27 = vsel %vm343_vm0, %v2693_v18, %v2694_v37  ;;  %v2900_v32 = vrot.slane %v8544_v1, 1 }
 0x54b   : > { %12384 = vst [vmem:[#allocation267_spill] sm:$0xff] %v8532_v22 }
 0x54c   : > { %12386 = vst [vmem:[#allocation98_spill] sm:$0xff] %v8538_v27 }
 0x54d   : > { %12387 = vst [vmem:[#allocation7_spill] sm:$0xff] %v8541_v38 }
 0x54e   : > { %2978 = vrot.lane.b32.xlu1 %v8497_v21, %s5180_s8  ;;  %2982 = vrot.lane.b32.xlu0 %v8500_v17, %s5180_s8  ;;  %v5169_v21 = vld [vmem:[%s10980_s3] ss:$0 sm:$0xff]  ;;  %12388 = vst [vmem:[#allocation182_spill] sm:$0xff] %v8544_v1 }
 0x54f   : > { %2980 = vrot.lane.b32.xlu2 %v8518_v33, %s5180_s8  ;;  %v2508_v3 = vpop.f32.mrf.mxu3  ;;  %v2587_v17 = vadd.f32 %v5169_v21, %v2551_v36  ;;  %v2588_v63 = vadd.f32 %v5169_v21, %v2552_v52  ;;  %v8535_v33 = vsel %vm343_vm0, 0.0, %v2693_v18  ;;  %12389 = vst [vmem:[#allocation230_spill] sm:$0xff] %v8554_v34  ;;  %v2589_v37 = vadd.f32 %v5169_v21, %v2553_v14 }
 0x550   : > { %12385 = vst [vmem:[#allocation311_spill] sm:$0xff] %v8535_v33  ;;  %v2554_v52 = vmul.f32 %v8509_v29, %v2508_v3  ;;  %v2896_v18 = vrot.slane %v8535_v33, 1 }
 0x551   : > { %v2619_v41 = vmax.f32 %v2587_v17, 0.0  ;;  %v2620_v36 = vmax.f32 %v2588_v63, 0.0  ;;  %v2898_v63 = vrot.slane %v8538_v27, 1 }
 0x552   : > { %v2590_v13 = vadd.f32 %v5169_v21, %v2554_v52 }
 0x553   : > { %v2696_v47 = vrot.slane %v2619_v41, 7  ;;  %v2697_v3 = vrot.slane %v2620_v36, 7  ;;  %v8569_v41 = vsel %vm508_vm1, %v2896_v18, %v2898_v63  ;;  %v2621_v36 = vmax.f32 %v2589_v37, 0.0 }
 0x554   : > { %12393 = vst [vmem:[#allocation187_spill] sm:$0xff] %v8569_v41  ;;  %v2622_v14 = vmax.f32 %v2590_v13, 0.0 }
 0x555   : > { %v8572_v34 = vsel %vm343_vm0, %v2696_v47, %v2697_v3 }
 0x556   : > { %2984 = vrot.lane.b32.xlu1 %v8529_v16, %s5180_s8  ;;  %2988 = vrot.lane.b32.xlu0 %v8532_v22, %s5180_s8  ;;  %v8560_v16 = vsel %vm343_vm0, 0.0, %v2696_v47  ;;  %v8563_v22 = vsel %vm508_vm1, %v2894_v53, %v2896_v18  ;;  %12394 = vst [vmem:[#allocation192_spill] sm:$0xff] %v8572_v34  ;;  %v8584_v18 = vpop.permute.xlu2 %2926  ;;  %v2700_v37 = vrot.slane %v2622_v14, 7 }
 0x557   : > { %2986 = vrot.lane.b32.xlu2 %v8541_v38, %s5180_s8  ;;  %v2511_v17 = vpop.f32.mrf.mxu3  ;;  %12390 = vst [vmem:[#allocation93_spill] sm:$0xff] %v8560_v16  ;;  %v8575_v38 = vsel %vm343_vm0, %v2697_v3, 0.0  ;;  %v2902_v47 = vrot.slane %v8560_v16, 1  ;;  %v2699_v3 = vrot.slane %v2621_v36, 7 }
 0x558   : > { %12391 = vst [vmem:[#allocation81_spill] sm:$0xff] %v8563_v22  ;;  %v8566_v17 = vsel %vm508_vm1, %v2898_v63, %v2900_v32  ;;  %v2904_v63 = vrot.slane %v8572_v34, 1  ;;  %v2906_v13 = vrot.slane %v8575_v38, 1  ;;  %v8605_v58 = vsel %vm343_vm0, %v2700_v37, 0.0 }
 0x559   : > { %12392 = vst [vmem:[#allocation127_spill] sm:$0xff] %v8566_v17  ;;  %v8590_v5 = vsel %vm508_vm1, %v2900_v32, %v2902_v47 }
 0x55a   : > { %12395 = vst [vmem:[#allocation234_spill] sm:$0xff] %v8575_v38 }
 0x55b   : > { %12396 = vst [vmem:[#allocation237_spill] sm:$0xff] %v8584_v18  ;;  %v8602_v18 = vsel %vm343_vm0, %v2699_v3, %v2700_v37 }
 0x55c   : > { %12397 = vst [vmem:[#allocation278_spill] sm:$0xff] %v8590_v5 }
 0x55d   : > { %12401 = vst [vmem:[#allocation134_spill] sm:$0xff] %v8602_v18 }
 0x55e   : > { %2990 = vrot.lane.b32.xlu1 %v8563_v22, %s5180_s8  ;;  %2994 = vrot.lane.b32.xlu0 %v8566_v17, %s5180_s8  ;;  %v8593_v17 = vsel %vm508_vm1, %v2904_v63, %v2906_v13  ;;  %12402 = vst [vmem:[#allocation175_spill] sm:$0xff] %v8605_v58 }
 0x55f   : > { %2992 = vrot.lane.b32.xlu2 %v8569_v41, %s5180_s8  ;;  %v2513_v53 = vpop.f32.mrf.mxu3  ;;  %12398 = vst [vmem:[#allocation283_spill] sm:$0xff] %v8593_v17  ;;  %v8596_v41 = vsel %vm508_vm1, %v2902_v47, %v2904_v63  ;;  %v2910_v63 = vrot.slane %v8602_v18, 1 }
 0x560   : > { %v2555_v52 = vmul.f32 %v8509_v29, %v2513_v53  ;;  %12399 = vst [vmem:[#allocation97_spill] sm:$0xff] %v8596_v41  ;;  %v8599_v53 = vsel %vm343_vm0, 0.0, %v2699_v3 }
 0x561   : > { %12400 = vst [vmem:[#allocation9_spill] sm:$0xff] %v8599_v53  ;;  %v2908_v47 = vrot.slane %v8599_v53, 1 }
 0x562   : > { %v2591_v22 = vadd.f32 %v5169_v21, %v2555_v52  ;;  %v8614_v52 = vpop.permute.xlu2 %2932 }
 0x563   : > { %12403 = vst [vmem:[#allocation200_spill] sm:$0xff] %v8614_v52  ;;  %v8620_v43 = vsel %vm508_vm1, %v2906_v13, %v2908_v47 }
 0x564   : > { %v2623_v36 = vmax.f32 %v2591_v22, 0.0  ;;  %v2912_v22 = vrot.slane %v8605_v58, 1  ;;  %12404 = vst [vmem:[#allocation225_spill] sm:$0xff] %v8620_v43 }
 0x566   : > { %2996 = vrot.lane.b32.xlu1 %v8590_v5, %s5180_s8  ;;  %3000 = vrot.lane.b32.xlu0 %v8593_v17, %s5180_s8  ;;  %v2702_v3 = vrot.slane %v2623_v36, 7  ;;  %v8623_v17 = vsel %vm508_vm1, %v2910_v63, %v2912_v22  ;;  %v8639_v36 = vpop.permute.xlu1 %2918 }
 0x567   : > { %2998 = vrot.lane.b32.xlu2 %v8596_v41, %s5180_s8  ;;  %v2516_v32 = vpop.f32.mrf.mxu3  ;;  %12405 = vst [vmem:[#allocation245_spill] sm:$0xff] %v8623_v17 }
 0x568   : > { %v2556_v14 = vmul.f32 %v8509_v29, %v2516_v32  ;;  %v8626_v41 = vsel %vm343_vm0, 0.0, %v2702_v3  ;;  %12407 = vst [vmem:[#allocation291_spill] sm:$0xff] %v8639_v36  ;;  %v8641_v32 = vpop.permute.xlu0 %2922  ;;  %v3063_v36 = vrot.slane %v7900_v46, 2 }
 0x569   : > { %12408 = vst [vmem:[#allocation314_spill] sm:$0xff] %v8641_v32  ;;  %v11279_v52 = vrot.slane %v8626_v41, 1 }
 0x56a   : > { %v2592_v37 = vadd.f32 %v5169_v21, %v2556_v14  ;;  %v8635_v21 = vsel %vm508_vm1, %v2908_v47, %v2910_v63  ;;  %v8647_v14 = vpop.permute.xlu2 %2938  ;;  %v12410_v47 = vld [vmem:[#allocation85_spill] sm:$0xff] }
 0x56b   : > { %12406 = vst [vmem:[#allocation269_spill] sm:$0xff] %v8635_v21 }
 0x56c   : > { %v2624_v5 = vmax.f32 %v2592_v37, 0.0  ;;  %12409 = vst [vmem:[#allocation104_spill] sm:$0xff] %v8647_v14  ;;  %v3057_v37 = vrot.slane %v7762_v7, 2 }
 0x56e   : > { %v8628_v29 = vrot.slane %v2624_v5, 7  ;;  %3002 = vrot.lane.b32.xlu1 %v8620_v43, %s5180_s8  ;;  %3006 = vrot.lane.b32.xlu0 %v8623_v17, %s5180_s8  ;;  %v3058_v63 = vsel %vm744_vm2, %v12410_v47, %v3057_v37  ;;  %v3059_v17 = vrot.slane %v7810_v48, 2 }
 0x56f   : > { %3004 = vrot.lane.b32.xlu2 %v8635_v21, %s5180_s8  ;;  %v2519_v13 = vpop.f32.mrf.mxu3  ;;  %v3065_v21 = vrot.slane %v7946_v59, 2 }
 0x570   : > { %v8645_v5 = vsel %vm343_vm0, %v2702_v3, %v8628_v29  ;;  %v8656_v13 = vsel %vm508_vm1, %v2912_v22, %v11279_v52  ;;  %v8663_v3 = vpop.permute.xlu1 %2924  ;;  %v8665_v14 = vpop.permute.xlu0 %2928  ;;  %v3061_v22 = vrot.slane %v7813_v28, 2  ;;  %v8676_v52 = vsel %vm744_vm2, %v3057_v37, %v3059_v17 }
 0x571   : > { %12411 = vst [vmem:[#allocation10_spill] sm:$0xff] %v8656_v13  ;;  %v3069_v37 = vrot.slane %v8036_v30, 2 }
 0x572   : > { %12412 = vst [vmem:[#allocation114_spill] sm:$0xff] %v8663_v3  ;;  %v8667_v32 = vpop.permute.xlu2 %2944  ;;  %v8681_v3 = vsel %vm744_vm2, %v3059_v17, %v3061_v22 }
 0x573   : > { %12413 = vst [vmem:[#allocation185_spill] sm:$0xff] %v8665_v14 }
 0x574   : > { %12414 = vst [vmem:[#allocation205_spill] sm:$0xff] %v8667_v32 }
 0x575   : > { %12416 = vst [vmem:[#allocation250_spill] sm:$0xff] %v8676_v52 }
 0x576   : > { %3151 = vrot.lane.b32.xlu0 %v3058_v63, %s5182_s10  ;;  %3008 = vrot.lane.b32.xlu1 %v8656_v13, %s5180_s8  ;;  %v8673_v63 = vsel %vm744_vm2, %v3061_v22, %v3063_v36  ;;  %12417 = vst [vmem:[#allocation276_spill] sm:$0xff] %v8681_v3  ;;  %v8700_v22 = vsel %vm744_vm2, %v3063_v36, %v3065_v21  ;;  %v3075_v36 = vrot.slane %v8141_v40, 2  ;;  %s5187_s8 = smov 40  }
 0x577   : > { %3149 = vrot.lane.b32.xlu2 %v12410_v47, %s5182_s10  ;;  %12415 = vst [vmem:[#allocation8_spill] sm:$0xff] %v8673_v63 }
 0x578   : > { %v8687_v32 = vpop.permute.xlu1 %2930  ;;  %v8689_v14 = vpop.permute.xlu0 %2934  ;;  %12422 = vst [vmem:[#allocation195_spill] sm:$0xff] %v8700_v22 }
 0x579   : > { %12418 = vst [vmem:[#allocation296_spill] sm:$0xff] %v8687_v32 }
 0x57a   : > { %12419 = vst [vmem:[#allocation86_spill] sm:$0xff] %v8689_v14  ;;  %v8691_v47 = vpop.permute.xlu2 %2950 }
 0x57b   : > { %12420 = vst [vmem:[#allocation133_spill] sm:$0xff] %v8691_v47 }
 0x57e   : > { %3157 = vrot.lane.b32.xlu0 %v8673_v63, %s5182_s10  ;;  %3153 = vrot.lane.b32.xlu1 %v8676_v52, %s5182_s10  ;;  %v3067_v63 = vrot.slane %v7949_v9, 2  ;;  %v3071_v52 = vrot.slane %v8082_v60, 2 }
 0x57f   : > { %3155 = vrot.lane.b32.xlu2 %v8681_v3, %s5182_s10 }
 0x580   : > { %v8697_v17 = vsel %vm744_vm2, %v3067_v63, %v3069_v37  ;;  %v8705_v32 = vsel %vm744_vm2, %v3065_v21, %v3067_v63  ;;  %v8711_v47 = vpop.permute.xlu1 %2936  ;;  %v8713_v14 = vpop.permute.xlu0 %2940  ;;  %v8724_v63 = vsel %vm744_vm2, %v3069_v37, %v3071_v52  ;;  %v3081_v37 = vrot.slane %v8226_v45, 2 }
 0x581   : > { %12421 = vst [vmem:[#allocation190_spill] sm:$0xff] %v8697_v17 }
 0x582   : > { %12423 = vst [vmem:[#allocation235_spill] sm:$0xff] %v8705_v32  ;;  %v8715_v3 = vpop.permute.xlu2 %2956 }
 0x583   : > { %12424 = vst [vmem:[#allocation240_spill] sm:$0xff] %v8711_v47 }
 0x584   : > { %12425 = vst [vmem:[#allocation281_spill] sm:$0xff] %v8713_v14 }
 0x585   : > { %12426 = vst [vmem:[#allocation286_spill] sm:$0xff] %v8715_v3 }
 0x586   : > { %3163 = vrot.lane.b32.xlu0 %v8697_v17, %s5182_s10  ;;  %3159 = vrot.lane.b32.xlu1 %v8700_v22, %s5182_s10  ;;  %v3073_v17 = vrot.slane %v8085_v15, 2  ;;  %12428 = vst [vmem:[#allocation67_spill] sm:$0xff] %v8724_v63  ;;  %v3077_v22 = vrot.slane %v8169_v19, 2 }
 0x587   : > { %3161 = vrot.lane.b32.xlu2 %v8705_v32, %s5182_s10 }
 0x588   : > { %v8721_v21 = vsel %vm744_vm2, %v3073_v17, %v3075_v36  ;;  %v8729_v47 = vsel %vm744_vm2, %v3071_v52, %v3073_v17  ;;  %v8735_v3 = vpop.permute.xlu1 %2942  ;;  %v8737_v14 = vpop.permute.xlu0 %2946  ;;  %v8748_v17 = vsel %vm744_vm2, %v3075_v36, %v3077_v22  ;;  %v3087_v36 = vrot.slane %v8306_v12, 2 }
 0x589   : > { %12427 = vst [vmem:[#allocation29_spill] sm:$0xff] %v8721_v21 }
 0x58a   : > { %12429 = vst [vmem:[#allocation105_spill] sm:$0xff] %v8729_v47  ;;  %v8739_v32 = vpop.permute.xlu2 %2962 }
 0x58b   : > { %12430 = vst [vmem:[#allocation103_spill] sm:$0xff] %v8735_v3 }
 0x58c   : > { %12431 = vst [vmem:[#allocation14_spill] sm:$0xff] %v8737_v14 }
 0x58d   : > { %12432 = vst [vmem:[#allocation140_spill] sm:$0xff] %v8739_v32 }
 0x58e   : > { %3169 = vrot.lane.b32.xlu0 %v8721_v21, %s5182_s10  ;;  %3165 = vrot.lane.b32.xlu1 %v8724_v63, %s5182_s10  ;;  %v3079_v21 = vrot.slane %v8172_v26, 2  ;;  %12434 = vst [vmem:[#allocation180_spill] sm:$0xff] %v8748_v17  ;;  %v3083_v63 = vrot.slane %v8262_v55, 2 }
 0x58f   : > { %3167 = vrot.lane.b32.xlu2 %v8729_v47, %s5182_s10 }
 0x590   : > { %v8745_v52 = vsel %vm744_vm2, %v3079_v21, %v3081_v37  ;;  %v8753_v3 = vsel %vm744_vm2, %v3077_v22, %v3079_v21  ;;  %v8759_v14 = vpop.permute.xlu1 %2948  ;;  %v8761_v32 = vpop.permute.xlu0 %2952  ;;  %v8772_v21 = vsel %vm744_vm2, %v3081_v37, %v3083_v63  ;;  %v3093_v37 = vrot.slane %v8350_v51, 2 }
 0x591   : > { %12433 = vst [vmem:[#allocation41_spill] sm:$0xff] %v8745_v52 }
 0x592   : > { %12435 = vst [vmem:[#allocation203_spill] sm:$0xff] %v8753_v3 }
 0x593   : > { %12436 = vst [vmem:[#allocation228_spill] sm:$0xff] %v8759_v14 }
 0x594   : > { %12437 = vst [vmem:[#allocation248_spill] sm:$0xff] %v8761_v32 }
 0x595   : > { %12440 = vst [vmem:[#allocation316_spill] sm:$0xff] %v8772_v21 }
 0x596   : > { %3175 = vrot.lane.b32.xlu0 %v8745_v52, %s5182_s10  ;;  %3171 = vrot.lane.b32.xlu1 %v8748_v17, %s5182_s10  ;;  %v3085_v52 = vrot.slane %v8265_v23, 2  ;;  %v3089_v17 = vrot.slane %v8327_v4, 2 }
 0x597   : > { %3173 = vrot.lane.b32.xlu2 %v8753_v3, %s5182_s10 }
 0x598   : > { %v8769_v22 = vsel %vm744_vm2, %v3085_v52, %v3087_v36  ;;  %v8777_v14 = vsel %vm744_vm2, %v3083_v63, %v3085_v52  ;;  %v8783_v32 = vpop.permute.xlu1 %2954  ;;  %v8796_v52 = vsel %vm744_vm2, %v3087_v36, %v3089_v17  ;;  %v3099_v36 = vrot.slane %v8391_v61, 2 }
 0x599   : > { %v8763_v47 = vpop.permute.xlu2 %2968  ;;  %12439 = vst [vmem:[#allocation294_spill] sm:$0xff] %v8769_v22 }
 0x59a   : > { %12438 = vst [vmem:[#allocation274_spill] sm:$0xff] %v8763_v47  ;;  %v8785_v47 = vpop.permute.xlu0 %2958 }
 0x59b   : > { %12441 = vst [vmem:[#allocation330_spill] sm:$0xff] %v8777_v14 }
 0x59c   : > { %12442 = vst [vmem:[#allocation347_spill] sm:$0xff] %v8783_v32 }
 0x59d   : > { %12443 = vst [vmem:[#allocation38_spill] sm:$0xff] %v8785_v47 }
 0x59e   : > { %3181 = vrot.lane.b32.xlu0 %v8769_v22, %s5182_s10  ;;  %3177 = vrot.lane.b32.xlu1 %v8772_v21, %s5182_s10  ;;  %v3091_v22 = vrot.slane %v8330_v35, 2  ;;  %12446 = vst [vmem:[#allocation110_spill] sm:$0xff] %v8796_v52  ;;  %v3095_v21 = vrot.slane %v8371_v8, 2 }
 0x59f   : > { %3179 = vrot.lane.b32.xlu2 %v8777_v14, %s5182_s10 }
 0x5a0   : > { %v8793_v63 = vsel %vm744_vm2, %v3091_v22, %v3093_v37  ;;  %v8801_v32 = vsel %vm744_vm2, %v3089_v17, %v3091_v22  ;;  %v8807_v47 = vpop.permute.xlu1 %2960  ;;  %v8820_v22 = vsel %vm744_vm2, %v3093_v37, %v3095_v21  ;;  %v3105_v37 = vrot.slane %v8431_v10, 2 }
 0x5a1   : > { %v8787_v3 = vpop.permute.xlu2 %2974  ;;  %12445 = vst [vmem:[#allocation111_spill] sm:$0xff] %v8793_v63 }
 0x5a2   : > { %12444 = vst [vmem:[#allocation74_spill] sm:$0xff] %v8787_v3  ;;  %v8809_v3 = vpop.permute.xlu0 %2964 }
 0x5a3   : > { %12447 = vst [vmem:[#allocation15_spill] sm:$0xff] %v8801_v32 }
 0x5a4   : > { %12448 = vst [vmem:[#allocation120_spill] sm:$0xff] %v8807_v47 }
 0x5a5   : > { %12449 = vst [vmem:[#allocation46_spill] sm:$0xff] %v8809_v3 }
 0x5a6   : > { %3187 = vrot.lane.b32.xlu0 %v8793_v63, %s5182_s10  ;;  %3183 = vrot.lane.b32.xlu1 %v8796_v52, %s5182_s10  ;;  %v3097_v63 = vrot.slane %v8374_v11, 2  ;;  %12452 = vst [vmem:[#allocation12_spill] sm:$0xff] %v8820_v22  ;;  %v3101_v52 = vrot.slane %v8404_v25, 2 }
 0x5a7   : > { %3185 = vrot.lane.b32.xlu2 %v8801_v32, %s5182_s10 }
 0x5a8   : > { %v8817_v17 = vsel %vm744_vm2, %v3097_v63, %v3099_v36  ;;  %v8825_v47 = vsel %vm744_vm2, %v3095_v21, %v3097_v63  ;;  %v8844_v63 = vsel %vm744_vm2, %v3099_v36, %v3101_v52  ;;  %v3111_v36 = vrot.slane %v8438_v0, 2 }
 0x5a9   : > { %v8811_v14 = vpop.permute.xlu2 %2980  ;;  %12451 = vst [vmem:[#allocation208_spill] sm:$0xff] %v8817_v17 }
 0x5aa   : > { %12450 = vst [vmem:[#allocation188_spill] sm:$0xff] %v8811_v14 }
 0x5ab   : > { %12453 = vst [vmem:[#allocation253_spill] sm:$0xff] %v8825_v47 }
 0x5ac   : > { %12458 = vst [vmem:[#allocation16_spill] sm:$0xff] %v8844_v63 }
 0x5ae   : > { %3193 = vrot.lane.b32.xlu0 %v8817_v17, %s5182_s10  ;;  %3189 = vrot.lane.b32.xlu1 %v8820_v22, %s5182_s10  ;;  %v3103_v17 = vrot.slane %v8407_v2, 2  ;;  %v3107_v22 = vrot.slane %v8428_v57, 2 }
 0x5af   : > { %3191 = vrot.lane.b32.xlu2 %v8825_v47, %s5182_s10 }
 0x5b0   : > { %v8831_v14 = vpop.permute.xlu0 %2970  ;;  %v8833_v3 = vpop.permute.xlu1 %2966  ;;  %v8841_v21 = vsel %vm744_vm2, %v3103_v17, %v3105_v37 }
 0x5b1   : > { %12454 = vst [vmem:[#allocation279_spill] sm:$0xff] %v8831_v14  ;;  %v8835_v32 = vpop.permute.xlu2 %2986  ;;  %v8849_v14 = vsel %vm744_vm2, %v3101_v52, %v3103_v17  ;;  %v8868_v17 = vsel %vm744_vm2, %v3105_v37, %v3107_v22  ;;  %v3117_v37 = vrot.slane %v8470_v49, 2 }
 0x5b2   : > { %12455 = vst [vmem:[#allocation299_spill] sm:$0xff] %v8833_v3 }
 0x5b3   : > { %12456 = vst [vmem:[#allocation319_spill] sm:$0xff] %v8835_v32 }
 0x5b4   : > { %12457 = vst [vmem:[#allocation334_spill] sm:$0xff] %v8841_v21 }
 0x5b5   : > { %12459 = vst [vmem:[#allocation44_spill] sm:$0xff] %v8849_v14 }
 0x5b6   : > { %3199 = vrot.lane.b32.xlu0 %v8841_v21, %s5182_s10  ;;  %3195 = vrot.lane.b32.xlu1 %v8844_v63, %s5182_s10  ;;  %v3109_v21 = vrot.slane %v8425_v56, 2  ;;  %12464 = vst [vmem:[#allocation139_spill] sm:$0xff] %v8868_v17  ;;  %v3113_v63 = vrot.slane %v8257_v54, 2 }
 0x5b7   : > { %3197 = vrot.lane.b32.xlu2 %v8849_v14, %s5182_s10 }
 0x5b8   : > { %v8855_v32 = vpop.permute.xlu0 %2976  ;;  %v8857_v3 = vpop.permute.xlu1 %2972  ;;  %v8865_v52 = vsel %vm744_vm2, %v3109_v21, %v3111_v36 }
 0x5b9   : > { %12460 = vst [vmem:[#allocation272_spill] sm:$0xff] %v8855_v32  ;;  %v8859_v47 = vpop.permute.xlu2 %2992  ;;  %v8873_v32 = vsel %vm744_vm2, %v3107_v22, %v3109_v21  ;;  %v8892_v21 = vsel %vm744_vm2, %v3111_v36, %v3113_v63  ;;  %v3123_v36 = vrot.slane %v8494_v39, 2 }
 0x5ba   : > { %12461 = vst [vmem:[#allocation99_spill] sm:$0xff] %v8857_v3 }
 0x5bb   : > { %12462 = vst [vmem:[#allocation90_spill] sm:$0xff] %v8859_v47 }
 0x5bc   : > { %12463 = vst [vmem:[#allocation20_spill] sm:$0xff] %v8865_v52 }
 0x5bd   : > { %12465 = vst [vmem:[#allocation45_spill] sm:$0xff] %v8873_v32 }
 0x5be   : > { %3205 = vrot.lane.b32.xlu0 %v8865_v52, %s5182_s10  ;;  %3201 = vrot.lane.b32.xlu1 %v8868_v17, %s5182_s10  ;;  %v3115_v52 = vrot.slane %v8442_v42, 2  ;;  %12470 = vst [vmem:[#allocation284_spill] sm:$0xff] %v8892_v21  ;;  %v3119_v17 = vrot.slane %v8324_v62, 2 }
 0x5bf   : > { %3203 = vrot.lane.b32.xlu2 %v8873_v32, %s5182_s10 }
 0x5c0   : > { %v8879_v47 = vpop.permute.xlu0 %2982  ;;  %v8881_v3 = vpop.permute.xlu1 %2978  ;;  %v8889_v22 = vsel %vm744_vm2, %v3115_v52, %v3117_v37 }
 0x5c1   : > { %12466 = vst [vmem:[#allocation193_spill] sm:$0xff] %v8879_v47  ;;  %v8883_v14 = vpop.permute.xlu2 %2998  ;;  %v8897_v47 = vsel %vm744_vm2, %v3113_v63, %v3115_v52  ;;  %v8916_v52 = vsel %vm744_vm2, %v3117_v37, %v3119_v17  ;;  %v3129_v37 = vrot.slane %v8535_v33, 2 }
 0x5c2   : > { %12467 = vst [vmem:[#allocation198_spill] sm:$0xff] %v8881_v3 }
 0x5c3   : > { %12468 = vst [vmem:[#allocation238_spill] sm:$0xff] %v8883_v14 }
 0x5c4   : > { %12469 = vst [vmem:[#allocation243_spill] sm:$0xff] %v8889_v22 }
 0x5c5   : > { %12471 = vst [vmem:[#allocation289_spill] sm:$0xff] %v8897_v47 }
 0x5c6   : > { %3211 = vrot.lane.b32.xlu0 %v8889_v22, %s5182_s10  ;;  %3207 = vrot.lane.b32.xlu1 %v8892_v21, %s5182_s10  ;;  %v3121_v22 = vrot.slane %v8474_v20, 2  ;;  %12476 = vst [vmem:[#allocation69_spill] sm:$0xff] %v8916_v52  ;;  %v3125_v21 = vrot.slane %v8368_v44, 2 }
 0x5c7   : > { %3209 = vrot.lane.b32.xlu2 %v8897_v47, %s5182_s10 }
 0x5c8   : > { %v8903_v14 = vpop.permute.xlu0 %2988  ;;  %v8905_v3 = vpop.permute.xlu1 %2984  ;;  %v8913_v63 = vsel %vm744_vm2, %v3121_v22, %v3123_v36 }
 0x5c9   : > { %12472 = vst [vmem:[#allocation322_spill] sm:$0xff] %v8903_v14  ;;  %v8907_v32 = vpop.permute.xlu2 %3004  ;;  %v8921_v14 = vsel %vm744_vm2, %v3119_v17, %v3121_v22  ;;  %v8940_v22 = vsel %vm744_vm2, %v3123_v36, %v3125_v21  ;;  %v3135_v36 = vrot.slane %v8560_v16, 2 }
 0x5ca   : > { %12473 = vst [vmem:[#allocation326_spill] sm:$0xff] %v8905_v3 }
 0x5cb   : > { %12474 = vst [vmem:[#allocation22_spill] sm:$0xff] %v8907_v32 }
 0x5cc   : > { %12475 = vst [vmem:[#allocation35_spill] sm:$0xff] %v8913_v63 }
 0x5cd   : > { %12477 = vst [vmem:[#allocation119_spill] sm:$0xff] %v8921_v14 }
 0x5ce   : > { %3217 = vrot.lane.b32.xlu0 %v8913_v63, %s5182_s10  ;;  %3213 = vrot.lane.b32.xlu1 %v8916_v52, %s5182_s10  ;;  %v3127_v63 = vrot.slane %v8504_v24, 2  ;;  %12482 = vst [vmem:[#allocation183_spill] sm:$0xff] %v8940_v22  ;;  %v3131_v52 = vrot.slane %v8538_v27, 2 }
 0x5cf   : > { %3215 = vrot.lane.b32.xlu2 %v8921_v14, %s5182_s10 }
 0x5d0   : > { %v8927_v32 = vpop.permute.xlu0 %2994  ;;  %v8929_v3 = vpop.permute.xlu1 %2990  ;;  %v8937_v17 = vsel %vm744_vm2, %v3127_v63, %v3129_v37 }
 0x5d1   : > { %12478 = vst [vmem:[#allocation109_spill] sm:$0xff] %v8927_v32  ;;  %v8931_v47 = vpop.permute.xlu2 %3149  ;;  %v8945_v32 = vsel %vm744_vm2, %v3125_v21, %v3127_v63  ;;  %v8964_v63 = vsel %vm744_vm2, %v3129_v37, %v3131_v52  ;;  %v3141_v37 = vrot.slane %v8599_v53, 2 }
 0x5d2   : > { %12479 = vst [vmem:[#allocation19_spill] sm:$0xff] %v8929_v3 }
 0x5d3   : > { %12480 = vst [vmem:[#allocation146_spill] sm:$0xff] %v8931_v47 }
 0x5d4   : > { %12481 = vst [vmem:[#allocation47_spill] sm:$0xff] %v8937_v17 }
 0x5d5   : > { %12483 = vst [vmem:[#allocation206_spill] sm:$0xff] %v8945_v32 }
 0x5d6   : > { %3223 = vrot.lane.b32.xlu0 %v8937_v17, %s5182_s10  ;;  %3219 = vrot.lane.b32.xlu1 %v8940_v22, %s5182_s10  ;;  %v3133_v17 = vrot.slane %v8544_v1, 2  ;;  %12488 = vst [vmem:[#allocation317_spill] sm:$0xff] %v8964_v63  ;;  %v3137_v22 = vrot.slane %v8572_v34, 2 }
 0x5d7   : > { %3221 = vrot.lane.b32.xlu2 %v8945_v32, %s5182_s10 }
 0x5d8   : > { %v8951_v3 = vpop.permute.xlu0 %3000  ;;  %v8953_v47 = vpop.permute.xlu1 %2996  ;;  %v8961_v21 = vsel %vm744_vm2, %v3133_v17, %v3135_v36 }
 0x5d9   : > { %12484 = vst [vmem:[#allocation231_spill] sm:$0xff] %v8951_v3  ;;  %v8955_v14 = vpop.permute.xlu2 %3155  ;;  %v8969_v3 = vsel %vm744_vm2, %v3131_v52, %v3133_v17  ;;  %v8988_v17 = vsel %vm744_vm2, %v3135_v36, %v3137_v22  ;;  %v3143_v36 = vrot.slane %v8602_v18, 2 }
 0x5da   : > { %12485 = vst [vmem:[#allocation251_spill] sm:$0xff] %v8953_v47 }
 0x5db   : > { %12486 = vst [vmem:[#allocation94_spill] sm:$0xff] %v8955_v14 }
 0x5dc   : > { %12487 = vst [vmem:[#allocation297_spill] sm:$0xff] %v8961_v21 }
 0x5dd   : > { %12489 = vst [vmem:[#allocation332_spill] sm:$0xff] %v8969_v3 }
 0x5de   : > { %3229 = vrot.lane.b32.xlu0 %v8961_v21, %s5182_s10  ;;  %3225 = vrot.lane.b32.xlu1 %v8964_v63, %s5182_s10  ;;  %v3139_v21 = vrot.slane %v8575_v38, 2  ;;  %v11360_v63 = vrot.slane %v8626_v41, 2 }
 0x5df   : > { %3227 = vrot.lane.b32.xlu2 %v8969_v3, %s5182_s10 }
 0x5e0   : > { %v8975_v47 = vpop.permute.xlu0 %3006  ;;  %v8977_v14 = vpop.permute.xlu1 %3002  ;;  %v8985_v52 = vsel %vm744_vm2, %v3139_v21, %v3141_v37 }
 0x5e1   : > { %12490 = vst [vmem:[#allocation13_spill] sm:$0xff] %v8975_v47  ;;  %v8979_v32 = vpop.permute.xlu2 %3161  ;;  %v8993_v47 = vsel %vm744_vm2, %v3137_v22, %v3139_v21  ;;  %v9014_v21 = vsel %vm744_vm2, %v3141_v37, %v3143_v36 }
 0x5e2   : > { %12491 = vst [vmem:[#allocation43_spill] sm:$0xff] %v8977_v14 }
 0x5e3   : > { %12492 = vst [vmem:[#allocation83_spill] sm:$0xff] %v8979_v32 }
 0x5e4   : > { %12493 = vst [vmem:[#allocation117_spill] sm:$0xff] %v8985_v52 }
 0x5e5   : > { %12498 = vst [vmem:[#allocation191_spill] sm:$0xff] %v9014_v21 }
 0x5e6   : > { %3235 = vrot.lane.b32.xlu0 %v8985_v52, %s5182_s10  ;;  %3231 = vrot.lane.b32.xlu1 %v8988_v17, %s5182_s10  ;;  %v3145_v52 = vrot.slane %v8605_v58, 2 }
 0x5e7   : > { %3233 = vrot.lane.b32.xlu2 %v8993_v47, %s5182_s10 }
 0x5e8   : > { %v8999_v14 = vpop.permute.xlu0 %3151  ;;  %v9001_v32 = vpop.permute.xlu1 %3008  ;;  %v9011_v22 = vsel %vm744_vm2, %v3145_v52, %v11360_v63 }
 0x5e9   : > { %12494 = vst [vmem:[#allocation116_spill] sm:$0xff] %v8999_v14  ;;  %v9003_v3 = vpop.permute.xlu2 %3167  ;;  %v9017_v14 = vsel %vm744_vm2, %v3143_v36, %v3145_v52 }
 0x5ea   : > { %12495 = vst [vmem:[#allocation21_spill] sm:$0xff] %v9001_v32 }
 0x5eb   : > { %12496 = vst [vmem:[#allocation126_spill] sm:$0xff] %v9003_v3 }
 0x5ec   : > { %12497 = vst [vmem:[#allocation52_spill] sm:$0xff] %v9011_v22 }
 0x5ed   : > { %12499 = vst [vmem:[#allocation211_spill] sm:$0xff] %v9017_v14 }
 0x5ee   : > { %3241 = vrot.lane.b32.xlu0 %v9011_v22, %s5182_s10  ;;  %3237 = vrot.lane.b32.xlu1 %v9014_v21, %s5182_s10 }
 0x5ef   : > { %3239 = vrot.lane.b32.xlu2 %v9017_v14, %s5182_s10  ;;  %s5188_s10 = smov 48  }
 0x5f0   : > { %v9025_v32 = vpop.permute.xlu0 %3157  ;;  %v9027_v3 = vpop.permute.xlu1 %3153 }
 0x5f1   : > { %12500 = vst [vmem:[#allocation236_spill] sm:$0xff] %v9025_v32  ;;  %v9029_v63 = vpop.permute.xlu2 %3173 }
 0x5f2   : > { %12501 = vst [vmem:[#allocation256_spill] sm:$0xff] %v9027_v3 }
 0x5f3   : > { %12502 = vst [vmem:[#allocation282_spill] sm:$0xff] %v9029_v63 }
 0x5f6   : > { %3295 = vrot.lane.b32.xlu0 %v7813_v28, %s5184_s12  ;;  %3291 = vrot.lane.b32.xlu1 %v7762_v7, %s5184_s12 }
 0x5f7   : > { %3293 = vrot.lane.b32.xlu2 %v7810_v48, %s5184_s12 }
 0x5f8   : > { %v9037_v37 = vpop.permute.xlu0 %3163  ;;  %v9039_v52 = vpop.permute.xlu1 %3159 }
 0x5f9   : > { %12503 = vst [vmem:[#allocation302_spill] sm:$0xff] %v9037_v37  ;;  %v9041_v36 = vpop.permute.xlu2 %3179 }
 0x5fa   : > { %12504 = vst [vmem:[#allocation321_spill] sm:$0xff] %v9039_v52 }
 0x5fb   : > { %12505 = vst [vmem:[#allocation337_spill] sm:$0xff] %v9041_v36 }
 0x5fe   : > { %3301 = vrot.lane.b32.xlu0 %v7949_v9, %s5184_s12  ;;  %3297 = vrot.lane.b32.xlu1 %v7900_v46, %s5184_s12 }
 0x5ff   : > { %3299 = vrot.lane.b32.xlu2 %v7946_v59, %s5184_s12 }
 0x600   : > { %v9049_v63 = vpop.permute.xlu0 %3169  ;;  %v9051_v32 = vpop.permute.xlu1 %3165 }
 0x601   : > { %12506 = vst [vmem:[#allocation23_spill] sm:$0xff] %v9049_v63  ;;  %v9053_v28 = vpop.permute.xlu2 %3185 }
 0x602   : > { %12507 = vst [vmem:[#allocation50_spill] sm:$0xff] %v9051_v32 }
 0x603   : > { %12508 = vst [vmem:[#allocation101_spill] sm:$0xff] %v9053_v28 }
 0x606   : > { %3307 = vrot.lane.b32.xlu0 %v8085_v15, %s5184_s12  ;;  %3303 = vrot.lane.b32.xlu1 %v8036_v30, %s5184_s12 }
 0x607   : > { %3305 = vrot.lane.b32.xlu2 %v8082_v60, %s5184_s12 }
 0x608   : > { %v9061_v36 = vpop.permute.xlu0 %3175  ;;  %v9063_v37 = vpop.permute.xlu1 %3171 }
 0x609   : > { %12509 = vst [vmem:[#allocation113_spill] sm:$0xff] %v9061_v36  ;;  %v9065_v52 = vpop.permute.xlu2 %3191 }
 0x60a   : > { %12510 = vst [vmem:[#allocation96_spill] sm:$0xff] %v9063_v37 }
 0x60b   : > { %12511 = vst [vmem:[#allocation26_spill] sm:$0xff] %v9065_v52 }
 0x60e   : > { %3313 = vrot.lane.b32.xlu0 %v8172_v26, %s5184_s12  ;;  %3309 = vrot.lane.b32.xlu1 %v8141_v40, %s5184_s12 }
 0x60f   : > { %3311 = vrot.lane.b32.xlu2 %v8169_v19, %s5184_s12 }
 0x610   : > { %v9073_v28 = vpop.permute.xlu0 %3181  ;;  %v9075_v63 = vpop.permute.xlu1 %3177 }
 0x611   : > { %12512 = vst [vmem:[#allocation145_spill] sm:$0xff] %v9073_v28  ;;  %v9077_v32 = vpop.permute.xlu2 %3197 }
 0x612   : > { %12513 = vst [vmem:[#allocation51_spill] sm:$0xff] %v9075_v63 }
 0x613   : > { %12514 = vst [vmem:[#allocation196_spill] sm:$0xff] %v9077_v32 }
 0x616   : > { %3319 = vrot.lane.b32.xlu0 %v8265_v23, %s5184_s12  ;;  %3315 = vrot.lane.b32.xlu1 %v8226_v45, %s5184_s12 }
 0x617   : > { %3317 = vrot.lane.b32.xlu2 %v8262_v55, %s5184_s12 }
 0x618   : > { %v9085_v52 = vpop.permute.xlu0 %3187  ;;  %v9087_v36 = vpop.permute.xlu1 %3183 }
 0x619   : > { %12515 = vst [vmem:[#allocation201_spill] sm:$0xff] %v9085_v52  ;;  %v9089_v37 = vpop.permute.xlu2 %3203 }
 0x61a   : > { %12516 = vst [vmem:[#allocation241_spill] sm:$0xff] %v9087_v36 }
 0x61b   : > { %12517 = vst [vmem:[#allocation246_spill] sm:$0xff] %v9089_v37 }
 0x61e   : > { %3325 = vrot.lane.b32.xlu0 %v8330_v35, %s5184_s12  ;;  %3321 = vrot.lane.b32.xlu1 %v8306_v12, %s5184_s12 }
 0x61f   : > { %3323 = vrot.lane.b32.xlu2 %v8327_v4, %s5184_s12 }
 0x620   : > { %v9097_v28 = vpop.permute.xlu0 %3193  ;;  %v9099_v63 = vpop.permute.xlu1 %3189 }
 0x621   : > { %12518 = vst [vmem:[#allocation287_spill] sm:$0xff] %v9097_v28  ;;  %v9101_v48 = vpop.permute.xlu2 %3209 }
 0x622   : > { %12519 = vst [vmem:[#allocation292_spill] sm:$0xff] %v9099_v63 }
 0x623   : > { %12520 = vst [vmem:[#allocation324_spill] sm:$0xff] %v9101_v48 }
 0x626   : > { %3331 = vrot.lane.b32.xlu0 %v8374_v11, %s5184_s12  ;;  %3327 = vrot.lane.b32.xlu1 %v8350_v51, %s5184_s12 }
 0x627   : > { %3329 = vrot.lane.b32.xlu2 %v8371_v8, %s5184_s12 }
 0x628   : > { %v9109_v52 = vpop.permute.xlu0 %3199  ;;  %v9111_v36 = vpop.permute.xlu1 %3195 }
 0x629   : > { %12521 = vst [vmem:[#allocation328_spill] sm:$0xff] %v9109_v52  ;;  %v9113_v3 = vpop.permute.xlu2 %3215 }
 0x62a   : > { %12522 = vst [vmem:[#allocation28_spill] sm:$0xff] %v9111_v36 }
 0x62b   : > { %12523 = vst [vmem:[#allocation36_spill] sm:$0xff] %v9113_v3 }
 0x62e   : > { %3337 = vrot.lane.b32.xlu0 %v8407_v2, %s5184_s12  ;;  %3333 = vrot.lane.b32.xlu1 %v8391_v61, %s5184_s12 }
 0x62f   : > { %3335 = vrot.lane.b32.xlu2 %v8404_v25, %s5184_s12 }
 0x630   : > { %v9121_v28 = vpop.permute.xlu0 %3205  ;;  %v9123_v63 = vpop.permute.xlu1 %3201 }
 0x631   : > { %12524 = vst [vmem:[#allocation75_spill] sm:$0xff] %v9121_v28  ;;  %v9125_v48 = vpop.permute.xlu2 %3221 }
 0x632   : > { %12525 = vst [vmem:[#allocation112_spill] sm:$0xff] %v9123_v63 }
 0x633   : > { %12526 = vst [vmem:[#allocation115_spill] sm:$0xff] %v9125_v48 }
 0x636   : > { %3343 = vrot.lane.b32.xlu0 %v8425_v56, %s5184_s12  ;;  %3339 = vrot.lane.b32.xlu1 %v8431_v10, %s5184_s12 }
 0x637   : > { %3341 = vrot.lane.b32.xlu2 %v8428_v57, %s5184_s12 }
 0x638   : > { %v9133_v3 = vpop.permute.xlu0 %3211  ;;  %v9135_v7 = vpop.permute.xlu1 %3207 }
 0x639   : > { %12527 = vst [vmem:[#allocation25_spill] sm:$0xff] %v9133_v3  ;;  %v9137_v37 = vpop.permute.xlu2 %3227 }
 0x63a   : > { %12528 = vst [vmem:[#allocation152_spill] sm:$0xff] %v9135_v7 }
 0x63b   : > { %12529 = vst [vmem:[#allocation53_spill] sm:$0xff] %v9137_v37 }
 0x63e   : > { %3349 = vrot.lane.b32.xlu0 %v8442_v42, %s5184_s12  ;;  %3345 = vrot.lane.b32.xlu1 %v8438_v0, %s5184_s12 }
 0x63f   : > { %3347 = vrot.lane.b32.xlu2 %v8257_v54, %s5184_s12 }
 0x640   : > { %v9145_v48 = vpop.permute.xlu0 %3217  ;;  %v9147_v28 = vpop.permute.xlu1 %3213 }
 0x641   : > { %12530 = vst [vmem:[#allocation186_spill] sm:$0xff] %v9145_v48  ;;  %v9149_v56 = vpop.permute.xlu2 %3233 }
 0x642   : > { %12531 = vst [vmem:[#allocation209_spill] sm:$0xff] %v9147_v28 }
 0x643   : > { %12532 = vst [vmem:[#allocation233_spill] sm:$0xff] %v9149_v56 }
 0x646   : > { %3355 = vrot.lane.b32.xlu0 %v8474_v20, %s5184_s12  ;;  %3351 = vrot.lane.b32.xlu1 %v8470_v49, %s5184_s12 }
 0x647   : > { %3353 = vrot.lane.b32.xlu2 %v8324_v62, %s5184_s12 }
 0x648   : > { %v9157_v37 = vpop.permute.xlu0 %3223  ;;  %v9159_v3 = vpop.permute.xlu1 %3219 }
 0x649   : > { %12533 = vst [vmem:[#allocation254_spill] sm:$0xff] %v9157_v37  ;;  %v9161_v7 = vpop.permute.xlu2 %3239 }
 0x64a   : > { %12534 = vst [vmem:[#allocation277_spill] sm:$0xff] %v9159_v3 }
 0x64b   : > { %12535 = vst [vmem:[#allocation300_spill] sm:$0xff] %v9161_v7 }
 0x64e   : > { %3361 = vrot.lane.b32.xlu0 %v8504_v24, %s5184_s12  ;;  %3357 = vrot.lane.b32.xlu1 %v8494_v39, %s5184_s12 }
 0x64f   : > { %3359 = vrot.lane.b32.xlu2 %v8368_v44, %s5184_s12 }
 0x650   : > { %v9169_v56 = vpop.permute.xlu0 %3229  ;;  %v9171_v48 = vpop.permute.xlu1 %3225 }
 0x651   : > { %12536 = vst [vmem:[#allocation318_spill] sm:$0xff] %v9169_v56  ;;  %v9173_v28 = vpop.permute.xlu2 %3293 }
 0x652   : > { %12537 = vst [vmem:[#allocation335_spill] sm:$0xff] %v9171_v48 }
 0x653   : > { %12538 = vst [vmem:[#allocation17_spill] sm:$0xff] %v9173_v28 }
 0x656   : > { %3367 = vrot.lane.b32.xlu0 %v8544_v1, %s5184_s12  ;;  %3363 = vrot.lane.b32.xlu1 %v8535_v33, %s5184_s12 }
 0x657   : > { %3365 = vrot.lane.b32.xlu2 %v8538_v27, %s5184_s12 }
 0x658   : > { %v9181_v7 = vpop.permute.xlu0 %3235  ;;  %v9183_v37 = vpop.permute.xlu1 %3231 }
 0x659   : > { %12539 = vst [vmem:[#allocation49_spill] sm:$0xff] %v9181_v7  ;;  %v9185_v3 = vpop.permute.xlu2 %3299 }
 0x65a   : > { %12540 = vst [vmem:[#allocation89_spill] sm:$0xff] %v9183_v37 }
 0x65b   : > { %12541 = vst [vmem:[#allocation131_spill] sm:$0xff] %v9185_v3 }
 0x65e   : > { %3373 = vrot.lane.b32.xlu0 %v8575_v38, %s5184_s12  ;;  %3369 = vrot.lane.b32.xlu1 %v8560_v16, %s5184_s12 }
 0x65f   : > { %3371 = vrot.lane.b32.xlu2 %v8572_v34, %s5184_s12 }
 0x660   : > { %v9193_v56 = vpop.permute.xlu0 %3241  ;;  %v9195_v48 = vpop.permute.xlu1 %3237 }
 0x661   : > { %12542 = vst [vmem:[#allocation122_spill] sm:$0xff] %v9193_v56  ;;  %v9197_v57 = vpop.permute.xlu2 %3305  ;;  %v9213_v56 = vsel %vm343_vm0, %v8628_v29, 0.0  ;;  %vm4435_vm0 = vcmask 457728  }
 0x662   : > { %12543 = vst [vmem:[#allocation27_spill] sm:$0xff] %v9195_v48 }
 0x663   : > { %12544 = vst [vmem:[#allocation132_spill] sm:$0xff] %v9197_v57 }
 0x664   : > { %12548 = vst [vmem:[#allocation239_spill] sm:$0xff] %v9213_v56 }
 0x666   : > { %3379 = vrot.lane.b32.xlu0 %v8605_v58, %s5184_s12  ;;  %3375 = vrot.lane.b32.xlu1 %v8599_v53, %s5184_s12  ;;  %v12555_v53 = vld [vmem:[#allocation141_spill] sm:$0xff] }
 0x667   : > { %3377 = vrot.lane.b32.xlu2 %v8602_v18, %s5184_s12 }
 0x668   : > { %v9205_v7 = vpop.permute.xlu0 %3295  ;;  %v9207_v37 = vpop.permute.xlu1 %3291 }
 0x669   : > { %12545 = vst [vmem:[#allocation58_spill] sm:$0xff] %v9205_v7  ;;  %v9209_v38 = vpop.permute.xlu2 %3311 }
 0x66a   : > { %12546 = vst [vmem:[#allocation194_spill] sm:$0xff] %v9207_v37 }
 0x66b   : > { %12547 = vst [vmem:[#allocation214_spill] sm:$0xff] %v9209_v38 }
 0x66e   : > { %3381 = vrot.lane.b32.xlu1 %v8626_v41, %s5184_s12  ;;  %3385 = vrot.lane.b32.xlu0 %v9213_v56, %s5184_s12 }
 0x66f   : > { %3383 = vrot.lane.b32.xlu2 %v8645_v5, %s5184_s12  ;;  %s5189_s12 = smov 56  }
 0x670   : > { %v9221_v48 = vpop.permute.xlu0 %3301  ;;  %v9223_v58 = vpop.permute.xlu1 %3297 }
 0x671   : > { %12549 = vst [vmem:[#allocation259_spill] sm:$0xff] %v9221_v48  ;;  %v9225_v57 = vpop.permute.xlu2 %3317 }
 0x672   : > { %12550 = vst [vmem:[#allocation285_spill] sm:$0xff] %v9223_v58 }
 0x673   : > { %12551 = vst [vmem:[#allocation305_spill] sm:$0xff] %v9225_v57  ;;  %v12556_v57 = vld [vmem:[#allocation142_spill] sm:$0xff] }
 0x676   : > { %3440 = vrot.lane.b32.xlu1 %v7836_v50, %s5186_s14  ;;  %3444 = vrot.lane.b32.xlu0 %v7921_v6, %s5186_s14  ;;  %v12557_v50 = vld [vmem:[#allocation149_spill] sm:$0xff] }
 0x677   : > { %3442 = vrot.lane.b32.xlu2 %v7833_v31, %s5186_s14 }
 0x678   : > { %v9233_v29 = vpop.permute.xlu0 %3307  ;;  %v9235_v38 = vpop.permute.xlu1 %3303 }
 0x679   : > { %12552 = vst [vmem:[#allocation323_spill] sm:$0xff] %v9233_v29  ;;  %v9237_v18 = vpop.permute.xlu2 %3323  ;;  %v12561_v29 = vld [vmem:[#allocation154_spill] sm:$0xff] }
 0x67a   : > { %12553 = vst [vmem:[#allocation340_spill] sm:$0xff] %v9235_v38  ;;  %v12563_v38 = vld [vmem:[#allocation148_spill] sm:$0xff] }
 0x67b   : > { %12554 = vst [vmem:[#allocation24_spill] sm:$0xff] %v9237_v18  ;;  %v12562_v18 = vld [vmem:[#allocation161_spill] sm:$0xff] }
 0x67e   : > { %3446 = vrot.lane.b32.xlu1 %v12555_v53, %s5186_s14  ;;  %3450 = vrot.lane.b32.xlu0 %v12556_v57, %s5186_s14 }
 0x67f   : > { %3448 = vrot.lane.b32.xlu2 %v12557_v50, %s5186_s14 }
 0x680   : > { %v9245_v48 = vpop.permute.xlu0 %3313  ;;  %v9247_v6 = vpop.permute.xlu1 %3309 }
 0x681   : > { %12558 = vst [vmem:[#allocation54_spill] sm:$0xff] %v9245_v48  ;;  %v9249_v31 = vpop.permute.xlu2 %3329  ;;  %v12567_v48 = vld [vmem:[#allocation172_spill] sm:$0xff] }
 0x682   : > { %12559 = vst [vmem:[#allocation107_spill] sm:$0xff] %v9247_v6  ;;  %v12569_v6 = vld [vmem:[#allocation165_spill] sm:$0xff] }
 0x683   : > { %12560 = vst [vmem:[#allocation106_spill] sm:$0xff] %v9249_v31  ;;  %v12568_v31 = vld [vmem:[#allocation166_spill] sm:$0xff] }
 0x686   : > { %3456 = vrot.lane.b32.xlu0 %v12561_v29, %s5186_s14  ;;  %3452 = vrot.lane.b32.xlu1 %v12562_v18, %s5186_s14 }
 0x687   : > { %3454 = vrot.lane.b32.xlu2 %v12563_v38, %s5186_s14 }
 0x688   : > { %v9257_v3 = vpop.permute.xlu0 %3319  ;;  %v9259_v34 = vpop.permute.xlu1 %3315 }
 0x689   : > { %12564 = vst [vmem:[#allocation102_spill] sm:$0xff] %v9257_v3  ;;  %v9261_v58 = vpop.permute.xlu2 %3335  ;;  %v12573_v3 = vld [vmem:[#allocation216_spill] sm:$0xff] }
 0x68a   : > { %12565 = vst [vmem:[#allocation32_spill] sm:$0xff] %v9259_v34  ;;  %v12575_v34 = vld [vmem:[#allocation270_spill] sm:$0xff] }
 0x68b   : > { %12566 = vst [vmem:[#allocation151_spill] sm:$0xff] %v9261_v58  ;;  %v12574_v58 = vld [vmem:[#allocation177_spill] sm:$0xff] }
 0x68e   : > { %3462 = vrot.lane.b32.xlu0 %v12567_v48, %s5186_s14  ;;  %3458 = vrot.lane.b32.xlu1 %v12568_v31, %s5186_s14 }
 0x68f   : > { %3460 = vrot.lane.b32.xlu2 %v12569_v6, %s5186_s14 }
 0x690   : > { %v9269_v16 = vpop.permute.xlu0 %3325  ;;  %v9271_v63 = vpop.permute.xlu1 %3321 }
 0x691   : > { %12570 = vst [vmem:[#allocation57_spill] sm:$0xff] %v9269_v16  ;;  %v9273_v10 = vpop.permute.xlu2 %3341  ;;  %v12579_v16 = vld [vmem:[#allocation224_spill] sm:$0xff] }
 0x692   : > { %12571 = vst [vmem:[#allocation199_spill] sm:$0xff] %v9271_v63  ;;  %v12580_v63 = vld [vmem:[#allocation87_spill] sm:$0xff] }
 0x693   : > { %12572 = vst [vmem:[#allocation204_spill] sm:$0xff] %v9273_v10 }
 0x696   : > { %3468 = vrot.lane.b32.xlu0 %v12573_v3, %s5186_s14  ;;  %3464 = vrot.lane.b32.xlu1 %v12574_v58, %s5186_s14  ;;  %v12581_v3 = vld [vmem:[#allocation315_spill] sm:$0xff] }
 0x697   : > { %3466 = vrot.lane.b32.xlu2 %v12575_v34, %s5186_s14 }
 0x698   : > { %v9281_v1 = vpop.permute.xlu0 %3331  ;;  %v9283_v7 = vpop.permute.xlu1 %3327 }
 0x699   : > { %12576 = vst [vmem:[#allocation244_spill] sm:$0xff] %v9281_v1  ;;  %v9285_v52 = vpop.permute.xlu2 %3347  ;;  %v12585_v1 = vld [vmem:[#allocation229_spill] sm:$0xff] }
 0x69a   : > { %12577 = vst [vmem:[#allocation249_spill] sm:$0xff] %v9283_v7  ;;  %v12586_v7 = vld [vmem:[#allocation181_spill] sm:$0xff] }
 0x69b   : > { %12578 = vst [vmem:[#allocation290_spill] sm:$0xff] %v9285_v52 }
 0x69e   : > { %3474 = vrot.lane.b32.xlu0 %v12579_v16, %s5186_s14  ;;  %3470 = vrot.lane.b32.xlu1 %v12580_v63, %s5186_s14  ;;  %v12587_v16 = vld [vmem:[#allocation4_spill] sm:$0xff] }
 0x69f   : > { %3472 = vrot.lane.b32.xlu2 %v12581_v3, %s5186_s14 }
 0x6a0   : > { %v9293_v2 = vpop.permute.xlu0 %3337  ;;  %v9295_v28 = vpop.permute.xlu1 %3333 }
 0x6a1   : > { %12582 = vst [vmem:[#allocation295_spill] sm:$0xff] %v9293_v2  ;;  %v9297_v34 = vpop.permute.xlu2 %3353  ;;  %v12591_v2 = vld [vmem:[#allocation66_spill] sm:$0xff] }
 0x6a2   : > { %12583 = vst [vmem:[#allocation327_spill] sm:$0xff] %v9295_v28  ;;  %v12592_v28 = vld [vmem:[#allocation163_spill] sm:$0xff] }
 0x6a3   : > { %12584 = vst [vmem:[#allocation331_spill] sm:$0xff] %v9297_v34 }
 0x6a6   : > { %3480 = vrot.lane.b32.xlu0 %v12585_v1, %s5186_s14  ;;  %3476 = vrot.lane.b32.xlu1 %v12586_v7, %s5186_s14  ;;  %v12593_v1 = vld [vmem:[#allocation5_spill] sm:$0xff] }
 0x6a7   : > { %3478 = vrot.lane.b32.xlu2 %v12587_v16, %s5186_s14 }
 0x6a8   : > { %v9305_v52 = vpop.permute.xlu0 %3343  ;;  %v9307_v63 = vpop.permute.xlu1 %3339 }
 0x6a9   : > { %12588 = vst [vmem:[#allocation34_spill] sm:$0xff] %v9305_v52  ;;  %v9309_v3 = vpop.permute.xlu2 %3359  ;;  %v12597_v52 = vld [vmem:[#allocation227_spill] sm:$0xff] }
 0x6aa   : > { %12589 = vst [vmem:[#allocation40_spill] sm:$0xff] %v9307_v63 }
 0x6ab   : > { %12590 = vst [vmem:[#allocation76_spill] sm:$0xff] %v9309_v3  ;;  %v12598_v3 = vld [vmem:[#allocation179_spill] sm:$0xff] }
 0x6ae   : > { %3486 = vrot.lane.b32.xlu0 %v12591_v2, %s5186_s14  ;;  %3482 = vrot.lane.b32.xlu1 %v12592_v28, %s5186_s14  ;;  %v12599_v2 = vld [vmem:[#allocation3_spill] sm:$0xff] }
 0x6af   : > { %3484 = vrot.lane.b32.xlu2 %v12593_v1, %s5186_s14 }
 0x6b0   : > { %v9317_v34 = vpop.permute.xlu0 %3349  ;;  %v9319_v7 = vpop.permute.xlu1 %3345 }
 0x6b1   : > { %12594 = vst [vmem:[#allocation118_spill] sm:$0xff] %v9317_v34  ;;  %v9321_v16 = vpop.permute.xlu2 %3365  ;;  %v12603_v34 = vld [vmem:[#allocation95_spill] sm:$0xff] }
 0x6b2   : > { %12595 = vst [vmem:[#allocation121_spill] sm:$0xff] %v9319_v7 }
 0x6b3   : > { %12596 = vst [vmem:[#allocation31_spill] sm:$0xff] %v9321_v16  ;;  %v12604_v16 = vld [vmem:[#allocation184_spill] sm:$0xff] }
 0x6b6   : > { %3492 = vrot.lane.b32.xlu0 %v12597_v52, %s5186_s14  ;;  %3488 = vrot.lane.b32.xlu1 %v12598_v3, %s5186_s14  ;;  %v12605_v52 = vld [vmem:[#allocation273_spill] sm:$0xff] }
 0x6b7   : > { %3490 = vrot.lane.b32.xlu2 %v12599_v2, %s5186_s14 }
 0x6b8   : > { %v9329_v58 = vpop.permute.xlu0 %3355  ;;  %v9331_v28 = vpop.permute.xlu1 %3351 }
 0x6b9   : > { %12600 = vst [vmem:[#allocation158_spill] sm:$0xff] %v9329_v58  ;;  %v9333_v1 = vpop.permute.xlu2 %3371  ;;  %v12609_v58 = vld [vmem:[#allocation222_spill] sm:$0xff] }
 0x6ba   : > { %12601 = vst [vmem:[#allocation59_spill] sm:$0xff] %v9331_v28  ;;  %v12611_v28 = vld [vmem:[#allocation91_spill] sm:$0xff] }
 0x6bb   : > { %12602 = vst [vmem:[#allocation189_spill] sm:$0xff] %v9333_v1  ;;  %v12610_v1 = vld [vmem:[#allocation169_spill] sm:$0xff] }
 0x6be   : > { %3498 = vrot.lane.b32.xlu0 %v12603_v34, %s5186_s14  ;;  %3494 = vrot.lane.b32.xlu1 %v12604_v16, %s5186_s14 }
 0x6bf   : > { %3496 = vrot.lane.b32.xlu2 %v12605_v52, %s5186_s14 }
 0x6c0   : > { %v9341_v7 = vpop.permute.xlu0 %3361  ;;  %v9343_v3 = vpop.permute.xlu1 %3357 }
 0x6c1   : > { %12606 = vst [vmem:[#allocation212_spill] sm:$0xff] %v9341_v7  ;;  %v9345_v2 = vpop.permute.xlu2 %3377  ;;  %v12615_v7 = vld [vmem:[#allocation81_spill] sm:$0xff] }
 0x6c2   : > { %12607 = vst [vmem:[#allocation11_spill] sm:$0xff] %v9343_v3  ;;  %v12617_v3 = vld [vmem:[#allocation267_spill] sm:$0xff] }
 0x6c3   : > { %12608 = vst [vmem:[#allocation257_spill] sm:$0xff] %v9345_v2  ;;  %v12616_v2 = vld [vmem:[#allocation7_spill] sm:$0xff] }
 0x6c6   : > { %3504 = vrot.lane.b32.xlu0 %v12609_v58, %s5186_s14  ;;  %3500 = vrot.lane.b32.xlu1 %v12610_v1, %s5186_s14 }
 0x6c7   : > { %3502 = vrot.lane.b32.xlu2 %v12611_v28, %s5186_s14 }
 0x6c8   : > { %v9353_v27 = vpop.permute.xlu0 %3367  ;;  %v9355_v37 = vpop.permute.xlu1 %3363 }
 0x6c9   : > { %12612 = vst [vmem:[#allocation280_spill] sm:$0xff] %v9353_v27  ;;  %v9357_v10 = vpop.permute.xlu2 %3383  ;;  %v12621_v27 = vld [vmem:[#allocation278_spill] sm:$0xff] }
 0x6ca   : > { %12613 = vst [vmem:[#allocation303_spill] sm:$0xff] %v9355_v37  ;;  %v12623_v37 = vld [vmem:[#allocation127_spill] sm:$0xff] }
 0x6cb   : > { %12614 = vst [vmem:[#allocation320_spill] sm:$0xff] %v9357_v10  ;;  %v12622_v10 = vld [vmem:[#allocation187_spill] sm:$0xff] }
 0x6ce   : > { %3510 = vrot.lane.b32.xlu0 %v12615_v7, %s5186_s14  ;;  %3506 = vrot.lane.b32.xlu1 %v12616_v2, %s5186_s14 }
 0x6cf   : > { %3508 = vrot.lane.b32.xlu2 %v12617_v3, %s5186_s14 }
 0x6d0   : > { %v9365_v32 = vpop.permute.xlu0 %3373  ;;  %v9367_v25 = vpop.permute.xlu1 %3369 }
 0x6d1   : > { %12618 = vst [vmem:[#allocation338_spill] sm:$0xff] %v9365_v32  ;;  %v9369_v33 = vpop.permute.xlu2 %3442  ;;  %v12627_v32 = vld [vmem:[#allocation97_spill] sm:$0xff] }
 0x6d2   : > { %12619 = vst [vmem:[#allocation18_spill] sm:$0xff] %v9367_v25  ;;  %v12628_v25 = vld [vmem:[#allocation283_spill] sm:$0xff] }
 0x6d3   : > { %12620 = vst [vmem:[#allocation55_spill] sm:$0xff] %v9369_v33 }
 0x6d6   : > { %3516 = vrot.lane.b32.xlu0 %v12621_v27, %s5186_s14  ;;  %3512 = vrot.lane.b32.xlu1 %v12622_v10, %s5186_s14 }
 0x6d7   : > { %3514 = vrot.lane.b32.xlu2 %v12623_v37, %s5186_s14 }
 0x6d8   : > { %v9377_v63 = vpop.permute.xlu0 %3379  ;;  %v9379_v36 = vpop.permute.xlu1 %3375 }
 0x6d9   : > { %12624 = vst [vmem:[#allocation271_spill] sm:$0xff] %v9377_v63  ;;  %v9381_v7 = vpop.permute.xlu2 %3448  ;;  %v12632_v63 = vld [vmem:[#allocation269_spill] sm:$0xff] }
 0x6da   : > { %12625 = vst [vmem:[#allocation137_spill] sm:$0xff] %v9379_v36  ;;  %v12633_v36 = vld [vmem:[#allocation245_spill] sm:$0xff] }
 0x6db   : > { %12626 = vst [vmem:[#allocation128_spill] sm:$0xff] %v9381_v7 }
 0x6de   : > { %3522 = vrot.lane.b32.xlu0 %v8620_v43, %s5186_s14  ;;  %3518 = vrot.lane.b32.xlu1 %v12627_v32, %s5186_s14 }
 0x6df   : > { %3520 = vrot.lane.b32.xlu2 %v12628_v25, %s5186_s14  ;;  %v3437_v25 = vrot.slane %v9213_v56, 1 }
 0x6e0   : > { %v9389_v27 = vpop.permute.xlu0 %3385  ;;  %v9391_v33 = vpop.permute.xlu1 %3381 }
 0x6e1   : > { %12629 = vst [vmem:[#allocation33_spill] sm:$0xff] %v9389_v27  ;;  %v9393_v37 = vpop.permute.xlu2 %3454  ;;  %v3435_v27 = vrot.slane %v8645_v5, 1 }
 0x6e2   : > { %12630 = vst [vmem:[#allocation138_spill] sm:$0xff] %v9391_v33 }
 0x6e3   : > { %12631 = vst [vmem:[#allocation64_spill] sm:$0xff] %v9393_v37  ;;  %v12637_v37 = vld [vmem:[#allocation2_spill] sm:$0xff] }
 0x6e4   : > { %v9411_v32 = vsel %vm508_vm1, %v3437_v25, %v12637_v37 }
 0x6e5   : > { %12638 = vst [vmem:[#allocation262_spill] sm:$0xff] %v9411_v32 }
 0x6e6   : > { %3528 = vrot.lane.b32.xlu0 %v8656_v13, %s5186_s14  ;;  %3524 = vrot.lane.b32.xlu1 %v12632_v63, %s5186_s14  ;;  %v12639_v13 = vrot.slane %v8626_v41, 1 }
 0x6e7   : > { %3526 = vrot.lane.b32.xlu2 %v12633_v36, %s5186_s14  ;;  %v9421_v36 = vsel %vm508_vm1, %v3435_v27, %v3437_v25 }
 0x6e8   : > { %v9401_v43 = vpop.permute.xlu0 %3444  ;;  %v9403_v7 = vpop.permute.xlu1 %3440  ;;  %v9416_v63 = vsel %vm508_vm1, %v12639_v13, %v3435_v27  ;;  %12641 = vst [vmem:[#allocation308_spill] sm:$0xff] %v9421_v36  ;;  %v12645_v13 = vld [vmem:[#allocation8_spill] sm:$0xff]  ;;  %vm4533_vm1 = vcmask 588800  }
 0x6e9   : > { %12634 = vst [vmem:[#allocation197_spill] sm:$0xff] %v9401_v43  ;;  %v9407_v33 = vpop.permute.xlu2 %3460  ;;  %v12647_v27 = vld [vmem:[#allocation276_spill] sm:$0xff] }
 0x6ea   : > { %12635 = vst [vmem:[#allocation217_spill] sm:$0xff] %v9403_v7 }
 0x6eb   : > { %12636 = vst [vmem:[#allocation242_spill] sm:$0xff] %v9407_v33 }
 0x6ec   : > { %12640 = vst [vmem:[#allocation288_spill] sm:$0xff] %v9416_v63 }
 0x6ee   : > { %3534 = vrot.lane.b32.xlu0 %v9411_v32, %s5186_s14  ;;  %3530 = vrot.lane.b32.xlu1 %v9416_v63, %s5186_s14  ;;  %v12646_v32 = vld [vmem:[#allocation250_spill] sm:$0xff] }
 0x6ef   : > { %3532 = vrot.lane.b32.xlu2 %v9421_v36, %s5186_s14  ;;  %s5190_s14 = smov 64  }
 0x6f0   : > { %v9427_v33 = vpop.permute.xlu0 %3450  ;;  %v9429_v37 = vpop.permute.xlu1 %3446 }
 0x6f1   : > { %12642 = vst [vmem:[#allocation325_spill] sm:$0xff] %v9427_v33  ;;  %v9431_v43 = vpop.permute.xlu2 %3466  ;;  %v12651_v33 = vld [vmem:[#allocation190_spill] sm:$0xff] }
 0x6f2   : > { %12643 = vst [vmem:[#allocation342_spill] sm:$0xff] %v9429_v37 }
 0x6f3   : > { %12644 = vst [vmem:[#allocation30_spill] sm:$0xff] %v9431_v43  ;;  %v12652_v43 = vld [vmem:[#allocation195_spill] sm:$0xff] }
 0x6f6   : > { %3593 = vrot.lane.b32.xlu0 %v12645_v13, %s5187_s8  ;;  %3589 = vrot.lane.b32.xlu1 %v12646_v32, %s5187_s8  ;;  %v12653_v13 = vld [vmem:[#allocation235_spill] sm:$0xff] }
 0x6f7   : > { %3591 = vrot.lane.b32.xlu2 %v12647_v27, %s5187_s8 }
 0x6f8   : > { %v9439_v25 = vpop.permute.xlu0 %3456  ;;  %v9441_v63 = vpop.permute.xlu1 %3452 }
 0x6f9   : > { %12648 = vst [vmem:[#allocation61_spill] sm:$0xff] %v9439_v25  ;;  %v9443_v36 = vpop.permute.xlu2 %3472  ;;  %v12657_v25 = vld [vmem:[#allocation29_spill] sm:$0xff] }
 0x6fa   : > { %12649 = vst [vmem:[#allocation100_spill] sm:$0xff] %v9441_v63  ;;  %v12659_v63 = vld [vmem:[#allocation105_spill] sm:$0xff] }
 0x6fb   : > { %12650 = vst [vmem:[#allocation125_spill] sm:$0xff] %v9443_v36  ;;  %v12658_v36 = vld [vmem:[#allocation67_spill] sm:$0xff] }
 0x6fe   : > { %3599 = vrot.lane.b32.xlu0 %v12651_v33, %s5187_s8  ;;  %3595 = vrot.lane.b32.xlu1 %v12652_v43, %s5187_s8 }
 0x6ff   : > { %3597 = vrot.lane.b32.xlu2 %v12653_v13, %s5187_s8 }
 0x700   : > { %v9451_v37 = vpop.permute.xlu0 %3462  ;;  %v9453_v32 = vpop.permute.xlu1 %3458 }
 0x701   : > { %12654 = vst [vmem:[#allocation108_spill] sm:$0xff] %v9451_v37  ;;  %v9455_v27 = vpop.permute.xlu2 %3478  ;;  %v12663_v37 = vld [vmem:[#allocation41_spill] sm:$0xff] }
 0x702   : > { %12655 = vst [vmem:[#allocation37_spill] sm:$0xff] %v9453_v32  ;;  %v12665_v32 = vld [vmem:[#allocation203_spill] sm:$0xff] }
 0x703   : > { %12656 = vst [vmem:[#allocation157_spill] sm:$0xff] %v9455_v27  ;;  %v12664_v27 = vld [vmem:[#allocation180_spill] sm:$0xff] }
 0x706   : > { %3605 = vrot.lane.b32.xlu0 %v12657_v25, %s5187_s8  ;;  %3601 = vrot.lane.b32.xlu1 %v12658_v36, %s5187_s8 }
 0x707   : > { %3603 = vrot.lane.b32.xlu2 %v12659_v63, %s5187_s8 }
 0x708   : > { %v9463_v7 = vpop.permute.xlu0 %3468  ;;  %v9465_v10 = vpop.permute.xlu1 %3464 }
 0x709   : > { %12660 = vst [vmem:[#allocation63_spill] sm:$0xff] %v9463_v7  ;;  %v9467_v48 = vpop.permute.xlu2 %3484  ;;  %v12669_v7 = vld [vmem:[#allocation294_spill] sm:$0xff] }
 0x70a   : > { %12661 = vst [vmem:[#allocation202_spill] sm:$0xff] %v9465_v10  ;;  %v12671_v10 = vld [vmem:[#allocation330_spill] sm:$0xff] }
 0x70b   : > { %12662 = vst [vmem:[#allocation207_spill] sm:$0xff] %v9467_v48  ;;  %v12670_v48 = vld [vmem:[#allocation316_spill] sm:$0xff] }
 0x70e   : > { %3611 = vrot.lane.b32.xlu0 %v12663_v37, %s5187_s8  ;;  %3607 = vrot.lane.b32.xlu1 %v12664_v27, %s5187_s8 }
 0x70f   : > { %3609 = vrot.lane.b32.xlu2 %v12665_v32, %s5187_s8 }
 0x710   : > { %v9475_v24 = vpop.permute.xlu0 %3474  ;;  %v9477_v6 = vpop.permute.xlu1 %3470 }
 0x711   : > { %12666 = vst [vmem:[#allocation247_spill] sm:$0xff] %v9475_v24  ;;  %v9479_v3 = vpop.permute.xlu2 %3490  ;;  %v12675_v24 = vld [vmem:[#allocation111_spill] sm:$0xff] }
 0x712   : > { %12667 = vst [vmem:[#allocation252_spill] sm:$0xff] %v9477_v6  ;;  %v12676_v6 = vld [vmem:[#allocation110_spill] sm:$0xff] }
 0x713   : > { %12668 = vst [vmem:[#allocation293_spill] sm:$0xff] %v9479_v3 }
 0x716   : > { %3617 = vrot.lane.b32.xlu0 %v12669_v7, %s5187_s8  ;;  %3613 = vrot.lane.b32.xlu1 %v12670_v48, %s5187_s8  ;;  %v12677_v7 = vld [vmem:[#allocation15_spill] sm:$0xff] }
 0x717   : > { %3615 = vrot.lane.b32.xlu2 %v12671_v10, %s5187_s8 }
 0x718   : > { %v9487_v37 = vpop.permute.xlu0 %3480  ;;  %v9489_v27 = vpop.permute.xlu1 %3476 }
 0x719   : > { %12672 = vst [vmem:[#allocation298_spill] sm:$0xff] %v9487_v37  ;;  %v9491_v32 = vpop.permute.xlu2 %3496  ;;  %v12681_v37 = vld [vmem:[#allocation208_spill] sm:$0xff] }
 0x71a   : > { %12673 = vst [vmem:[#allocation329_spill] sm:$0xff] %v9489_v27  ;;  %v12682_v27 = vld [vmem:[#allocation12_spill] sm:$0xff] }
 0x71b   : > { %12674 = vst [vmem:[#allocation333_spill] sm:$0xff] %v9491_v32 }
 0x71e   : > { %3623 = vrot.lane.b32.xlu0 %v12675_v24, %s5187_s8  ;;  %3619 = vrot.lane.b32.xlu1 %v12676_v6, %s5187_s8  ;;  %v12683_v24 = vld [vmem:[#allocation253_spill] sm:$0xff] }
 0x71f   : > { %3621 = vrot.lane.b32.xlu2 %v12677_v7, %s5187_s8 }
 0x720   : > { %v9499_v3 = vpop.permute.xlu0 %3486  ;;  %v9501_v48 = vpop.permute.xlu1 %3482 }
 0x721   : > { %12678 = vst [vmem:[#allocation39_spill] sm:$0xff] %v9499_v3  ;;  %v9503_v10 = vpop.permute.xlu2 %3502  ;;  %v12687_v3 = vld [vmem:[#allocation334_spill] sm:$0xff] }
 0x722   : > { %12679 = vst [vmem:[#allocation42_spill] sm:$0xff] %v9501_v48  ;;  %v12688_v48 = vld [vmem:[#allocation16_spill] sm:$0xff] }
 0x723   : > { %12680 = vst [vmem:[#allocation84_spill] sm:$0xff] %v9503_v10 }
 0x726   : > { %3629 = vrot.lane.b32.xlu0 %v12681_v37, %s5187_s8  ;;  %3625 = vrot.lane.b32.xlu1 %v12682_v27, %s5187_s8  ;;  %v12689_v37 = vld [vmem:[#allocation44_spill] sm:$0xff] }
 0x727   : > { %3627 = vrot.lane.b32.xlu2 %v12683_v24, %s5187_s8 }
 0x728   : > { %v9511_v32 = vpop.permute.xlu0 %3492  ;;  %v9513_v6 = vpop.permute.xlu1 %3488 }
 0x729   : > { %12684 = vst [vmem:[#allocation124_spill] sm:$0xff] %v9511_v32  ;;  %v9515_v7 = vpop.permute.xlu2 %3508  ;;  %v12693_v32 = vld [vmem:[#allocation20_spill] sm:$0xff] }
 0x72a   : > { %12685 = vst [vmem:[#allocation164_spill] sm:$0xff] %v9513_v6 }
 0x72b   : > { %12686 = vst [vmem:[#allocation65_spill] sm:$0xff] %v9515_v7  ;;  %v12694_v7 = vld [vmem:[#allocation139_spill] sm:$0xff] }
 0x72e   : > { %3635 = vrot.lane.b32.xlu0 %v12687_v3, %s5187_s8  ;;  %3631 = vrot.lane.b32.xlu1 %v12688_v48, %s5187_s8  ;;  %v12695_v3 = vld [vmem:[#allocation45_spill] sm:$0xff] }
 0x72f   : > { %3633 = vrot.lane.b32.xlu2 %v12689_v37, %s5187_s8 }
 0x730   : > { %v9523_v10 = vpop.permute.xlu0 %3498  ;;  %v9525_v27 = vpop.permute.xlu1 %3494 }
 0x731   : > { %12690 = vst [vmem:[#allocation215_spill] sm:$0xff] %v9523_v10  ;;  %v9527_v24 = vpop.permute.xlu2 %3514  ;;  %v12699_v10 = vld [vmem:[#allocation243_spill] sm:$0xff] }
 0x732   : > { %12691 = vst [vmem:[#allocation260_spill] sm:$0xff] %v9525_v27 }
 0x733   : > { %12692 = vst [vmem:[#allocation306_spill] sm:$0xff] %v9527_v24  ;;  %v12700_v24 = vld [vmem:[#allocation284_spill] sm:$0xff] }
 0x736   : > { %3641 = vrot.lane.b32.xlu0 %v12693_v32, %s5187_s8  ;;  %3637 = vrot.lane.b32.xlu1 %v12694_v7, %s5187_s8  ;;  %v12701_v32 = vld [vmem:[#allocation289_spill] sm:$0xff] }
 0x737   : > { %3639 = vrot.lane.b32.xlu2 %v12695_v3, %s5187_s8 }
 0x738   : > { %v9535_v6 = vpop.permute.xlu0 %3504  ;;  %v9537_v48 = vpop.permute.xlu1 %3500 }
 0x739   : > { %12696 = vst [vmem:[#allocation341_spill] sm:$0xff] %v9535_v6  ;;  %v9539_v37 = vpop.permute.xlu2 %3520  ;;  %v12705_v6 = vld [vmem:[#allocation35_spill] sm:$0xff] }
 0x73a   : > { %12697 = vst [vmem:[#allocation56_spill] sm:$0xff] %v9537_v48  ;;  %v12707_v48 = vld [vmem:[#allocation119_spill] sm:$0xff] }
 0x73b   : > { %12698 = vst [vmem:[#allocation144_spill] sm:$0xff] %v9539_v37  ;;  %v12706_v37 = vld [vmem:[#allocation69_spill] sm:$0xff] }
 0x73e   : > { %3647 = vrot.lane.b32.xlu0 %v12699_v10, %s5187_s8  ;;  %3643 = vrot.lane.b32.xlu1 %v12700_v24, %s5187_s8 }
 0x73f   : > { %3645 = vrot.lane.b32.xlu2 %v12701_v32, %s5187_s8 }
 0x740   : > { %v9547_v27 = vpop.permute.xlu0 %3510  ;;  %v9549_v7 = vpop.permute.xlu1 %3506 }
 0x741   : > { %12702 = vst [vmem:[#allocation71_spill] sm:$0xff] %v9547_v27  ;;  %v9551_v3 = vpop.permute.xlu2 %3526  ;;  %v12711_v27 = vld [vmem:[#allocation47_spill] sm:$0xff] }
 0x742   : > { %12703 = vst [vmem:[#allocation220_spill] sm:$0xff] %v9549_v7  ;;  %v12713_v7 = vld [vmem:[#allocation206_spill] sm:$0xff] }
 0x743   : > { %12704 = vst [vmem:[#allocation265_spill] sm:$0xff] %v9551_v3  ;;  %v12712_v3 = vld [vmem:[#allocation183_spill] sm:$0xff] }
 0x746   : > { %3653 = vrot.lane.b32.xlu0 %v12705_v6, %s5187_s8  ;;  %3649 = vrot.lane.b32.xlu1 %v12706_v37, %s5187_s8 }
 0x747   : > { %3651 = vrot.lane.b32.xlu2 %v12707_v48, %s5187_s8 }
 0x748   : > { %v9559_v31 = vpop.permute.xlu0 %3516  ;;  %v9561_v44 = vpop.permute.xlu1 %3512 }
 0x749   : > { %12708 = vst [vmem:[#allocation310_spill] sm:$0xff] %v9559_v31  ;;  %v9563_v25 = vpop.permute.xlu2 %3532  ;;  %v12717_v31 = vld [vmem:[#allocation297_spill] sm:$0xff] }
 0x74a   : > { %12709 = vst [vmem:[#allocation344_spill] sm:$0xff] %v9561_v44  ;;  %v12719_v44 = vld [vmem:[#allocation332_spill] sm:$0xff] }
 0x74b   : > { %12710 = vst [vmem:[#allocation62_spill] sm:$0xff] %v9563_v25  ;;  %v12718_v25 = vld [vmem:[#allocation317_spill] sm:$0xff] }
 0x74e   : > { %3659 = vrot.lane.b32.xlu0 %v12711_v27, %s5187_s8  ;;  %3655 = vrot.lane.b32.xlu1 %v12712_v3, %s5187_s8 }
 0x74f   : > { %3657 = vrot.lane.b32.xlu2 %v12713_v7, %s5187_s8 }
 0x750   : > { %v9571_v39 = vpop.permute.xlu0 %3522  ;;  %v9573_v2 = vpop.permute.xlu1 %3518 }
 0x751   : > { %12714 = vst [vmem:[#allocation123_spill] sm:$0xff] %v9571_v39  ;;  %v9575_v6 = vpop.permute.xlu2 %3591  ;;  %v12723_v39 = vld [vmem:[#allocation117_spill] sm:$0xff] }
 0x752   : > { %12715 = vst [vmem:[#allocation162_spill] sm:$0xff] %v9573_v2 }
 0x753   : > { %12716 = vst [vmem:[#allocation70_spill] sm:$0xff] %v9575_v6 }
 0x756   : > { %3665 = vrot.lane.b32.xlu0 %v12717_v31, %s5187_s8  ;;  %3661 = vrot.lane.b32.xlu1 %v12718_v25, %s5187_s8 }
 0x757   : > { %3663 = vrot.lane.b32.xlu2 %v12719_v44, %s5187_s8 }
 0x758   : > { %v9583_v27 = vpop.permute.xlu0 %3528  ;;  %v9585_v3 = vpop.permute.xlu1 %3524 }
 0x759   : > { %12720 = vst [vmem:[#allocation210_spill] sm:$0xff] %v9583_v27  ;;  %v9587_v7 = vpop.permute.xlu2 %3597 }
 0x75a   : > { %12721 = vst [vmem:[#allocation255_spill] sm:$0xff] %v9585_v3 }
 0x75b   : > { %12722 = vst [vmem:[#allocation301_spill] sm:$0xff] %v9587_v7 }
 0x75e   : > { %3671 = vrot.lane.b32.xlu0 %v12723_v39, %s5187_s8  ;;  %3667 = vrot.lane.b32.xlu1 %v8988_v17, %s5187_s8  ;;  %v3586_v39 = vrot.slane %v9213_v56, 2 }
 0x75f   : > { %3669 = vrot.lane.b32.xlu2 %v8993_v47, %s5187_s8 }
 0x760   : > { %v9595_v2 = vpop.permute.xlu0 %3534  ;;  %v9597_v31 = vpop.permute.xlu1 %3530 }
 0x761   : > { %12724 = vst [vmem:[#allocation336_spill] sm:$0xff] %v9595_v2  ;;  %v9599_v6 = vpop.permute.xlu2 %3603  ;;  %v3584_v2 = vrot.slane %v8645_v5, 2 }
 0x762   : > { %12725 = vst [vmem:[#allocation48_spill] sm:$0xff] %v9597_v31 }
 0x763   : > { %12726 = vst [vmem:[#allocation170_spill] sm:$0xff] %v9599_v6  ;;  %v12728_v6 = vld [vmem:[#allocation85_spill] sm:$0xff] }
 0x764   : > { %v9617_v7 = vsel %vm744_vm2, %v3586_v39, %v12728_v6 }
 0x765   : > { %12729 = vst [vmem:[#allocation218_spill] sm:$0xff] %v9617_v7 }
 0x766   : > { %3677 = vrot.lane.b32.xlu0 %v9011_v22, %s5187_s8  ;;  %3673 = vrot.lane.b32.xlu1 %v9014_v21, %s5187_s8  ;;  %v12730_v22 = vrot.slane %v8626_v41, 2 }
 0x767   : > { %3675 = vrot.lane.b32.xlu2 %v9017_v14, %s5187_s8  ;;  %v9627_v14 = vsel %vm744_vm2, %v3584_v2, %v3586_v39 }
 0x768   : > { %v9607_v27 = vpop.permute.xlu0 %3593  ;;  %v9609_v3 = vpop.permute.xlu1 %3589  ;;  %v9622_v21 = vsel %vm744_vm2, %v12730_v22, %v3584_v2  ;;  %12731 = vst [vmem:[#allocation263_spill] sm:$0xff] %v9627_v14 }
 0x769   : > { %v9613_v31 = vpop.permute.xlu2 %3609 }
 0x76a   : > { %12727 = vst [vmem:[#allocation72_spill] sm:$0xff] %v9613_v31 }
 0x76e   : > { %3683 = vrot.lane.b32.xlu0 %v9617_v7, %s5187_s8  ;;  %3679 = vrot.lane.b32.xlu1 %v9622_v21, %s5187_s8 }
 0x76f   : > { %3681 = vrot.lane.b32.xlu2 %v9627_v14, %s5187_s8 }
 0x770   : > { %v9633_v56 = vpop.permute.xlu0 %3599  ;;  %v9635_v6 = vpop.permute.xlu1 %3595 }
 0x771   : > { %v9637_v31 = vpop.permute.xlu2 %3615 }
 0x772   : > { %12732 = vst [vmem:[#allocation167_spill] sm:$0xff] %v9637_v31 }
 0x776   : > { %3737 = vrot.lane.b32.xlu0 %v7949_v9, %s5188_s10  ;;  %3733 = vrot.lane.b32.xlu1 %v7900_v46, %s5188_s10 }
 0x777   : > { %3735 = vrot.lane.b32.xlu2 %v7946_v59, %s5188_s10 }
 0x778   : > { %v9645_v2 = vpop.permute.xlu0 %3605  ;;  %v9647_v39 = vpop.permute.xlu1 %3601 }
 0x779   : > { %v9649_v22 = vpop.permute.xlu2 %3621 }
 0x77a   : > { %12733 = vst [vmem:[#allocation343_spill] sm:$0xff] %v9649_v22 }
 0x77e   : > { %3743 = vrot.lane.b32.xlu0 %v8085_v15, %s5188_s10  ;;  %3739 = vrot.lane.b32.xlu1 %v8036_v30, %s5188_s10 }
 0x77f   : > { %3741 = vrot.lane.b32.xlu2 %v8082_v60, %s5188_s10 }
 0x780   : > { %v9657_v31 = vpop.permute.xlu0 %3611  ;;  %v9659_v7 = vpop.permute.xlu1 %3607 }
 0x781   : > { %12734 = vst [vmem:[#allocation60_spill] sm:$0xff] %v9657_v31  ;;  %v9661_v14 = vpop.permute.xlu2 %3627  ;;  %v12788_v31 = vld [vmem:[#allocation187_spill] sm:$0xff] }
 0x782   : > { %12735 = vst [vmem:[#allocation130_spill] sm:$0xff] %v9661_v14 }
 0x786   : > { %3749 = vrot.lane.b32.xlu0 %v8172_v26, %s5188_s10  ;;  %3745 = vrot.lane.b32.xlu1 %v8141_v40, %s5188_s10  ;;  %v12774_v40 = vld [vmem:[#allocation203_spill] sm:$0xff] }
 0x787   : > { %3747 = vrot.lane.b32.xlu2 %v8169_v19, %s5188_s10 }
 0x788   : > { %v9669_v22 = vpop.permute.xlu0 %3617  ;;  %v9671_v15 = vpop.permute.xlu1 %3613 }
 0x789   : > { %12736 = vst [vmem:[#allocation150_spill] sm:$0xff] %v9669_v22  ;;  %v9673_v60 = vpop.permute.xlu2 %3633  ;;  %v2784_v22 = vld [vmem:[%s10981_s4] sm:$0xff] }
 0x78a   : > { %12737 = vst [vmem:[#allocation78_spill] sm:$0xff] %v9671_v15 }
 0x78b   : > { %12738 = vst [vmem:[#allocation223_spill] sm:$0xff] %v9673_v60 }
 0x78e   : > { %3755 = vrot.lane.b32.xlu0 %v8265_v23, %s5188_s10  ;;  %3751 = vrot.lane.b32.xlu1 %v8226_v45, %s5188_s10  ;;  %v12767_v45 = vld [vmem:[#allocation166_spill] sm:$0xff] }
 0x78f   : > { %3753 = vrot.lane.b32.xlu2 %v8262_v55, %s5188_s10 }
 0x790   : > { %v9681_v14 = vpop.permute.xlu0 %3623  ;;  %v9683_v26 = vpop.permute.xlu1 %3619 }
 0x791   : > { %12739 = vst [vmem:[#allocation268_spill] sm:$0xff] %v9681_v14  ;;  %v9685_v19 = vpop.permute.xlu2 %3639 }
 0x792   : > { %12740 = vst [vmem:[#allocation312_spill] sm:$0xff] %v9683_v26 }
 0x796   : > { %3761 = vrot.lane.b32.xlu0 %v8330_v35, %s5188_s10  ;;  %3757 = vrot.lane.b32.xlu1 %v8306_v12, %s5188_s10 }
 0x797   : > { %3759 = vrot.lane.b32.xlu2 %v8327_v4, %s5188_s10 }
 0x798   : > { %v9693_v60 = vpop.permute.xlu0 %3629  ;;  %v9695_v23 = vpop.permute.xlu1 %3625 }
 0x799   : > { %12741 = vst [vmem:[#allocation346_spill] sm:$0xff] %v9693_v60  ;;  %v9697_v55 = vpop.permute.xlu2 %3645 }
 0x79a   : > { %12742 = vst [vmem:[#allocation68_spill] sm:$0xff] %v9695_v23 }
 0x79e   : > { %3767 = vrot.lane.b32.xlu0 %v8374_v11, %s5188_s10  ;;  %3763 = vrot.lane.b32.xlu1 %v8350_v51, %s5188_s10 }
 0x79f   : > { %3765 = vrot.lane.b32.xlu2 %v8371_v8, %s5188_s10 }
 0x7a0   : > { %v9705_v35 = vpop.permute.xlu0 %3635  ;;  %v9707_v12 = vpop.permute.xlu1 %3631 }
 0x7a1   : > { %12743 = vst [vmem:[#allocation129_spill] sm:$0xff] %v9705_v35  ;;  %v9709_v4 = vpop.permute.xlu2 %3651 }
 0x7a2   : > { %12744 = vst [vmem:[#allocation168_spill] sm:$0xff] %v9707_v12 }
 0x7a6   : > { %3919 = vrot.lane.b32.xlu0 %v12604_v16, %s5189_s12  ;;  %3769 = vrot.lane.b32.xlu1 %v8391_v61, %s5188_s10 }
 0x7a7   : > { %3781 = vrot.lane.b32.xlu2 %v8438_v0, %s5188_s10 }
 0x7a8   : > { %v9717_v11 = vpop.permute.xlu0 %3641  ;;  %v9719_v51 = vpop.permute.xlu1 %3637 }
 0x7a9   : > { %v9721_v8 = vpop.permute.xlu2 %3657 }
 0x7ae   : > { %3783 = vrot.lane.b32.xlu0 %v8257_v54, %s5188_s10  ;;  %4057 = vrot.lane.b32.xlu1 %v12700_v24, %s5190_s14 }
 0x7af   : > { %3871 = vrot.lane.b32.xlu2 %v12555_v53, %s5189_s12 }
 0x7b0   : > { %v9729_v16 = vpop.permute.xlu0 %3647  ;;  %v9731_v35 = vpop.permute.xlu1 %3643 }
 0x7b1   : > { %v9733_v12 = vpop.permute.xlu2 %3663 }
 0x7b2   : > { %12745 = vst [vmem:[#allocation77_spill] sm:$0xff] %v9733_v12 }
 0x7b6   : > { %4059 = vrot.lane.b32.xlu0 %v12701_v32, %s5190_s14  ;;  %4009 = vrot.lane.b32.xlu1 %v12652_v43, %s5190_s14 }
 0x7b7   : > { %3921 = vrot.lane.b32.xlu2 %v12605_v52, %s5189_s12 }
 0x7b8   : > { %v9741_v60 = vpop.permute.xlu0 %3653  ;;  %v9743_v24 = vpop.permute.xlu1 %3649 }
 0x7b9   : > { %v9745_v53 = vpop.permute.xlu2 %3669 }
 0x7ba   : > { %12746 = vst [vmem:[#allocation213_spill] sm:$0xff] %v9745_v53  ;;  %v2786_v53 = vld [vmem:[%s10981_s4 + $0x10] sm:$0xff] }
 0x7be   : > { %4011 = vrot.lane.b32.xlu0 %v12653_v13, %s5190_s14  ;;  %3873 = vrot.lane.b32.xlu1 %v12557_v50, %s5189_s12 }
 0x7bf   : > { %3785 = vrot.lane.b32.xlu2 %v8442_v42, %s5188_s10 }
 0x7c0   : > { %v9753_v32 = vpop.permute.xlu0 %3659  ;;  %v9755_v43 = vpop.permute.xlu1 %3655 }
 0x7c1   : > { %12747 = vst [vmem:[#allocation258_spill] sm:$0xff] %v9753_v32  ;;  %v9757_v52 = vpop.permute.xlu2 %3675 }
 0x7c2   : > { %12748 = vst [vmem:[#allocation304_spill] sm:$0xff] %v9757_v52 }
 0x7c6   : > { %3875 = vrot.lane.b32.xlu0 %v12556_v57, %s5189_s12  ;;  %3923 = vrot.lane.b32.xlu1 %v12603_v34, %s5189_s12 }
 0x7c7   : > { %4061 = vrot.lane.b32.xlu2 %v12699_v10, %s5190_s14 }
 0x7c8   : > { %v9765_v13 = vpop.permute.xlu0 %3665  ;;  %v9767_v50 = vpop.permute.xlu1 %3661 }
 0x7c9   : > { %12749 = vst [vmem:[#allocation339_spill] sm:$0xff] %v9765_v13  ;;  %v9769_v23 = vpop.permute.xlu2 %3681 }
 0x7ca   : > { %12750 = vst [vmem:[#allocation176_spill] sm:$0xff] %v9767_v50 }
 0x7cb   : > { %12751 = vst [vmem:[#allocation79_spill] sm:$0xff] %v9769_v23 }
 0x7ce   : > { %3925 = vrot.lane.b32.xlu0 %v12610_v1, %s5189_s12  ;;  %3787 = vrot.lane.b32.xlu1 %v8470_v49, %s5188_s10 }
 0x7cf   : > { %4013 = vrot.lane.b32.xlu2 %v12651_v33, %s5190_s14 }
 0x7d0   : > { %v9777_v57 = vpop.permute.xlu0 %3671  ;;  %v9779_v34 = vpop.permute.xlu1 %3667 }
 0x7d1   : > { %12752 = vst [vmem:[#allocation221_spill] sm:$0xff] %v9777_v57  ;;  %v9781_v10 = vpop.permute.xlu2 %3735  ;;  %v12763_v57 = vld [vmem:[#allocation29_spill] sm:$0xff] }
 0x7d2   : > { %12753 = vst [vmem:[#allocation266_spill] sm:$0xff] %v9779_v34 }
 0x7d6   : > { %3789 = vrot.lane.b32.xlu0 %v8324_v62, %s5188_s10  ;;  %4063 = vrot.lane.b32.xlu1 %v12706_v37, %s5190_s14 }
 0x7d7   : > { %3877 = vrot.lane.b32.xlu2 %v12562_v18, %s5189_s12 }
 0x7d8   : > { %v9789_v1 = vpop.permute.xlu0 %3677  ;;  %v9791_v23 = vpop.permute.xlu1 %3673 }
 0x7d9   : > { %12754 = vst [vmem:[#allocation173_spill] sm:$0xff] %v9789_v1  ;;  %v9793_v33 = vpop.permute.xlu2 %3741  ;;  %v2792_v1 = vld [vmem:[%s10981_s4 + $0x40] sm:$0xff] }
 0x7da   : > { %12755 = vst [vmem:[#allocation345_spill] sm:$0xff] %v9791_v23  ;;  %5129 = vmatpush.msra.mxu2 %v2792_v1  ;;  %4685 = vmatpush.msra.mxu1 %v2792_v1  ;;  %v12762_v23 = vld [vmem:[#allocation232_spill] sm:$0xff]  ;;  %v2789_v1 = vld [vmem:[%s10981_s4 + $0x28] sm:$0xff] }
 0x7de   : > { %4065 = vrot.lane.b32.xlu0 %v12707_v48, %s5190_s14  ;;  %4015 = vrot.lane.b32.xlu1 %v12658_v36, %s5190_s14 }
 0x7df   : > { %3927 = vrot.lane.b32.xlu2 %v12611_v28, %s5189_s12 }
 0x7e0   : > { %v9801_v52 = vpop.permute.xlu0 %3683  ;;  %v9803_v37 = vpop.permute.xlu1 %3679 }
 0x7e1   : > { %12756 = vst [vmem:[#allocation141_spill] sm:$0xff] %v9801_v52  ;;  %v9805_v18 = vpop.permute.xlu2 %3747 }
 0x7e2   : > { %12757 = vst [vmem:[#allocation142_spill] sm:$0xff] %v9803_v37 }
 0x7e6   : > { %4017 = vrot.lane.b32.xlu0 %v12659_v63, %s5190_s14  ;;  %3879 = vrot.lane.b32.xlu1 %v12563_v38, %s5189_s12  ;;  %v12759_v63 = vld [vmem:[#allocation35_spill] sm:$0xff] }
 0x7e7   : > { %3791 = vrot.lane.b32.xlu2 %v8474_v20, %s5188_s10  ;;  %v12795_v20 = vld [vmem:[#allocation146_spill] sm:$0xff] }
 0x7e8   : > { %v9813_v48 = vpop.permute.xlu0 %3737  ;;  %v9815_v36 = vpop.permute.xlu1 %3733 }
 0x7e9   : > { %v9817_v28 = vpop.permute.xlu2 %3753 }
 0x7ea   : > { %12758 = vst [vmem:[#allocation149_spill] sm:$0xff] %v9817_v28 }
 0x7ee   : > { %3881 = vrot.lane.b32.xlu0 %v12561_v29, %s5189_s12  ;;  %3929 = vrot.lane.b32.xlu1 %v12609_v58, %s5189_s12  ;;  %v2791_v29 = vld [vmem:[%s10981_s4 + $0x38] sm:$0xff]  ;;  %v2790_v58 = vld [vmem:[%s10981_s4 + $0x30] sm:$0xff] }
 0x7ef   : > { %4067 = vrot.lane.b32.xlu2 %v12759_v63, %s5190_s14  ;;  %5130 = vmatpush.msra.mxu2 %v2791_v29  ;;  %v12761_v63 = vld [vmem:[#allocation7_spill] sm:$0xff] }
 0x7f0   : > { %v9825_v52 = vpop.permute.xlu0 %3743  ;;  %v9827_v38 = vpop.permute.xlu1 %3739  ;;  %4686 = vmatpush.msra.mxu1 %v2791_v29 }
 0x7f1   : > { %v9829_v37 = vpop.permute.xlu2 %3759  ;;  %5131 = vmatpush.msra.mxu2 %v2790_v58 }
 0x7f2   : > { %12760 = vst [vmem:[#allocation154_spill] sm:$0xff] %v9829_v37  ;;  %4687 = vmatpush.msra.mxu1 %v2790_v58  ;;  %v12765_v58 = vld [vmem:[#allocation82_spill] sm:$0xff]  ;;  %v12771_v37 = vld [vmem:[#allocation267_spill] sm:$0xff] }
 0x7f3   : > { %5132 = vmatpush.msra.mxu2 %v2789_v1 }
 0x7f4   : > { %4688 = vmatpush.msra.mxu1 %v2789_v1  ;;  %v2785_v1 = vld [vmem:[%s10981_s4 + $0x8] sm:$0xff] }
 0x7f6   : > { %3931 = vrot.lane.b32.xlu0 %v12761_v63, %s5189_s12  ;;  %3793 = vrot.lane.b32.xlu1 %v12762_v23, %s5188_s10  ;;  %v2788_v63 = vld [vmem:[%s10981_s4 + $0x20] sm:$0xff]  ;;  %v12785_v23 = vld [vmem:[#allocation40_spill] sm:$0xff] }
 0x7f7   : > { %4019 = vrot.lane.b32.xlu2 %v12763_v57, %s5190_s14  ;;  %v2787_v57 = vld [vmem:[%s10981_s4 + $0x18] sm:$0xff]  ;;  %5133 = vmatpush.msra.mxu2 %v2788_v63 }
 0x7f8   : > { %v9849_v14 = vpop.permute.xlu0 %3749  ;;  %v9851_v26 = vpop.permute.xlu1 %3745  ;;  %4689 = vmatpush.msra.mxu1 %v2788_v63 }
 0x7f9   : > { %v9853_v29 = vpop.permute.xlu2 %3765  ;;  %5134 = vmatpush.msra.mxu2 %v2787_v57 }
 0x7fa   : > { %12764 = vst [vmem:[#allocation161_spill] sm:$0xff] %v9853_v29  ;;  %v12766_v29 = vld [vmem:[#allocation183_spill] sm:$0xff]  ;;  %4690 = vmatpush.msra.mxu1 %v2787_v57 }
 0x7fb   : > { %5135 = vmatpush.msra.mxu2 %v2786_v53 }
 0x7fc   : > { %4691 = vmatpush.msra.mxu1 %v2786_v53  ;;  %v12775_v53 = vld [vmem:[#allocation165_spill] sm:$0xff] }
 0x7fd   : > { %5136 = vmatpush.msra.mxu2 %v2785_v1 }
 0x7fe   : > { %3795 = vrot.lane.b32.xlu0 %v12765_v58, %s5188_s10  ;;  %4069 = vrot.lane.b32.xlu1 %v12766_v29, %s5190_s14  ;;  %v12770_v29 = vld [vmem:[#allocation180_spill] sm:$0xff] }
 0x7ff   : > { %3883 = vrot.lane.b32.xlu2 %v12767_v45, %s5189_s12  ;;  %5137 = vmatpush.msra.mxu2 %v2784_v22  ;;  %v12769_v45 = vld [vmem:[#allocation206_spill] sm:$0xff] }
 0x800   : > { %v9873_v34 = vpop.permute.xlu0 %3755  ;;  %v9875_v13 = vpop.permute.xlu1 %3751  ;;  %4692 = vmatpush.msra.mxu1 %v2785_v1  ;;  %v12776_v1 = vld [vmem:[#allocation6_spill] sm:$0xff] }
 0x801   : > { %12768 = vst [vmem:[#allocation148_spill] sm:$0xff] %v9873_v34  ;;  %v3782_v63 = vpop.permute.xlu2 %3781  ;;  %v12786_v34 = vld [vmem:[#allocation164_spill] sm:$0xff] }
 0x802   : > { %4693 = vmatpush.msra.mxu1 %v2784_v22  ;;  %v12779_v22 = vld [vmem:[#allocation172_spill] sm:$0xff] }
 0x806   : > { %4071 = vrot.lane.b32.xlu0 %v12769_v45, %s5190_s14  ;;  %4021 = vrot.lane.b32.xlu1 %v12770_v29, %s5190_s14 }
 0x807   : > { %3933 = vrot.lane.b32.xlu2 %v12771_v37, %s5189_s12 }
 0x808   : > { %v9886_v57 = vpop.permute.xlu0 %3761  ;;  %v9888_v15 = vpop.permute.xlu1 %3757 }
 0x809   : > { %12772 = vst [vmem:[#allocation95_spill] sm:$0xff] %v9886_v57  ;;  %v3872_v12 = vpop.permute.xlu2 %3871  ;;  %v12780_v57 = vld [vmem:[#allocation81_spill] sm:$0xff] }
 0x80a   : > { %12773 = vst [vmem:[#allocation184_spill] sm:$0xff] %v9888_v15  ;;  %v12781_v15 = vld [vmem:[#allocation47_spill] sm:$0xff] }
 0x80e   : > { %4023 = vrot.lane.b32.xlu0 %v12774_v40, %s5190_s14  ;;  %3885 = vrot.lane.b32.xlu1 %v12775_v53, %s5189_s12 }
 0x80f   : > { %3797 = vrot.lane.b32.xlu2 %v12776_v1, %s5188_s10  ;;  %v12783_v1 = vld [vmem:[#allocation140_spill] sm:$0xff] }
 0x810   : > { %v9896_v45 = vpop.permute.xlu0 %3767  ;;  %v9898_v29 = vpop.permute.xlu1 %3763 }
 0x811   : > { %12777 = vst [vmem:[#allocation273_spill] sm:$0xff] %v9896_v45  ;;  %v3922_v37 = vpop.permute.xlu2 %3921  ;;  %v4170_v45 = vsel %vm1885_vm5, %v8391_v61, %v12783_v1  ;;  %v12789_v61 = vld [vmem:[#allocation311_spill] sm:$0xff] }
 0x812   : > { %12778 = vst [vmem:[#allocation222_spill] sm:$0xff] %v9898_v29  ;;  %v12784_v29 = vld [vmem:[#allocation28_spill] sm:$0xff] }
 0x813   : > { %v4217_v50 = vsel %vm1982_vm7, %v4170_v45, %v12784_v29 }
 0x816   : > { %3887 = vrot.lane.b32.xlu0 %v12779_v22, %s5189_s12  ;;  %3935 = vrot.lane.b32.xlu1 %v12780_v57, %s5189_s12  ;;  %v4265_v22 = vsel %vm2080_vm10, %v4217_v50, %v12785_v23  ;;  %v12790_v23 = vld [vmem:[#allocation41_spill] sm:$0xff]  ;;  %v12791_v50 = vld [vmem:[#allocation46_spill] sm:$0xff] }
 0x817   : > { %4073 = vrot.lane.b32.xlu2 %v12781_v15, %s5190_s14  ;;  %v4313_v57 = vsel %vm2178_vm12, %v4265_v22, %v12786_v34  ;;  %v12787_v15 = vld [vmem:[#allocation156_spill] sm:$0xff]  ;;  %v12792_v34 = vld [vmem:[#allocation275_spill] sm:$0xff] }
 0x818   : > { %v3920_v40 = vpop.permute.xlu0 %3919  ;;  %v9906_v58 = vpop.permute.xlu1 %3769  ;;  %v5163_v32 = vunpack.i.h.bf16 %v12787_v15  ;;  %v4171_v45 = vsel %vm1885_vm5, %v12792_v34, %v12791_v50  ;;  %v12796_v34 = vld [vmem:[#allocation293_spill] sm:$0xff] }
 0x819   : > { %12782 = vst [vmem:[#allocation169_spill] sm:$0xff] %v9906_v58  ;;  %v9908_v53 = vpop.permute.xlu2 %3785  ;;  %v4362_v58 = vsel %vm4337_vm13, %v4313_v57, %v9719_v51 }
 0x81a   : > { %v4411_v1 = vsel %vm4386_vm14, %v4362_v58, %v3782_v63  ;;  %v4147_v58 = vsel %vm1885_vm5, 0.0, %v5163_v32  ;;  %v12794_v63 = vld [vmem:[#allocation204_spill] sm:$0xff] }
 0x81b   : > { %v4460_v51 = vsel %vm4435_vm0, %v4411_v1, %v3920_v40  ;;  %v4194_v50 = vsel %vm1982_vm7, %v4147_v58, %v12795_v20  ;;  %v12797_v1 = vld [vmem:[#allocation194_spill] sm:$0xff] }
 0x81c   : > { %v4241_v28 = vsel %vm2080_vm10, %v4194_v50, %v12797_v1 }
 0x81e   : > { %3937 = vrot.lane.b32.xlu0 %v12788_v31, %s5189_s12  ;;  %3799 = vrot.lane.b32.xlu1 %v12789_v61, %s5188_s10  ;;  %v12793_v31 = vld [vmem:[#allocation196_spill] sm:$0xff] }
 0x81f   : > { %4025 = vrot.lane.b32.xlu2 %v12790_v23, %s5190_s14  ;;  %v4218_v57 = vsel %vm1982_vm7, %v4171_v45, %v12793_v31  ;;  %v12799_v31 = vld [vmem:[#allocation98_spill] sm:$0xff] }
 0x820   : > { %v3784_v29 = vpop.permute.xlu0 %3783  ;;  %v4058_v22 = vpop.permute.xlu1 %4057  ;;  %v4266_v23 = vsel %vm2080_vm10, %v4218_v57, %v12794_v63 }
 0x821   : > { %v4062_v15 = vpop.permute.xlu2 %4061  ;;  %v4509_v61 = vsel %vm4484_vm15, %v4460_v51, %v4058_v22  ;;  %v4314_v40 = vsel %vm2178_vm12, %v4266_v23, %v12796_v34  ;;  %v12798_v51 = vld [vmem:[#allocation217_spill] sm:$0xff]  ;;  %v12802_v23 = vld [vmem:[#allocation55_spill] sm:$0xff] }
 0x822   : > { %5096 = vmatmul.msk.f32.vlgmr.msra.gmra.mxu2 %vm4533_vm1, %v4509_v61  ;;  %v4363_v45 = vsel %vm4337_vm13, %v4314_v40, %v9685_v19  ;;  %v4289_v32 = vsel %vm2178_vm12, %v4241_v28, %v12798_v51  ;;  %v12800_v34 = vld [vmem:[#allocation177_spill] sm:$0xff] }
 0x823   : > { %v4412_v22 = vsel %vm4386_vm14, %v4363_v45, %v3784_v29  ;;  %v4338_v61 = vsel %vm4337_vm13, %v4289_v32, %v9609_v3  ;;  %v12805_v45 = vld [vmem:[#allocation127_spill] sm:$0xff] }
 0x824   : > { %v4387_v20 = vsel %vm4386_vm14, %v4338_v61, %v9815_v36  ;;  %v4461_v29 = vsel %vm4435_vm0, %v4412_v22, %v3922_v37  ;;  %v12804_v37 = vld [vmem:[#allocation70_spill] sm:$0xff] }
 0x825   : > { %v4436_v19 = vsel %vm4435_vm0, %v4387_v20, %v3872_v12  ;;  %v12803_v12 = vld [vmem:[#allocation316_spill] sm:$0xff]  ;;  %v12806_v20 = vld [vmem:[#allocation291_spill] sm:$0xff] }
 0x826   : > { %3801 = vrot.lane.b32.xlu0 %v12799_v31, %s5188_s10  ;;  %4075 = vrot.lane.b32.xlu1 %v12718_v25, %s5190_s14  ;;  %v12801_v25 = vld [vmem:[#allocation17_spill] sm:$0xff] }
 0x827   : > { %3889 = vrot.lane.b32.xlu2 %v12800_v34, %s5189_s12  ;;  %v4242_v36 = vsel %vm2080_vm10, %v4194_v50, %v12801_v25  ;;  %v4148_v34 = vsel %vm1885_vm5, 0.0, %v12806_v20  ;;  %v12811_v25 = vld [vmem:[#allocation58_spill] sm:$0xff] }
 0x828   : > { %v4060_v28 = vpop.permute.xlu0 %4059  ;;  %v4010_v57 = vpop.permute.xlu1 %4009  ;;  %v4290_v40 = vsel %vm2178_vm12, %v4242_v36, %v12802_v23  ;;  %v12812_v23 = vld [vmem:[#allocation34_spill] sm:$0xff] }
 0x829   : > { %v4014_v58 = vpop.permute.xlu2 %4013  ;;  %v4485_v3 = vsel %vm4484_vm15, %v4436_v19, %v4010_v57  ;;  %v4510_v63 = vsel %vm4484_vm15, %v4461_v29, %v4060_v28  ;;  %v4339_v1 = vsel %vm4337_vm13, %v4290_v40, %v12804_v37  ;;  %v12807_v19 = vld [vmem:[#allocation299_spill] sm:$0xff]  ;;  %v12808_v28 = vld [vmem:[#allocation92_spill] sm:$0xff] }
 0x82a   : > { %5072 = vmatmul.msk.f32.vlgmr.msra.gmra.mxu1 %vm4533_vm1, %v4485_v3  ;;  %5097 = vmatmul.msk.f32.gmra.mxu2 %vm4533_vm1, %v4510_v63  ;;  %v4388_v51 = vsel %vm4386_vm14, %v4339_v1, %v9781_v10  ;;  %v4172_v57 = vsel %vm1885_vm5, %v12808_v28, %v12807_v19  ;;  %v12809_v29 = vld [vmem:[#allocation116_spill] sm:$0xff] }
 0x82b   : > { %v4195_v10 = vsel %vm1982_vm7, %v4148_v34, %v12809_v29  ;;  %v12810_v3 = vld [vmem:[#allocation328_spill] sm:$0xff] }
 0x82c   : > { %v4219_v63 = vsel %vm1982_vm7, %v4172_v57, %v12810_v3  ;;  %v4243_v36 = vsel %vm2080_vm10, %v4195_v10, %v12811_v25  ;;  %v12814_v1 = vld [vmem:[#allocation124_spill] sm:$0xff]  ;;  %v12821_v25 = vld [vmem:[#allocation274_spill] sm:$0xff] }
 0x82d   : > { %v4267_v40 = vsel %vm2080_vm10, %v4219_v63, %v12812_v23  ;;  %v12820_v63 = vld [vmem:[#allocation297_spill] sm:$0xff] }
 0x82e   : > { %4077 = vrot.lane.b32.xlu0 %v12719_v44, %s5190_s14  ;;  %4027 = vrot.lane.b32.xlu1 %v12803_v12, %s5190_s14  ;;  %v12813_v12 = vld [vmem:[#allocation197_spill] sm:$0xff] }
 0x82f   : > { %3939 = vrot.lane.b32.xlu2 %v12805_v45, %s5189_s12  ;;  %v4291_v37 = vsel %vm2178_vm12, %v4243_v36, %v12813_v12  ;;  %v4315_v45 = vsel %vm2178_vm12, %v4267_v40, %v12814_v1  ;;  %v12822_v36 = vld [vmem:[#allocation309_spill] sm:$0xff] }
 0x830   : > { %v4012_v32 = vpop.permute.xlu0 %4011  ;;  %v3874_v50 = vpop.permute.xlu1 %3873  ;;  %v4173_v23 = vsel %vm1885_vm5, %v12822_v36, %v12821_v25  ;;  %v12824_v1 = vld [vmem:[#allocation121_spill] sm:$0xff] }
 0x831   : > { %v9981_v22 = vpop.permute.xlu2 %3877  ;;  %v4437_v61 = vsel %vm4435_vm0, %v4388_v51, %v3874_v50  ;;  %v12815_v51 = vld [vmem:[#allocation330_spill] sm:$0xff]  ;;  %v4340_v50 = vsel %vm4337_vm13, %v4291_v37, %v9607_v27 }
 0x832   : > { %v4486_v44 = vsel %vm4484_vm15, %v4437_v61, %v4012_v32  ;;  %v12816_v32 = vld [vmem:[#allocation270_spill] sm:$0xff]  ;;  %v4364_v61 = vsel %vm4337_vm13, %v4315_v45, %v9717_v11  ;;  %v4389_v20 = vsel %vm4386_vm14, %v4340_v50, %v9813_v48  ;;  %v12818_v48 = vld [vmem:[#allocation216_spill] sm:$0xff] }
 0x833   : > { %5073 = vmatmul.msk.f32.gmra.mxu1 %vm4533_vm1, %v4486_v44  ;;  %v12817_v44 = vld [vmem:[#allocation182_spill] sm:$0xff]  ;;  %v4413_v34 = vsel %vm4386_vm14, %v4364_v61, %v9908_v53 }
 0x834   : > { %v12819_v53 = vld [vmem:[#allocation278_spill] sm:$0xff] }
 0x836   : > { %4029 = vrot.lane.b32.xlu0 %v12815_v51, %s5190_s14  ;;  %3891 = vrot.lane.b32.xlu1 %v12816_v32, %s5189_s12  ;;  %v12825_v51 = vld [vmem:[#allocation260_spill] sm:$0xff] }
 0x837   : > { %3803 = vrot.lane.b32.xlu2 %v12817_v44, %s5188_s10 }
 0x838   : > { %v3876_v19 = vpop.permute.xlu0 %3875  ;;  %v3924_v57 = vpop.permute.xlu1 %3923 }
 0x839   : > { %v4438_v29 = vsel %vm4435_vm0, %v4389_v20, %v3876_v19  ;;  %v3928_v10 = vpop.permute.xlu2 %3927  ;;  %v4462_v3 = vsel %vm4435_vm0, %v4413_v34, %v3924_v57  ;;  %v12826_v20 = vld [vmem:[#allocation97_spill] sm:$0xff]  ;;  %v12828_v19 = vld [vmem:[#allocation294_spill] sm:$0xff]  ;;  %v12829_v57 = vld [vmem:[#allocation279_spill] sm:$0xff] }
 0x83a   : > { %v4487_v27 = vsel %vm4484_vm15, %v4438_v29, %v4014_v58  ;;  %v4511_v11 = vsel %vm4484_vm15, %v4462_v3, %v4062_v15  ;;  %v12823_v15 = vld [vmem:[#allocation112_spill] sm:$0xff]  ;;  %v12827_v34 = vld [vmem:[#allocation93_spill] sm:$0xff] }
 0x83b   : > { %5074 = vmatmul.msk.f32.gmra.mxu1 %vm4533_vm1, %v4487_v27  ;;  %5098 = vmatmul.msk.f32.gmra.mxu2 %vm4533_vm1, %v4511_v11  ;;  %v4220_v12 = vsel %vm1982_vm7, %v4173_v23, %v12823_v15  ;;  %v12830_v29 = vld [vmem:[#allocation264_spill] sm:$0xff]  ;;  %v12832_v23 = vld [vmem:[#allocation230_spill] sm:$0xff] }
 0x83c   : > { %v4268_v45 = vsel %vm2080_vm10, %v4220_v12, %v12824_v1  ;;  %v4174_v3 = vsel %vm1885_vm5, %v12830_v29, %v12829_v57  ;;  %v12834_v12 = vld [vmem:[#allocation290_spill] sm:$0xff] }
 0x83d   : > { %v4316_v32 = vsel %vm2178_vm12, %v4268_v45, %v12825_v51  ;;  %v12835_v45 = vld [vmem:[#allocation256_spill] sm:$0xff] }
 0x83e   : > { %3893 = vrot.lane.b32.xlu0 %v12818_v48, %s5189_s12  ;;  %3941 = vrot.lane.b32.xlu1 %v12819_v53, %s5189_s12  ;;  %v4365_v50 = vsel %vm4337_vm13, %v4316_v32, %v9731_v35  ;;  %v12831_v35 = vld [vmem:[#allocation246_spill] sm:$0xff]  ;;  %v12836_v32 = vld [vmem:[#allocation333_spill] sm:$0xff] }
 0x83f   : > { %4079 = vrot.lane.b32.xlu2 %v12820_v63, %s5190_s14  ;;  %v4221_v53 = vsel %vm1982_vm7, %v4174_v3, %v12831_v35 }
 0x840   : > { %v3926_v58 = vpop.permute.xlu0 %3925  ;;  %v3788_v40 = vpop.permute.xlu1 %3787  ;;  %v4269_v1 = vsel %vm2080_vm10, %v4221_v53, %v12834_v12  ;;  %v12840_v53 = vld [vmem:[#allocation87_spill] sm:$0xff] }
 0x841   : > { %v10034_v37 = vpop.permute.xlu2 %3791  ;;  %v4414_v61 = vsel %vm4386_vm14, %v4365_v50, %v3788_v40  ;;  %v12833_v40 = vld [vmem:[#allocation143_spill] sm:$0xff]  ;;  %v12837_v50 = vld [vmem:[#allocation285_spill] sm:$0xff] }
 0x842   : > { %v4463_v48 = vsel %vm4435_vm0, %v4414_v61, %v3926_v58  ;;  %v4149_v15 = vsel %vm1885_vm5, %v12833_v40, %v12832_v23  ;;  %v4317_v58 = vsel %vm2178_vm12, %v4269_v1, %v12836_v32  ;;  %v12843_v1 = vld [vmem:[#allocation94_spill] sm:$0xff] }
 0x843   : > { %v4196_v51 = vsel %vm1982_vm7, %v4149_v15, %v12835_v45  ;;  %v12844_v45 = vld [vmem:[#allocation131_spill] sm:$0xff] }
 0x844   : > { %v4244_v61 = vsel %vm2080_vm10, %v4196_v51, %v12837_v50  ;;  %v12847_v50 = vld [vmem:[#allocation301_spill] sm:$0xff] }
 0x846   : > { %3943 = vrot.lane.b32.xlu0 %v12826_v20, %s5189_s12  ;;  %3805 = vrot.lane.b32.xlu1 %v12827_v34, %s5188_s10  ;;  %v4366_v20 = vsel %vm4337_vm13, %v4317_v58, %v9697_v55  ;;  %v12846_v58 = vld [vmem:[#allocation110_spill] sm:$0xff] }
 0x847   : > { %4031 = vrot.lane.b32.xlu2 %v12828_v19, %s5190_s14  ;;  %v12838_v19 = vld [vmem:[#allocation342_spill] sm:$0xff] }
 0x848   : > { %v3790_v27 = vpop.permute.xlu0 %3789  ;;  %v4064_v11 = vpop.permute.xlu1 %4063  ;;  %v4292_v57 = vsel %vm2178_vm12, %v4244_v61, %v12838_v19 }
 0x849   : > { %v4068_v63 = vpop.permute.xlu2 %4067  ;;  %v4512_v25 = vsel %vm4484_vm15, %v4463_v48, %v4064_v11  ;;  %v4415_v3 = vsel %vm4386_vm14, %v4366_v20, %v3790_v27  ;;  %v4341_v11 = vsel %vm4337_vm13, %v4292_v57, %v9635_v6  ;;  %v12839_v48 = vld [vmem:[#allocation192_spill] sm:$0xff]  ;;  %v12848_v20 = vld [vmem:[#allocation283_spill] sm:$0xff] }
 0x84a   : > { %5099 = vmatmul.msk.f32.gmra.mxu2 %vm4533_vm1, %v4512_v25  ;;  %v4390_v35 = vsel %vm4386_vm14, %v4341_v11, %v9827_v38  ;;  %v4464_v23 = vsel %vm4435_vm0, %v4415_v3, %v3928_v10  ;;  %v12842_v38 = vld [vmem:[#allocation135_spill] sm:$0xff]  ;;  %v12845_v10 = vld [vmem:[#allocation128_spill] sm:$0xff] }
 0x84b   : > { %v4439_v55 = vsel %vm4435_vm0, %v4390_v35, %v9981_v22 }
 0x84e   : > { %3807 = vrot.lane.b32.xlu0 %v12839_v48, %s5188_s10  ;;  %4081 = vrot.lane.b32.xlu1 %v8988_v17, %s5190_s14  ;;  %v12841_v17 = vld [vmem:[#allocation314_spill] sm:$0xff] }
 0x84f   : > { %3895 = vrot.lane.b32.xlu2 %v12840_v53, %s5189_s12  ;;  %v4150_v12 = vsel %vm1885_vm5, %v12842_v38, %v12841_v17  ;;  %v12849_v53 = vld [vmem:[#allocation114_spill] sm:$0xff]  ;;  %v12854_v17 = vld [vmem:[#allocation75_spill] sm:$0xff] }
 0x850   : > { %v4066_v25 = vpop.permute.xlu0 %4065  ;;  %v4016_v27 = vpop.permute.xlu1 %4015  ;;  %v4197_v22 = vsel %vm1982_vm7, %v4150_v12, %v12843_v1  ;;  %v12855_v12 = vld [vmem:[#allocation259_spill] sm:$0xff] }
 0x851   : > { %v4020_v6 = vpop.permute.xlu2 %4019  ;;  %v4488_v40 = vsel %vm4484_vm15, %v4439_v55, %v4016_v27  ;;  %v4513_v15 = vsel %vm4484_vm15, %v4464_v23, %v4066_v25  ;;  %v4245_v51 = vsel %vm2080_vm10, %v4197_v22, %v12844_v45  ;;  %v12850_v55 = vld [vmem:[#allocation136_spill] sm:$0xff]  ;;  %v12851_v27 = vld [vmem:[#allocation99_spill] sm:$0xff]  ;;  %v12856_v22 = vld [vmem:[#allocation118_spill] sm:$0xff] }
 0x852   : > { %5075 = vmatmul.msk.f32.gmra.mxu1 %vm4533_vm1, %v4488_v40  ;;  %5100 = vmatmul.msk.f32.gmra.mxu2 %vm4533_vm1, %v4513_v15  ;;  %v4293_v32 = vsel %vm2178_vm12, %v4245_v51, %v12845_v10  ;;  %v4151_v25 = vsel %vm1885_vm5, %v12850_v55, %v12849_v53  ;;  %v12852_v23 = vld [vmem:[#allocation219_spill] sm:$0xff]  ;;  %v12853_v15 = vld [vmem:[#allocation236_spill] sm:$0xff]  ;;  %v12857_v51 = vld [vmem:[#allocation325_spill] sm:$0xff] }
 0x853   : > { %v4342_v61 = vsel %vm4337_vm13, %v4293_v32, %v12847_v50  ;;  %v4175_v40 = vsel %vm1885_vm5, %v12852_v23, %v12851_v27  ;;  %v12858_v32 = vld [vmem:[#allocation215_spill] sm:$0xff] }
 0x854   : > { %v4391_v19 = vsel %vm4386_vm14, %v4342_v61, %v9793_v33  ;;  %v4198_v33 = vsel %vm1982_vm7, %v4151_v25, %v12853_v15  ;;  %v4222_v38 = vsel %vm1982_vm7, %v4175_v40, %v12854_v17  ;;  %v12859_v50 = vld [vmem:[#allocation15_spill] sm:$0xff]  ;;  %v12864_v40 = vld [vmem:[#allocation117_spill] sm:$0xff]  ;;  %v12865_v15 = vld [vmem:[#allocation74_spill] sm:$0xff] }
 0x855   : > { %v4246_v1 = vsel %vm2080_vm10, %v4198_v33, %v12855_v12  ;;  %v4270_v45 = vsel %vm2080_vm10, %v4222_v38, %v12856_v22  ;;  %v12860_v61 = vld [vmem:[#allocation315_spill] sm:$0xff]  ;;  %v4176_v33 = vsel %vm1885_vm5, %v8438_v0, %v12865_v15  ;;  %v12869_v0 = vld [vmem:[#allocation269_spill] sm:$0xff] }
 0x856   : > { %4083 = vrot.lane.b32.xlu0 %v8993_v47, %s5190_s14  ;;  %4033 = vrot.lane.b32.xlu1 %v12846_v58, %s5190_s14  ;;  %v4294_v10 = vsel %vm2178_vm12, %v4246_v1, %v12857_v51  ;;  %v4318_v58 = vsel %vm2178_vm12, %v4270_v45, %v12858_v32  ;;  %v12867_v1 = vld [vmem:[#allocation59_spill] sm:$0xff]  ;;  %v12868_v45 = vld [vmem:[#allocation56_spill] sm:$0xff] }
 0x857   : > { %3945 = vrot.lane.b32.xlu2 %v12848_v20, %s5189_s12  ;;  %v4343_v20 = vsel %vm4337_vm13, %v4294_v10, %v9633_v56 }
 0x858   : > { %v4018_v57 = vpop.permute.xlu0 %4017  ;;  %v3880_v3 = vpop.permute.xlu1 %3879 }
 0x859   : > { %v10109_v11 = vpop.permute.xlu2 %3883  ;;  %v4440_v35 = vsel %vm4435_vm0, %v4391_v19, %v3880_v3  ;;  %v4367_v19 = vsel %vm4337_vm13, %v4318_v58, %v9729_v16  ;;  %v4392_v3 = vsel %vm4386_vm14, %v4343_v20, %v9825_v52  ;;  %v12862_v52 = vld [vmem:[#allocation224_spill] sm:$0xff]  ;;  %v12870_v58 = vld [vmem:[#allocation9_spill] sm:$0xff] }
 0x85a   : > { %v4489_v47 = vsel %vm4484_vm15, %v4440_v35, %v4018_v57  ;;  %v12861_v57 = vld [vmem:[#allocation234_spill] sm:$0xff]  ;;  %v4416_v35 = vsel %vm4386_vm14, %v4367_v19, %v10034_v37  ;;  %v12863_v37 = vld [vmem:[#allocation225_spill] sm:$0xff] }
 0x85b   : > { %5076 = vmatmul.msk.f32.gmra.mxu1 %vm4533_vm1, %v4489_v47 }
 0x85e   : > { %4035 = vrot.lane.b32.xlu0 %v12859_v50, %s5190_s14  ;;  %3897 = vrot.lane.b32.xlu1 %v12860_v61, %s5189_s12  ;;  %v12871_v50 = vld [vmem:[#allocation111_spill] sm:$0xff]  ;;  %v12872_v61 = vld [vmem:[#allocation272_spill] sm:$0xff] }
 0x85f   : > { %3809 = vrot.lane.b32.xlu2 %v12861_v57, %s5188_s10  ;;  %v4177_v20 = vsel %vm1885_vm5, %v8257_v54, %v12872_v61  ;;  %v12876_v54 = vld [vmem:[#allocation321_spill] sm:$0xff] }
 0x860   : > { %v3882_v47 = vpop.permute.xlu0 %3881  ;;  %v3930_v53 = vpop.permute.xlu1 %3929 }
 0x861   : > { %v4441_v55 = vsel %vm4435_vm0, %v4392_v3, %v3882_v47  ;;  %v3934_v25 = vpop.permute.xlu2 %3933  ;;  %v4465_v27 = vsel %vm4435_vm0, %v4416_v35, %v3930_v53 }
 0x862   : > { %v4490_v56 = vsel %vm4484_vm15, %v4441_v55, %v4020_v6  ;;  %v4514_v16 = vsel %vm4484_vm15, %v4465_v27, %v4068_v63  ;;  %v12866_v63 = vld [vmem:[#allocation152_spill] sm:$0xff]  ;;  %v12874_v27 = vld [vmem:[#allocation237_spill] sm:$0xff] }
 0x863   : > { %5077 = vmatmul.msk.f32.gmra.mxu1 %vm4533_vm1, %v4490_v56  ;;  %5101 = vmatmul.msk.f32.gmra.mxu2 %vm4533_vm1, %v4514_v16  ;;  %v4223_v38 = vsel %vm1982_vm7, %v4176_v33, %v12866_v63  ;;  %v4152_v56 = vsel %vm1885_vm5, %v7900_v46, %v12874_v27  ;;  %v12875_v16 = vld [vmem:[#allocation331_spill] sm:$0xff]  ;;  %v12878_v33 = vld [vmem:[#allocation340_spill] sm:$0xff] }
 0x864   : > { %v4271_v22 = vsel %vm2080_vm10, %v4223_v38, %v12867_v1  ;;  %v12879_v63 = vld [vmem:[#allocation100_spill] sm:$0xff] }
 0x865   : > { %v4319_v51 = vsel %vm2178_vm12, %v4271_v22, %v12868_v45  ;;  %v12880_v22 = vld [vmem:[#allocation134_spill] sm:$0xff]  ;;  %v12881_v45 = vld [vmem:[#allocation191_spill] sm:$0xff]  ;;  %v12888_v27 = vld [vmem:[#allocation12_spill] sm:$0xff] }
 0x866   : > { %3899 = vrot.lane.b32.xlu0 %v12862_v52, %s5189_s12  ;;  %3947 = vrot.lane.b32.xlu1 %v12863_v37, %s5189_s12  ;;  %v4368_v10 = vsel %vm4337_vm13, %v4319_v51, %v9743_v24  ;;  %v12873_v24 = vld [vmem:[#allocation324_spill] sm:$0xff]  ;;  %v4199_v37 = vsel %vm1982_vm7, %v4152_v56, %v12876_v54  ;;  %v12889_v56 = vld [vmem:[#allocation170_spill] sm:$0xff] }
 0x867   : > { %4085 = vrot.lane.b32.xlu2 %v12864_v40, %s5190_s14  ;;  %v4224_v47 = vsel %vm1982_vm7, %v4177_v20, %v12873_v24  ;;  %v12877_v40 = vld [vmem:[#allocation84_spill] sm:$0xff] }
 0x868   : > { %v3932_v6 = vpop.permute.xlu0 %3931  ;;  %v3794_v17 = vpop.permute.xlu1 %3793  ;;  %v4272_v52 = vsel %vm2080_vm10, %v4224_v47, %v12875_v16 }
 0x869   : > { %v10163_v12 = vpop.permute.xlu2 %3797  ;;  %v4417_v32 = vsel %vm4386_vm14, %v4368_v10, %v3794_v17  ;;  %v4320_v15 = vsel %vm2178_vm12, %v4272_v52, %v12877_v40  ;;  %v12882_v10 = vld [vmem:[#allocation181_spill] sm:$0xff] }
 0x86a   : > { %v4466_v35 = vsel %vm4435_vm0, %v4417_v32, %v3932_v6  ;;  %v4247_v6 = vsel %vm2080_vm10, %v4199_v37, %v12878_v33  ;;  %v4369_v17 = vsel %vm4337_vm13, %v4320_v15, %v9709_v4 }
 0x86b   : > { %v4295_v46 = vsel %vm2178_vm12, %v4247_v6, %v12879_v63  ;;  %v12891_v6 = vld [vmem:[#allocation296_spill] sm:$0xff]  ;;  %v12892_v63 = vld [vmem:[#allocation198_spill] sm:$0xff] }
 0x86c   : > { %v4344_v1 = vsel %vm4337_vm13, %v4295_v46, %v9647_v39  ;;  %v4178_v46 = vsel %vm1885_vm5, %v8442_v42, %v12892_v63 }
 0x86d   : > { %v4393_v51 = vsel %vm4386_vm14, %v4344_v1, %v9851_v26  ;;  %v12883_v26 = vld [vmem:[#allocation185_spill] sm:$0xff] }
 0x86e   : > { %3949 = vrot.lane.b32.xlu0 %v12869_v0, %s5189_s12  ;;  %3811 = vrot.lane.b32.xlu1 %v12870_v58, %s5188_s10  ;;  %v4442_v4 = vsel %vm4435_vm0, %v4393_v51, %v10109_v11  ;;  %v12894_v1 = vld [vmem:[#allocation25_spill] sm:$0xff]  ;;  %v12895_v51 = vld [vmem:[#allocation323_spill] sm:$0xff] }
 0x86f   : > { %4037 = vrot.lane.b32.xlu2 %v12871_v50, %s5190_s14 }
 0x870   : > { %v3796_v19 = vpop.permute.xlu0 %3795  ;;  %v4070_v3 = vpop.permute.xlu1 %4069 }
 0x871   : > { %v4074_v53 = vpop.permute.xlu2 %4073  ;;  %v4515_v55 = vsel %vm4484_vm15, %v4466_v35, %v4070_v3  ;;  %v4418_v38 = vsel %vm4386_vm14, %v4369_v17, %v3796_v19  ;;  %v4153_v19 = vsel %vm1885_vm5, %v7946_v59, %v12883_v26  ;;  %v12884_v3 = vld [vmem:[#allocation83_spill] sm:$0xff]  ;;  %v12885_v35 = vld [vmem:[#allocation132_spill] sm:$0xff]  ;;  %v12890_v59 = vld [vmem:[#allocation245_spill] sm:$0xff]  ;;  %v4154_v17 = vsel %vm1885_vm5, %v7949_v9, %v12891_v6 }
 0x872   : > { %5102 = vmatmul.msk.f32.gmra.mxu2 %vm4533_vm1, %v4515_v55  ;;  %v4467_v50 = vsel %vm4435_vm0, %v4418_v38, %v3934_v25  ;;  %v4200_v11 = vsel %vm1982_vm7, %v4153_v19, %v12884_v3  ;;  %v12886_v25 = vld [vmem:[#allocation64_spill] sm:$0xff]  ;;  %v12887_v55 = vld [vmem:[#allocation211_spill] sm:$0xff]  ;;  %v12893_v38 = vld [vmem:[#allocation302_spill] sm:$0xff] }
 0x873   : > { %v4248_v24 = vsel %vm2080_vm10, %v4200_v11, %v12885_v35  ;;  %v12901_v3 = vld [vmem:[#allocation175_spill] sm:$0xff]  ;;  %v12908_v6 = vld [vmem:[#allocation220_spill] sm:$0xff] }
 0x874   : > { %v4296_v47 = vsel %vm2178_vm12, %v4248_v24, %v12886_v25 }
 0x875   : > { %v4345_v16 = vsel %vm4337_vm13, %v4296_v47, %v12889_v56  ;;  %v12904_v56 = vld [vmem:[#allocation52_spill] sm:$0xff] }
 0x876   : > { %3813 = vrot.lane.b32.xlu0 %v12880_v22, %s5188_s10  ;;  %4087 = vrot.lane.b32.xlu1 %v12881_v45, %s5190_s14  ;;  %v4394_v52 = vsel %vm4386_vm14, %v4345_v16, %v9805_v18  ;;  %v4201_v18 = vsel %vm1982_vm7, %v4154_v17, %v12893_v38  ;;  %v4225_v45 = vsel %vm1982_vm7, %v4178_v46, %v12894_v1  ;;  %v12905_v16 = vld [vmem:[#allocation188_spill] sm:$0xff] }
 0x877   : > { %3901 = vrot.lane.b32.xlu2 %v12882_v10, %s5189_s12  ;;  %v4249_v10 = vsel %vm2080_vm10, %v4201_v18, %v12895_v51  ;;  %v12910_v38 = vld [vmem:[#allocation208_spill] sm:$0xff]  ;;  %v12911_v18 = vld [vmem:[#allocation193_spill] sm:$0xff] }
 0x878   : > { %v4072_v32 = vpop.permute.xlu0 %4071  ;;  %v4022_v0 = vpop.permute.xlu1 %4021  ;;  %v4180_v1 = vsel %vm1885_vm5, %v8324_v62, %v12911_v18  ;;  %v12915_v62 = vld [vmem:[#allocation50_spill] sm:$0xff] }
 0x879   : > { %v4026_v39 = vpop.permute.xlu2 %4025  ;;  %v4491_v61 = vsel %vm4484_vm15, %v4442_v4, %v4022_v0  ;;  %v4516_v20 = vsel %vm4484_vm15, %v4467_v50, %v4072_v32  ;;  %v12896_v4 = vld [vmem:[#allocation158_spill] sm:$0xff]  ;;  %v12897_v0 = vld [vmem:[#allocation61_spill] sm:$0xff] }
 0x87a   : > { %5078 = vmatmul.msk.f32.gmra.mxu1 %vm4533_vm1, %v4491_v61  ;;  %5103 = vmatmul.msk.f32.gmra.mxu2 %vm4533_vm1, %v4516_v20  ;;  %v4273_v32 = vsel %vm2080_vm10, %v4225_v45, %v12896_v4  ;;  %v4297_v9 = vsel %vm2178_vm12, %v4249_v10, %v12897_v0  ;;  %v12898_v50 = vld [vmem:[#allocation341_spill] sm:$0xff]  ;;  %v12900_v20 = vld [vmem:[#allocation4_spill] sm:$0xff] }
 0x87b   : > { %v4321_v42 = vsel %vm2178_vm12, %v4273_v32, %v12898_v50  ;;  %v12899_v61 = vld [vmem:[#allocation253_spill] sm:$0xff]  ;;  %v4346_v26 = vsel %vm4337_vm13, %v4297_v9, %v9645_v2  ;;  %v12913_v9 = vld [vmem:[#allocation200_spill] sm:$0xff] }
 0x87c   : > { %v4370_v19 = vsel %vm4337_vm13, %v4321_v42, %v9741_v60  ;;  %v4395_v11 = vsel %vm4386_vm14, %v4346_v26, %v9849_v14  ;;  %v12902_v14 = vld [vmem:[#allocation229_spill] sm:$0xff]  ;;  %v12914_v50 = vld [vmem:[#allocation76_spill] sm:$0xff] }
 0x87d   : > { %v4419_v35 = vsel %vm4386_vm14, %v4370_v19, %v10163_v12  ;;  %v12903_v12 = vld [vmem:[#allocation10_spill] sm:$0xff]  ;;  %v12917_v19 = vld [vmem:[#allocation107_spill] sm:$0xff] }
 0x87e   : > { %4089 = vrot.lane.b32.xlu0 %v12887_v55, %s5190_s14  ;;  %4039 = vrot.lane.b32.xlu1 %v12888_v27, %s5190_s14 }
 0x87f   : > { %3951 = vrot.lane.b32.xlu2 %v12890_v59, %s5189_s12  ;;  %v4179_v59 = vsel %vm1885_vm5, %v8470_v49, %v12905_v16  ;;  %v12909_v49 = vld [vmem:[#allocation288_spill] sm:$0xff] }
 0x880   : > { %v4024_v54 = vpop.permute.xlu0 %4023  ;;  %v3886_v37 = vpop.permute.xlu1 %3885 }
 0x881   : > { %v10238_v40 = vpop.permute.xlu2 %3889  ;;  %v4443_v15 = vsel %vm4435_vm0, %v4394_v52, %v3886_v37 }
 0x882   : > { %v4492_v33 = vsel %vm4484_vm15, %v4443_v15, %v4024_v54  ;;  %v12907_v15 = vld [vmem:[#allocation11_spill] sm:$0xff] }
 0x883   : > { %5079 = vmatmul.msk.f32.gmra.mxu1 %vm4533_vm1, %v4492_v33 }
 0x886   : > { %4041 = vrot.lane.b32.xlu0 %v12899_v61, %s5190_s14  ;;  %3903 = vrot.lane.b32.xlu1 %v12900_v20, %s5189_s12  ;;  %v12916_v20 = vld [vmem:[#allocation65_spill] sm:$0xff] }
 0x887   : > { %3815 = vrot.lane.b32.xlu2 %v12901_v3, %s5188_s10 }
 0x888   : > { %v3888_v24 = vpop.permute.xlu0 %3887  ;;  %v3936_v25 = vpop.permute.xlu1 %3935 }
 0x889   : > { %v4444_v47 = vsel %vm4435_vm0, %v4395_v11, %v3888_v24  ;;  %v3940_v55 = vpop.permute.xlu2 %3939  ;;  %v4468_v27 = vsel %vm4435_vm0, %v4419_v35, %v3936_v25  ;;  %v12918_v24 = vld [vmem:[#allocation37_spill] sm:$0xff] }
 0x88a   : > { %v4493_v2 = vsel %vm4484_vm15, %v4444_v47, %v4026_v39  ;;  %v4517_v60 = vsel %vm4484_vm15, %v4468_v27, %v4074_v53  ;;  %v12906_v53 = vld [vmem:[#allocation209_spill] sm:$0xff] }
 0x88b   : > { %5080 = vmatmul.msk.f32.gmra.mxu1 %vm4533_vm1, %v4493_v2  ;;  %5104 = vmatmul.msk.f32.gmra.mxu2 %vm4533_vm1, %v4517_v60  ;;  %v4226_v54 = vsel %vm1982_vm7, %v4179_v59, %v12906_v53  ;;  %v12919_v2 = vld [vmem:[#allocation163_spill] sm:$0xff]  ;;  %v12922_v59 = vld [vmem:[#allocation126_spill] sm:$0xff] }
 0x88c   : > { %v4274_v33 = vsel %vm2080_vm10, %v4226_v54, %v12907_v15  ;;  %v12924_v15 = vld [vmem:[#allocation242_spill] sm:$0xff] }
 0x88d   : > { %v4322_v17 = vsel %vm2178_vm12, %v4274_v33, %v12908_v6 }
 0x88e   : > { %3905 = vrot.lane.b32.xlu0 %v12902_v14, %s5189_s12  ;;  %3953 = vrot.lane.b32.xlu1 %v12903_v12, %s5189_s12  ;;  %v4371_v63 = vsel %vm4337_vm13, %v4322_v17, %v9755_v43  ;;  %v12912_v43 = vld [vmem:[#allocation36_spill] sm:$0xff]  ;;  %v12925_v17 = vld [vmem:[#allocation263_spill] sm:$0xff] }
 0x88f   : > { %4091 = vrot.lane.b32.xlu2 %v12904_v56, %s5190_s14  ;;  %v4227_v4 = vsel %vm1982_vm7, %v4180_v1, %v12912_v43  ;;  %v12929_v1 = vld [vmem:[#allocation149_spill] sm:$0xff] }
 0x890   : > { %v3938_v39 = vpop.permute.xlu0 %3937  ;;  %v3800_v52 = vpop.permute.xlu1 %3799  ;;  %v4275_v42 = vsel %vm2080_vm10, %v4227_v4, %v12914_v50 }
 0x891   : > { %v10292_v37 = vpop.permute.xlu2 %3803  ;;  %v4420_v46 = vsel %vm4386_vm14, %v4371_v63, %v3800_v52  ;;  %v4323_v26 = vsel %vm2178_vm12, %v4275_v42, %v12916_v20  ;;  %v12923_v52 = vld [vmem:[#allocation214_spill] sm:$0xff]  ;;  %v12926_v63 = vld [vmem:[#allocation16_spill] sm:$0xff] }
 0x892   : > { %v4469_v10 = vsel %vm4435_vm0, %v4420_v46, %v3938_v39  ;;  %v4372_v35 = vsel %vm4337_vm13, %v4323_v26, %v9721_v8  ;;  %v10363_v39 = vld [vmem:[%s10983_s6] ss:$0 sm:$0xff]  ;;  %v12927_v46 = vld [vmem:[#allocation72_spill] sm:$0xff] }
 0x893   : > { %v12932_v26 = vld [vmem:[#allocation326_spill] sm:$0xff] }
 0x896   : > { %3955 = vrot.lane.b32.xlu0 %v12909_v49, %s5189_s12  ;;  %3817 = vrot.lane.b32.xlu1 %v8626_v41, %s5188_s10  ;;  %v4155_v41 = vsel %vm1885_vm5, %v8036_v30, %v12913_v9 }
 0x897   : > { %4043 = vrot.lane.b32.xlu2 %v12910_v38, %s5190_s14  ;;  %v4202_v61 = vsel %vm1982_vm7, %v4155_v41, %v12915_v62  ;;  %v12928_v38 = vld [vmem:[#allocation308_spill] sm:$0xff] }
 0x898   : > { %v3802_v45 = vpop.permute.xlu0 %3801  ;;  %v4076_v51 = vpop.permute.xlu1 %4075  ;;  %v4250_v11 = vsel %vm2080_vm10, %v4202_v61, %v12917_v19  ;;  %v12930_v62 = vld [vmem:[#allocation240_spill] sm:$0xff]  ;;  %v12931_v61 = vld [vmem:[#allocation147_spill] sm:$0xff]  ;;  %v12933_v19 = vld [vmem:[#allocation73_spill] sm:$0xff] }
 0x899   : > { %v10313_v32 = vpop.permute.xlu2 %4079  ;;  %v4518_v0 = vsel %vm4484_vm15, %v4469_v10, %v4076_v51  ;;  %v4298_v30 = vsel %vm2178_vm12, %v4250_v11, %v12918_v24  ;;  %v4421_v25 = vsel %vm4386_vm14, %v4372_v35, %v3802_v45  ;;  %v4157_v20 = vsel %vm1885_vm5, %v12931_v61, %v12930_v62  ;;  %v12934_v35 = vld [vmem:[#allocation23_spill] sm:$0xff] }
 0x89a   : > { %5105 = vmatmul.msk.f32.gmra.mxu2 %vm4533_vm1, %v4518_v0  ;;  %v4347_v47 = vsel %vm4337_vm13, %v4298_v30, %v9659_v7  ;;  %v4470_v12 = vsel %vm4435_vm0, %v4421_v25, %v3940_v55  ;;  %v4181_v11 = vsel %vm1885_vm5, %v12933_v19, %v12932_v26  ;;  %v4204_v24 = vsel %vm1982_vm7, %v4157_v20, %v12934_v35  ;;  %v12935_v25 = vld [vmem:[#allocation186_spill] sm:$0xff]  ;;  %v12949_v61 = vld [vmem:[#allocation319_spill] sm:$0xff] }
 0x89b   : > { %v4396_v27 = vsel %vm4386_vm14, %v4347_v47, %v9875_v13  ;;  %v12920_v13 = vld [vmem:[#allocation86_spill] sm:$0xff]  ;;  %v4228_v47 = vsel %vm1982_vm7, %v4181_v11, %v12935_v25  ;;  %v12951_v11 = vld [vmem:[#allocation277_spill] sm:$0xff]  ;;  %v12953_v25 = vld [vmem:[#allocation344_spill] sm:$0xff] }
 0x89c   : > { %v4445_v8 = vsel %vm4435_vm0, %v4396_v27, %v10238_v40  ;;  %v12921_v40 = vld [vmem:[#allocation155_spill] sm:$0xff]  ;;  %v12936_v27 = vld [vmem:[#allocation54_spill] sm:$0xff] }
 0x89d   : > { %v4156_v16 = vsel %vm1885_vm5, %v12921_v40, %v12920_v13  ;;  %v12939_v13 = vld [vmem:[#allocation239_spill] sm:$0xff] }
 0x89e   : > { %3819 = vrot.lane.b32.xlu0 %v8645_v5, %s5188_s10  ;;  %4093 = vrot.lane.b32.xlu1 %v9622_v21, %s5190_s14  ;;  %v10353_v21 = vld [vmem:[%s10982_s5] ss:$0 sm:$0xff]  ;;  %v4203_v55 = vsel %vm1982_vm7, %v4156_v16, %v12922_v59  ;;  %v12940_v40 = vld [vmem:[#allocation275_spill] sm:$0xff] }
 0x89f   : > { %3907 = vrot.lane.b32.xlu2 %v12919_v2, %s5189_s12  ;;  %v4251_v53 = vsel %vm2080_vm10, %v4203_v55, %v12923_v52  ;;  %v4252_v2 = vsel %vm2080_vm10, %v4204_v24, %v12936_v27  ;;  %v12941_v16 = vld [vmem:[#allocation71_spill] sm:$0xff]  ;;  %v12942_v55 = vld [vmem:[#allocation60_spill] sm:$0xff] }
 0x8a0   : > { %v4078_v60 = vpop.permute.xlu0 %4077  ;;  %v4028_v14 = vpop.permute.xlu1 %4027  ;;  %v4299_v33 = vsel %vm2178_vm12, %v4251_v53, %v12924_v15  ;;  %v12943_v53 = vld [vmem:[#allocation5_spill] sm:$0xff]  ;;  %v12952_v24 = vld [vmem:[#allocation303_spill] sm:$0xff]  ;;  %v12954_v27 = vld [vmem:[#allocation176_spill] sm:$0xff] }
 0x8a1   : > { %v4032_v7 = vpop.permute.xlu2 %4031  ;;  %v4494_v56 = vsel %vm4484_vm15, %v4445_v8, %v4028_v14  ;;  %v4519_v5 = vsel %vm4484_vm15, %v4470_v12, %v4078_v60  ;;  %v4348_v49 = vsel %vm4337_vm13, %v4299_v33, %v12927_v46  ;;  %v12937_v60 = vld [vmem:[#allocation212_spill] sm:$0xff] }
 0x8a2   : > { %5081 = vmatmul.msk.f32.gmra.mxu1 %vm4533_vm1, %v4494_v56  ;;  %5106 = vmatmul.msk.f32.gmra.mxu2 %vm4533_vm1, %v4519_v5  ;;  %v4397_v45 = vsel %vm4386_vm14, %v4348_v49, %v12929_v1  ;;  %v4276_v14 = vsel %vm2080_vm10, %v4228_v47, %v12937_v60  ;;  %v12938_v12 = vld [vmem:[#allocation108_spill] sm:$0xff]  ;;  %v12955_v60 = vmov 0.0  }
 0x8a3   : > { %v4300_v56 = vsel %vm2178_vm12, %v4252_v2, %v12938_v12  ;;  %v4324_v59 = vsel %vm2178_vm12, %v4276_v14, %v12941_v16  ;;  %v12945_v33 = vld [vmem:[#allocation148_spill] sm:$0xff]  ;;  %v12956_v12 = vld [vmem:[#allocation66_spill] sm:$0xff]  ;;  %v12959_v16 = vld [vmem:[#allocation115_spill] sm:$0xff] }
 0x8a4   : > { %v4349_v52 = vsel %vm4337_vm13, %v4300_v56, %v12942_v55  ;;  %v12957_v56 = vld [vmem:[#allocation322_spill] sm:$0xff] }
 0x8a5   : > { %v4759_v54 = vpop.f32.mrf.mxu2 }
 0x8a6   : > { %v4843_v6 = vmul.f32 %v10353_v21, %v4759_v54  ;;  %4095 = vrot.lane.b32.xlu0 %v12925_v17, %s5190_s14  ;;  %4045 = vrot.lane.b32.xlu1 %v12926_v63, %s5190_s14  ;;  %v12944_v54 = vld [vmem:[#allocation258_spill] sm:$0xff] }
 0x8a7   : > { %3957 = vrot.lane.b32.xlu2 %v12928_v38, %s5189_s12  ;;  %v4695_v18 = vpop.f32.mrf.mxu1  ;;  %v4373_v15 = vsel %vm4337_vm13, %v4324_v59, %v12944_v54  ;;  %v12960_v54 = vld [vmem:[#allocation31_spill] sm:$0xff] }
 0x8a8   : > { %v4879_v51 = vadd.f32 %v10363_v39, %v4843_v6  ;;  %v4827_v10 = vmul.f32 %v10353_v21, %v4695_v18  ;;  %v4030_v43 = vpop.permute.xlu0 %4029  ;;  %v3892_v4 = vpop.permute.xlu1 %3891  ;;  %v4398_v6 = vsel %vm4386_vm14, %v4349_v52, %v12945_v33  ;;  %v4422_v49 = vsel %vm4386_vm14, %v4373_v15, %v10292_v37  ;;  %v12961_v33 = vld [vmem:[#allocation104_spill] sm:$0xff] }
 0x8a9   : > { %v10389_v0 = vpop.permute.xlu2 %3895  ;;  %v4446_v9 = vsel %vm4435_vm0, %v4397_v45, %v3892_v4 }
 0x8aa   : > { %v4911_v41 = vmax.f32 %v4879_v51, 0.0  ;;  %v4863_v50 = vadd.f32 %v10363_v39, %v4827_v10  ;;  %v4495_v42 = vsel %vm4484_vm15, %v4446_v9, %v4030_v43 }
 0x8ab   : > { %5082 = vmatmul.msk.f32.gmra.mxu1 %vm4533_vm1, %v4495_v42 }
 0x8ac   : > { %4943 = vst.msk [vmem:[%s10387_s26 + $0x80] sm:$0xff] %vm1885_vm5, %v4911_v41  ;;  %v4895_v30 = vmax.f32 %v4863_v50, 0.0  ;;  %v12946_v41 = vld [vmem:[#allocation218_spill] sm:$0xff]  ;;  %v12947_v50 = vld [vmem:[#allocation44_spill] sm:$0xff] }
 0x8ad   : > { %v4762_v8 = vpop.f32.mrf.mxu2 }
 0x8ae   : > { %4927 = vst.msk [vmem:[%s10387_s26] sm:$0xff] %vm1885_vm5, %v4895_v30  ;;  %v4844_v5 = vmul.f32 %v10353_v21, %v4762_v8  ;;  %3821 = vrot.lane.b32.xlu0 %v12939_v13, %s5188_s10  ;;  %3771 = vrot.lane.b32.xlu1 %v12940_v40, %s5188_s10 }
 0x8af   : > { %3909 = vrot.lane.b32.xlu2 %v12943_v53, %s5189_s12 }
 0x8b0   : > { %v4880_v17 = vadd.f32 %v10363_v39, %v4844_v5  ;;  %v3894_v63 = vpop.permute.xlu0 %3893  ;;  %v4698_v46 = vpop.f32.mrf.mxu1  ;;  %v12958_v5 = vld [vmem:[#allocation82_spill] sm:$0xff] }
 0x8b1   : > { %v4447_v38 = vsel %vm4435_vm0, %v4398_v6, %v3894_v63  ;;  %v3946_v18 = vpop.permute.xlu2 %3945  ;;  %v4828_v1 = vmul.f32 %v10353_v21, %v4698_v46  ;;  %v3942_v45 = vpop.permute.xlu1 %3941  ;;  %v4183_v13 = vsel %vm1885_vm5, %v12958_v5, %v12957_v56  ;;  %v12962_v6 = vld [vmem:[#allocation153_spill] sm:$0xff]  ;;  %v12963_v63 = vld [vmem:[#allocation306_spill] sm:$0xff] }
 0x8b2   : > { %v4912_v51 = vmax.f32 %v4880_v17, 0.0  ;;  %v4471_v10 = vsel %vm4435_vm0, %v4422_v49, %v3942_v45  ;;  %v4496_v43 = vsel %vm4484_vm15, %v4447_v38, %v4032_v7  ;;  %v12948_v7 = vld [vmem:[#allocation262_spill] sm:$0xff]  ;;  %v4230_v59 = vsel %vm1982_vm7, %v4183_v13, %v12959_v16  ;;  %v12964_v49 = vld [vmem:[#allocation96_spill] sm:$0xff]  ;;  %v12979_v13 = vld [vmem:[#allocation179_spill] sm:$0xff] }
 0x8b3   : > { %v4864_v4 = vadd.f32 %v10363_v39, %v4828_v1  ;;  %5083 = vmatmul.msk.f32.gmra.mxu1 %vm4533_vm1, %v4496_v43  ;;  %v4520_v9 = vsel %vm4484_vm15, %v4471_v10, %v10313_v32  ;;  %v12950_v32 = vld [vmem:[#allocation232_spill] sm:$0xff]  ;;  %v4158_v17 = vsel %vm1885_vm5, %v12962_v6, %v12961_v33  ;;  %v12965_v1 = vld [vmem:[#allocation77_spill] sm:$0xff]  ;;  %v12978_v56 = vld [vmem:[#allocation30_spill] sm:$0xff] }
 0x8b4   : > { %4944 = vst.msk [vmem:[%s10387_s26 + $0x88] sm:$0xff] %vm1885_vm5, %v4912_v51  ;;  %5107 = vmatmul.msk.f32.gmra.mxu2 %vm4533_vm1, %v4520_v9  ;;  %v4182_v20 = vsel %vm1885_vm5, %v12950_v32, %v12949_v61  ;;  %v4205_v38 = vsel %vm1982_vm7, %v4158_v17, %v12964_v49  ;;  %v12966_v51 = vld [vmem:[#allocation32_spill] sm:$0xff]  ;;  %v12980_v16 = vld [vmem:[#allocation167_spill] sm:$0xff] }
 0x8b5   : > { %v4896_v37 = vmax.f32 %v4864_v4, 0.0  ;;  %v4229_v35 = vsel %vm1982_vm7, %v4182_v20, %v12951_v11  ;;  %v4253_v10 = vsel %vm2080_vm10, %v4205_v38, %v12966_v51  ;;  %v12967_v4 = vld [vmem:[#allocation202_spill] sm:$0xff]  ;;  %v12983_v49 = vld [vmem:[#allocation160_spill] sm:$0xff] }
 0x8b6   : > { %4097 = vrot.lane.b32.xlu0 %v12946_v41, %s5190_s14  ;;  %4047 = vrot.lane.b32.xlu1 %v12947_v50, %s5190_s14  ;;  %v4277_v30 = vsel %vm2080_vm10, %v4229_v35, %v12952_v24  ;;  %v4301_v9 = vsel %vm2178_vm12, %v4253_v10, %v12967_v4  ;;  %v12969_v41 = vld [vmem:[#allocation334_spill] sm:$0xff] }
 0x8b7   : > { %4928 = vst.msk [vmem:[%s10387_s26 + $0x8] sm:$0xff] %vm1885_vm5, %v4896_v37  ;;  %3959 = vrot.lane.b32.xlu2 %v12948_v7, %s5189_s12  ;;  %v4325_v47 = vsel %vm2178_vm12, %v4277_v30, %v12953_v25  ;;  %v12968_v37 = vld [vmem:[#allocation85_spill] sm:$0xff]  ;;  %v12970_v50 = vld [vmem:[#allocation78_spill] sm:$0xff] }
 0x8b8   : > { %v3944_v42 = vpop.permute.xlu0 %3943  ;;  %v4701_v62 = vpop.f32.mrf.mxu1  ;;  %v4374_v2 = vsel %vm4337_vm13, %v4325_v47, %v12954_v27  ;;  %v4350_v7 = vsel %vm4337_vm13, %v4301_v9, %v12970_v50  ;;  %v12973_v25 = vld [vmem:[#allocation281_spill] sm:$0xff]  ;;  %v12974_v47 = vld [vmem:[#allocation159_spill] sm:$0xff]  ;;  %v12985_v51 = vld [vmem:[#allocation6_spill] sm:$0xff] }
 0x8b9   : > { %v10455_v26 = vpop.permute.xlu2 %3809  ;;  %v3806_v19 = vpop.permute.xlu1 %3805  ;;  %v12972_v62 = vld [vmem:[#allocation184_spill] sm:$0xff]  ;;  %v4159_v27 = vsel %vm1885_vm5, %v12974_v47, %v12973_v25  ;;  %v12988_v50 = vld [vmem:[#allocation102_spill] sm:$0xff] }
 0x8ba   : > { %v4423_v8 = vsel %vm4386_vm14, %v4374_v2, %v3806_v19  ;;  %v4399_v61 = vsel %vm4386_vm14, %v4350_v7, %v12972_v62  ;;  %v12975_v2 = vld [vmem:[#allocation282_spill] sm:$0xff]  ;;  %v12989_v62 = vld [vmem:[#allocation280_spill] sm:$0xff] }
 0x8bb   : > { %v4472_v53 = vsel %vm4435_vm0, %v4423_v8, %v3944_v42  ;;  %v12971_v42 = vld [vmem:[#allocation2_spill] sm:$0xff]  ;;  %v4448_v19 = vsel %vm4435_vm0, %v4399_v61, %v10389_v0 }
 0x8bc   : > { %v12993_v25 = vld [vmem:[#allocation150_spill] sm:$0xff] }
 0x8be   : > { %3823 = vrot.lane.b32.xlu0 %v12955_v60, %s5188_s10  ;;  %3773 = vrot.lane.b32.xlu1 %v12808_v28, %s5188_s10  ;;  %v4765_v14 = vpop.f32.mrf.mxu2  ;;  %v4278_v28 = vsel %vm2080_vm10, %v4230_v59, %v12960_v54  ;;  %v12976_v60 = vld [vmem:[#allocation305_spill] sm:$0xff] }
 0x8bf   : > { %3911 = vrot.lane.b32.xlu2 %v12956_v12, %s5189_s12  ;;  %v4326_v46 = vsel %vm2178_vm12, %v4278_v28, %v12963_v63  ;;  %v12977_v12 = vld [vmem:[#allocation139_spill] sm:$0xff]  ;;  %v12981_v28 = vld [vmem:[#allocation154_spill] sm:$0xff] }
 0x8c0   : > { %v3808_v40 = vpop.permute.xlu0 %3807  ;;  %v4375_v45 = vsel %vm4337_vm13, %v4326_v46, %v12965_v1  ;;  %v12982_v46 = vld [vmem:[#allocation103_spill] sm:$0xff] }
 0x8c1   : > { %v10477_v55 = vpop.permute.xlu2 %4085  ;;  %v4082_v52 = vpop.permute.xlu1 %4081  ;;  %v4424_v43 = vsel %vm4386_vm14, %v4375_v45, %v3808_v40  ;;  %v4160_v38 = vsel %vm1885_vm5, %v12983_v49, %v12982_v46  ;;  %v12984_v45 = vld [vmem:[#allocation19_spill] sm:$0xff] }
 0x8c2   : > { %v4521_v15 = vsel %vm4484_vm15, %v4472_v53, %v4082_v52  ;;  %v4473_v20 = vsel %vm4435_vm0, %v4424_v43, %v3946_v18  ;;  %v4206_v18 = vsel %vm1982_vm7, %v4159_v27, %v12975_v2  ;;  %v4184_v10 = vsel %vm1885_vm5, %v12985_v51, %v12984_v45  ;;  %v12986_v43 = vld [vmem:[#allocation113_spill] sm:$0xff]  ;;  %v12994_v27 = vld [vmem:[#allocation3_spill] sm:$0xff]  ;;  %v13003_v45 = vld [vmem:[#allocation162_spill] sm:$0xff] }
 0x8c3   : > { %5108 = vmatmul.msk.f32.gmra.mxu2 %vm4533_vm1, %v4521_v15  ;;  %v4254_v0 = vsel %vm2080_vm10, %v4206_v18, %v12976_v60  ;;  %v4207_v4 = vsel %vm1982_vm7, %v4160_v38, %v12986_v43  ;;  %v12995_v2 = vld [vmem:[#allocation339_spill] sm:$0xff]  ;;  %v13002_v38 = vld [vmem:[#allocation18_spill] sm:$0xff] }
 0x8c4   : > { %v4302_v5 = vsel %vm2178_vm12, %v4254_v0, %v12978_v56  ;;  %v4255_v7 = vsel %vm2080_vm10, %v4207_v4, %v12988_v50  ;;  %v13001_v46 = vld [vmem:[#allocation335_spill] sm:$0xff] }
 0x8c5   : > { %v4351_v59 = vsel %vm4337_vm13, %v4302_v5, %v12980_v16 }
 0x8c6   : > { %4099 = vrot.lane.b32.xlu0 %v12968_v37, %s5190_s14  ;;  %4049 = vrot.lane.b32.xlu1 %v12969_v41, %s5190_s14  ;;  %v4400_v15 = vsel %vm4386_vm14, %v4351_v59, %v12981_v28  ;;  %v12987_v37 = vld [vmem:[#allocation254_spill] sm:$0xff]  ;;  %v12997_v28 = vld [vmem:[#allocation20_spill] sm:$0xff] }
 0x8c7   : > { %3961 = vrot.lane.b32.xlu2 %v12971_v42, %s5189_s12  ;;  %v4231_v41 = vsel %vm1982_vm7, %v4184_v10, %v12987_v37  ;;  %v13004_v10 = vld [vmem:[#allocation266_spill] sm:$0xff]  ;;  %v13005_v37 = vld [vmem:[#allocation109_spill] sm:$0xff] }
 0x8c8   : > { %v4084_v32 = vpop.permute.xlu0 %4083  ;;  %v4279_v61 = vsel %vm2080_vm10, %v4231_v41, %v12989_v62  ;;  %v4186_v41 = vsel %vm1885_vm5, %v12799_v31, %v13005_v37  ;;  %v13011_v31 = vld [vmem:[#allocation51_spill] sm:$0xff] }
 0x8c9   : > { %v4038_v11 = vpop.permute.xlu2 %4037  ;;  %v4034_v35 = vpop.permute.xlu1 %4033  ;;  %v4522_v24 = vsel %vm4484_vm15, %v4473_v20, %v4084_v32  ;;  %v12990_v32 = vld [vmem:[#allocation63_spill] sm:$0xff] }
 0x8ca   : > { %v4497_v30 = vsel %vm4484_vm15, %v4448_v19, %v4034_v35  ;;  %v4303_v20 = vsel %vm2178_vm12, %v4255_v7, %v12990_v32  ;;  %v12991_v35 = vld [vmem:[#allocation45_spill] sm:$0xff] }
 0x8cb   : > { %5084 = vmatmul.msk.f32.gmra.mxu1 %vm4533_vm1, %v4497_v30  ;;  %5109 = vmatmul.msk.f32.gmra.mxu2 %vm4533_vm1, %v4522_v24  ;;  %v12992_v24 = vld [vmem:[#allocation310_spill] sm:$0xff]  ;;  %v4352_v47 = vsel %vm4337_vm13, %v4303_v20, %v12993_v25  ;;  %v13006_v7 = vld [vmem:[#allocation53_spill] sm:$0xff]  ;;  %v13010_v25 = vld [vmem:[#allocation144_spill] sm:$0xff] }
 0x8cc   : > { %v4327_v30 = vsel %vm2178_vm12, %v4279_v61, %v12992_v24  ;;  %v13007_v32 = vld [vmem:[#allocation189_spill] sm:$0xff]  ;;  %v13009_v24 = vld [vmem:[#allocation171_spill] sm:$0xff] }
 0x8cd   : > { %v4767_v8 = vpop.f32.mrf.mxu2  ;;  %v4376_v18 = vsel %vm4337_vm13, %v4327_v30, %v12995_v2  ;;  %v13012_v2 = vld [vmem:[#allocation213_spill] sm:$0xff] }
 0x8ce   : > { %v4845_v14 = vmul.f32 %v10353_v21, %v4767_v8  ;;  %4051 = vrot.lane.b32.xlu0 %v12977_v12, %s5190_s14  ;;  %3775 = vrot.lane.b32.xlu1 %v12822_v36, %s5188_s10  ;;  %v12996_v8 = vld [vmem:[#allocation95_spill] sm:$0xff]  ;;  %v4425_v12 = vsel %vm4386_vm14, %v4376_v18, %v10455_v26 }
 0x8cf   : > { %3913 = vrot.lane.b32.xlu2 %v12979_v13, %s5189_s12  ;;  %v4703_v40 = vpop.f32.mrf.mxu1  ;;  %v4401_v60 = vsel %vm4386_vm14, %v4352_v47, %v12996_v8  ;;  %v13013_v8 = vld [vmem:[#allocation199_spill] sm:$0xff] }
 0x8d0   : > { %v4881_v52 = vadd.f32 %v10363_v39, %v4845_v14  ;;  %v4829_v53 = vmul.f32 %v10353_v21, %v4703_v40  ;;  %v4036_v54 = vpop.permute.xlu0 %4035 }
 0x8d1   : > { %v10537_v36 = vpop.permute.xlu2 %3901  ;;  %v3898_v33 = vpop.permute.xlu1 %3897 }
 0x8d2   : > { %v4913_v6 = vmax.f32 %v4881_v52, 0.0  ;;  %v4865_v17 = vadd.f32 %v10363_v39, %v4829_v53  ;;  %v4449_v63 = vsel %vm4435_vm0, %v4400_v15, %v3898_v33  ;;  %v12999_v33 = vld [vmem:[#allocation90_spill] sm:$0xff] }
 0x8d3   : > { %v4498_v1 = vsel %vm4484_vm15, %v4449_v63, %v4036_v54 }
 0x8d4   : > { %4945 = vst.msk [vmem:[%s10387_s26 + $0x90] sm:$0xff] %vm1885_vm5, %v4913_v6  ;;  %v4897_v9 = vmax.f32 %v4865_v17, 0.0  ;;  %5085 = vmatmul.msk.f32.gmra.mxu1 %vm4533_vm1, %v4498_v1  ;;  %v13000_v6 = vld [vmem:[#allocation311_spill] sm:$0xff] }
 0x8d5   : > { %v4770_v42 = vpop.f32.mrf.mxu2  ;;  %v4185_v17 = vsel %vm1885_vm5, %v13000_v6, %v12999_v33  ;;  %v13019_v33 = vld [vmem:[#allocation337_spill] sm:$0xff] }
 0x8d6   : > { %4929 = vst.msk [vmem:[%s10387_s26 + $0x10] sm:$0xff] %vm1885_vm5, %v4897_v9  ;;  %v4846_v19 = vmul.f32 %v10353_v21, %v4770_v42  ;;  %4053 = vrot.lane.b32.xlu0 %v12991_v35, %s5190_s14  ;;  %3777 = vrot.lane.b32.xlu1 %v12830_v29, %s5188_s10  ;;  %v4232_v49 = vsel %vm1982_vm7, %v4185_v17, %v13001_v46  ;;  %v13008_v35 = vld [vmem:[#allocation205_spill] sm:$0xff]  ;;  %v13020_v17 = vld [vmem:[#allocation24_spill] sm:$0xff] }
 0x8d7   : > { %3915 = vrot.lane.b32.xlu2 %v12994_v27, %s5189_s12  ;;  %v4280_v1 = vsel %vm2080_vm10, %v4232_v49, %v13002_v38  ;;  %v4233_v42 = vsel %vm1982_vm7, %v4186_v41, %v13006_v7  ;;  %v4161_v30 = vsel %vm1885_vm5, %v13009_v24, %v13008_v35  ;;  %v13021_v46 = vld [vmem:[#allocation125_spill] sm:$0xff] }
 0x8d8   : > { %v4882_v0 = vadd.f32 %v10363_v39, %v4846_v19  ;;  %v3900_v14 = vpop.permute.xlu0 %3899  ;;  %v4706_v29 = vpop.f32.mrf.mxu1  ;;  %v4281_v20 = vsel %vm2080_vm10, %v4233_v42, %v13007_v32  ;;  %v4208_v27 = vsel %vm1982_vm7, %v4161_v30, %v13011_v31  ;;  %v13027_v24 = vld [vmem:[#allocation145_spill] sm:$0xff] }
 0x8d9   : > { %v4450_v56 = vsel %vm4435_vm0, %v4401_v60, %v3900_v14  ;;  %v4830_v5 = vmul.f32 %v10353_v21, %v4706_v29  ;;  %v3948_v13 = vpop.permute.xlu1 %3947  ;;  %v3952_v16 = vpop.permute.xlu2 %3951  ;;  %v4329_v47 = vsel %vm2178_vm12, %v4281_v20, %v13010_v25  ;;  %v4256_v60 = vsel %vm2080_vm10, %v4208_v27, %v13013_v8  ;;  %v13014_v14 = vld [vmem:[#allocation252_spill] sm:$0xff]  ;;  %v13029_v27 = vld [vmem:[#allocation57_spill] sm:$0xff]  ;;  %v13030_v8 = vld [vmem:[#allocation338_spill] sm:$0xff] }
 0x8da   : > { %v4914_v40 = vmax.f32 %v4882_v0, 0.0  ;;  %v4474_v59 = vsel %vm4435_vm0, %v4425_v12, %v3948_v13  ;;  %v4499_v52 = vsel %vm4484_vm15, %v4450_v56, %v4038_v11  ;;  %v12998_v11 = vld [vmem:[#allocation227_spill] sm:$0xff]  ;;  %v4378_v18 = vsel %vm4337_vm13, %v4329_v47, %v13012_v2  ;;  %v13015_v56 = vld [vmem:[#allocation312_spill] sm:$0xff]  ;;  %v13016_v13 = vld [vmem:[#allocation222_spill] sm:$0xff] }
 0x8db   : > { %v4866_v53 = vadd.f32 %v10363_v39, %v4830_v5  ;;  %v4523_v54 = vsel %vm4484_vm15, %v4474_v59, %v10477_v55  ;;  %v4304_v29 = vsel %vm2178_vm12, %v4256_v60, %v13014_v14  ;;  %v13028_v47 = vld [vmem:[#allocation318_spill] sm:$0xff] }
 0x8dc   : > { %4946 = vst.msk [vmem:[%s10387_s26 + $0x98] sm:$0xff] %vm1885_vm5, %v4914_v40  ;;  %5086 = vmatmul.msk.f32.gmra.mxu1 %vm4533_vm1, %v4499_v52  ;;  %5110 = vmatmul.msk.f32.gmra.mxu2 %vm4533_vm1, %v4523_v54  ;;  %v4353_v5 = vsel %vm4337_vm13, %v4304_v29, %v13015_v56  ;;  %v13032_v29 = vld [vmem:[#allocation123_spill] sm:$0xff] }
 0x8dd   : > { %v4898_v26 = vmax.f32 %v4866_v53, 0.0  ;;  %v4402_v40 = vsel %vm4386_vm14, %v4353_v5, %v13016_v13  ;;  %v13033_v5 = vld [vmem:[#allocation268_spill] sm:$0xff] }
 0x8de   : > { %4055 = vrot.lane.b32.xlu0 %v12997_v28, %s5190_s14  ;;  %3779 = vrot.lane.b32.xlu1 %v12852_v23, %s5188_s10  ;;  %v4328_v23 = vsel %vm2178_vm12, %v4280_v1, %v13003_v45  ;;  %v4451_v53 = vsel %vm4435_vm0, %v4402_v40, %v10537_v36  ;;  %v13022_v1 = vld [vmem:[#allocation343_spill] sm:$0xff]  ;;  %v13034_v40 = vld [vmem:[#allocation221_spill] sm:$0xff] }
 0x8df   : > { %4930 = vst.msk [vmem:[%s10387_s26 + $0x18] sm:$0xff] %vm1885_vm5, %v4898_v26  ;;  %3917 = vrot.lane.b32.xlu2 %v12998_v11, %s5189_s12  ;;  %v4377_v43 = vsel %vm4337_vm13, %v4328_v23, %v13004_v10  ;;  %v13017_v11 = vld [vmem:[#allocation14_spill] sm:$0xff] }
 0x8e0   : > { %v3950_v15 = vpop.permute.xlu0 %3949  ;;  %v4709_v55 = vpop.f32.mrf.mxu1 }
 0x8e1   : > { %v3812_v63 = vpop.permute.xlu1 %3811  ;;  %v10609_v51 = vpop.permute.xlu2 %3815 }
 0x8e2   : > { %v4426_v4 = vsel %vm4386_vm14, %v4377_v43, %v3812_v63 }
 0x8e3   : > { %v4475_v61 = vsel %vm4435_vm0, %v4426_v4, %v3950_v15  ;;  %v13018_v15 = vld [vmem:[#allocation80_spill] sm:$0xff] }
 0x8e4   : > { %v4162_v55 = vsel %vm1885_vm5, %v13018_v15, %v13017_v11 }
 0x8e5   : > { %v4209_v6 = vsel %vm1982_vm7, %v4162_v55, %v13019_v33 }
 0x8e6   : > { %v4773_v9 = vpop.f32.mrf.mxu2  ;;  %v4257_v36 = vsel %vm2080_vm10, %v4209_v6, %v13020_v17 }
 0x8e7   : > { %v4305_v49 = vsel %vm2178_vm12, %v4257_v36, %v13021_v46  ;;  %v13023_v9 = vld [vmem:[#allocation161_spill] sm:$0xff] }
 0x8e8   : > { %v3814_v50 = vpop.permute.xlu0 %3813  ;;  %v4354_v45 = vsel %vm4337_vm13, %v4305_v49, %v13022_v1  ;;  %v13036_v1 = vld [vmem:[#allocation238_spill] sm:$0xff] }
 0x8e9   : > { %v4088_v62 = vpop.permute.xlu1 %4087  ;;  %v4427_v0 = vsel %vm4386_vm14, %v4378_v18, %v3814_v50  ;;  %v4092_v12 = vpop.permute.xlu2 %4091  ;;  %v4403_v37 = vsel %vm4386_vm14, %v4354_v45, %v13023_v9  ;;  %v4188_v45 = vsel %vm1885_vm5, %v12827_v34, %v13036_v1  ;;  %v13039_v9 = vld [vmem:[#allocation255_spill] sm:$0xff]  ;;  %v13054_v1 = vld [vmem:[#allocation248_spill] sm:$0xff] }
 0x8ea   : > { %v4524_v19 = vsel %vm4484_vm15, %v4475_v61, %v4088_v62  ;;  %v4476_v52 = vsel %vm4435_vm0, %v4427_v0, %v3952_v16  ;;  %v13024_v62 = vld [vmem:[#allocation228_spill] sm:$0xff]  ;;  %v13025_v61 = vld [vmem:[#allocation226_spill] sm:$0xff]  ;;  %v13031_v0 = vld [vmem:[#allocation247_spill] sm:$0xff] }
 0x8eb   : > { %5111 = vmatmul.msk.f32.gmra.mxu2 %vm4533_vm1, %v4524_v19  ;;  %v4163_v32 = vsel %vm1885_vm5, %v13025_v61, %v13024_v62  ;;  %v13026_v19 = vld [vmem:[#allocation251_spill] sm:$0xff] }
 0x8ec   : > { %v4187_v35 = vsel %vm1885_vm5, %v12817_v44, %v13026_v19  ;;  %v4210_v30 = vsel %vm1982_vm7, %v4163_v32, %v13027_v24  ;;  %v13041_v61 = vld [vmem:[#allocation231_spill] sm:$0xff] }
 0x8ed   : > { %v4234_v31 = vsel %vm1982_vm7, %v4187_v35, %v13028_v47  ;;  %v4258_v2 = vsel %vm2080_vm10, %v4210_v30, %v13029_v27  ;;  %v4189_v34 = vsel %vm1885_vm5, %v12839_v48, %v13041_v61  ;;  %v13043_v30 = vld [vmem:[#allocation257_spill] sm:$0xff]  ;;  %v13045_v27 = vld [vmem:[#allocation178_spill] sm:$0xff] }
 0x8ee   : > { %v4282_v60 = vsel %vm2080_vm10, %v4234_v31, %v13030_v8  ;;  %v4306_v44 = vsel %vm2178_vm12, %v4258_v2, %v13031_v0  ;;  %v13044_v31 = vld [vmem:[#allocation133_spill] sm:$0xff]  ;;  %v13048_v0 = vld [vmem:[#allocation304_spill] sm:$0xff] }
 0x8ef   : > { %v4330_v56 = vsel %vm2178_vm12, %v4282_v60, %v13032_v29  ;;  %v4355_v13 = vsel %vm4337_vm13, %v4306_v44, %v13033_v5  ;;  %v4164_v2 = vsel %vm1885_vm5, %v13045_v27, %v13044_v31  ;;  %v13047_v48 = vld [vmem:[#allocation241_spill] sm:$0xff] }
 0x8f0   : > { %v4090_v59 = vpop.permute.xlu0 %4089  ;;  %v4211_v60 = vsel %vm1982_vm7, %v4164_v2, %v13047_v48  ;;  %v13050_v5 = vld [vmem:[#allocation329_spill] sm:$0xff] }
 0x8f1   : > { %v4040_v54 = vpop.permute.xlu1 %4039  ;;  %v4525_v26 = vsel %vm4484_vm15, %v4476_v52, %v4090_v59  ;;  %v4044_v23 = vpop.permute.xlu2 %4043  ;;  %v4379_v59 = vsel %vm4337_vm13, %v4330_v56, %v13034_v40  ;;  %v13035_v52 = vld [vmem:[#allocation273_spill] sm:$0xff] }
 0x8f2   : > { %v4500_v28 = vsel %vm4484_vm15, %v4451_v53, %v4040_v54  ;;  %v4404_v53 = vsel %vm4386_vm14, %v4355_v13, %v13035_v52  ;;  %v4428_v11 = vsel %vm4386_vm14, %v4379_v59, %v10609_v51  ;;  %v13051_v59 = vld [vmem:[#allocation68_spill] sm:$0xff] }
 0x8f3   : > { %5087 = vmatmul.msk.f32.gmra.mxu1 %vm4533_vm1, %v4500_v28  ;;  %5112 = vmatmul.msk.f32.gmra.mxu2 %vm4533_vm1, %v4525_v26 }
 0x8f5   : > { %v4775_v16 = vpop.f32.mrf.mxu2 }
 0x8f6   : > { %v4847_v63 = vmul.f32 %v10353_v21, %v4775_v16 }
 0x8f7   : > { %v4711_v38 = vpop.f32.mrf.mxu1 }
 0x8f8   : > { %v4883_v10 = vadd.f32 %v10363_v39, %v4847_v63  ;;  %v4831_v43 = vmul.f32 %v10353_v21, %v4711_v38  ;;  %v4042_v4 = vpop.permute.xlu0 %4041 }
 0x8f9   : > { %v3904_v41 = vpop.permute.xlu1 %3903  ;;  %v3908_v6 = vpop.permute.xlu2 %3907 }
 0x8fa   : > { %v4915_v50 = vmax.f32 %v4883_v10, 0.0  ;;  %v4867_v7 = vadd.f32 %v10363_v39, %v4831_v43  ;;  %v4452_v42 = vsel %vm4435_vm0, %v4403_v37, %v3904_v41  ;;  %v13037_v10 = vld [vmem:[#allocation89_spill] sm:$0xff] }
 0x8fb   : > { %v4501_v20 = vsel %vm4484_vm15, %v4452_v42, %v4042_v4  ;;  %v4235_v43 = vsel %vm1982_vm7, %v4188_v45, %v13037_v10  ;;  %v13055_v45 = vld [vmem:[#allocation261_spill] sm:$0xff] }
 0x8fc   : > { %4947 = vst.msk [vmem:[%s10387_s26 + $0xa0] sm:$0xff] %vm1885_vm5, %v4915_v50  ;;  %v4899_v25 = vmax.f32 %v4867_v7, 0.0  ;;  %5088 = vmatmul.msk.f32.gmra.mxu1 %vm4533_vm1, %v4501_v20  ;;  %v13040_v50 = vld [vmem:[#allocation345_spill] sm:$0xff] }
 0x8fd   : > { %v4778_v18 = vpop.f32.mrf.mxu2  ;;  %v13042_v20 = vld [vmem:[#allocation233_spill] sm:$0xff] }
 0x8fe   : > { %4931 = vst.msk [vmem:[%s10387_s26 + $0x20] sm:$0xff] %vm1885_vm5, %v4899_v25  ;;  %v4848_v14 = vmul.f32 %v10353_v21, %v4778_v18  ;;  %v4236_v19 = vsel %vm1982_vm7, %v4189_v34, %v13042_v20  ;;  %v13046_v18 = vld [vmem:[#allocation265_spill] sm:$0xff] }
 0x8ff   : > { %v4284_v25 = vsel %vm2080_vm10, %v4236_v19, %v13043_v30  ;;  %v13056_v10 = vld [vmem:[#allocation49_spill] sm:$0xff] }
 0x900   : > { %v4884_v54 = vadd.f32 %v10363_v39, %v4848_v14  ;;  %v3906_v26 = vpop.permute.xlu0 %3905  ;;  %v4714_v28 = vpop.f32.mrf.mxu1  ;;  %v4332_v8 = vsel %vm2178_vm12, %v4284_v25, %v13046_v18  ;;  %v13049_v14 = vld [vmem:[#allocation249_spill] sm:$0xff] }
 0x901   : > { %v4453_v15 = vsel %vm4435_vm0, %v4404_v53, %v3906_v26  ;;  %v4832_v55 = vmul.f32 %v10353_v21, %v4714_v28  ;;  %v3954_v33 = vpop.permute.xlu1 %3953  ;;  %v3958_v41 = vpop.permute.xlu2 %3957  ;;  %v4381_v44 = vsel %vm4337_vm13, %v4332_v8, %v13048_v0  ;;  %v4259_v29 = vsel %vm2080_vm10, %v4211_v60, %v13049_v14  ;;  %v13052_v53 = vld [vmem:[#allocation169_spill] sm:$0xff] }
 0x902   : > { %v4916_v16 = vmax.f32 %v4884_v54, 0.0  ;;  %v4477_v17 = vsel %vm4435_vm0, %v4428_v11, %v3954_v33  ;;  %v4502_v36 = vsel %vm4484_vm15, %v4453_v15, %v4044_v23  ;;  %v4307_v13 = vsel %vm2178_vm12, %v4259_v29, %v13050_v5  ;;  %v13061_v34 = vld [vmem:[#allocation157_spill] sm:$0xff] }
 0x903   : > { %v4868_v63 = vadd.f32 %v10363_v39, %v4832_v55  ;;  %v4526_v46 = vsel %vm4484_vm15, %v4477_v17, %v4092_v12  ;;  %v13038_v12 = vld [vmem:[#allocation137_spill] sm:$0xff]  ;;  %v4356_v52 = vsel %vm4337_vm13, %v4307_v13, %v13051_v59 }
 0x904   : > { %4948 = vst.msk [vmem:[%s10387_s26 + $0xa8] sm:$0xff] %vm1885_vm5, %v4916_v16  ;;  %5089 = vmatmul.msk.f32.gmra.mxu1 %vm4533_vm1, %v4502_v36  ;;  %5113 = vmatmul.msk.f32.gmra.mxu2 %vm4533_vm1, %v4526_v46  ;;  %v4283_v4 = vsel %vm2080_vm10, %v4235_v43, %v13038_v12  ;;  %v4405_v54 = vsel %vm4386_vm14, %v4356_v52, %v13052_v53  ;;  %v13062_v20 = vld [vmem:[#allocation173_spill] sm:$0xff]  ;;  %v13064_v52 = vld [vmem:[#allocation22_spill] sm:$0xff] }
 0x905   : > { %v4900_v51 = vmax.f32 %v4868_v63, 0.0  ;;  %v4331_v37 = vsel %vm2178_vm12, %v4283_v4, %v13039_v9  ;;  %v4454_v11 = vsel %vm4435_vm0, %v4405_v54, %v3908_v6  ;;  %v13053_v63 = vld [vmem:[#allocation43_spill] sm:$0xff]  ;;  %v13057_v4 = vld [vmem:[#allocation101_spill] sm:$0xff] }
 0x906   : > { %v4380_v7 = vsel %vm4337_vm13, %v4331_v37, %v13040_v50  ;;  %v4190_v46 = vsel %vm1885_vm5, %v12861_v57, %v13053_v63  ;;  %v13058_v57 = vld [vmem:[#allocation271_spill] sm:$0xff] }
 0x907   : > { %4932 = vst.msk [vmem:[%s10387_s26 + $0x28] sm:$0xff] %vm1885_vm5, %v4900_v51  ;;  %v4237_v43 = vsel %vm1982_vm7, %v4190_v46, %v13056_v10  ;;  %v13070_v46 = vld [vmem:[#allocation244_spill] sm:$0xff]  ;;  %v13074_v10 = vld [vmem:[#allocation346_spill] sm:$0xff] }
 0x908   : > { %v3956_v49 = vpop.permute.xlu0 %3955  ;;  %v4717_v38 = vpop.f32.mrf.mxu1  ;;  %v4285_v37 = vsel %vm2080_vm10, %v4237_v43, %v13058_v57  ;;  %v13075_v57 = vld [vmem:[#allocation13_spill] sm:$0xff] }
 0x909   : > { %v3818_v23 = vpop.permute.xlu1 %3817  ;;  %v3910_v40 = vpop.permute.xlu2 %3909 }
 0x90a   : > { %v4429_v42 = vsel %vm4386_vm14, %v4380_v7, %v3818_v23  ;;  %v4165_v23 = vsel %vm1885_vm5, %v13055_v45, %v13054_v1  ;;  %v13059_v7 = vld [vmem:[#allocation106_spill] sm:$0xff] }
 0x90b   : > { %v4478_v24 = vsel %vm4435_vm0, %v4429_v42, %v3956_v49  ;;  %v4212_v9 = vsel %vm1982_vm7, %v4165_v23, %v13057_v4  ;;  %v13073_v1 = vld [vmem:[#allocation142_spill] sm:$0xff] }
 0x90c   : > { %v4260_v42 = vsel %vm2080_vm10, %v4212_v9, %v13059_v7  ;;  %v13076_v7 = vld [vmem:[#allocation300_spill] sm:$0xff] }
 0x90e   : > { %v4781_v62 = vpop.f32.mrf.mxu2 }
 0x90f   : > { %v13060_v62 = vld [vmem:[#allocation210_spill] sm:$0xff] }
 0x910   : > { %v3820_v32 = vpop.permute.xlu0 %3819  ;;  %v4333_v61 = vsel %vm2178_vm12, %v4285_v37, %v13060_v62  ;;  %v4192_v37 = vsel %vm1885_vm5, %v12880_v22, %v13075_v57 }
 0x911   : > { %v4094_v35 = vpop.permute.xlu1 %4093  ;;  %v4430_v56 = vsel %vm4386_vm14, %v4381_v44, %v3820_v32  ;;  %v3960_v51 = vpop.permute.xlu2 %3959  ;;  %v4308_v32 = vsel %vm2178_vm12, %v4260_v42, %v13061_v34  ;;  %v4382_v19 = vsel %vm4337_vm13, %v4333_v61, %v13062_v20  ;;  %v4239_v42 = vsel %vm1982_vm7, %v4192_v37, %v13076_v7 }
 0x912   : > { %v4527_v47 = vsel %vm4484_vm15, %v4478_v24, %v4094_v35  ;;  %v4479_v28 = vsel %vm4435_vm0, %v4430_v56, %v3958_v41  ;;  %v13063_v24 = vld [vmem:[#allocation130_spill] sm:$0xff] }
 0x913   : > { %5114 = vmatmul.msk.f32.gmra.mxu2 %vm4533_vm1, %v4527_v47  ;;  %v4357_v30 = vsel %vm4337_vm13, %v4308_v32, %v13063_v24  ;;  %v13077_v32 = vld [vmem:[#allocation320_spill] sm:$0xff]  ;;  %v13079_v24 = vld [vmem:[#allocation79_spill] sm:$0xff] }
 0x914   : > { %v4287_v20 = vsel %vm2080_vm10, %v4239_v42, %v13077_v32 }
 0x918   : > { %v4096_v26 = vpop.permute.xlu0 %4095 }
 0x919   : > { %v4046_v15 = vpop.permute.xlu1 %4045  ;;  %v4528_v55 = vsel %vm4484_vm15, %v4479_v28, %v4096_v26  ;;  %v3912_v29 = vpop.permute.xlu2 %3911  ;;  %v13065_v26 = vld [vmem:[#allocation347_spill] sm:$0xff] }
 0x91a   : > { %v4503_v33 = vsel %vm4484_vm15, %v4454_v11, %v4046_v15  ;;  %v13066_v28 = vld [vmem:[#allocation307_spill] sm:$0xff] }
 0x91b   : > { %5090 = vmatmul.msk.f32.gmra.mxu1 %vm4533_vm1, %v4503_v33  ;;  %5115 = vmatmul.msk.f32.gmra.mxu2 %vm4533_vm1, %v4528_v55  ;;  %v4166_v11 = vsel %vm1885_vm5, %v13066_v28, %v13065_v26  ;;  %v13067_v15 = vld [vmem:[#allocation27_spill] sm:$0xff]  ;;  %v13088_v28 = vld [vmem:[#allocation33_spill] sm:$0xff] }
 0x91d   : > { %v4783_v16 = vpop.f32.mrf.mxu2 }
 0x91e   : > { %v4849_v17 = vmul.f32 %v10353_v21, %v4783_v16  ;;  %v13068_v16 = vld [vmem:[#allocation201_spill] sm:$0xff] }
 0x91f   : > { %v4719_v36 = vpop.f32.mrf.mxu1 }
 0x920   : > { %v4885_v6 = vadd.f32 %v10363_v39, %v4849_v17  ;;  %v4833_v49 = vmul.f32 %v10353_v21, %v4719_v36  ;;  %v3822_v38 = vpop.permute.xlu0 %3821  ;;  %v4213_v17 = vsel %vm1982_vm7, %v4166_v11, %v13068_v16  ;;  %v13069_v36 = vld [vmem:[#allocation138_spill] sm:$0xff]  ;;  %v13090_v16 = vld [vmem:[#allocation141_spill] sm:$0xff] }
 0x921   : > { %v3772_v12 = vpop.permute.xlu1 %3771  ;;  %v4431_v25 = vsel %vm4386_vm14, %v4382_v19, %v3822_v38  ;;  %v3962_v23 = vpop.permute.xlu2 %3961 }
 0x922   : > { %v4917_v41 = vmax.f32 %v4885_v6, 0.0  ;;  %v4869_v50 = vadd.f32 %v10363_v39, %v4833_v49  ;;  %v4406_v31 = vsel %vm4386_vm14, %v4357_v30, %v3772_v12  ;;  %v4480_v48 = vsel %vm4435_vm0, %v4431_v25, %v3960_v51  ;;  %v13072_v49 = vld [vmem:[#allocation298_spill] sm:$0xff] }
 0x923   : > { %v4455_v44 = vsel %vm4435_vm0, %v4406_v31, %v3910_v40  ;;  %v4191_v40 = vsel %vm1885_vm5, %v12870_v58, %v13064_v52  ;;  %v4261_v51 = vsel %vm2080_vm10, %v4213_v17, %v13070_v46  ;;  %v13071_v58 = vld [vmem:[#allocation48_spill] sm:$0xff]  ;;  %v13080_v25 = vld [vmem:[#allocation286_spill] sm:$0xff]  ;;  %v13092_v46 = vld [vmem:[#allocation313_spill] sm:$0xff] }
 0x924   : > { %4949 = vst.msk [vmem:[%s10387_s26 + $0xb0] sm:$0xff] %vm1885_vm5, %v4917_v41  ;;  %v4901_v35 = vmax.f32 %v4869_v50, 0.0  ;;  %v4238_v55 = vsel %vm1982_vm7, %v4191_v40, %v13067_v15  ;;  %v4309_v38 = vsel %vm2178_vm12, %v4261_v51, %v13072_v49  ;;  %v13087_v52 = vld [vmem:[#allocation168_spill] sm:$0xff] }
 0x925   : > { %v4786_v47 = vpop.f32.mrf.mxu2  ;;  %v4286_v63 = vsel %vm2080_vm10, %v4238_v55, %v13069_v36  ;;  %v4358_v43 = vsel %vm4337_vm13, %v4309_v38, %v13074_v10  ;;  %v13089_v15 = vld [vmem:[#allocation336_spill] sm:$0xff] }
 0x926   : > { %4933 = vst.msk [vmem:[%s10387_s26 + $0x30] sm:$0xff] %vm1885_vm5, %v4901_v35  ;;  %v4850_v27 = vmul.f32 %v10353_v21, %v4786_v47  ;;  %v4334_v6 = vsel %vm2178_vm12, %v4286_v63, %v13071_v58  ;;  %v13078_v35 = vld [vmem:[#allocation62_spill] sm:$0xff] }
 0x927   : > { %v4383_v45 = vsel %vm4337_vm13, %v4334_v6, %v13073_v1  ;;  %v4335_v22 = vsel %vm2178_vm12, %v4287_v20, %v13078_v35  ;;  %v13081_v47 = vld [vmem:[#allocation174_spill] sm:$0xff]  ;;  %v13094_v1 = vld [vmem:[#allocation151_spill] sm:$0xff]  ;;  %v13097_v35 = vld [vmem:[#allocation120_spill] sm:$0xff] }
 0x928   : > { %v4886_v2 = vadd.f32 %v10363_v39, %v4850_v27  ;;  %v4098_v18 = vpop.permute.xlu0 %4097  ;;  %v4722_v8 = vpop.f32.mrf.mxu1  ;;  %v4384_v30 = vsel %vm4337_vm13, %v4335_v22, %v13079_v24  ;;  %v4167_v31 = vsel %vm1885_vm5, %v13081_v47, %v13080_v25  ;;  %v13091_v63 = vld [vmem:[#allocation38_spill] sm:$0xff]  ;;  %v13098_v22 = vld [vmem:[#allocation88_spill] sm:$0xff] }
 0x929   : > { %v4834_v60 = vmul.f32 %v10353_v21, %v4722_v8  ;;  %v4048_v0 = vpop.permute.xlu1 %4047  ;;  %v4529_v14 = vsel %vm4484_vm15, %v4480_v48, %v4098_v18  ;;  %v3914_v8 = vpop.permute.xlu2 %3913  ;;  %v13083_v48 = vld [vmem:[#allocation327_spill] sm:$0xff]  ;;  %v4168_v51 = vsel %vm1885_vm5, %v13092_v46, %v13091_v63  ;;  %v13093_v6 = vld [vmem:[#allocation26_spill] sm:$0xff]  ;;  %v4169_v24 = vsel %vm1885_vm5, %v13098_v22, %v13097_v35 }
 0x92a   : > { %v4918_v56 = vmax.f32 %v4886_v2, 0.0  ;;  %v4504_v5 = vsel %vm4484_vm15, %v4455_v44, %v4048_v0  ;;  %5116 = vmatmul.msk.f32.gmra.mxu2 %vm4533_vm1, %v4529_v14  ;;  %v13082_v2 = vld [vmem:[#allocation292_spill] sm:$0xff]  ;;  %v13084_v0 = vld [vmem:[#allocation21_spill] sm:$0xff]  ;;  %v13085_v14 = vld [vmem:[#allocation42_spill] sm:$0xff]  ;;  %v4215_v49 = vsel %vm1982_vm7, %v4168_v51, %v13093_v6 }
 0x92b   : > { %v4870_v13 = vadd.f32 %v10363_v39, %v4834_v60  ;;  %5091 = vmatmul.msk.f32.gmra.mxu1 %vm4533_vm1, %v4504_v5  ;;  %v4214_v18 = vsel %vm1982_vm7, %v4167_v31, %v13082_v2  ;;  %v4193_v44 = vsel %vm1885_vm5, %v12901_v3, %v13084_v0  ;;  %v13100_v31 = vld [vmem:[#allocation295_spill] sm:$0xff] }
 0x92c   : > { %4950 = vst.msk [vmem:[%s10387_s26 + $0xb8] sm:$0xff] %vm1885_vm5, %v4918_v56  ;;  %v4262_v60 = vsel %vm2080_vm10, %v4214_v18, %v13083_v48  ;;  %v13101_v18 = vld [vmem:[#allocation39_spill] sm:$0xff]  ;;  %v13102_v48 = vld [vmem:[#allocation129_spill] sm:$0xff] }
 0x92d   : > { %v4902_v59 = vmax.f32 %v4870_v13, 0.0  ;;  %v13086_v13 = vld [vmem:[#allocation122_spill] sm:$0xff] }
 0x92f   : > { %4934 = vst.msk [vmem:[%s10387_s26 + $0x38] sm:$0xff] %vm1885_vm5, %v4902_v59  ;;  %v4240_v59 = vsel %vm1982_vm7, %v4193_v44, %v13086_v13 }
 0x930   : > { %v3824_v53 = vpop.permute.xlu0 %3823  ;;  %v4725_v54 = vpop.f32.mrf.mxu1  ;;  %v4288_v11 = vsel %vm2080_vm10, %v4240_v59, %v13088_v28 }
 0x931   : > { %v3774_v33 = vpop.permute.xlu1 %3773  ;;  %v4432_v12 = vsel %vm4386_vm14, %v4383_v45, %v3824_v53  ;;  %v4433_v27 = vsel %vm4386_vm14, %v4384_v30, %v3824_v53  ;;  %v4336_v55 = vsel %vm2178_vm12, %v4288_v11, %v13089_v15  ;;  %v4263_v45 = vsel %vm2080_vm10, %v4215_v49, %v13094_v1 }
 0x932   : > { %v4407_v4 = vsel %vm4386_vm14, %v4358_v43, %v3774_v33  ;;  %v4481_v50 = vsel %vm4435_vm0, %v4432_v12, %v3962_v23  ;;  %v4482_v5 = vsel %vm4435_vm0, %v4433_v27, %v3962_v23  ;;  %v4385_v17 = vsel %vm4337_vm13, %v4336_v55, %v13090_v16  ;;  %v13095_v43 = vld [vmem:[#allocation207_spill] sm:$0xff] }
 0x933   : > { %v4456_v61 = vsel %vm4435_vm0, %v4407_v4, %v3912_v29  ;;  %v4310_v29 = vsel %vm2178_vm12, %v4262_v60, %v13085_v14  ;;  %v4434_v58 = vsel %vm4386_vm14, %v4385_v17, %v3824_v53  ;;  %v4311_v12 = vsel %vm2178_vm12, %v4263_v45, %v13095_v43  ;;  %v3916_v4 = vpop.permute.xlu2 %3915  ;;  %v13096_v53 = vld [vmem:[#allocation223_spill] sm:$0xff] }
 0x934   : > { %v4359_v40 = vsel %vm4337_vm13, %v4310_v29, %v13087_v52  ;;  %v4483_v57 = vsel %vm4435_vm0, %v4434_v58, %v3962_v23  ;;  %v4360_v37 = vsel %vm4337_vm13, %v4311_v12, %v13096_v53 }
 0x937   : > { %v4789_v9 = vpop.f32.mrf.mxu2 }
 0x938   : > { %v4100_v41 = vpop.permute.xlu0 %4099 }
 0x939   : > { %v4050_v62 = vpop.permute.xlu1 %4049  ;;  %v4530_v34 = vsel %vm4484_vm15, %v4481_v50, %v4100_v41  ;;  %v4531_v26 = vsel %vm4484_vm15, %v4482_v5, %v4100_v41 }
 0x93a   : > { %v4505_v19 = vsel %vm4484_vm15, %v4456_v61, %v4050_v62  ;;  %5117 = vmatmul.msk.f32.gmra.mxu2 %vm4533_vm1, %v4530_v34  ;;  %v4532_v61 = vsel %vm4484_vm15, %v4483_v57, %v4100_v41  ;;  %v13099_v41 = vld [vmem:[#allocation287_spill] sm:$0xff] }
 0x93b   : > { %5092 = vmatmul.msk.f32.gmra.mxu1 %vm4533_vm1, %v4505_v19  ;;  %v4216_v25 = vsel %vm1982_vm7, %v4169_v24, %v13099_v41  ;;  %v3918_v29 = vpop.permute.xlu2 %3917 }
 0x93c   : > { %v4264_v27 = vsel %vm2080_vm10, %v4216_v25, %v13100_v31 }
 0x940   : > { %v4052_v56 = vpop.permute.xlu0 %4051 }
 0x941   : > { %v3776_v54 = vpop.permute.xlu1 %3775 }
 0x942   : > { %v4408_v3 = vsel %vm4386_vm14, %v4359_v40, %v3776_v54  ;;  %5118 = vmatmul.msk.f32.gmra.mxu2 %vm4533_vm1, %v4531_v26 }
 0x943   : > { %v4457_v33 = vsel %vm4435_vm0, %v4408_v3, %v3914_v8  ;;  %v4312_v8 = vsel %vm2178_vm12, %v4264_v27, %v13101_v18 }
 0x944   : > { %v4506_v36 = vsel %vm4484_vm15, %v4457_v33, %v4052_v56  ;;  %v4361_v60 = vsel %vm4337_vm13, %v4312_v8, %v13102_v48 }
 0x945   : > { %5093 = vmatmul.msk.f32.gmra.mxu1 %vm4533_vm1, %v4506_v36 }
 0x946   : > { %v4791_v38 = vpop.f32.mrf.mxu2 }
 0x947   : > { %v4851_v10 = vmul.f32 %v10353_v21, %v4791_v38 }
 0x948   : > { %v4727_v9 = vpop.f32.mrf.mxu1  ;;  %v4054_v42 = vpop.permute.xlu0 %4053 }
 0x949   : > { %v4887_v50 = vadd.f32 %v10363_v39, %v4851_v10  ;;  %v4835_v7 = vmul.f32 %v10353_v21, %v4727_v9  ;;  %v3778_v62 = vpop.permute.xlu1 %3777 }
 0x94a   : > { %v4409_v34 = vsel %vm4386_vm14, %v4360_v37, %v3778_v62  ;;  %5119 = vmatmul.msk.f32.gmra.mxu2 %vm4533_vm1, %v4532_v61 }
 0x94b   : > { %v4919_v32 = vmax.f32 %v4887_v50, 0.0  ;;  %v4871_v20 = vadd.f32 %v10363_v39, %v4835_v7  ;;  %v4458_v23 = vsel %vm4435_vm0, %v4409_v34, %v3916_v4 }
 0x94c   : > { %v4507_v19 = vsel %vm4484_vm15, %v4458_v23, %v4054_v42 }
 0x94d   : > { %4951 = vst.msk [vmem:[%s10387_s26 + $0xc0] sm:$0xff] %vm1885_vm5, %v4919_v32  ;;  %v4903_v30 = vmax.f32 %v4871_v20, 0.0  ;;  %5094 = vmatmul.msk.f32.gmra.mxu1 %vm4533_vm1, %v4507_v19 }
 0x94e   : > { %v4794_v47 = vpop.f32.mrf.mxu2 }
 0x94f   : > { %4935 = vst.msk [vmem:[%s10387_s26 + $0x40] sm:$0xff] %vm1885_vm5, %v4903_v30  ;;  %v4852_v2 = vmul.f32 %v10353_v21, %v4794_v47 }
 0x950   : > { %v4056_v59 = vpop.permute.xlu0 %4055 }
 0x951   : > { %v4888_v0 = vadd.f32 %v10363_v39, %v4852_v2  ;;  %v4730_v44 = vpop.f32.mrf.mxu1  ;;  %v3780_v14 = vpop.permute.xlu1 %3779 }
 0x952   : > { %v4836_v56 = vmul.f32 %v10353_v21, %v4730_v44  ;;  %v4410_v5 = vsel %vm4386_vm14, %v4361_v60, %v3780_v14 }
 0x953   : > { %v4920_v13 = vmax.f32 %v4888_v0, 0.0  ;;  %v4459_v52 = vsel %vm4435_vm0, %v4410_v5, %v3918_v29 }
 0x954   : > { %v4872_v40 = vadd.f32 %v10363_v39, %v4836_v56  ;;  %v4508_v54 = vsel %vm4484_vm15, %v4459_v52, %v4056_v59 }
 0x955   : > { %4952 = vst.msk [vmem:[%s10387_s26 + $0xc8] sm:$0xff] %vm1885_vm5, %v4920_v13  ;;  %5095 = vmatmul.msk.f32.gmra.mxu1 %vm4533_vm1, %v4508_v54 }
 0x956   : > { %v4904_v26 = vmax.f32 %v4872_v40, 0.0 }
 0x958   : > { %4936 = vst.msk [vmem:[%s10387_s26 + $0x48] sm:$0xff] %vm1885_vm5, %v4904_v26 }
 0x959   : > { %v4733_v28 = vpop.f32.mrf.mxu1 }
 0x95f   : > { %v4797_v11 = vpop.f32.mrf.mxu2 }
 0x96e   : > { %v4799_v3 = vpop.f32.mrf.mxu2 }
 0x96f   : > { %v4853_v15 = vmul.f32 %v10353_v21, %v4799_v3 }
 0x970   : > { %v4735_v55 = vpop.f32.mrf.mxu1 }
 0x971   : > { %v4889_v33 = vadd.f32 %v10363_v39, %v4853_v15  ;;  %v4837_v16 = vmul.f32 %v10353_v21, %v4735_v55 }
 0x973   : > { %v4921_v17 = vmax.f32 %v4889_v33, 0.0  ;;  %v4873_v36 = vadd.f32 %v10363_v39, %v4837_v16 }
 0x975   : > { %4953 = vst.msk [vmem:[%s10387_s26 + $0xd0] sm:$0xff] %vm1885_vm5, %v4921_v17  ;;  %v4905_v63 = vmax.f32 %v4873_v36, 0.0 }
 0x976   : > { %v4802_v46 = vpop.f32.mrf.mxu2 }
 0x977   : > { %4937 = vst.msk [vmem:[%s10387_s26 + $0x50] sm:$0xff] %vm1885_vm5, %v4905_v63  ;;  %v4854_v51 = vmul.f32 %v10353_v21, %v4802_v46 }
 0x979   : > { %v4890_v58 = vadd.f32 %v10363_v39, %v4854_v51  ;;  %v4738_v6 = vpop.f32.mrf.mxu1 }
 0x97a   : > { %v4838_v49 = vmul.f32 %v10353_v21, %v4738_v6 }
 0x97b   : > { %v4922_v38 = vmax.f32 %v4890_v58, 0.0 }
 0x97c   : > { %v4874_v1 = vadd.f32 %v10363_v39, %v4838_v49 }
 0x97d   : > { %4954 = vst.msk [vmem:[%s10387_s26 + $0xd8] sm:$0xff] %vm1885_vm5, %v4922_v38 }
 0x97e   : > { %v4906_v45 = vmax.f32 %v4874_v1, 0.0 }
 0x980   : > { %4938 = vst.msk [vmem:[%s10387_s26 + $0x58] sm:$0xff] %vm1885_vm5, %v4906_v45 }
 0x981   : > { %v4741_v10 = vpop.f32.mrf.mxu1 }
 0x987   : > { %v4805_v43 = vpop.f32.mrf.mxu2 }
 0x996   : > { %v4807_v12 = vpop.f32.mrf.mxu2 }
 0x997   : > { %v4855_v4 = vmul.f32 %v10353_v21, %v4807_v12 }
 0x998   : > { %v4743_v9 = vpop.f32.mrf.mxu1 }
 0x999   : > { %v4891_v57 = vadd.f32 %v10363_v39, %v4855_v4  ;;  %v4839_v53 = vmul.f32 %v10353_v21, %v4743_v9 }
 0x99b   : > { %v4923_v37 = vmax.f32 %v4891_v57, 0.0  ;;  %v4875_v50 = vadd.f32 %v10363_v39, %v4839_v53 }
 0x99d   : > { %4955 = vst.msk [vmem:[%s10387_s26 + $0xe0] sm:$0xff] %vm1885_vm5, %v4923_v37  ;;  %v4907_v7 = vmax.f32 %v4875_v50, 0.0 }
 0x99e   : > { %v4810_v42 = vpop.f32.mrf.mxu2 }
 0x99f   : > { %4939 = vst.msk [vmem:[%s10387_s26 + $0x60] sm:$0xff] %vm1885_vm5, %v4907_v7  ;;  %v4856_v62 = vmul.f32 %v10353_v21, %v4810_v42 }
 0x9a1   : > { %v4892_v61 = vadd.f32 %v10363_v39, %v4856_v62 }
 0x9a3   : > { %v4924_v34 = vmax.f32 %v4892_v61, 0.0 }
 0x9a5   : > { %4956 = vst.msk [vmem:[%s10387_s26 + $0xe8] sm:$0xff] %vm1885_vm5, %v4924_v34 }
 0x9a8   : > { %v4746_v32 = vpop.f32.mrf.mxu1 }
 0x9a9   : > { %v4840_v20 = vmul.f32 %v10353_v21, %v4746_v32 }
 0x9ab   : > { %v4876_v23 = vadd.f32 %v10363_v39, %v4840_v20 }
 0x9ad   : > { %v4908_v19 = vmax.f32 %v4876_v23, 0.0  ;;  %v4813_v35 = vpop.f32.mrf.mxu2 }
 0x9af   : > { %4940 = vst.msk [vmem:[%s10387_s26 + $0x68] sm:$0xff] %vm1885_vm5, %v4908_v19 }
 0x9b8   : > { %v4749_v22 = vpop.f32.mrf.mxu1 }
 0x9bd   : > { %v4815_v24 = vpop.f32.mrf.mxu2 }
 0x9be   : > { %v4857_v30 = vmul.f32 %v10353_v21, %v4815_v24 }
 0x9c0   : > { %v4893_v41 = vadd.f32 %v10363_v39, %v4857_v30 }
 0x9c2   : > { %v4925_v25 = vmax.f32 %v4893_v41, 0.0  ;;  %v4751_v47 = vpop.f32.mrf.mxu1 }
 0x9c3   : > { %v4841_v31 = vmul.f32 %v10353_v21, %v4751_v47 }
 0x9c4   : > { %4957 = vst.msk [vmem:[%s10387_s26 + $0xf0] sm:$0xff] %vm1885_vm5, %v4925_v25 }
 0x9c5   : > { %v4877_v27 = vadd.f32 %v10363_v39, %v4841_v31  ;;  %v4818_v2 = vpop.f32.mrf.mxu2 }
 0x9c6   : > { %v4858_v18 = vmul.f32 %v10353_v21, %v4818_v2 }
 0x9c7   : > { %v4909_v8 = vmax.f32 %v4877_v27, 0.0 }
 0x9c8   : > { %v4894_v48 = vadd.f32 %v10363_v39, %v4858_v18 }
 0x9c9   : > { %4941 = vst.msk [vmem:[%s10387_s26 + $0x70] sm:$0xff] %vm1885_vm5, %v4909_v8 }
 0x9ca   : > { %v4926_v60 = vmax.f32 %v4894_v48, 0.0  ;;  %v4754_v0 = vpop.f32.mrf.mxu1 }
 0x9cb   : > { %v4842_v44 = vmul.f32 %v10353_v21, %v4754_v0 }
 0x9cc   : > { %4958 = vst.msk [vmem:[%s10387_s26 + $0xf8] sm:$0xff] %vm1885_vm5, %v4926_v60 }
 0x9cd   : > { %v4878_v14 = vadd.f32 %v10363_v39, %v4842_v44  ;;  %v4821_v29 = vpop.f32.mrf.mxu2 }
 0x9cf   : > { %v4910_v56 = vmax.f32 %v4878_v14, 0.0 }
 0x9d1   : > { %4942 = vst.msk [vmem:[%s10387_s26 + $0x78] sm:$0xff] %vm1885_vm5, %v4910_v56 }
 0x9d2   : > { %v4757_v5 = vpop.f32.mrf.mxu1 }
 0x9d3 PF: > { %s17_s24 = sadd.s32 1, %s5176_s24  }
 0x9d4   : > { %p14_p4 = scmp.ge.s32.totalorder %s17_s24, 4  }
 0x9d6   :  { %16 = sbr.rel (!%p14_p4) target bundleno = 1 (0x1), region = 78 }

</bundles_post_ra>
